<compile_context>
chip_gen: v7x
topology: tpu7x:2x2x1
jax: 0.10.0
libtpu: 0.0.40
codegen_flags: <defaults>
</compile_context>

<pallas_src>
import functools
import math

import jax
import jax.numpy as jnp
from jax import lax
from jax.experimental import pallas as pl
from jax.experimental.pallas import tpu as pltpu

_MASK_VALUE = -1e30


def _round_up(x, m):
    return ((x + m - 1) // m) * m


# ----------------------------------------------------------------------------
# Pallas kernel 1/3: fused (optional PE add) + depthwise 3x3 + pointwise 1x1
# ----------------------------------------------------------------------------
def _ds_conv_kernel(*refs, H, W, with_pe):
    """One batch image per grid step.

    refs = (x_ref[, pe_ref], dw_ref, pw_ref, o_ref)
      x_ref : (1, H+2, W+2, Cin)  spatially pre-padded NHWC input, channels
                                  zero-padded to a lane-dense width
      pe_ref: (1, H+2, W+2, Cin)  positional encoding (qkv path only)
      dw_ref: (3, 3, Cin)         depthwise weights (zero rows for padded chans)
      pw_ref: (Cin, Cout)         pointwise weights (Cout lane-dense)
      o_ref : (1, H*W, Cout)
    """
    if with_pe:
        x_ref, pe_ref, dw_ref, pw_ref, o_ref = refs
    else:
        x_ref, dw_ref, pw_ref, o_ref = refs
    Cin = x_ref.shape[3]

    x = x_ref[0].astype(jnp.float32)                          # (H+2, W+2, Cin)
    if with_pe:
        x = x + pe_ref[0].astype(jnp.float32)                 # PE add folded in
    dw = dw_ref[...].astype(jnp.float32)                      # (3, 3, Cin)

    # depthwise 3x3 (lane-dense: Cin padded to >=128)
    acc = jnp.zeros((H, W, Cin), jnp.float32)
    for di in range(3):
        for dj in range(3):
            acc = acc + x[di:di + H, dj:dj + W, :] * dw[di, dj, :]

    # pointwise 1x1 fused in the same kernel as a single MXU matmul
    out = jnp.dot(acc.reshape(H * W, Cin),
                  pw_ref[...].astype(jnp.float32),
                  preferred_element_type=jnp.float32)         # (H*W, Cout)
    o_ref[0] = out.astype(o_ref.dtype)


def ds_conv_fused(x_pad, dw_w, pw_w, *, H, W, pe_pad=None):
    """x_pad: (B, H+2, W+2, Cin) -> (B, H*W, Cout)."""
    B, Hp2, Wp2, Cin = x_pad.shape
    Cout = pw_w.shape[1]
    with_pe = pe_pad is not None

    in_specs = [pl.BlockSpec((1, Hp2, Wp2, Cin), lambda b: (b, 0, 0, 0))]
    args = [x_pad]
    if with_pe:
        in_specs.append(pl.BlockSpec((1, Hp2, Wp2, Cin), lambda b: (0, 0, 0, 0)))
        args.append(pe_pad)
    in_specs += [
        pl.BlockSpec((3, 3, Cin), lambda b: (0, 0, 0)),
        pl.BlockSpec((Cin, Cout), lambda b: (0, 0)),
    ]
    args += [dw_w, pw_w]

    return pl.pallas_call(
        functools.partial(_ds_conv_kernel, H=H, W=W, with_pe=with_pe),
        out_shape=jax.ShapeDtypeStruct((B, H * W, Cout), x_pad.dtype),
        grid=(B,),
        in_specs=in_specs,
        out_specs=pl.BlockSpec((1, H * W, Cout), lambda b: (b, 0, 0)),
        compiler_params=pltpu.CompilerParams(
            dimension_semantics=("parallel",),
            vmem_limit_bytes=32 * 1024 * 1024),
    )(*args)


# ----------------------------------------------------------------------------
# Pallas kernel 2/3: fused k/v bilinear reduction + multi-head attention
# ----------------------------------------------------------------------------
def _attention_kernel(qkv_ref, r_ref, o_ref, *, heads, dim_head, m_valid):
    """One batch per grid step; heads merged on the lane axis.

    qkv_ref: (1, N, 3*inner)  q | k | v, channels already head-contiguous,
                              softmax scale pre-folded into the q weights.
    r_ref  : (Mp, N)          bilinear reduction matrix (rows >= m_valid are 0).
    o_ref  : (1, N, Cpad)     merged-head output; lanes >= inner are zero pad.
    """
    inner = heads * dim_head
    N = qkv_ref.shape[1]
    Mp = r_ref.shape[0]

    qkv = qkv_ref[0].astype(jnp.float32)                       # (N, 3*inner)
    q = qkv[:, :inner]
    k = qkv[:, inner:2 * inner]
    v = qkv[:, 2 * inner:3 * inner]
    r = r_ref[...].astype(jnp.float32)                         # (Mp, N)

    # bilinear resize of k, v fused in as matmuls (K = N contraction on the MXU)
    kr = jnp.dot(r, k, preferred_element_type=jnp.float32)     # (Mp, inner)
    vr = jnp.dot(r, v, preferred_element_type=jnp.float32)     # (Mp, inner)

    valid = lax.broadcasted_iota(jnp.int32, (N, Mp), 1) < m_valid

    outs = []
    for h in range(heads):                                     # static, unrolled
        sl = slice(h * dim_head, (h + 1) * dim_head)
        qh, kh, vh = q[:, sl], kr[:, sl], vr[:, sl]
        s = jnp.dot(qh, kh.T, preferred_element_type=jnp.float32)   # (N, Mp)
        s = jnp.where(valid, s, _MASK_VALUE)                   # mask padded cols
        s = s - jnp.max(s, axis=-1, keepdims=True)
        p = jnp.exp(s)
        denom = jnp.sum(p, axis=-1, keepdims=True)
        oh = jnp.dot(p, vh, preferred_element_type=jnp.float32)     # (N, d)
        outs.append(oh * pl.reciprocal(denom, approx=True))    # EUP reciprocal

    cpad = o_ref.shape[2]
    if cpad > inner:                                           # lane-dense store
        outs.append(jnp.zeros((N, cpad - inner), jnp.float32))
    o_ref[0] = jnp.concatenate(outs, axis=-1).astype(o_ref.dtype)


def attention_pallas(qkv, r_mat, *, heads, dim_head, m_valid, out_channels):
    """qkv: (B, N, 3*inner), r_mat: (Mp, N) -> (B, N, out_channels)."""
    B, N, C3 = qkv.shape
    Mp = r_mat.shape[0]
    return pl.pallas_call(
        functools.partial(_attention_kernel, heads=heads, dim_head=dim_head,
                          m_valid=m_valid),
        out_shape=jax.ShapeDtypeStruct((B, N, out_channels), qkv.dtype),
        grid=(B,),
        in_specs=[
            pl.BlockSpec((1, N, C3), lambda b: (b, 0, 0)),
            pl.BlockSpec((Mp, N), lambda b: (0, 0)),
        ],
        out_specs=pl.BlockSpec((1, N, out_channels), lambda b: (b, 0, 0)),
        compiler_params=pltpu.CompilerParams(
            dimension_semantics=("parallel",),
            vmem_limit_bytes=32 * 1024 * 1024),
    )(qkv, r_mat)


# ----------------------------------------------------------------------------
# Plain-JAX glue: positional encoding, bilinear matrices, weight preprocessing
# (all tiny / weight-only; fused or constant-folded by XLA)
# ----------------------------------------------------------------------------
def positional_encoding_2d(H, W, orig_ch, dtype=jnp.float32):
    """PositionalEncoding2D, returned in NHWC layout (1, H, W, orig_ch)."""
    ch = int(math.ceil(orig_ch / 2))
    inv_freq = 1.0 / (10000.0 ** (jnp.arange(0, ch, 2, dtype=jnp.float32) / ch))
    pos_x = jnp.arange(H, dtype=jnp.float32)
    pos_y = jnp.arange(W, dtype=jnp.float32)
    sin_inp_x = jnp.einsum("i,j->ij", pos_x, inv_freq)
    sin_inp_y = jnp.einsum("i,j->ij", pos_y, inv_freq)
    emb_x = jnp.concatenate([jnp.sin(sin_inp_x), jnp.cos(sin_inp_x)], axis=-1)[:, None, :]
    emb_y = jnp.concatenate([jnp.sin(sin_inp_y), jnp.cos(sin_inp_y)], axis=-1)
    emb = jnp.zeros((H, W, 2 * ch), jnp.float32)
    emb = emb.at[:, :, :ch].set(jnp.broadcast_to(emb_x, (H, W, ch)))
    emb = emb.at[:, :, ch:2 * ch].set(jnp.broadcast_to(emb_y[None, :, :], (H, W, ch)))
    return emb[None, :, :, :orig_ch].astype(dtype)


def _bilinear_matrix(in_size, out_size):
    """Interpolation matrix A (out_size, in_size), align_corners=True."""
    if in_size == 1:
        return jnp.ones((out_size, 1), jnp.float32)
    if out_size == 1:
        return jnp.zeros((1, in_size), jnp.float32).at[0, 0].set(1.0)
    src = jnp.arange(out_size, dtype=jnp.float32) * (in_size - 1) / (out_size - 1)
    i0 = jnp.clip(jnp.floor(src).astype(jnp.int32), 0, in_size - 2)
    frac = src - i0.astype(jnp.float32)
    rows = jnp.arange(out_size)
    A = jnp.zeros((out_size, in_size), jnp.float32)
    A = A.at[rows, i0].add(1.0 - frac)
    A = A.at[rows, i0 + 1].add(frac)
    return A


def bilinear_resize_nhwc(x, out_hw):
    H, W = x.shape[1], x.shape[2]
    A_h = _bilinear_matrix(H, out_hw[0])
    A_w = _bilinear_matrix(W, out_hw[1])
    y = jnp.einsum("ph,bhwc->bpwc", A_h, x)
    y = jnp.einsum("qw,bpwc->bpqc", A_w, y)
    return y


def _head_merge_perm(heads, dim_head):
    """perm[h*dim_head + dh] = dh*heads + h  (einops channel order -> merged)."""
    dh = jnp.arange(dim_head)
    h = jnp.arange(heads)
    return (dh[None, :] * heads + h[:, None]).reshape(-1)


def _prepare_qkv_weights(dw, pw, heads, dim_head, scale, cin_pad):
    """Permute q/k/v output columns to head-contiguous order, fold the softmax
    scale into q, and zero-pad the input-channel dim to the lane-dense width."""
    C = dw.shape[-1]
    inner = heads * dim_head
    perm = _head_merge_perm(heads, dim_head)
    pw_q = pw[:, :inner][:, perm] * scale
    pw_k = pw[:, inner:2 * inner][:, perm]
    pw_v = pw[:, 2 * inner:][:, perm]
    pw2 = jnp.concatenate([pw_q, pw_k, pw_v], axis=1)
    dw_p = jnp.pad(dw, ((0, 0), (0, 0), (0, cin_pad - C)))
    pw_p = jnp.pad(pw2, ((0, cin_pad - C), (0, 0)))
    return dw_p, pw_p


def _prepare_out_weights(dw, pw, heads, dim_head, cin_pad, cout_pad):
    """Permute to_out weights to accept head-contiguous input channels; pad the
    input-channel and output-channel dims to lane-dense widths."""
    inner = heads * dim_head
    Cout = pw.shape[-1]
    perm = _head_merge_perm(heads, dim_head)
    dw2 = dw[:, :, perm]
    pw2 = pw[perm, :]
    dw_p = jnp.pad(dw2, ((0, 0), (0, 0), (0, cin_pad - inner)))
    pw_p = jnp.pad(pw2, ((0, cin_pad - inner), (0, cout_pad - Cout)))
    return dw_p, pw_p


def split_heads(x_nhwc, heads, dim_head):
    B, H, W, C = x_nhwc.shape
    x = x_nhwc.reshape(B, H, W, dim_head, heads)
    return jnp.transpose(x, (0, 4, 1, 2, 3)).reshape(B, heads, H * W, dim_head)


def merge_heads(x, H, W, heads, dim_head):
    B = x.shape[0]
    x = x.reshape(B, heads, H, W, dim_head)
    return jnp.transpose(x, (0, 2, 3, 4, 1)).reshape(B, H, W, dim_head * heads)


# ----------------------------------------------------------------------------
# Full forward (matches LinearAttention.forward, eval mode)
# ----------------------------------------------------------------------------
def linear_attention_forward(x_nchw, params, *, heads, dim_head, reduce_size):
    B, C, H, W = x_nchw.shape
    inner = heads * dim_head
    scale = float(dim_head) ** (-0.5)
    N = H * W
    rh, rw = reduce_size
    M = rh * rw
    Mp = _round_up(M, 128)           # lane-dense score matrix / softmax
    cin_pad = _round_up(C, 128)      # lane-dense to_qkv conv channels
    inner_pad = _round_up(inner, 128)  # lane-dense attention output store
    cout_pad = _round_up(C, 128)     # lane-dense to_out output store

    # ---- prep (weights + padded inputs), all tiny ----
    x = jnp.transpose(x_nchw, (0, 2, 3, 1))                         # NCHW -> NHWC
    x_pad = jnp.pad(x, ((0, 0), (1, 1), (1, 1), (0, cin_pad - C)))
    pe = positional_encoding_2d(H, W, C, x.dtype)
    pe_pad = jnp.pad(pe, ((0, 0), (1, 1), (1, 1), (0, cin_pad - C)))

    qkv_dw, qkv_pw = _prepare_qkv_weights(params["qkv_dw"], params["qkv_pw"],
                                          heads, dim_head, scale, cin_pad)
    out_dw, out_pw = _prepare_out_weights(params["out_dw"], params["out_pw"],
                                          heads, dim_head, inner_pad, cout_pad)

    # bilinear (align_corners=True) reduction matrix, folded into attention
    A_h = _bilinear_matrix(H, rh)
    A_w = _bilinear_matrix(W, rw)
    r_mat = jnp.pad(jnp.kron(A_h, A_w), ((0, Mp - M), (0, 0))).astype(x.dtype)

    # [1] fused PE add + depthwise 3x3 + pointwise 1x1 (to_qkv)
    qkv = ds_conv_fused(x_pad, qkv_dw, qkv_pw, H=H, W=W, pe_pad=pe_pad)
    # (B, N, 3*inner): q|k|v head-contiguous, q pre-scaled

    # [2] fused k/v bilinear reduction + multi-head attention
    att = attention_pallas(qkv, r_mat, heads=heads, dim_head=dim_head,
                           m_valid=M, out_channels=inner_pad)    # (B, N, inner_pad)

    # [3] fused depthwise 3x3 + pointwise 1x1 (to_out)
    att_pad = jnp.pad(att.reshape(B, H, W, inner_pad),
                      ((0, 0), (1, 1), (1, 1), (0, 0)))
    out = ds_conv_fused(att_pad, out_dw, out_pw, H=H, W=W)        # (B, N, cout_pad)

    out = out[..., :C].reshape(B, H, W, C)
    return jnp.transpose(out, (0, 3, 1, 2))                       # NHWC -> NCHW


# ----------------------------------------------------------------------------
# Pure-JAX reference (correctness check of the Pallas path)
# ----------------------------------------------------------------------------
def _ref_forward(x_nchw, params, *, heads, dim_head, reduce_size):
    B, C, H, W = x_nchw.shape
    inner_dim = heads * dim_head
    scale = float(dim_head) ** (-0.5)

    x = jnp.transpose(x_nchw, (0, 2, 3, 1))
    x = x + positional_encoding_2d(H, W, C, x.dtype)

    def dw(x, w):
        c = x.shape[-1]
        rhs = w[:, :, None, :]  # HWIO with I=1
        return lax.conv_general_dilated(
            x, rhs, window_strides=(1, 1), padding="SAME",
            dimension_numbers=("NHWC", "HWIO", "NHWC"),
            feature_group_count=c)

    qkv = jnp.einsum("bhwc,cd->bhwd", dw(x, params["qkv_dw"]), params["qkv_pw"])
    q = qkv[..., :inner_dim]
    k = qkv[..., inner_dim:2 * inner_dim]
    v = qkv[..., 2 * inner_dim:]
    k = bilinear_resize_nhwc(k, reduce_size)
    v = bilinear_resize_nhwc(v, reduce_size)
    q = split_heads(q, heads, dim_head)
    k = split_heads(k, heads, dim_head)
    v = split_heads(v, heads, dim_head)
    attn = jnp.einsum("bhid,bhjd->bhij", q, k) * scale
    attn = jax.nn.softmax(attn, axis=-1)
    out = jnp.einsum("bhij,bhjd->bhid", attn, v)
    out = merge_heads(out, H, W, heads, dim_head)
    out = jnp.einsum("bhwc,cd->bhwd", dw(out, params["out_dw"]), params["out_pw"])
    return jnp.transpose(out, (0, 3, 1, 2))


# ----------------------------------------------------------------------------
# Main
# ----------------------------------------------------------------------------
if __name__ == "__main__":
    B, dim, H, W = 2, 8, 16, 16
    heads, dim_head = 4, 16
    reduce_size = (8, 8)
    inner_dim = heads * dim_head

    key = jax.random.PRNGKey(0)
    k0, k1, k2, k3, k4 = jax.random.split(key, 5)
    x = jax.random.normal(k0, (B, dim, H, W), jnp.float32)
    params = {
        # depthwise weights stored as (3, 3, C); pointwise as (Cin, Cout)
        "qkv_dw": 0.1 * jax.random.normal(k1, (3, 3, dim), jnp.float32),
        "qkv_pw": 0.1 * jax.random.normal(k2, (dim, 3 * inner_dim), jnp.float32),
        "out_dw": 0.1 * jax.random.normal(k3, (3, 3, inner_dim), jnp.float32),
        "out_pw": 0.1 * jax.random.normal(k4, (inner_dim, dim), jnp.float32),
    }

    fwd = jax.jit(functools.partial(
        linear_attention_forward, heads=heads, dim_head=dim_head,
        reduce_size=reduce_size))
    out = fwd(x, params)
    jax.block_until_ready(out)

    ref = _ref_forward(x, params, heads=heads, dim_head=dim_head,
                       reduce_size=reduce_size)
    assert out.shape == (B, dim, H, W), out.shape
    # Tolerance is relaxed vs. a bit-exact f32 path because the kernel uses the
    # approximate EUP reciprocal for the softmax denominator and folds the
    # softmax scale / bilinear reduction into different (but equivalent) matmuls.
    err = float(jnp.max(jnp.abs(out - ref)))
    assert err < 2e-2, f"max diff {err}"

    print("KERNEL_OK")
</pallas_src>

<mosaic_0001>
module attributes {stable_mosaic.version = 11 : i64} {
  func.func @_ds_conv_kernel(%arg0: i32, %arg1: memref<1x18x18x128xf32, #tpu.memory_space<vmem>>, %arg2: memref<1x18x18x128xf32, #tpu.memory_space<vmem>>, %arg3: memref<3x3x128xf32, #tpu.memory_space<vmem>>, %arg4: memref<128x192xf32, #tpu.memory_space<vmem>>, %arg5: memref<1x256x192xf32, #tpu.memory_space<vmem>>) attributes {dimension_semantics = [#tpu.dimension_semantics<parallel>], iteration_bounds = array<i64: 2>, scalar_prefetch = 0 : i64, scratch_operands = 0 : i64, tpu.core_type = #tpu.core_type<tc>, window_params = [{transform_indices = @transform_0, window_bounds = array<i64: 1, 18, 18, 128>}, {pipeline_mode = #tpu.pipeline_mode<synchronous>, transform_indices = @transform_1, window_bounds = array<i64: 1, 18, 18, 128>}, {pipeline_mode = #tpu.pipeline_mode<synchronous>, transform_indices = @transform_2, window_bounds = array<i64: 3, 3, 128>}, {pipeline_mode = #tpu.pipeline_mode<synchronous>, transform_indices = @transform_3, window_bounds = array<i64: 128, 192>}, {transform_indices = @transform_4, window_bounds = array<i64: 1, 256, 192>}]} {
    %c0 = arith.constant 0 : index
    %c0_0 = arith.constant 0 : index
    %c0_1 = arith.constant 0 : index
    %c0_2 = arith.constant 0 : index
    %0 = vector.load %arg1[%c0, %c0_0, %c0_1, %c0_2] : memref<1x18x18x128xf32, #tpu.memory_space<vmem>>, vector<1x18x18x128xf32>
    %1 = vector.shape_cast %0 : vector<1x18x18x128xf32> to vector<18x18x128xf32>
    %c0_3 = arith.constant 0 : index
    %c0_4 = arith.constant 0 : index
    %c0_5 = arith.constant 0 : index
    %c0_6 = arith.constant 0 : index
    %2 = vector.load %arg2[%c0_3, %c0_4, %c0_5, %c0_6] : memref<1x18x18x128xf32, #tpu.memory_space<vmem>>, vector<1x18x18x128xf32>
    %3 = vector.shape_cast %2 : vector<1x18x18x128xf32> to vector<18x18x128xf32>
    %4 = arith.addf %1, %3 : vector<18x18x128xf32>
    %c0_7 = arith.constant 0 : index
    %c0_8 = arith.constant 0 : index
    %c0_9 = arith.constant 0 : index
    %5 = vector.load %arg3[%c0_7, %c0_8, %c0_9] : memref<3x3x128xf32, #tpu.memory_space<vmem>>, vector<3x3x128xf32>
    %cst = arith.constant 0.000000e+00 : f32
    %6 = vector.broadcast %cst : f32 to vector<16x16x128xf32>
    %7 = vector.extract_strided_slice %4 {offsets = [0, 0, 0], sizes = [16, 16, 128], strides = [1, 1, 1]} : vector<18x18x128xf32> to vector<16x16x128xf32>
    %8 = vector.extract_strided_slice %5 {offsets = [0, 0, 0], sizes = [1, 1, 128], strides = [1, 1, 1]} : vector<3x3x128xf32> to vector<1x1x128xf32>
    %9 = vector.shape_cast %8 : vector<1x1x128xf32> to vector<128xf32>
    %10 = vector.shape_cast %9 : vector<128xf32> to vector<1x1x128xf32>
    %11 = vector.broadcast %10 : vector<1x1x128xf32> to vector<16x16x128xf32>
    %12 = arith.mulf %7, %11 : vector<16x16x128xf32>
    %13 = arith.addf %6, %12 : vector<16x16x128xf32>
    %14 = vector.extract_strided_slice %4 {offsets = [0, 1, 0], sizes = [16, 16, 128], strides = [1, 1, 1]} : vector<18x18x128xf32> to vector<16x16x128xf32>
    %15 = vector.extract_strided_slice %5 {offsets = [0, 1, 0], sizes = [1, 1, 128], strides = [1, 1, 1]} : vector<3x3x128xf32> to vector<1x1x128xf32>
    %16 = vector.shape_cast %15 : vector<1x1x128xf32> to vector<128xf32>
    %17 = vector.shape_cast %16 : vector<128xf32> to vector<1x1x128xf32>
    %18 = vector.broadcast %17 : vector<1x1x128xf32> to vector<16x16x128xf32>
    %19 = arith.mulf %14, %18 : vector<16x16x128xf32>
    %20 = arith.addf %13, %19 : vector<16x16x128xf32>
    %21 = vector.extract_strided_slice %4 {offsets = [0, 2, 0], sizes = [16, 16, 128], strides = [1, 1, 1]} : vector<18x18x128xf32> to vector<16x16x128xf32>
    %22 = vector.extract_strided_slice %5 {offsets = [0, 2, 0], sizes = [1, 1, 128], strides = [1, 1, 1]} : vector<3x3x128xf32> to vector<1x1x128xf32>
    %23 = vector.shape_cast %22 : vector<1x1x128xf32> to vector<128xf32>
    %24 = vector.shape_cast %23 : vector<128xf32> to vector<1x1x128xf32>
    %25 = vector.broadcast %24 : vector<1x1x128xf32> to vector<16x16x128xf32>
    %26 = arith.mulf %21, %25 : vector<16x16x128xf32>
    %27 = arith.addf %20, %26 : vector<16x16x128xf32>
    %28 = vector.extract_strided_slice %4 {offsets = [1, 0, 0], sizes = [16, 16, 128], strides = [1, 1, 1]} : vector<18x18x128xf32> to vector<16x16x128xf32>
    %29 = vector.extract_strided_slice %5 {offsets = [1, 0, 0], sizes = [1, 1, 128], strides = [1, 1, 1]} : vector<3x3x128xf32> to vector<1x1x128xf32>
    %30 = vector.shape_cast %29 : vector<1x1x128xf32> to vector<128xf32>
    %31 = vector.shape_cast %30 : vector<128xf32> to vector<1x1x128xf32>
    %32 = vector.broadcast %31 : vector<1x1x128xf32> to vector<16x16x128xf32>
    %33 = arith.mulf %28, %32 : vector<16x16x128xf32>
    %34 = arith.addf %27, %33 : vector<16x16x128xf32>
    %35 = vector.extract_strided_slice %4 {offsets = [1, 1, 0], sizes = [16, 16, 128], strides = [1, 1, 1]} : vector<18x18x128xf32> to vector<16x16x128xf32>
    %36 = vector.extract_strided_slice %5 {offsets = [1, 1, 0], sizes = [1, 1, 128], strides = [1, 1, 1]} : vector<3x3x128xf32> to vector<1x1x128xf32>
    %37 = vector.shape_cast %36 : vector<1x1x128xf32> to vector<128xf32>
    %38 = vector.shape_cast %37 : vector<128xf32> to vector<1x1x128xf32>
    %39 = vector.broadcast %38 : vector<1x1x128xf32> to vector<16x16x128xf32>
    %40 = arith.mulf %35, %39 : vector<16x16x128xf32>
    %41 = arith.addf %34, %40 : vector<16x16x128xf32>
    %42 = vector.extract_strided_slice %4 {offsets = [1, 2, 0], sizes = [16, 16, 128], strides = [1, 1, 1]} : vector<18x18x128xf32> to vector<16x16x128xf32>
    %43 = vector.extract_strided_slice %5 {offsets = [1, 2, 0], sizes = [1, 1, 128], strides = [1, 1, 1]} : vector<3x3x128xf32> to vector<1x1x128xf32>
    %44 = vector.shape_cast %43 : vector<1x1x128xf32> to vector<128xf32>
    %45 = vector.shape_cast %44 : vector<128xf32> to vector<1x1x128xf32>
    %46 = vector.broadcast %45 : vector<1x1x128xf32> to vector<16x16x128xf32>
    %47 = arith.mulf %42, %46 : vector<16x16x128xf32>
    %48 = arith.addf %41, %47 : vector<16x16x128xf32>
    %49 = vector.extract_strided_slice %4 {offsets = [2, 0, 0], sizes = [16, 16, 128], strides = [1, 1, 1]} : vector<18x18x128xf32> to vector<16x16x128xf32>
    %50 = vector.extract_strided_slice %5 {offsets = [2, 0, 0], sizes = [1, 1, 128], strides = [1, 1, 1]} : vector<3x3x128xf32> to vector<1x1x128xf32>
    %51 = vector.shape_cast %50 : vector<1x1x128xf32> to vector<128xf32>
    %52 = vector.shape_cast %51 : vector<128xf32> to vector<1x1x128xf32>
    %53 = vector.broadcast %52 : vector<1x1x128xf32> to vector<16x16x128xf32>
    %54 = arith.mulf %49, %53 : vector<16x16x128xf32>
    %55 = arith.addf %48, %54 : vector<16x16x128xf32>
    %56 = vector.extract_strided_slice %4 {offsets = [2, 1, 0], sizes = [16, 16, 128], strides = [1, 1, 1]} : vector<18x18x128xf32> to vector<16x16x128xf32>
    %57 = vector.extract_strided_slice %5 {offsets = [2, 1, 0], sizes = [1, 1, 128], strides = [1, 1, 1]} : vector<3x3x128xf32> to vector<1x1x128xf32>
    %58 = vector.shape_cast %57 : vector<1x1x128xf32> to vector<128xf32>
    %59 = vector.shape_cast %58 : vector<128xf32> to vector<1x1x128xf32>
    %60 = vector.broadcast %59 : vector<1x1x128xf32> to vector<16x16x128xf32>
    %61 = arith.mulf %56, %60 : vector<16x16x128xf32>
    %62 = arith.addf %55, %61 : vector<16x16x128xf32>
    %63 = vector.extract_strided_slice %4 {offsets = [2, 2, 0], sizes = [16, 16, 128], strides = [1, 1, 1]} : vector<18x18x128xf32> to vector<16x16x128xf32>
    %64 = vector.extract_strided_slice %5 {offsets = [2, 2, 0], sizes = [1, 1, 128], strides = [1, 1, 1]} : vector<3x3x128xf32> to vector<1x1x128xf32>
    %65 = vector.shape_cast %64 : vector<1x1x128xf32> to vector<128xf32>
    %66 = vector.shape_cast %65 : vector<128xf32> to vector<1x1x128xf32>
    %67 = vector.broadcast %66 : vector<1x1x128xf32> to vector<16x16x128xf32>
    %68 = arith.mulf %63, %67 : vector<16x16x128xf32>
    %69 = arith.addf %62, %68 : vector<16x16x128xf32>
    %70 = vector.shape_cast %69 : vector<16x16x128xf32> to vector<256x128xf32>
    %c0_10 = arith.constant 0 : index
    %c0_11 = arith.constant 0 : index
    %71 = vector.load %arg4[%c0_10, %c0_11] : memref<128x192xf32, #tpu.memory_space<vmem>>, vector<128x192xf32>
    %cst_12 = arith.constant dense<0.000000e+00> : vector<256x192xf32>
    %72 = tpu.matmul %70, %71, %cst_12 {dimension_numbers = #tpu.dot_dimension_numbers<[1], [0], [0], [1], [0, 0, 1, 1], [], []>} : vector<256x128xf32>, vector<128x192xf32>, vector<256x192xf32> -> vector<256x192xf32>
    %c0_13 = arith.constant 0 : index
    %c0_14 = arith.constant 0 : index
    %c0_15 = arith.constant 0 : index
    %73 = vector.load %arg5[%c0_13, %c0_14, %c0_15] : memref<1x256x192xf32, #tpu.memory_space<vmem>>, vector<1x256x192xf32>
    %74 = vector.shape_cast %73 : vector<1x256x192xf32> to vector<256x192xf32>
    %75 = vector.shape_cast %72 : vector<256x192xf32> to vector<1x256x192xf32>
    tpu.vector_store %arg5[%c0_13, %c0_14, %c0_15], %75 {strides = array<i32>} : memref<1x256x192xf32, #tpu.memory_space<vmem>>, vector<1x256x192xf32>,
    return
  }
  func.func @transform_0(%arg0: i32) -> (i32, i32, i32, i32) {
    %c0_i32 = arith.constant 0 : i32
    %c0_i32_0 = arith.constant 0 : i32
    %c0_i32_1 = arith.constant 0 : i32
    %c0_i32_2 = arith.constant 0 : i32
    return %arg0, %c0_i32, %c0_i32_0, %c0_i32_1 : i32, i32, i32, i32
  }
  func.func @transform_1(%arg0: i32) -> (i32, i32, i32, i32) {
    %c0_i32 = arith.constant 0 : i32
    %c0_i32_0 = arith.constant 0 : i32
    %c0_i32_1 = arith.constant 0 : i32
    %c0_i32_2 = arith.constant 0 : i32
    %c0_i32_3 = arith.constant 0 : i32
    return %c0_i32, %c0_i32_0, %c0_i32_1, %c0_i32_2 : i32, i32, i32, i32
  }
  func.func @transform_2(%arg0: i32) -> (i32, i32, i32) {
    %c0_i32 = arith.constant 0 : i32
    %c0_i32_0 = arith.constant 0 : i32
    %c0_i32_1 = arith.constant 0 : i32
    %c0_i32_2 = arith.constant 0 : i32
    return %c0_i32, %c0_i32_0, %c0_i32_1 : i32, i32, i32
  }
  func.func @transform_3(%arg0: i32) -> (i32, i32) {
    %c0_i32 = arith.constant 0 : i32
    %c0_i32_0 = arith.constant 0 : i32
    %c0_i32_1 = arith.constant 0 : i32
    return %c0_i32, %c0_i32_0 : i32, i32
  }
  func.func @transform_4(%arg0: i32) -> (i32, i32, i32) {
    %c0_i32 = arith.constant 0 : i32
    %c0_i32_0 = arith.constant 0 : i32
    %c0_i32_1 = arith.constant 0 : i32
    return %arg0, %c0_i32, %c0_i32_0 : i32, i32, i32
  }
}

module attributes {stable_mosaic.version = 11 : i64} {
  func.func @_attention_kernel(%arg0: i32, %arg1: memref<1x256x192xf32, #tpu.memory_space<vmem>>, %arg2: memref<128x256xf32, #tpu.memory_space<vmem>>, %arg3: memref<1x256x128xf32, #tpu.memory_space<vmem>>) attributes {dimension_semantics = [#tpu.dimension_semantics<parallel>], iteration_bounds = array<i64: 2>, scalar_prefetch = 0 : i64, scratch_operands = 0 : i64, tpu.core_type = #tpu.core_type<tc>, window_params = [{transform_indices = @transform_0, window_bounds = array<i64: 1, 256, 192>}, {pipeline_mode = #tpu.pipeline_mode<synchronous>, transform_indices = @transform_1, window_bounds = array<i64: 128, 256>}, {transform_indices = @transform_2, window_bounds = array<i64: 1, 256, 128>}]} {
    %c0 = arith.constant 0 : index
    %c0_0 = arith.constant 0 : index
    %c0_1 = arith.constant 0 : index
    %0 = vector.load %arg1[%c0, %c0_0, %c0_1] : memref<1x256x192xf32, #tpu.memory_space<vmem>>, vector<1x256x192xf32>
    %1 = vector.shape_cast %0 : vector<1x256x192xf32> to vector<256x192xf32>
    %2 = vector.extract_strided_slice %1 {offsets = [0, 0], sizes = [256, 64], strides = [1, 1]} : vector<256x192xf32> to vector<256x64xf32>
    %3 = vector.extract_strided_slice %1 {offsets = [0, 64], sizes = [256, 64], strides = [1, 1]} : vector<256x192xf32> to vector<256x64xf32>
    %4 = vector.extract_strided_slice %1 {offsets = [0, 128], sizes = [256, 64], strides = [1, 1]} : vector<256x192xf32> to vector<256x64xf32>
    %c0_2 = arith.constant 0 : index
    %c0_3 = arith.constant 0 : index
    %5 = vector.load %arg2[%c0_2, %c0_3] : memref<128x256xf32, #tpu.memory_space<vmem>>, vector<128x256xf32>
    %cst = arith.constant dense<0.000000e+00> : vector<128x64xf32>
    %6 = tpu.matmul %5, %3, %cst {dimension_numbers = #tpu.dot_dimension_numbers<[1], [0], [0], [1], [0, 0, 1, 1], [], []>} : vector<128x256xf32>, vector<256x64xf32>, vector<128x64xf32> -> vector<128x64xf32>
    %cst_4 = arith.constant dense<0.000000e+00> : vector<128x64xf32>
    %7 = tpu.matmul %5, %4, %cst_4 {dimension_numbers = #tpu.dot_dimension_numbers<[1], [0], [0], [1], [0, 0, 1, 1], [], []>} : vector<128x256xf32>, vector<256x64xf32>, vector<128x64xf32> -> vector<128x64xf32>
    %8 = tpu.iota {dimensions = array<i32: 1>} : vector<256x128xi32>
    %c64_i32 = arith.constant 64 : i32
    %9 = vector.broadcast %c64_i32 : i32 to vector<256x128xi32>
    %10 = arith.cmpi slt, %8, %9 : vector<256x128xi32>
    %11 = vector.extract_strided_slice %2 {offsets = [0, 0], sizes = [256, 16], strides = [1, 1]} : vector<256x64xf32> to vector<256x16xf32>
    %12 = vector.extract_strided_slice %6 {offsets = [0, 0], sizes = [128, 16], strides = [1, 1]} : vector<128x64xf32> to vector<128x16xf32>
    %13 = vector.extract_strided_slice %7 {offsets = [0, 0], sizes = [128, 16], strides = [1, 1]} : vector<128x64xf32> to vector<128x16xf32>
    %14 = tpu.transpose %12, [1, 0] : vector<128x16xf32> -> vector<16x128xf32>
    %cst_5 = arith.constant dense<0.000000e+00> : vector<256x128xf32>
    %15 = tpu.matmul %11, %14, %cst_5 {dimension_numbers = #tpu.dot_dimension_numbers<[1], [0], [0], [1], [0, 0, 1, 1], [], []>} : vector<256x16xf32>, vector<16x128xf32>, vector<256x128xf32> -> vector<256x128xf32>
    %cst_6 = arith.constant -1.000000e+30 : f32
    %16 = vector.broadcast %cst_6 : f32 to vector<256x128xf32>
    %17 = arith.select %10, %15, %16 : vector<256x128xi1>, vector<256x128xf32>
    %cst_7 = arith.constant dense<0xFF800000> : vector<256xf32>
    %18 = vector.multi_reduction <maximumf>, %17, %cst_7 [1] : vector<256x128xf32> to vector<256xf32>
    %19 = vector.shape_cast %18 : vector<256xf32> to vector<256x1xf32>
    %20 = vector.broadcast %19 : vector<256x1xf32> to vector<256x128xf32>
    %21 = arith.subf %17, %20 : vector<256x128xf32>
    %22 = math.exp %21 : vector<256x128xf32>
    %cst_8 = arith.constant dense<0.000000e+00> : vector<256xf32>
    %23 = vector.multi_reduction <add>, %22, %cst_8 [1] : vector<256x128xf32> to vector<256xf32>
    %24 = vector.shape_cast %23 : vector<256xf32> to vector<256x1xf32>
    %cst_9 = arith.constant dense<0.000000e+00> : vector<256x16xf32>
    %25 = tpu.matmul %22, %13, %cst_9 {dimension_numbers = #tpu.dot_dimension_numbers<[1], [0], [0], [1], [0, 0, 1, 1], [], []>} : vector<256x128xf32>, vector<128x16xf32>, vector<256x16xf32> -> vector<256x16xf32>
    %26 = tpu.reciprocal %24 {approx = true} : vector<256x1xf32> -> vector<256x1xf32>
    %27 = vector.broadcast %26 : vector<256x1xf32> to vector<256x16xf32>
    %28 = arith.mulf %25, %27 : vector<256x16xf32>
    %29 = vector.extract_strided_slice %2 {offsets = [0, 16], sizes = [256, 16], strides = [1, 1]} : vector<256x64xf32> to vector<256x16xf32>
    %30 = vector.extract_strided_slice %6 {offsets = [0, 16], sizes = [128, 16], strides = [1, 1]} : vector<128x64xf32> to vector<128x16xf32>
    %31 = vector.extract_strided_slice %7 {offsets = [0, 16], sizes = [128, 16], strides = [1, 1]} : vector<128x64xf32> to vector<128x16xf32>
    %32 = tpu.transpose %30, [1, 0] : vector<128x16xf32> -> vector<16x128xf32>
    %cst_10 = arith.constant dense<0.000000e+00> : vector<256x128xf32>
    %33 = tpu.matmul %29, %32, %cst_10 {dimension_numbers = #tpu.dot_dimension_numbers<[1], [0], [0], [1], [0, 0, 1, 1], [], []>} : vector<256x16xf32>, vector<16x128xf32>, vector<256x128xf32> -> vector<256x128xf32>
    %cst_11 = arith.constant -1.000000e+30 : f32
    %34 = vector.broadcast %cst_11 : f32 to vector<256x128xf32>
    %35 = arith.select %10, %33, %34 : vector<256x128xi1>, vector<256x128xf32>
    %cst_12 = arith.constant dense<0xFF800000> : vector<256xf32>
    %36 = vector.multi_reduction <maximumf>, %35, %cst_12 [1] : vector<256x128xf32> to vector<256xf32>
    %37 = vector.shape_cast %36 : vector<256xf32> to vector<256x1xf32>
    %38 = vector.broadcast %37 : vector<256x1xf32> to vector<256x128xf32>
    %39 = arith.subf %35, %38 : vector<256x128xf32>
    %40 = math.exp %39 : vector<256x128xf32>
    %cst_13 = arith.constant dense<0.000000e+00> : vector<256xf32>
    %41 = vector.multi_reduction <add>, %40, %cst_13 [1] : vector<256x128xf32> to vector<256xf32>
    %42 = vector.shape_cast %41 : vector<256xf32> to vector<256x1xf32>
    %cst_14 = arith.constant dense<0.000000e+00> : vector<256x16xf32>
    %43 = tpu.matmul %40, %31, %cst_14 {dimension_numbers = #tpu.dot_dimension_numbers<[1], [0], [0], [1], [0, 0, 1, 1], [], []>} : vector<256x128xf32>, vector<128x16xf32>, vector<256x16xf32> -> vector<256x16xf32>
    %44 = tpu.reciprocal %42 {approx = true} : vector<256x1xf32> -> vector<256x1xf32>
    %45 = vector.broadcast %44 : vector<256x1xf32> to vector<256x16xf32>
    %46 = arith.mulf %43, %45 : vector<256x16xf32>
    %47 = vector.extract_strided_slice %2 {offsets = [0, 32], sizes = [256, 16], strides = [1, 1]} : vector<256x64xf32> to vector<256x16xf32>
    %48 = vector.extract_strided_slice %6 {offsets = [0, 32], sizes = [128, 16], strides = [1, 1]} : vector<128x64xf32> to vector<128x16xf32>
    %49 = vector.extract_strided_slice %7 {offsets = [0, 32], sizes = [128, 16], strides = [1, 1]} : vector<128x64xf32> to vector<128x16xf32>
    %50 = tpu.transpose %48, [1, 0] : vector<128x16xf32> -> vector<16x128xf32>
    %cst_15 = arith.constant dense<0.000000e+00> : vector<256x128xf32>
    %51 = tpu.matmul %47, %50, %cst_15 {dimension_numbers = #tpu.dot_dimension_numbers<[1], [0], [0], [1], [0, 0, 1, 1], [], []>} : vector<256x16xf32>, vector<16x128xf32>, vector<256x128xf32> -> vector<256x128xf32>
    %cst_16 = arith.constant -1.000000e+30 : f32
    %52 = vector.broadcast %cst_16 : f32 to vector<256x128xf32>
    %53 = arith.select %10, %51, %52 : vector<256x128xi1>, vector<256x128xf32>
    %cst_17 = arith.constant dense<0xFF800000> : vector<256xf32>
    %54 = vector.multi_reduction <maximumf>, %53, %cst_17 [1] : vector<256x128xf32> to vector<256xf32>
    %55 = vector.shape_cast %54 : vector<256xf32> to vector<256x1xf32>
    %56 = vector.broadcast %55 : vector<256x1xf32> to vector<256x128xf32>
    %57 = arith.subf %53, %56 : vector<256x128xf32>
    %58 = math.exp %57 : vector<256x128xf32>
    %cst_18 = arith.constant dense<0.000000e+00> : vector<256xf32>
    %59 = vector.multi_reduction <add>, %58, %cst_18 [1] : vector<256x128xf32> to vector<256xf32>
    %60 = vector.shape_cast %59 : vector<256xf32> to vector<256x1xf32>
    %cst_19 = arith.constant dense<0.000000e+00> : vector<256x16xf32>
    %61 = tpu.matmul %58, %49, %cst_19 {dimension_numbers = #tpu.dot_dimension_numbers<[1], [0], [0], [1], [0, 0, 1, 1], [], []>} : vector<256x128xf32>, vector<128x16xf32>, vector<256x16xf32> -> vector<256x16xf32>
    %62 = tpu.reciprocal %60 {approx = true} : vector<256x1xf32> -> vector<256x1xf32>
    %63 = vector.broadcast %62 : vector<256x1xf32> to vector<256x16xf32>
    %64 = arith.mulf %61, %63 : vector<256x16xf32>
    %65 = vector.extract_strided_slice %2 {offsets = [0, 48], sizes = [256, 16], strides = [1, 1]} : vector<256x64xf32> to vector<256x16xf32>
    %66 = vector.extract_strided_slice %6 {offsets = [0, 48], sizes = [128, 16], strides = [1, 1]} : vector<128x64xf32> to vector<128x16xf32>
    %67 = vector.extract_strided_slice %7 {offsets = [0, 48], sizes = [128, 16], strides = [1, 1]} : vector<128x64xf32> to vector<128x16xf32>
    %68 = tpu.transpose %66, [1, 0] : vector<128x16xf32> -> vector<16x128xf32>
    %cst_20 = arith.constant dense<0.000000e+00> : vector<256x128xf32>
    %69 = tpu.matmul %65, %68, %cst_20 {dimension_numbers = #tpu.dot_dimension_numbers<[1], [0], [0], [1], [0, 0, 1, 1], [], []>} : vector<256x16xf32>, vector<16x128xf32>, vector<256x128xf32> -> vector<256x128xf32>
    %cst_21 = arith.constant -1.000000e+30 : f32
    %70 = vector.broadcast %cst_21 : f32 to vector<256x128xf32>
    %71 = arith.select %10, %69, %70 : vector<256x128xi1>, vector<256x128xf32>
    %cst_22 = arith.constant dense<0xFF800000> : vector<256xf32>
    %72 = vector.multi_reduction <maximumf>, %71, %cst_22 [1] : vector<256x128xf32> to vector<256xf32>
    %73 = vector.shape_cast %72 : vector<256xf32> to vector<256x1xf32>
    %74 = vector.broadcast %73 : vector<256x1xf32> to vector<256x128xf32>
    %75 = arith.subf %71, %74 : vector<256x128xf32>
    %76 = math.exp %75 : vector<256x128xf32>
    %cst_23 = arith.constant dense<0.000000e+00> : vector<256xf32>
    %77 = vector.multi_reduction <add>, %76, %cst_23 [1] : vector<256x128xf32> to vector<256xf32>
    %78 = vector.shape_cast %77 : vector<256xf32> to vector<256x1xf32>
    %cst_24 = arith.constant dense<0.000000e+00> : vector<256x16xf32>
    %79 = tpu.matmul %76, %67, %cst_24 {dimension_numbers = #tpu.dot_dimension_numbers<[1], [0], [0], [1], [0, 0, 1, 1], [], []>} : vector<256x128xf32>, vector<128x16xf32>, vector<256x16xf32> -> vector<256x16xf32>
    %80 = tpu.reciprocal %78 {approx = true} : vector<256x1xf32> -> vector<256x1xf32>
    %81 = vector.broadcast %80 : vector<256x1xf32> to vector<256x16xf32>
    %82 = arith.mulf %79, %81 : vector<256x16xf32>
    %cst_25 = arith.constant 0.000000e+00 : f32
    %83 = vector.broadcast %cst_25 : f32 to vector<256x64xf32>
    %84 = tpu.concatenate %28, %46, %64, %82, %83 in 1 : vector<256x16xf32>, vector<256x16xf32>, vector<256x16xf32>, vector<256x16xf32>, vector<256x64xf32> -> vector<256x128xf32>
    %c0_26 = arith.constant 0 : index
    %c0_27 = arith.constant 0 : index
    %c0_28 = arith.constant 0 : index
    %85 = vector.load %arg3[%c0_26, %c0_27, %c0_28] : memref<1x256x128xf32, #tpu.memory_space<vmem>>, vector<1x256x128xf32>
    %86 = vector.shape_cast %85 : vector<1x256x128xf32> to vector<256x128xf32>
    %87 = vector.shape_cast %84 : vector<256x128xf32> to vector<1x256x128xf32>
    tpu.vector_store %arg3[%c0_26, %c0_27, %c0_28], %87 {strides = array<i32>} : memref<1x256x128xf32, #tpu.memory_space<vmem>>, vector<1x256x128xf32>,
    return
  }
  func.func @transform_0(%arg0: i32) -> (i32, i32, i32) {
    %c0_i32 = arith.constant 0 : i32
    %c0_i32_0 = arith.constant 0 : i32
    %c0_i32_1 = arith.constant 0 : i32
    return %arg0, %c0_i32, %c0_i32_0 : i32, i32, i32
  }
  func.func @transform_1(%arg0: i32) -> (i32, i32) {
    %c0_i32 = arith.constant 0 : i32
    %c0_i32_0 = arith.constant 0 : i32
    %c0_i32_1 = arith.constant 0 : i32
    return %c0_i32, %c0_i32_0 : i32, i32
  }
  func.func @transform_2(%arg0: i32) -> (i32, i32, i32) {
    %c0_i32 = arith.constant 0 : i32
    %c0_i32_0 = arith.constant 0 : i32
    %c0_i32_1 = arith.constant 0 : i32
    return %arg0, %c0_i32, %c0_i32_0 : i32, i32, i32
  }
}

module attributes {stable_mosaic.version = 11 : i64} {
  func.func @_ds_conv_kernel(%arg0: i32, %arg1: memref<1x18x18x128xf32, #tpu.memory_space<vmem>>, %arg2: memref<3x3x128xf32, #tpu.memory_space<vmem>>, %arg3: memref<128x128xf32, #tpu.memory_space<vmem>>, %arg4: memref<1x256x128xf32, #tpu.memory_space<vmem>>) attributes {dimension_semantics = [#tpu.dimension_semantics<parallel>], iteration_bounds = array<i64: 2>, scalar_prefetch = 0 : i64, scratch_operands = 0 : i64, tpu.core_type = #tpu.core_type<tc>, window_params = [{transform_indices = @transform_0, window_bounds = array<i64: 1, 18, 18, 128>}, {pipeline_mode = #tpu.pipeline_mode<synchronous>, transform_indices = @transform_1, window_bounds = array<i64: 3, 3, 128>}, {pipeline_mode = #tpu.pipeline_mode<synchronous>, transform_indices = @transform_2, window_bounds = array<i64: 128, 128>}, {transform_indices = @transform_3, window_bounds = array<i64: 1, 256, 128>}]} {
    %c0 = arith.constant 0 : index
    %c0_0 = arith.constant 0 : index
    %c0_1 = arith.constant 0 : index
    %c0_2 = arith.constant 0 : index
    %0 = vector.load %arg1[%c0, %c0_0, %c0_1, %c0_2] : memref<1x18x18x128xf32, #tpu.memory_space<vmem>>, vector<1x18x18x128xf32>
    %1 = vector.shape_cast %0 : vector<1x18x18x128xf32> to vector<18x18x128xf32>
    %c0_3 = arith.constant 0 : index
    %c0_4 = arith.constant 0 : index
    %c0_5 = arith.constant 0 : index
    %2 = vector.load %arg2[%c0_3, %c0_4, %c0_5] : memref<3x3x128xf32, #tpu.memory_space<vmem>>, vector<3x3x128xf32>
    %cst = arith.constant 0.000000e+00 : f32
    %3 = vector.broadcast %cst : f32 to vector<16x16x128xf32>
    %4 = vector.extract_strided_slice %1 {offsets = [0, 0, 0], sizes = [16, 16, 128], strides = [1, 1, 1]} : vector<18x18x128xf32> to vector<16x16x128xf32>
    %5 = vector.extract_strided_slice %2 {offsets = [0, 0, 0], sizes = [1, 1, 128], strides = [1, 1, 1]} : vector<3x3x128xf32> to vector<1x1x128xf32>
    %6 = vector.shape_cast %5 : vector<1x1x128xf32> to vector<128xf32>
    %7 = vector.shape_cast %6 : vector<128xf32> to vector<1x1x128xf32>
    %8 = vector.broadcast %7 : vector<1x1x128xf32> to vector<16x16x128xf32>
    %9 = arith.mulf %4, %8 : vector<16x16x128xf32>
    %10 = arith.addf %3, %9 : vector<16x16x128xf32>
    %11 = vector.extract_strided_slice %1 {offsets = [0, 1, 0], sizes = [16, 16, 128], strides = [1, 1, 1]} : vector<18x18x128xf32> to vector<16x16x128xf32>
    %12 = vector.extract_strided_slice %2 {offsets = [0, 1, 0], sizes = [1, 1, 128], strides = [1, 1, 1]} : vector<3x3x128xf32> to vector<1x1x128xf32>
    %13 = vector.shape_cast %12 : vector<1x1x128xf32> to vector<128xf32>
    %14 = vector.shape_cast %13 : vector<128xf32> to vector<1x1x128xf32>
    %15 = vector.broadcast %14 : vector<1x1x128xf32> to vector<16x16x128xf32>
    %16 = arith.mulf %11, %15 : vector<16x16x128xf32>
    %17 = arith.addf %10, %16 : vector<16x16x128xf32>
    %18 = vector.extract_strided_slice %1 {offsets = [0, 2, 0], sizes = [16, 16, 128], strides = [1, 1, 1]} : vector<18x18x128xf32> to vector<16x16x128xf32>
    %19 = vector.extract_strided_slice %2 {offsets = [0, 2, 0], sizes = [1, 1, 128], strides = [1, 1, 1]} : vector<3x3x128xf32> to vector<1x1x128xf32>
    %20 = vector.shape_cast %19 : vector<1x1x128xf32> to vector<128xf32>
    %21 = vector.shape_cast %20 : vector<128xf32> to vector<1x1x128xf32>
    %22 = vector.broadcast %21 : vector<1x1x128xf32> to vector<16x16x128xf32>
    %23 = arith.mulf %18, %22 : vector<16x16x128xf32>
    %24 = arith.addf %17, %23 : vector<16x16x128xf32>
    %25 = vector.extract_strided_slice %1 {offsets = [1, 0, 0], sizes = [16, 16, 128], strides = [1, 1, 1]} : vector<18x18x128xf32> to vector<16x16x128xf32>
    %26 = vector.extract_strided_slice %2 {offsets = [1, 0, 0], sizes = [1, 1, 128], strides = [1, 1, 1]} : vector<3x3x128xf32> to vector<1x1x128xf32>
    %27 = vector.shape_cast %26 : vector<1x1x128xf32> to vector<128xf32>
    %28 = vector.shape_cast %27 : vector<128xf32> to vector<1x1x128xf32>
    %29 = vector.broadcast %28 : vector<1x1x128xf32> to vector<16x16x128xf32>
    %30 = arith.mulf %25, %29 : vector<16x16x128xf32>
    %31 = arith.addf %24, %30 : vector<16x16x128xf32>
    %32 = vector.extract_strided_slice %1 {offsets = [1, 1, 0], sizes = [16, 16, 128], strides = [1, 1, 1]} : vector<18x18x128xf32> to vector<16x16x128xf32>
    %33 = vector.extract_strided_slice %2 {offsets = [1, 1, 0], sizes = [1, 1, 128], strides = [1, 1, 1]} : vector<3x3x128xf32> to vector<1x1x128xf32>
    %34 = vector.shape_cast %33 : vector<1x1x128xf32> to vector<128xf32>
    %35 = vector.shape_cast %34 : vector<128xf32> to vector<1x1x128xf32>
    %36 = vector.broadcast %35 : vector<1x1x128xf32> to vector<16x16x128xf32>
    %37 = arith.mulf %32, %36 : vector<16x16x128xf32>
    %38 = arith.addf %31, %37 : vector<16x16x128xf32>
    %39 = vector.extract_strided_slice %1 {offsets = [1, 2, 0], sizes = [16, 16, 128], strides = [1, 1, 1]} : vector<18x18x128xf32> to vector<16x16x128xf32>
    %40 = vector.extract_strided_slice %2 {offsets = [1, 2, 0], sizes = [1, 1, 128], strides = [1, 1, 1]} : vector<3x3x128xf32> to vector<1x1x128xf32>
    %41 = vector.shape_cast %40 : vector<1x1x128xf32> to vector<128xf32>
    %42 = vector.shape_cast %41 : vector<128xf32> to vector<1x1x128xf32>
    %43 = vector.broadcast %42 : vector<1x1x128xf32> to vector<16x16x128xf32>
    %44 = arith.mulf %39, %43 : vector<16x16x128xf32>
    %45 = arith.addf %38, %44 : vector<16x16x128xf32>
    %46 = vector.extract_strided_slice %1 {offsets = [2, 0, 0], sizes = [16, 16, 128], strides = [1, 1, 1]} : vector<18x18x128xf32> to vector<16x16x128xf32>
    %47 = vector.extract_strided_slice %2 {offsets = [2, 0, 0], sizes = [1, 1, 128], strides = [1, 1, 1]} : vector<3x3x128xf32> to vector<1x1x128xf32>
    %48 = vector.shape_cast %47 : vector<1x1x128xf32> to vector<128xf32>
    %49 = vector.shape_cast %48 : vector<128xf32> to vector<1x1x128xf32>
    %50 = vector.broadcast %49 : vector<1x1x128xf32> to vector<16x16x128xf32>
    %51 = arith.mulf %46, %50 : vector<16x16x128xf32>
    %52 = arith.addf %45, %51 : vector<16x16x128xf32>
    %53 = vector.extract_strided_slice %1 {offsets = [2, 1, 0], sizes = [16, 16, 128], strides = [1, 1, 1]} : vector<18x18x128xf32> to vector<16x16x128xf32>
    %54 = vector.extract_strided_slice %2 {offsets = [2, 1, 0], sizes = [1, 1, 128], strides = [1, 1, 1]} : vector<3x3x128xf32> to vector<1x1x128xf32>
    %55 = vector.shape_cast %54 : vector<1x1x128xf32> to vector<128xf32>
    %56 = vector.shape_cast %55 : vector<128xf32> to vector<1x1x128xf32>
    %57 = vector.broadcast %56 : vector<1x1x128xf32> to vector<16x16x128xf32>
    %58 = arith.mulf %53, %57 : vector<16x16x128xf32>
    %59 = arith.addf %52, %58 : vector<16x16x128xf32>
    %60 = vector.extract_strided_slice %1 {offsets = [2, 2, 0], sizes = [16, 16, 128], strides = [1, 1, 1]} : vector<18x18x128xf32> to vector<16x16x128xf32>
    %61 = vector.extract_strided_slice %2 {offsets = [2, 2, 0], sizes = [1, 1, 128], strides = [1, 1, 1]} : vector<3x3x128xf32> to vector<1x1x128xf32>
    %62 = vector.shape_cast %61 : vector<1x1x128xf32> to vector<128xf32>
    %63 = vector.shape_cast %62 : vector<128xf32> to vector<1x1x128xf32>
    %64 = vector.broadcast %63 : vector<1x1x128xf32> to vector<16x16x128xf32>
    %65 = arith.mulf %60, %64 : vector<16x16x128xf32>
    %66 = arith.addf %59, %65 : vector<16x16x128xf32>
    %67 = vector.shape_cast %66 : vector<16x16x128xf32> to vector<256x128xf32>
    %c0_6 = arith.constant 0 : index
    %c0_7 = arith.constant 0 : index
    %68 = vector.load %arg3[%c0_6, %c0_7] : memref<128x128xf32, #tpu.memory_space<vmem>>, vector<128x128xf32>
    %cst_8 = arith.constant dense<0.000000e+00> : vector<256x128xf32>
    %69 = tpu.matmul %67, %68, %cst_8 {dimension_numbers = #tpu.dot_dimension_numbers<[1], [0], [0], [1], [0, 0, 1, 1], [], []>} : vector<256x128xf32>, vector<128x128xf32>, vector<256x128xf32> -> vector<256x128xf32>
    %c0_9 = arith.constant 0 : index
    %c0_10 = arith.constant 0 : index
    %c0_11 = arith.constant 0 : index
    %70 = vector.load %arg4[%c0_9, %c0_10, %c0_11] : memref<1x256x128xf32, #tpu.memory_space<vmem>>, vector<1x256x128xf32>
    %71 = vector.shape_cast %70 : vector<1x256x128xf32> to vector<256x128xf32>
    %72 = vector.shape_cast %69 : vector<256x128xf32> to vector<1x256x128xf32>
    tpu.vector_store %arg4[%c0_9, %c0_10, %c0_11], %72 {strides = array<i32>} : memref<1x256x128xf32, #tpu.memory_space<vmem>>, vector<1x256x128xf32>,
    return
  }
  func.func @transform_0(%arg0: i32) -> (i32, i32, i32, i32) {
    %c0_i32 = arith.constant 0 : i32
    %c0_i32_0 = arith.constant 0 : i32
    %c0_i32_1 = arith.constant 0 : i32
    %c0_i32_2 = arith.constant 0 : i32
    return %arg0, %c0_i32, %c0_i32_0, %c0_i32_1 : i32, i32, i32, i32
  }
  func.func @transform_1(%arg0: i32) -> (i32, i32, i32) {
    %c0_i32 = arith.constant 0 : i32
    %c0_i32_0 = arith.constant 0 : i32
    %c0_i32_1 = arith.constant 0 : i32
    %c0_i32_2 = arith.constant 0 : i32
    return %c0_i32, %c0_i32_0, %c0_i32_1 : i32, i32, i32
  }
  func.func @transform_2(%arg0: i32) -> (i32, i32) {
    %c0_i32 = arith.constant 0 : i32
    %c0_i32_0 = arith.constant 0 : i32
    %c0_i32_1 = arith.constant 0 : i32
    return %c0_i32, %c0_i32_0 : i32, i32
  }
  func.func @transform_3(%arg0: i32) -> (i32, i32, i32) {
    %c0_i32 = arith.constant 0 : i32
    %c0_i32_0 = arith.constant 0 : i32
    %c0_i32_1 = arith.constant 0 : i32
    return %arg0, %c0_i32, %c0_i32_0 : i32, i32, i32
  }
}

</mosaic_0001>

<bundles_post_ra>
// kernel: linear_attention_forward.3
= control target key start
LH: loop header
LB: loop body
LE: loop exit
PB: predicated region body
PF: predicated region fallthrough
CT: control target
= control target key end

     0   :  { %s2545_s15 = smov 0   ;;  %s4804_s0 = inlined_call_operand.vmem [shape: f32[2,18,18,128], index: 0, kind: input, shape index: {}]   ;;  %s4805_s1 = inlined_call_operand.vmem [shape: f32[1,18,18,128], index: 1, kind: input, shape index: {}]   ;;  %s4806_s2 = inlined_call_operand.vmem [shape: f32[3,3,128], index: 2, kind: input, shape index: {}]   ;;  %s4807_s3 = inlined_call_operand.vmem [shape: f32[128,192], index: 3, kind: input, shape index: {}]   ;;  %s4808_s4 = inlined_call_operand.vmem [shape: f32[2,256,192], index: 4, kind: output, shape index: {}]  }
   0x1 LB: > { %s2442_s16 = sadd.s32 4294967295, %s2517_s15   ;;  %p2446_p0 = scmp.ge.s32.totalorder %s2517_s15, 1  ;;  %s2517_s15 = sphi %s2545_s15, %s14_s15  }
   0x2   : > { %p162_p1 = scmp.lt.s32.totalorder %s2517_s15, 3 }
   0x4   : > { %p163_p2 = pnand %p2446_p0, %p162_p1 }
   0x6   : > { %166 = sbr.rel (%p163_p2) target bundleno = 562 (0x232), region = 36 }
   0xd   : > { %v2034_v0 = vld [vmem:[%s4807_s3 + $0x8] sm:$0xff]  ;;  %v2036_v1 = vld [vmem:[%s4807_s3 + $0x18] sm:$0xff]  ;;  %v2033_v2 = vld [vmem:[%s4807_s3] sm:$0xff]  ;;  %p188_p3 = scmp.lt.s32.totalorder %s2442_s16, 1  ;;  %v4815_v7 = vmov 0.0   ;;  %v363_v14 = vlaneseq  ;;  %vm531_vm0 = vcmask 1046528  }
   0xe   : > { %v2453_v3 = vpack.c.bf16 %v2036_v1, %v2034_v0  ;;  %v2035_v4 = vld [vmem:[%s4807_s3 + $0x10] sm:$0xff]  ;;  %v2038_v5 = vld [vmem:[%s4807_s3 + $0x28] sm:$0xff]  ;;  %v2040_v6 = vld [vmem:[%s4807_s3 + $0x38] sm:$0xff]  ;;  %2129 = vmatprep.mubr.f32.mxu0 %v4815_v7  ;;  %2225 = vmatprep.mubr.f32.mxu1 %v4815_v7  ;;  %vm776_vm1 = vcmask 1045504   ;;  %vm2323_vm2 = vcmask 523264  }
   0xf   : > { %v2455_v8 = vpack.c.bf16 %v2035_v4, %v2033_v2  ;;  %v2457_v9 = vpack.c.bf16 %v2040_v6, %v2038_v5  ;;  %v2037_v10 = vld [vmem:[%s4807_s3 + $0x20] sm:$0xff]  ;;  %v2039_v11 = vld [vmem:[%s4807_s3 + $0x30] sm:$0xff]  ;;  %v2042_v12 = vld [vmem:[%s4807_s3 + $0x48] sm:$0xff]  ;;  %s4947_s16 = smov (!%p188_p3, %s2442_s16), 1  ;;  %v364_v31 = vshrl.u32 %v363_v14, 7 }
  0x10   : > { %2454 = vmatprep.subr.bf16.mxu0 %v2453_v3  ;;  %2485 = vmatprep.subr.bf16.mxu1 %v2453_v3  ;;  %v2044_v13 = vld [vmem:[%s4807_s3 + $0x58] sm:$0xff]  ;;  %v2459_v15 = vpack.c.bf16 %v2039_v11, %v2037_v10  ;;  %v2041_v16 = vld [vmem:[%s4807_s3 + $0x40] sm:$0xff]  ;;  %s2501_s13 = smul.u32 432, %s4947_s16  ;;  %v2043_v18 = vld [vmem:[%s4807_s3 + $0x50] sm:$0xff]  ;;  %s2452_s25 = sshll.u32 %s4947_s16, 9 }
  0x11   : > { %2456 = vmatpush1.bf16.msra.mxu0 %v2455_v8  ;;  %2493 = vmatpush1.bf16.msra.mxu1 %v2455_v8  ;;  %v2461_v17 = vpack.c.bf16 %v2044_v13, %v2042_v12  ;;  %v2046_v19 = vld [vmem:[%s4807_s3 + $0x68] sm:$0xff]  ;;  %v2048_v20 = vld [vmem:[%s4807_s3 + $0x78] sm:$0xff]  ;;  %v2045_v21 = vld [vmem:[%s4807_s3 + $0x60] sm:$0xff]  ;;  %v2463_v32 = vpack.c.bf16 %v2043_v18, %v2041_v16  ;;  %v2660_v43 = vsub.s32 0, %v364_v31  ;;  %v2665_v50 = vsub.s32 1, %v364_v31  ;;  %s4310_s30 = scalar_lea.vmem %s4808_s4, %s2452_s25 }
  0x12   : > { %2458 = vmatprep.subr.bf16.mxu0 %v2457_v9  ;;  %2486 = vmatprep.subr.bf16.mxu1 %v2457_v9  ;;  %v2047_v22 = vld [vmem:[%s4807_s3 + $0x70] sm:$0xff]  ;;  %v2050_v23 = vld [vmem:[%s4807_s3 + $0x88] sm:$0xff]  ;;  %v2052_v24 = vld [vmem:[%s4807_s3 + $0x98] sm:$0xff]  ;;  %s2633_s21 = scalar_lea.vmem %s4804_s0, %s2501_s13  ;;  %v2465_v36 = vpack.c.bf16 %v2048_v20, %v2046_v19  ;;  %v678_v57 = vsub.s32 2, %v364_v31 }
  0x13   : > { %v2049_v25 = vld [vmem:[%s4807_s3 + $0x80] sm:$0xff]  ;;  %v2051_v26 = vld [vmem:[%s4807_s3 + $0x90] sm:$0xff]  ;;  %v2054_v27 = vld [vmem:[%s4807_s3 + $0xa8] sm:$0xff]  ;;  %v2467_v44 = vpack.c.bf16 %v2047_v22, %v2045_v21  ;;  %v2469_v45 = vpack.c.bf16 %v2052_v24, %v2050_v23 }
  0x14   : > { %v2056_v28 = vld [vmem:[%s4807_s3 + $0xb8] sm:$0xff]  ;;  %v2053_v29 = vld [vmem:[%s4807_s3 + $0xa0] sm:$0xff]  ;;  %v2055_v30 = vld [vmem:[%s4807_s3 + $0xb0] sm:$0xff]  ;;  %v2471_v46 = vpack.c.bf16 %v2051_v26, %v2049_v25 }
  0x15   : > { %2460 = vmatpush1.bf16.msra.mxu0 %v2459_v15  ;;  %2494 = vmatpush1.bf16.msra.mxu1 %v2459_v15  ;;  %v2058_v33 = vld [vmem:[%s4807_s3 + $0xc8] sm:$0xff]  ;;  %v2060_v34 = vld [vmem:[%s4807_s3 + $0xd8] sm:$0xff]  ;;  %v2057_v35 = vld [vmem:[%s4807_s3 + $0xc0] sm:$0xff]  ;;  %v2473_v51 = vpack.c.bf16 %v2056_v28, %v2054_v27  ;;  %v2667_v52 = vpack.c.bf16 %v2055_v30, %v2053_v29 }
  0x16   : > { %2462 = vmatprep.subr.bf16.mxu0 %v2461_v17  ;;  %2487 = vmatprep.subr.bf16.mxu1 %v2461_v17  ;;  %v2059_v37 = vld [vmem:[%s4807_s3 + $0xd0] sm:$0xff]  ;;  %v2062_v38 = vld [vmem:[%s4807_s3 + $0xe8] sm:$0xff]  ;;  %v2064_v39 = vld [vmem:[%s4807_s3 + $0xf8] sm:$0xff]  ;;  %v2669_v53 = vpack.c.bf16 %v2060_v34, %v2058_v33 }
  0x17   : > { %v2061_v40 = vld [vmem:[%s4807_s3 + $0xe0] sm:$0xff]  ;;  %v2063_v41 = vld [vmem:[%s4807_s3 + $0xf0] sm:$0xff]  ;;  %v199_v47 = vld [vmem:[%s2633_s21 + $0x8] sm:$0xff]  ;;  %v2676_v58 = vpack.c.bf16 %v2059_v37, %v2057_v35  ;;  %v2678_v59 = vpack.c.bf16 %v2064_v39, %v2062_v38 }
  0x18   : > { %v198_v42 = vld [vmem:[%s2633_s21] sm:$0xff]  ;;  %v201_v48 = vld [vmem:[%s2633_s21 + $0x18] sm:$0xff]  ;;  %v204_v54 = vld [vmem:[%s2633_s21 + $0x30] sm:$0xff]  ;;  %v2689_v0 = vpack.c.bf16 %v2063_v41, %v2061_v40 }
  0x19   : > { %v202_v49 = vld [vmem:[%s2633_s21 + $0x20] sm:$0xff]  ;;  %2464 = vmatpush1.bf16.msra.mxu0 %v2463_v32  ;;  %2495 = vmatpush1.bf16.msra.mxu1 %v2463_v32  ;;  %v205_v55 = vld [vmem:[%s2633_s21 + $0x38] sm:$0xff]  ;;  %v253_v60 = vld [vmem:[%s4805_s1 + $0x8] sm:$0xff] }
  0x1a   : > { %v252_v56 = vld [vmem:[%s4805_s1] sm:$0xff]  ;;  %2466 = vmatprep.subr.bf16.mxu0 %v2465_v36  ;;  %2488 = vmatprep.subr.bf16.mxu1 %v2465_v36  ;;  %v255_v61 = vld [vmem:[%s4805_s1 + $0x18] sm:$0xff]  ;;  %v258_v1 = vld [vmem:[%s4805_s1 + $0x30] sm:$0xff]  ;;  %v2697_v3 = vadd.f32 %v253_v60, %v199_v47 }
  0x1b   : > { %v256_v62 = vld [vmem:[%s4805_s1 + $0x20] sm:$0xff]  ;;  %v306_v63 = vadd.f32 %v252_v56, %v198_v42  ;;  %v259_v2 = vld [vmem:[%s4805_s1 + $0x38] sm:$0xff]  ;;  %v2699_v4 = vadd.f32 %v255_v61, %v201_v48  ;;  %v2706_v8 = vadd.f32 %v258_v1, %v204_v54  ;;  %v362_v16 = vld [vmem:[%s4806_s2 + $0x8] sm:$0x7] }
  0x1c   : > { %v2701_v5 = vadd.f32 %v256_v62, %v202_v49  ;;  %v360_v6 = vld [vmem:[%s4806_s2] sm:$0x7]  ;;  %v2708_v9 = vadd.f32 %v259_v2, %v205_v55  ;;  %v361_v10 = vld [vmem:[%s4806_s2 + $0x4] sm:$0x7]  ;;  %v2754_v31 = vrot.slane %v362_v16, %v2660_v43  ;;  %v2772_v39 = vrot.slane %v362_v16, %v2665_v50  ;;  %v279_v54 = vld [vmem:[%s4805_s1 + $0xd8] sm:$0xff] }
  0x1d   : > { %v2714_v11 = vrot.slane %v360_v6, %v2660_v43  ;;  %v2717_v12 = vrot.slane %v360_v6, %v2665_v50  ;;  %2468 = vmatpush1.bf16.msra.mxu0 %v2467_v44  ;;  %2496 = vmatpush1.bf16.msra.mxu1 %v2467_v44  ;;  %v2719_v13 = vrot.slane %v360_v6, %v678_v57  ;;  %v222_v44 = vld [vmem:[%s2633_s21 + $0xc0] sm:$0xff]  ;;  %v228_v60 = vld [vmem:[%s2633_s21 + $0xf0] sm:$0xff]  ;;  %v229_v1 = vld [vmem:[%s2633_s21 + $0xf8] sm:$0xff] }
  0x1e   : > { %v2722_v14 = vrot.slane %v361_v10, %v2660_v43  ;;  %v2725_v15 = vrot.slane %v361_v10, %v2665_v50  ;;  %2470 = vmatprep.subr.bf16.mxu0 %v2469_v45  ;;  %2489 = vmatprep.subr.bf16.mxu1 %v2469_v45  ;;  %v2750_v27 = vrot.slane %v361_v10, %v678_v57  ;;  %v223_v45 = vld [vmem:[%s2633_s21 + $0xc8] sm:$0xff]  ;;  %v225_v50 = vld [vmem:[%s2633_s21 + $0xd8] sm:$0xff]  ;;  %v280_v61 = vld [vmem:[%s4805_s1 + $0xe0] sm:$0xff] }
  0x1f   : > { %v367_v17 = vmul.f32 %v2714_v11, %v306_v63  ;;  %v435_v18 = vmul.f32 %v2717_v12, %v306_v63  ;;  %v2734_v19 = vmul.f32 %v2717_v12, %v2697_v3  ;;  %v680_v20 = vmul.f32 %v2719_v13, %v306_v63  ;;  %v282_v2 = vld [vmem:[%s4805_s1 + $0xf0] sm:$0xff]  ;;  %v283_v6 = vld [vmem:[%s4805_s1 + $0xf8] sm:$0xff] }
  0x20   : > { %v2739_v21 = vmul.f32 %v2719_v13, %v2697_v3  ;;  %v925_v22 = vmul.f32 %v2722_v14, %v2699_v4  ;;  %v993_v23 = vmul.f32 %v2725_v15, %v2699_v4  ;;  %v2748_v26 = vmul.f32 %v2725_v15, %v2701_v5 }
  0x21   : > { %v532_v24 = vrot.slane %v435_v18, 1  ;;  %v533_v25 = vrot.slane %v2734_v19, 1  ;;  %2472 = vmatpush1.bf16.msra.mxu0 %v2471_v46  ;;  %2497 = vmatpush1.bf16.msra.mxu1 %v2471_v46  ;;  %v777_v28 = vrot.slane %v680_v20, 2  ;;  %v1237_v34 = vmul.f32 %v2750_v27, %v2699_v4  ;;  %v276_v46 = vld [vmem:[%s4805_s1 + $0xc0] sm:$0xff] }
  0x22   : > { %v778_v29 = vrot.slane %v2739_v21, 2  ;;  %v1089_v30 = vrot.slane %v993_v23, 1  ;;  %2474 = vmatprep.subr.bf16.mxu0 %v2473_v51  ;;  %2490 = vmatprep.subr.bf16.mxu1 %v2473_v51  ;;  %v1090_v33 = vrot.slane %v2748_v26, 1  ;;  %v2764_v35 = vmul.f32 %v2750_v27, %v2701_v5  ;;  %v277_v51 = vld [vmem:[%s4805_s1 + $0xc8] sm:$0xff] }
  0x23   : > { %v534_v32 = vsel %vm531_vm0, %v532_v24, %v533_v25  ;;  %v1481_v38 = vmul.f32 %v2754_v31, %v2706_v8  ;;  %v1333_v41 = vrot.slane %v1237_v34, 2  ;;  %v2778_v43 = vrot.slane %v362_v16, %v678_v57  ;;  %v226_v57 = vld [vmem:[%s2633_s21 + $0xe0] sm:$0xff] }
  0x24   : > { %v644_v36 = vadd.f32 %v534_v32, %v367_v17  ;;  %v779_v37 = vsel %vm776_vm1, %v777_v28, %v778_v29  ;;  %v1091_v40 = vsel %vm531_vm0, %v1089_v30, %v1090_v33  ;;  %v1334_v42 = vrot.slane %v2764_v35, 2 }
  0x25   : > { %2476 = vmatpush1.bf16.msra.mxu0 %v2667_v52  ;;  %2498 = vmatpush1.bf16.msra.mxu1 %v2667_v52  ;;  %v1549_v48 = vmul.f32 %v2772_v39, %v2706_v8  ;;  %v2791_v49 = vmul.f32 %v2772_v39, %v2708_v9  ;;  %v1793_v55 = vmul.f32 %v2778_v43, %v2706_v8 }
  0x26   : > { %v889_v47 = vadd.f32 %v779_v37, %v644_v36  ;;  %2478 = vmatprep.subr.bf16.mxu0 %v2669_v53  ;;  %2491 = vmatprep.subr.bf16.mxu1 %v2669_v53  ;;  %v1335_v52 = vsel %vm776_vm1, %v1333_v41, %v1334_v42  ;;  %v2809_v56 = vmul.f32 %v2778_v43, %v2708_v9 }
  0x27   : > { %v1645_v63 = vrot.slane %v1549_v48, 1  ;;  %v4818_v53 = vrot.slane %v2791_v49, 1  ;;  %v2824_v10 = vadd.f32 %v276_v46, %v222_v44  ;;  %v1889_v16 = vrot.slane %v1793_v55, 2 }
  0x28   : > { %v957_v62 = vadd.f32 %v925_v22, %v889_v47  ;;  %v4817_v17 = vrot.slane %v2809_v56, 2  ;;  %v2827_v18 = vadd.f32 %v277_v51, %v223_v45  ;;  %v2829_v20 = vadd.f32 %v279_v54, %v225_v50 }
  0x29   : > { %2480 = vmatpush1.bf16.msra.mxu0 %v2676_v58  ;;  %2499 = vmatpush1.bf16.msra.mxu1 %v2676_v58  ;;  %v1647_v23 = vsel %vm531_vm0, %v1645_v63, %v4818_v53  ;;  %v2836_v24 = vadd.f32 %v280_v61, %v226_v57  ;;  %v2843_v30 = vadd.f32 %v282_v2, %v228_v60  ;;  %v200_v60 = vld [vmem:[%s2633_s21 + $0x10] sm:$0x3]  ;;  %v203_v61 = vld [vmem:[%s2633_s21 + $0x28] sm:$0x3]  ;;  %v284_v53 = vld [vmem:[%s4805_s1 + $0x100] sm:$0x3] }
  0x2a   : > { %4878 = vst [vmem:[#allocation2_spill] sm:$0xff] %v2829_v20  ;;  %v1201_v22 = vadd.f32 %v1091_v40, %v957_v62  ;;  %2482 = vmatprep.subr.bf16.mxu0 %v2678_v59  ;;  %2492 = vmatprep.subr.bf16.mxu1 %v2678_v59  ;;  %v1891_v28 = vsel %vm776_vm1, %v1889_v16, %v4817_v17  ;;  %v257_v16 = vld [vmem:[%s4805_s1 + $0x28] sm:$0x3]  ;;  %v230_v17 = vld [vmem:[%s2633_s21 + $0x100] sm:$0x3] }
  0x2b   : > { %4879 = vst [vmem:[#allocation3_spill] sm:$0xff] %v2836_v24  ;;  %v2845_v32 = vadd.f32 %v283_v6, %v229_v1  ;;  %v383_v34 = vmul.f32 %v2714_v11, %v2824_v10  ;;  %v459_v36 = vmul.f32 %v2717_v12, %v2824_v10  ;;  %v2853_v37 = vmul.f32 %v2717_v12, %v2827_v18  ;;  %v254_v6 = vld [vmem:[%s4805_s1 + $0x10] sm:$0x3] }
  0x2c   : > { %v1445_v58 = vadd.f32 %v1335_v52, %v1201_v22  ;;  %v704_v59 = vmul.f32 %v2719_v13, %v2824_v10  ;;  %v2859_v40 = vmul.f32 %v2719_v13, %v2827_v18  ;;  %v941_v41 = vmul.f32 %v2722_v14, %v2829_v20 }
  0x2d   : > { %v1017_v44 = vmul.f32 %v2725_v15, %v2829_v20  ;;  %2484 = vmatpush1.bf16.msra.mxu0 %v2689_v0  ;;  %2500 = vmatpush1.bf16.msra.mxu1 %v2689_v0  ;;  %v572_v46 = vrot.slane %v459_v36, 1  ;;  %v4814_v47 = vrot.slane %v2853_v37, 1  ;;  %v2870_v48 = vmul.f32 %v2725_v15, %v2836_v24 }
  0x2e   : > { %v1513_v45 = vadd.f32 %v1481_v38, %v1445_v58  ;;  %v817_v50 = vrot.slane %v704_v59, 2  ;;  %v4810_v51 = vrot.slane %v2859_v40, 2  ;;  %v1261_v52 = vmul.f32 %v2750_v27, %v2829_v20 }
  0x2f   : > { %v1129_v54 = vrot.slane %v1017_v44, 1  ;;  %v574_v0 = vsel %vm531_vm0, %v572_v46, %v4814_v47  ;;  %v4809_v38 = vrot.slane %v2870_v48, 1  ;;  %v2881_v57 = vmul.f32 %v2750_v27, %v2836_v24  ;;  %v260_v46 = vld [vmem:[%s4805_s1 + $0x40] sm:$0x3] }
  0x30   : > { %v1757_v55 = vadd.f32 %v1647_v23, %v1513_v45  ;;  %v660_v62 = vadd.f32 %v574_v0, %v383_v34  ;;  %v819_v63 = vsel %vm776_vm1, %v817_v50, %v4810_v51  ;;  %v1373_v1 = vrot.slane %v1261_v52, 2  ;;  %v206_v45 = vld [vmem:[%s2633_s21 + $0x40] sm:$0x3] }
  0x31   : > { %v1497_v2 = vmul.f32 %v2754_v31, %v2843_v30  ;;  %v1131_v23 = vsel %vm531_vm0, %v1129_v54, %v4809_v38  ;;  %v4813_v58 = vrot.slane %v2881_v57, 2  ;;  %v1573_v34 = vmul.f32 %v2772_v39, %v2843_v30 }
  0x32   : > { %v2001_v22 = vadd.f32 %v1891_v28, %v1757_v55  ;;  %v905_v36 = vadd.f32 %v819_v63, %v660_v62  ;;  %v2904_v59 = vmul.f32 %v2772_v39, %v2845_v32  ;;  %v1817_v44 = vmul.f32 %v2778_v43, %v2843_v30 }
  0x33   : > { %v2910_v28 = vmul.f32 %v2778_v43, %v2845_v32  ;;  %v1375_v50 = vsel %vm776_vm1, %v1373_v1, %v4813_v58  ;;  %v1685_v54 = vrot.slane %v1573_v34, 1  ;;  %v308_v52 = vadd.f32 %v254_v6, %v200_v60 }
  0x34   : > { %2130 = vmatmul.mubr.f32.vlgmr.msra.gmra.mrb[0].mxu0 %v2001_v22  ;;  %v2919_v55 = vadd.f32 %v257_v16, %v203_v61  ;;  %v973_v0 = vadd.f32 %v941_v41, %v905_v36  ;;  %v4812_v62 = vrot.slane %v2904_v59, 1  ;;  %v1929_v63 = vrot.slane %v1817_v44, 2 }
  0x35   : > { %v4811_v38 = vrot.slane %v2910_v28, 2  ;;  %2135 = vmatprep.mubr.f32.mxu0 %v4815_v7  ;;  %v2924_v51 = vadd.f32 %v260_v46, %v206_v45  ;;  %v368_v22 = vmul.f32 %v2714_v11, %v2697_v3  ;;  %v437_v1 = vmul.f32 %v2717_v12, %v308_v52 }
  0x36   : > { %v682_v60 = vmul.f32 %v2719_v13, %v308_v52  ;;  %v1217_v61 = vadd.f32 %v1131_v23, %v973_v0  ;;  %v1687_v41 = vsel %vm531_vm0, %v1685_v54, %v4812_v62  ;;  %v926_v16 = vmul.f32 %v2722_v14, %v2701_v5  ;;  %v224_v23 = vld [vmem:[%s2633_s21 + $0xd0] sm:$0x3]  ;;  %v227_v0 = vld [vmem:[%s2633_s21 + $0xe8] sm:$0x3] }
  0x37   : > { %v1931_v6 = vsel %vm776_vm1, %v1929_v63, %v4811_v38  ;;  %v535_v34 = vrot.slane %v437_v1, 1  ;;  %v995_v3 = vmul.f32 %v2725_v15, %v2919_v55  ;;  %v1239_v44 = vmul.f32 %v2750_v27, %v2919_v55  ;;  %v278_v63 = vld [vmem:[%s4805_s1 + $0xd0] sm:$0x3]  ;;  %v281_v1 = vld [vmem:[%s4805_s1 + $0xe8] sm:$0x3] }
  0x38   : > { %v780_v36 = vrot.slane %v682_v60, 2  ;;  %v1461_v45 = vadd.f32 %v1375_v50, %v1217_v61  ;;  %v1482_v46 = vmul.f32 %v2754_v31, %v2708_v9  ;;  %v1551_v54 = vmul.f32 %v2772_v39, %v2924_v51 }
  0x39   : > { %v1795_v52 = vmul.f32 %v2778_v43, %v2924_v51  ;;  %v536_v50 = vsel %vm531_vm0, %v533_v25, %v535_v34  ;;  %v1092_v61 = vrot.slane %v995_v3, 1  ;;  %v1336_v38 = vrot.slane %v1239_v44, 2 }
  0x3a   : > { %v781_v60 = vsel %vm776_vm1, %v778_v29, %v780_v36  ;;  %v1529_v62 = vadd.f32 %v1497_v2, %v1461_v45  ;;  %v645_v58 = vadd.f32 %v536_v50, %v368_v22  ;;  %v1648_v47 = vrot.slane %v1551_v54, 1  ;;  %v208_v54 = vld [vmem:[%s2633_s21 + $0x50] sm:$0xff] }
  0x3b   : > { %v1892_v7 = vrot.slane %v1795_v52, 2  ;;  %v1093_v19 = vsel %vm531_vm0, %v1090_v33, %v1092_v61  ;;  %v1337_v21 = vsel %vm776_vm1, %v1334_v42, %v1336_v38  ;;  %v2972_v25 = vadd.f32 %v278_v63, %v224_v23  ;;  %v262_v52 = vld [vmem:[%s4805_s1 + $0x50] sm:$0xff] }
  0x3c   : > { %v2974_v29 = vadd.f32 %v281_v1, %v227_v0  ;;  %v1773_v2 = vadd.f32 %v1687_v41, %v1529_v62  ;;  %v890_v22 = vadd.f32 %v781_v60, %v645_v58  ;;  %v4882_v34 = vrot.slane %v2791_v49, 1 }
  0x3d   : > { %4880 = vst [vmem:[#allocation4_spill] sm:$0xff] %v2972_v25  ;;  %v4883_v3 = vrot.slane %v2809_v56, 2  ;;  %v2982_v33 = vadd.f32 %v284_v53, %v230_v17  ;;  %v384_v35 = vmul.f32 %v2714_v11, %v2827_v18  ;;  %v461_v42 = vmul.f32 %v2717_v12, %v2972_v25  ;;  %v207_v56 = vld [vmem:[%s2633_s21 + $0x48] sm:$0xff] }
  0x3e   : > { %4881 = vst [vmem:[#allocation5_spill] sm:$0xff] %v2974_v29  ;;  %v1649_v36 = vsel %vm531_vm0, %v4882_v34, %v1648_v47  ;;  %v706_v38 = vmul.f32 %v2719_v13, %v2972_v25  ;;  %v2017_v58 = vadd.f32 %v1931_v6, %v1773_v2  ;;  %v958_v49 = vadd.f32 %v926_v16, %v890_v22  ;;  %v261_v53 = vld [vmem:[%s4805_s1 + $0x48] sm:$0xff] }
  0x3f   : > { %v1893_v26 = vsel %vm776_vm1, %v4883_v3, %v1892_v7  ;;  %v942_v47 = vmul.f32 %v2722_v14, %v2836_v24  ;;  %v1019_v7 = vmul.f32 %v2725_v15, %v2974_v29  ;;  %v575_v17 = vrot.slane %v461_v42, 1 }
  0x40   : > { %v820_v62 = vrot.slane %v706_v38, 2  ;;  %v1263_v41 = vmul.f32 %v2750_v27, %v2974_v29  ;;  %v1498_v6 = vmul.f32 %v2754_v31, %v2845_v32  ;;  %2226 = vmatmul.mubr.f32.vlgmr.msra.gmra.mrb[0].mxu1 %v2017_v58  ;;  %v1202_v16 = vadd.f32 %v1093_v19, %v958_v49 }
  0x41   : > { %v1132_v44 = vrot.slane %v1019_v7, 1  ;;  %v1575_v23 = vmul.f32 %v2772_v39, %v2982_v33  ;;  %v1819_v45 = vmul.f32 %v2778_v43, %v2982_v33  ;;  %v4884_v0 = vmov 0.0  }
  0x42   : > { %2231 = vmatprep.mubr.f32.mxu1 %v4884_v0  ;;  %v4885_v63 = vrot.slane %v2853_v37, 1  ;;  %v4886_v50 = vrot.slane %v2859_v40, 2  ;;  %v1376_v61 = vrot.slane %v1263_v41, 2  ;;  %v3017_v19 = vadd.f32 %v261_v53, %v207_v56 }
  0x43   : > { %v1446_v2 = vadd.f32 %v1337_v21, %v1202_v16  ;;  %v4887_v34 = vrot.slane %v2870_v48, 1  ;;  %v1688_v42 = vrot.slane %v1575_v23, 1  ;;  %v4888_v38 = vrot.slane %v2881_v57, 2 }
  0x44   : > { %v576_v1 = vsel %vm531_vm0, %v4885_v63, %v575_v17  ;;  %v821_v60 = vsel %vm776_vm1, %v4886_v50, %v820_v62  ;;  %v1932_v58 = vrot.slane %v1819_v45, 2  ;;  %v3025_v49 = vadd.f32 %v262_v52, %v208_v54 }
  0x45   : > { %v661_v22 = vadd.f32 %v576_v1, %v384_v35  ;;  %v1133_v3 = vsel %vm531_vm0, %v4887_v34, %v1132_v44  ;;  %v1377_v37 = vsel %vm776_vm1, %v4888_v38, %v1376_v61  ;;  %v369_v40 = vmul.f32 %v2714_v11, %v2699_v4 }
  0x46   : > { %v1514_v7 = vadd.f32 %v1482_v46, %v1446_v2  ;;  %v4889_v21 = vrot.slane %v2904_v59, 1  ;;  %v438_v48 = vmul.f32 %v2717_v12, %v2699_v4  ;;  %v4890_v53 = vrot.slane %v2910_v28, 2 }
  0x47   : > { %v906_v56 = vadd.f32 %v821_v60, %v661_v22  ;;  %v3039_v17 = vmul.f32 %v2717_v12, %v2701_v5  ;;  %v683_v62 = vmul.f32 %v2719_v13, %v2699_v4  ;;  %v3045_v46 = vmul.f32 %v2719_v13, %v2701_v5 }
  0x48   : > { %v1689_v35 = vsel %vm531_vm0, %v4889_v21, %v1688_v42  ;;  %v1933_v57 = vsel %vm776_vm1, %v4890_v53, %v1932_v58  ;;  %v1758_v59 = vadd.f32 %v1649_v36, %v1514_v7  ;;  %v537_v16 = vrot.slane %v438_v48, 1  ;;  %v231_v58 = vld [vmem:[%s2633_s21 + $0x108] sm:$0xff]  ;;  %v232_v48 = vld [vmem:[%s2633_s21 + $0x110] sm:$0xff] }
  0x49   : > { %v974_v41 = vadd.f32 %v942_v47, %v906_v56  ;;  %v927_v44 = vmul.f32 %v2722_v14, %v2706_v8  ;;  %v538_v28 = vrot.slane %v3039_v17, 1  ;;  %v782_v23 = vrot.slane %v683_v62, 2  ;;  %v286_v53 = vld [vmem:[%s4805_s1 + $0x110] sm:$0xff] }
  0x4a   : > { %v783_v45 = vrot.slane %v3045_v46, 2  ;;  %v996_v54 = vmul.f32 %v2725_v15, %v2706_v8  ;;  %v2002_v52 = vadd.f32 %v1893_v26, %v1758_v59  ;;  %v3055_v63 = vmul.f32 %v2725_v15, %v2708_v9 }
  0x4b   : > { %v1218_v4 = vadd.f32 %v1133_v3, %v974_v41  ;;  %v1240_v36 = vmul.f32 %v2750_v27, %v2706_v8  ;;  %v539_v47 = vsel %vm531_vm0, %v537_v16, %v538_v28  ;;  %v3067_v26 = vmul.f32 %v2750_v27, %v2708_v9 }
  0x4c   : > { %v784_v1 = vsel %vm776_vm1, %v782_v23, %v783_v45  ;;  %v1094_v50 = vrot.slane %v996_v54, 1  ;;  %2136 = vmatmul.mubr.f32.gmra.mrb[2].mxu0 %v2002_v52  ;;  %v646_v61 = vadd.f32 %v539_v47, %v369_v40  ;;  %v1095_v2 = vrot.slane %v3055_v63, 1 }
  0x4d   : > { %v1462_v60 = vadd.f32 %v1377_v37, %v1218_v4  ;;  %v1338_v22 = vrot.slane %v1240_v36, 2  ;;  %2141 = vmatprep.mubr.f32.mxu0 %v4884_v0  ;;  %v4827_v34 = vrot.slane %v3067_v26, 2  ;;  %v1483_v3 = vmul.f32 %v2754_v31, %v3017_v19  ;;  %v285_v37 = vld [vmem:[%s4805_s1 + $0x108] sm:$0xff] }
  0x4e   : > { %v1552_v42 = vmul.f32 %v2772_v39, %v3017_v19  ;;  %v3078_v38 = vmul.f32 %v2772_v39, %v3025_v49  ;;  %v891_v7 = vadd.f32 %v784_v1, %v646_v61  ;;  %v1096_v56 = vsel %vm531_vm0, %v1094_v50, %v1095_v2 }
  0x4f   : > { %v1530_v40 = vadd.f32 %v1498_v6, %v1462_v60  ;;  %v1796_v21 = vmul.f32 %v2778_v43, %v3017_v19  ;;  %v1340_v62 = vsel %vm776_vm1, %v1338_v22, %v4827_v34  ;;  %v3099_v41 = vmul.f32 %v2778_v43, %v3025_v49 }
  0x50   : > { %v1650_v59 = vrot.slane %v1552_v42, 1  ;;  %v4823_v6 = vrot.slane %v3078_v38, 1  ;;  %v959_v23 = vadd.f32 %v927_v44, %v891_v7  ;;  %v3101_v52 = vadd.f32 %v285_v37, %v231_v58 }
  0x51   : > { %v1774_v16 = vadd.f32 %v1689_v35, %v1530_v40  ;;  %v1894_v54 = vrot.slane %v1796_v21, 2  ;;  %v4822_v36 = vrot.slane %v3099_v41, 2  ;;  %v3107_v47 = vadd.f32 %v286_v53, %v232_v48 }
  0x52   : > { %v1652_v4 = vsel %vm531_vm0, %v1650_v59, %v4823_v6  ;;  %v385_v1 = vmul.f32 %v2714_v11, %v2829_v20  ;;  %v1203_v60 = vadd.f32 %v1096_v56, %v959_v23  ;;  %v462_v35 = vmul.f32 %v2717_v12, %v2829_v20 }
  0x53   : > { %v2018_v50 = vadd.f32 %v1933_v57, %v1774_v16  ;;  %v3115_v44 = vmul.f32 %v2717_v12, %v2836_v24  ;;  %v1896_v61 = vsel %vm776_vm1, %v1894_v54, %v4822_v36  ;;  %v707_v22 = vmul.f32 %v2719_v13, %v2829_v20 }
  0x54   : > { %v3124_v42 = vmul.f32 %v2719_v13, %v2836_v24  ;;  %v943_v57 = vmul.f32 %v2722_v14, %v2843_v30  ;;  %v1447_v58 = vadd.f32 %v1340_v62, %v1203_v60  ;;  %v577_v37 = vrot.slane %v462_v35, 1 }
  0x55   : > { %2232 = vmatmul.mubr.f32.gmra.mrb[2].mxu1 %v2018_v50  ;;  %v4820_v40 = vrot.slane %v3115_v44, 1  ;;  %v1020_v7 = vmul.f32 %v2725_v15, %v2843_v30  ;;  %v822_v56 = vrot.slane %v707_v22, 2  ;;  %v3135_v48 = vmul.f32 %v2725_v15, %v2845_v32 }
  0x56   : > { %2237 = vmatprep.mubr.f32.mxu1 %v4884_v0  ;;  %v4819_v21 = vrot.slane %v3124_v42, 2  ;;  %v1264_v53 = vmul.f32 %v2750_v27, %v2843_v30  ;;  %v1515_v62 = vadd.f32 %v1483_v3, %v1447_v58  ;;  %v3144_v23 = vmul.f32 %v2750_v27, %v2845_v32 }
  0x57   : > { %v579_v59 = vsel %vm531_vm0, %v577_v37, %v4820_v40  ;;  %v1134_v16 = vrot.slane %v1020_v7, 1  ;;  %v4821_v60 = vrot.slane %v3135_v48, 1  ;;  %v1499_v58 = vmul.f32 %v2754_v31, %v3101_v52  ;;  %v209_v7 = vld [vmem:[%s2633_s21 + $0x58] sm:$0x3] }
  0x58   : > { %v662_v54 = vadd.f32 %v579_v59, %v385_v1  ;;  %v824_v50 = vsel %vm776_vm1, %v822_v56, %v4819_v21  ;;  %v1378_v35 = vrot.slane %v1264_v53, 2  ;;  %v1759_v22 = vadd.f32 %v1652_v4, %v1515_v62  ;;  %v263_v1 = vld [vmem:[%s4805_s1 + $0x58] sm:$0x3] }
  0x59   : > { %v4825_v3 = vrot.slane %v3144_v23, 2  ;;  %v1576_v37 = vmul.f32 %v2772_v39, %v3101_v52  ;;  %v1136_v56 = vsel %vm531_vm0, %v1134_v16, %v4821_v60  ;;  %v3164_v4 = vmul.f32 %v2772_v39, %v3107_v47 }
  0x5a   : > { %v907_v59 = vadd.f32 %v824_v50, %v662_v54  ;;  %v1820_v53 = vmul.f32 %v2778_v43, %v3101_v52  ;;  %v2003_v62 = vadd.f32 %v1896_v61, %v1759_v22  ;;  %v3173_v54 = vmul.f32 %v2778_v43, %v3107_v47 }
  0x5b   : > { %v1380_v21 = vsel %vm776_vm1, %v1378_v35, %v4825_v3  ;;  %v1690_v40 = vrot.slane %v1576_v37, 1  ;;  %v4824_v16 = vrot.slane %v3164_v4, 1  ;;  %v3176_v36 = vadd.f32 %v263_v1, %v209_v7  ;;  %v287_v3 = vld [vmem:[%s4805_s1 + $0x118] sm:$0x3] }
  0x5c   : > { %v975_v50 = vadd.f32 %v943_v57, %v907_v59  ;;  %v1934_v60 = vrot.slane %v1820_v53, 2  ;;  %2142 = vmatmul.mubr.f32.gmra.mrb[4].mxu0 %v2003_v62  ;;  %v4826_v6 = vrot.slane %v3173_v54, 2  ;;  %v370_v61 = vmul.f32 %v2714_v11, %v2701_v5 }
  0x5d   : > { %v440_v35 = vmul.f32 %v2717_v12, %v2919_v55  ;;  %v685_v22 = vmul.f32 %v2719_v13, %v2919_v55  ;;  %v1692_v57 = vsel %vm531_vm0, %v1690_v40, %v4824_v16  ;;  %2147 = vmatprep.mubr.f32.mxu0 %v4884_v0  ;;  %v928_v7 = vmul.f32 %v2722_v14, %v2708_v9  ;;  %v233_v16 = vld [vmem:[%s2633_s21 + $0x118] sm:$0x3] }
  0x5e   : > { %v1219_v37 = vadd.f32 %v1136_v56, %v975_v50  ;;  %v998_v5 = vmul.f32 %v2725_v15, %v2924_v51  ;;  %v1936_v1 = vsel %vm776_vm1, %v1934_v60, %v4826_v6  ;;  %v1242_v55 = vmul.f32 %v2750_v27, %v2924_v51 }
  0x5f   : > { %v540_v59 = vrot.slane %v440_v35, 1  ;;  %v785_v53 = vrot.slane %v685_v22, 2  ;;  %v1484_v40 = vmul.f32 %v2754_v31, %v3025_v49  ;;  %v1554_v50 = vmul.f32 %v2772_v39, %v3176_v36 }
  0x60   : > { %v1463_v56 = vadd.f32 %v1380_v21, %v1219_v37  ;;  %v1097_v62 = vrot.slane %v998_v5, 1  ;;  %v1341_v35 = vrot.slane %v1242_v55, 2  ;;  %v1798_v22 = vmul.f32 %v2778_v43, %v3176_v36 }
  0x61   : > { %v541_v60 = vsel %vm531_vm0, %v538_v28, %v540_v59  ;;  %v786_v21 = vsel %vm776_vm1, %v783_v45, %v785_v53  ;;  %v1653_v34 = vrot.slane %v1554_v50, 1  ;;  %v4891_v20 = vrot.slane %v3067_v26, 2 }
  0x62   : > { %v1531_v37 = vadd.f32 %v1499_v58, %v1463_v56  ;;  %v647_v5 = vadd.f32 %v541_v60, %v370_v61  ;;  %v1098_v6 = vsel %vm531_vm0, %v1095_v2, %v1097_v62  ;;  %v1897_v28 = vrot.slane %v1798_v22, 2  ;;  %v210_v60 = vld [vmem:[%s2633_s21 + $0x60] sm:$0xff] }
  0x63   : > { %v1342_v17 = vsel %vm776_vm1, %v4891_v20, %v1341_v35  ;;  %v3220_v59 = vadd.f32 %v287_v3, %v233_v16  ;;  %v386_v46 = vmul.f32 %v2714_v11, %v2836_v24  ;;  %v4892_v58 = vrot.slane %v3078_v38, 1 }
  0x64   : > { %v1775_v45 = vadd.f32 %v1692_v57, %v1531_v37  ;;  %v892_v53 = vadd.f32 %v786_v21, %v647_v5  ;;  %v464_v2 = vmul.f32 %v2717_v12, %v2974_v29  ;;  %v4893_v26 = vrot.slane %v3099_v41, 2  ;;  %v264_v21 = vld [vmem:[%s4805_s1 + $0x60] sm:$0xff]  ;;  %v211_v5 = vld [vmem:[%s2633_s21 + $0x68] sm:$0xff] }
  0x65   : > { %v1654_v63 = vsel %vm531_vm0, %v4892_v58, %v1653_v34  ;;  %v709_v3 = vmul.f32 %v2719_v13, %v2974_v29  ;;  %v944_v16 = vmul.f32 %v2722_v14, %v2845_v32  ;;  %v1022_v61 = vmul.f32 %v2725_v15, %v2982_v33 }
  0x66   : > { %v1898_v20 = vsel %vm776_vm1, %v4893_v26, %v1897_v28  ;;  %v2019_v38 = vadd.f32 %v1936_v1, %v1775_v45  ;;  %v960_v57 = vadd.f32 %v928_v7, %v892_v53  ;;  %v580_v34 = vrot.slane %v464_v2, 1  ;;  %v265_v28 = vld [vmem:[%s4805_s1 + $0x68] sm:$0xff] }
  0x67   : > { %v1266_v55 = vmul.f32 %v2750_v27, %v2982_v33  ;;  %v825_v56 = vrot.slane %v709_v3, 2  ;;  %v1137_v41 = vrot.slane %v1022_v61, 1  ;;  %v1500_v62 = vmul.f32 %v2754_v31, %v3107_v47 }
  0x68   : > { %v1578_v50 = vmul.f32 %v2772_v39, %v3220_v59  ;;  %2238 = vmatmul.mubr.f32.gmra.mrb[4].mxu1 %v2019_v38  ;;  %v1204_v1 = vadd.f32 %v1098_v6, %v960_v57  ;;  %v4894_v7 = vrot.slane %v3115_v44, 1  ;;  %v1822_v37 = vmul.f32 %v2778_v43, %v3220_v59 }
  0x69   : > { %v1381_v22 = vrot.slane %v1266_v55, 2  ;;  %2243 = vmatprep.mubr.f32.mxu1 %v4884_v0  ;;  %v4895_v53 = vrot.slane %v3124_v42, 2  ;;  %v4896_v44 = vrot.slane %v3135_v48, 1  ;;  %v4897_v3 = vrot.slane %v3144_v23, 2 }
  0x6a   : > { %v581_v35 = vsel %vm531_vm0, %v4894_v7, %v580_v34  ;;  %v1693_v2 = vrot.slane %v1578_v50, 1  ;;  %v1448_v26 = vadd.f32 %v1342_v17, %v1204_v1  ;;  %v1937_v38 = vrot.slane %v1822_v37, 2 }
  0x6b   : > { %v663_v45 = vadd.f32 %v581_v35, %v386_v46  ;;  %v826_v6 = vsel %vm776_vm1, %v4895_v53, %v825_v56  ;;  %v1138_v58 = vsel %vm531_vm0, %v4896_v44, %v1137_v41  ;;  %v1382_v61 = vsel %vm776_vm1, %v4897_v3, %v1381_v22 }
  0x6c   : > { %v3267_v57 = vadd.f32 %v264_v21, %v210_v60  ;;  %v4898_v46 = vrot.slane %v3164_v4, 1  ;;  %v3272_v55 = vadd.f32 %v265_v28, %v211_v5  ;;  %v371_v48 = vmul.f32 %v2714_v11, %v2706_v8 }
  0x6d   : > { %v908_v34 = vadd.f32 %v826_v6, %v663_v45  ;;  %v1516_v56 = vadd.f32 %v1484_v40, %v1448_v26  ;;  %v4899_v17 = vrot.slane %v3173_v54, 2  ;;  %v441_v41 = vmul.f32 %v2717_v12, %v2706_v8 }
  0x6e   : > { %v1694_v42 = vsel %vm531_vm0, %v4898_v46, %v1693_v2  ;;  %v3283_v50 = vmul.f32 %v2717_v12, %v2708_v9  ;;  %v686_v60 = vmul.f32 %v2719_v13, %v2706_v8  ;;  %v3289_v21 = vmul.f32 %v2719_v13, %v2708_v9 }
  0x6f   : > { %v1938_v23 = vsel %vm776_vm1, %v4899_v17, %v1937_v38  ;;  %v976_v4 = vadd.f32 %v944_v16, %v908_v34  ;;  %v929_v54 = vmul.f32 %v2722_v14, %v3017_v19  ;;  %v1760_v40 = vadd.f32 %v1654_v63, %v1516_v56  ;;  %v288_v38 = vld [vmem:[%s4805_s1 + $0x120] sm:$0xff]  ;;  %v235_v17 = vld [vmem:[%s2633_s21 + $0x128] sm:$0xff] }
  0x70   : > { %v542_v1 = vrot.slane %v441_v41, 1  ;;  %v543_v7 = vrot.slane %v3283_v50, 1  ;;  %v999_v35 = vmul.f32 %v2725_v15, %v3017_v19  ;;  %v787_v37 = vrot.slane %v686_v60, 2  ;;  %v289_v41 = vld [vmem:[%s4805_s1 + $0x128] sm:$0xff] }
  0x71   : > { %v1220_v22 = vadd.f32 %v1138_v58, %v976_v4  ;;  %v788_v16 = vrot.slane %v3289_v21, 2  ;;  %v3299_v8 = vmul.f32 %v2725_v15, %v3025_v49  ;;  %v2004_v5 = vadd.f32 %v1898_v20, %v1760_v40 }
  0x72   : > { %v544_v63 = vsel %vm531_vm0, %v542_v1, %v543_v7  ;;  %v1099_v28 = vrot.slane %v999_v35, 1  ;;  %v1243_v45 = vmul.f32 %v2750_v27, %v3017_v19  ;;  %v3312_v20 = vmul.f32 %v2750_v27, %v3025_v49 }
  0x73   : > { %v1464_v53 = vadd.f32 %v1382_v61, %v1220_v22  ;;  %v648_v6 = vadd.f32 %v544_v63, %v371_v48  ;;  %v789_v44 = vsel %vm776_vm1, %v787_v37, %v788_v16  ;;  %v4839_v58 = vrot.slane %v3299_v8, 1  ;;  %2148 = vmatmul.mubr.f32.gmra.mrb[6].mxu0 %v2004_v5  ;;  %v234_v61 = vld [vmem:[%s2633_s21 + $0x120] sm:$0xff] }
  0x74   : > { %v1343_v2 = vrot.slane %v1243_v45, 2  ;;  %v1485_v26 = vmul.f32 %v2754_v31, %v3267_v57  ;;  %v1555_v3 = vmul.f32 %v2772_v39, %v3267_v57  ;;  %2153 = vmatprep.mubr.f32.mxu0 %v4884_v0  ;;  %v3328_v56 = vmul.f32 %v2772_v39, %v3272_v55 }
  0x75   : > { %v1532_v34 = vadd.f32 %v1500_v62, %v1464_v53  ;;  %v893_v46 = vadd.f32 %v789_v44, %v648_v6  ;;  %v1101_v48 = vsel %vm531_vm0, %v1099_v28, %v4839_v58  ;;  %v4835_v4 = vrot.slane %v3312_v20, 2 }
  0x76   : > { %v1655_v60 = vrot.slane %v1555_v3, 1  ;;  %v1799_v62 = vmul.f32 %v2778_v43, %v3267_v57  ;;  %v3339_v40 = vmul.f32 %v2778_v43, %v3272_v55  ;;  %v4834_v22 = vrot.slane %v3328_v56, 1 }
  0x77   : > { %v1776_v1 = vadd.f32 %v1694_v42, %v1532_v34  ;;  %v961_v35 = vadd.f32 %v929_v54, %v893_v46  ;;  %v3342_v37 = vadd.f32 %v288_v38, %v234_v61  ;;  %v1345_v5 = vsel %vm776_vm1, %v1343_v2, %v4835_v4 }
  0x78   : > { %v1899_v63 = vrot.slane %v1799_v62, 2  ;;  %v4831_v28 = vrot.slane %v3339_v40, 2  ;;  %v3348_v45 = vadd.f32 %v289_v41, %v235_v17  ;;  %v1657_v42 = vsel %vm531_vm0, %v1655_v60, %v4834_v22 }
  0x79   : > { %v2020_v53 = vadd.f32 %v1938_v23, %v1776_v1  ;;  %v1205_v6 = vadd.f32 %v1101_v48, %v961_v35  ;;  %v387_v54 = vmul.f32 %v2714_v11, %v2843_v30  ;;  %v465_v2 = vmul.f32 %v2717_v12, %v2843_v30 }
  0x7a   : > { %v1901_v44 = vsel %vm776_vm1, %v1899_v63, %v4831_v28  ;;  %v3362_v3 = vmul.f32 %v2717_v12, %v2845_v32  ;;  %v710_v23 = vmul.f32 %v2719_v13, %v2843_v30  ;;  %v3368_v38 = vmul.f32 %v2719_v13, %v2845_v32 }
  0x7b   : > { %2244 = vmatmul.mubr.f32.gmra.mrb[6].mxu1 %v2020_v53  ;;  %v1449_v61 = vadd.f32 %v1345_v5, %v1205_v6  ;;  %v945_v34 = vmul.f32 %v2722_v14, %v3101_v52  ;;  %v1023_v46 = vmul.f32 %v2725_v15, %v3101_v52  ;;  %v582_v48 = vrot.slane %v465_v2, 1 }
  0x7c   : > { %2249 = vmatprep.mubr.f32.mxu1 %v4884_v0  ;;  %v4830_v17 = vrot.slane %v3362_v3, 1  ;;  %v827_v41 = vrot.slane %v710_v23, 2  ;;  %v3378_v30 = vmul.f32 %v2725_v15, %v3107_v47  ;;  %v4833_v62 = vrot.slane %v3368_v38, 2 }
  0x7d   : > { %v1517_v60 = vadd.f32 %v1485_v26, %v1449_v61  ;;  %v1139_v1 = vrot.slane %v1023_v46, 1  ;;  %v1267_v35 = vmul.f32 %v2750_v27, %v3101_v52  ;;  %v3389_v53 = vmul.f32 %v2750_v27, %v3107_v47  ;;  %v212_v46 = vld [vmem:[%s2633_s21 + $0x70] sm:$0x3] }
  0x7e   : > { %v584_v5 = vsel %vm531_vm0, %v582_v48, %v4830_v17  ;;  %v4832_v63 = vrot.slane %v3378_v30, 1  ;;  %v1501_v6 = vmul.f32 %v2754_v31, %v3342_v37  ;;  %v829_v23 = vsel %vm776_vm1, %v827_v41, %v4833_v62  ;;  %v266_v48 = vld [vmem:[%s4805_s1 + $0x70] sm:$0x3] }
  0x7f   : > { %v1761_v26 = vadd.f32 %v1657_v42, %v1517_v60  ;;  %v664_v2 = vadd.f32 %v584_v5, %v387_v54  ;;  %v1383_v61 = vrot.slane %v1267_v35, 2  ;;  %v4838_v28 = vrot.slane %v3389_v53, 2 }
  0x80   : > { %v1141_v17 = vsel %vm531_vm0, %v1139_v1, %v4832_v63  ;;  %v1579_v42 = vmul.f32 %v2772_v39, %v3342_v37  ;;  %v3408_v54 = vmul.f32 %v2772_v39, %v3348_v45  ;;  %v1823_v35 = vmul.f32 %v2778_v43, %v3342_v37 }
  0x81   : > { %v2005_v41 = vadd.f32 %v1901_v44, %v1761_v26  ;;  %v909_v60 = vadd.f32 %v829_v23, %v664_v2  ;;  %v3414_v5 = vmul.f32 %v2778_v43, %v3348_v45  ;;  %v1385_v1 = vsel %vm776_vm1, %v1383_v61, %v4838_v28 }
  0x82   : > { %v1695_v63 = vrot.slane %v1579_v42, 1  ;;  %v4837_v62 = vrot.slane %v3408_v54, 1  ;;  %v3420_v22 = vadd.f32 %v266_v48, %v212_v46  ;;  %v1939_v26 = vrot.slane %v1823_v35, 2 }
  0x83   : > { %2154 = vmatmul.mubr.f32.gmra.mrb[8].mxu0 %v2005_v41  ;;  %v977_v44 = vadd.f32 %v945_v34, %v909_v60  ;;  %v4836_v2 = vrot.slane %v3414_v5, 2  ;;  %v372_v23 = vmul.f32 %v2714_v11, %v2708_v9  ;;  %v443_v61 = vmul.f32 %v2717_v12, %v2924_v51  ;;  %v236_v41 = vld [vmem:[%s2633_s21 + $0x130] sm:$0x3] }
  0x84   : > { %v1697_v4 = vsel %vm531_vm0, %v1695_v63, %v4837_v62  ;;  %2159 = vmatprep.mubr.f32.mxu0 %v4884_v0  ;;  %v688_v46 = vmul.f32 %v2719_v13, %v2924_v51  ;;  %v930_v34 = vmul.f32 %v2722_v14, %v3025_v49  ;;  %v1001_v42 = vmul.f32 %v2725_v15, %v3176_v36  ;;  %v290_v60 = vld [vmem:[%s4805_s1 + $0x130] sm:$0x3] }
  0x85   : > { %v1221_v48 = vadd.f32 %v1141_v17, %v977_v44  ;;  %v1941_v9 = vsel %vm776_vm1, %v1939_v26, %v4836_v2  ;;  %v1245_v63 = vmul.f32 %v2750_v27, %v3176_v36  ;;  %v545_v51 = vrot.slane %v443_v61, 1 }
  0x86   : > { %v790_v35 = vrot.slane %v688_v46, 2  ;;  %v1486_v17 = vmul.f32 %v2754_v31, %v3272_v55  ;;  %v1557_v44 = vmul.f32 %v2772_v39, %v3420_v22  ;;  %v1102_v2 = vrot.slane %v1001_v42, 1 }
  0x87   : > { %v1465_v26 = vadd.f32 %v1385_v1, %v1221_v48  ;;  %v1346_v62 = vrot.slane %v1245_v63, 2  ;;  %v1801_v28 = vmul.f32 %v2778_v43, %v3420_v22  ;;  %v546_v58 = vsel %vm531_vm0, %v543_v7, %v545_v51 }
  0x88   : > { %v791_v61 = vsel %vm776_vm1, %v788_v16, %v790_v35  ;;  %v1658_v46 = vrot.slane %v1557_v44, 1  ;;  %v3458_v29 = vadd.f32 %v290_v60, %v236_v41  ;;  %v649_v25 = vadd.f32 %v546_v58, %v372_v23  ;;  %v213_v41 = vld [vmem:[%s2633_s21 + $0x78] sm:$0xff] }
  0x89   : > { %v1533_v24 = vadd.f32 %v1501_v6, %v1465_v26  ;;  %v4900_v1 = vrot.slane %v3299_v8, 1  ;;  %v4901_v42 = vrot.slane %v3312_v20, 2  ;;  %v4902_v50 = vrot.slane %v3328_v56, 1 }
  0x8a   : > { %v1902_v21 = vrot.slane %v1801_v28, 2  ;;  %v388_v16 = vmul.f32 %v2714_v11, %v2845_v32  ;;  %v467_v58 = vmul.f32 %v2717_v12, %v2982_v33  ;;  %v894_v8 = vadd.f32 %v791_v61, %v649_v25 }
  0x8b   : > { %v1103_v48 = vsel %vm531_vm0, %v4900_v1, %v1102_v2  ;;  %v1347_v63 = vsel %vm776_vm1, %v4901_v42, %v1346_v62  ;;  %v1659_v7 = vsel %vm531_vm0, %v4902_v50, %v1658_v46  ;;  %v1777_v6 = vadd.f32 %v1697_v4, %v1533_v24 }
  0x8c   : > { %v712_v2 = vmul.f32 %v2719_v13, %v2982_v33  ;;  %v946_v20 = vmul.f32 %v2722_v14, %v3107_v47  ;;  %v4903_v56 = vrot.slane %v3339_v40, 2  ;;  %v585_v28 = vrot.slane %v467_v58, 1  ;;  %v267_v40 = vld [vmem:[%s4805_s1 + $0x78] sm:$0xff] }
  0x8d   : > { %v1025_v32 = vmul.f32 %v2725_v15, %v3220_v59  ;;  %v1269_v23 = vmul.f32 %v2750_v27, %v3220_v59  ;;  %v2021_v24 = vadd.f32 %v1941_v9, %v1777_v6  ;;  %v962_v25 = vadd.f32 %v930_v34, %v894_v8  ;;  %v214_v9 = vld [vmem:[%s2633_s21 + $0x80] sm:$0xff] }
  0x8e   : > { %v1903_v62 = vsel %vm776_vm1, %v4903_v56, %v1902_v21  ;;  %v830_v4 = vrot.slane %v712_v2, 2  ;;  %v1502_v33 = vmul.f32 %v2754_v31, %v3348_v45  ;;  %v4904_v60 = vrot.slane %v3362_v3, 1  ;;  %v268_v34 = vld [vmem:[%s4805_s1 + $0x80] sm:$0xff] }
  0x8f   : > { %v1142_v35 = vrot.slane %v1025_v32, 1  ;;  %v1386_v44 = vrot.slane %v1269_v23, 2  ;;  %v1581_v26 = vmul.f32 %v2772_v39, %v3458_v29  ;;  %2250 = vmatmul.mubr.f32.gmra.mrb[8].mxu1 %v2021_v24  ;;  %v1206_v61 = vadd.f32 %v1103_v48, %v962_v25 }
  0x90   : > { %v586_v51 = vsel %vm531_vm0, %v4904_v60, %v585_v28  ;;  %v4905_v1 = vrot.slane %v3368_v38, 2  ;;  %v1825_v3 = vmul.f32 %v2778_v43, %v3458_v29  ;;  %2255 = vmatprep.mubr.f32.mxu1 %v4884_v0  ;;  %v4906_v50 = vrot.slane %v3378_v30, 1 }
  0x91   : > { %v665_v46 = vadd.f32 %v586_v51, %v388_v16  ;;  %v4907_v58 = vrot.slane %v3389_v53, 2  ;;  %v1698_v8 = vrot.slane %v1581_v26, 1  ;;  %v3511_v48 = vadd.f32 %v267_v40, %v213_v41 }
  0x92   : > { %v831_v42 = vsel %vm776_vm1, %v4905_v1, %v830_v4  ;;  %v1143_v21 = vsel %vm531_vm0, %v4906_v50, %v1142_v35  ;;  %v1450_v16 = vadd.f32 %v1347_v63, %v1206_v61  ;;  %v1942_v2 = vrot.slane %v1825_v3, 2 }
  0x93   : > { %v1387_v6 = vsel %vm776_vm1, %v4907_v58, %v1386_v44  ;;  %v910_v38 = vadd.f32 %v831_v42, %v665_v46  ;;  %v3513_v56 = vadd.f32 %v268_v34, %v214_v9  ;;  %v4908_v28 = vrot.slane %v3408_v54, 1 }
  0x94   : > { %v373_v30 = vmul.f32 %v2714_v11, %v3017_v19  ;;  %v444_v53 = vmul.f32 %v2717_v12, %v3017_v19  ;;  %v3524_v23 = vmul.f32 %v2717_v12, %v3025_v49  ;;  %v1518_v24 = vadd.f32 %v1486_v17, %v1450_v16  ;;  %v291_v16 = vld [vmem:[%s4805_s1 + $0x138] sm:$0xff] }
  0x95   : > { %v1699_v32 = vsel %vm531_vm0, %v4908_v28, %v1698_v8  ;;  %v978_v63 = vadd.f32 %v946_v20, %v910_v38  ;;  %v4909_v25 = vrot.slane %v3414_v5, 2  ;;  %v689_v54 = vmul.f32 %v2719_v13, %v3017_v19  ;;  %v237_v8 = vld [vmem:[%s2633_s21 + $0x138] sm:$0xff] }
  0x96   : > { %v547_v41 = vrot.slane %v444_v53, 1  ;;  %v548_v40 = vrot.slane %v3524_v23, 1  ;;  %v3534_v60 = vmul.f32 %v2719_v13, %v3025_v49  ;;  %v931_v51 = vmul.f32 %v2722_v14, %v3267_v57  ;;  %v292_v53 = vld [vmem:[%s4805_s1 + $0x140] sm:$0xff] }
  0x97   : > { %v1943_v4 = vsel %vm776_vm1, %v4909_v25, %v1942_v2  ;;  %v1762_v35 = vadd.f32 %v1659_v7, %v1518_v24  ;;  %v1222_v17 = vadd.f32 %v1143_v21, %v978_v63  ;;  %v792_v20 = vrot.slane %v689_v54, 2 }
  0x98   : > { %v1002_v5 = vmul.f32 %v2725_v15, %v3267_v57  ;;  %v549_v19 = vsel %vm531_vm0, %v547_v41, %v548_v40  ;;  %v793_v44 = vrot.slane %v3534_v60, 2  ;;  %v3546_v26 = vmul.f32 %v2725_v15, %v3272_v55 }
  0x99   : > { %v1246_v9 = vmul.f32 %v2750_v27, %v3267_v57  ;;  %v2006_v7 = vadd.f32 %v1903_v62, %v1762_v35  ;;  %v1466_v34 = vadd.f32 %v1387_v6, %v1222_v17  ;;  %v650_v61 = vadd.f32 %v549_v19, %v373_v30  ;;  %v238_v30 = vld [vmem:[%s2633_s21 + $0x140] sm:$0xff] }
  0x9a   : > { %v1104_v46 = vrot.slane %v1002_v5, 1  ;;  %v794_v1 = vsel %vm776_vm1, %v792_v20, %v793_v44  ;;  %v1105_v42 = vrot.slane %v3546_v26, 1  ;;  %v3556_v3 = vmul.f32 %v2750_v27, %v3272_v55 }
  0x9b   : > { %v1348_v50 = vrot.slane %v1246_v9, 2  ;;  %2160 = vmatmul.mubr.f32.gmra.mrb[10].mxu0 %v2006_v7  ;;  %v1534_v21 = vadd.f32 %v1502_v33, %v1466_v34  ;;  %v895_v58 = vadd.f32 %v794_v1, %v650_v61  ;;  %v1487_v62 = vmul.f32 %v2754_v31, %v3511_v48 }
  0x9c   : > { %v1558_v6 = vmul.f32 %v2772_v39, %v3511_v48  ;;  %2165 = vmatprep.mubr.f32.mxu0 %v4884_v0  ;;  %v1106_v38 = vsel %vm531_vm0, %v1104_v46, %v1105_v42  ;;  %v1349_v33 = vrot.slane %v3556_v3, 2  ;;  %v3573_v2 = vmul.f32 %v2772_v39, %v3513_v56 }
  0x9d   : > { %v1802_v28 = vmul.f32 %v2778_v43, %v3511_v48  ;;  %v1778_v24 = vadd.f32 %v1699_v32, %v1534_v21  ;;  %v963_v63 = vadd.f32 %v931_v51, %v895_v58  ;;  %v3583_v54 = vmul.f32 %v2778_v43, %v3513_v56 }
  0x9e   : > { %v1660_v25 = vrot.slane %v1558_v6, 1  ;;  %v1350_v41 = vsel %vm776_vm1, %v1348_v50, %v1349_v33  ;;  %v1661_v35 = vrot.slane %v3573_v2, 1  ;;  %v3589_v20 = vadd.f32 %v291_v16, %v237_v8 }
  0x9f   : > { %v1904_v17 = vrot.slane %v1802_v28, 2  ;;  %v2022_v5 = vadd.f32 %v1943_v4, %v1778_v24  ;;  %v1207_v19 = vadd.f32 %v1106_v38, %v963_v63  ;;  %v4852_v9 = vrot.slane %v3583_v54, 2 }
  0xa0   : > { %v3592_v32 = vadd.f32 %v292_v53, %v238_v30  ;;  %v1662_v51 = vsel %vm531_vm0, %v1660_v25, %v1661_v35  ;;  %v389_v7 = vmul.f32 %v2714_v11, %v3101_v52  ;;  %v468_v34 = vmul.f32 %v2717_v12, %v3101_v52 }
  0xa1   : > { %v3603_v61 = vmul.f32 %v2717_v12, %v3107_v47  ;;  %2256 = vmatmul.mubr.f32.gmra.mrb[10].mxu1 %v2022_v5  ;;  %v1451_v4 = vadd.f32 %v1350_v41, %v1207_v19  ;;  %v1906_v46 = vsel %vm776_vm1, %v1904_v17, %v4852_v9  ;;  %v713_v1 = vmul.f32 %v2719_v13, %v3101_v52 }
  0xa2   : > { %v3612_v50 = vmul.f32 %v2719_v13, %v3107_v47  ;;  %2261 = vmatprep.mubr.f32.mxu1 %v4884_v0  ;;  %v587_v21 = vrot.slane %v468_v34, 1  ;;  %v947_v6 = vmul.f32 %v2722_v14, %v3342_v37  ;;  %v1026_v8 = vmul.f32 %v2725_v15, %v3342_v37 }
  0xa3   : > { %v4850_v58 = vrot.slane %v3603_v61, 1  ;;  %v1519_v16 = vadd.f32 %v1487_v62, %v1451_v4  ;;  %v832_v38 = vrot.slane %v713_v1, 2  ;;  %v3623_v28 = vmul.f32 %v2725_v15, %v3348_v45  ;;  %v215_v1 = vld [vmem:[%s2633_s21 + $0x88] sm:$0x3] }
  0xa4   : > { %v4849_v52 = vrot.slane %v3612_v50, 2  ;;  %v1144_v53 = vrot.slane %v1026_v8, 1  ;;  %v1270_v24 = vmul.f32 %v2750_v27, %v3342_v37  ;;  %v3632_v63 = vmul.f32 %v2750_v27, %v3348_v45 }
  0xa5   : > { %v589_v30 = vsel %vm531_vm0, %v587_v21, %v4850_v58  ;;  %v1763_v62 = vadd.f32 %v1662_v51, %v1519_v16  ;;  %v4846_v17 = vrot.slane %v3623_v28, 1  ;;  %v1503_v34 = vmul.f32 %v2754_v31, %v3589_v20  ;;  %v269_v51 = vld [vmem:[%s4805_s1 + $0x88] sm:$0x3] }
  0xa6   : > { %v666_v25 = vadd.f32 %v589_v30, %v389_v7  ;;  %v834_v41 = vsel %vm776_vm1, %v832_v38, %v4849_v52  ;;  %v1388_v5 = vrot.slane %v1270_v24, 2  ;;  %v4847_v19 = vrot.slane %v3632_v63, 2  ;;  %v239_v52 = vld [vmem:[%s2633_s21 + $0x148] sm:$0x3] }
  0xa7   : > { %v1582_v4 = vmul.f32 %v2772_v39, %v3589_v20  ;;  %v2007_v7 = vadd.f32 %v1906_v46, %v1763_v62  ;;  %v1146_v8 = vsel %vm531_vm0, %v1144_v53, %v4846_v17  ;;  %v3652_v16 = vmul.f32 %v2772_v39, %v3592_v32  ;;  %v293_v58 = vld [vmem:[%s4805_s1 + $0x148] sm:$0x3] }
  0xa8   : > { %v911_v21 = vadd.f32 %v834_v41, %v666_v25  ;;  %v1390_v38 = vsel %vm776_vm1, %v1388_v5, %v4847_v19  ;;  %v1826_v24 = vmul.f32 %v2778_v43, %v3589_v20  ;;  %v3661_v46 = vmul.f32 %v2778_v43, %v3592_v32 }
  0xa9   : > { %v1700_v30 = vrot.slane %v1582_v4, 1  ;;  %2166 = vmatmul.mubr.f32.gmra.mrb[12].mxu0 %v2007_v7  ;;  %v4848_v53 = vrot.slane %v3652_v16, 1  ;;  %v3664_v25 = vadd.f32 %v269_v51, %v215_v1  ;;  %v374_v41 = vmul.f32 %v2714_v11, %v3025_v49 }
  0xaa   : > { %v979_v62 = vadd.f32 %v947_v6, %v911_v21  ;;  %v1944_v17 = vrot.slane %v1826_v24, 2  ;;  %v4851_v5 = vrot.slane %v3661_v46, 2  ;;  %2171 = vmatprep.mubr.f32.mxu0 %v4884_v0  ;;  %v446_v4 = vmul.f32 %v2717_v12, %v3176_v36 }
  0xab   : > { %v691_v7 = vmul.f32 %v2719_v13, %v3176_v36  ;;  %v1702_v1 = vsel %vm531_vm0, %v1700_v30, %v4848_v53  ;;  %v932_v49 = vmul.f32 %v2722_v14, %v3272_v55  ;;  %v1004_v51 = vmul.f32 %v2725_v15, %v3420_v22 }
  0xac   : > { %v1223_v6 = vadd.f32 %v1146_v8, %v979_v62  ;;  %v1946_v21 = vsel %vm776_vm1, %v1944_v17, %v4851_v5  ;;  %v550_v24 = vrot.slane %v446_v4, 1  ;;  %v1248_v36 = vmul.f32 %v2750_v27, %v3420_v22 }
  0xad   : > { %v795_v19 = vrot.slane %v691_v7, 2  ;;  %v1107_v62 = vrot.slane %v1004_v51, 1  ;;  %v1488_v30 = vmul.f32 %v2754_v31, %v3513_v56  ;;  %v1560_v53 = vmul.f32 %v2772_v39, %v3664_v25 }
  0xae   : > { %v1467_v8 = vadd.f32 %v1390_v38, %v1223_v6  ;;  %v551_v17 = vsel %vm531_vm0, %v548_v40, %v550_v24  ;;  %v1351_v4 = vrot.slane %v1248_v36, 2  ;;  %v1804_v7 = vmul.f32 %v2778_v43, %v3664_v25  ;;  %v270_v36 = vld [vmem:[%s4805_s1 + $0x90] sm:$0xff] }
  0xaf   : > { %v796_v38 = vsel %vm776_vm1, %v793_v44, %v795_v19  ;;  %v651_v51 = vadd.f32 %v551_v17, %v374_v41  ;;  %v1108_v5 = vsel %vm531_vm0, %v1105_v42, %v1107_v62  ;;  %v1663_v9 = vrot.slane %v1560_v53, 1 }
  0xb0   : > { %v1535_v6 = vadd.f32 %v1503_v34, %v1467_v8  ;;  %v1352_v23 = vsel %vm776_vm1, %v1349_v33, %v1351_v4  ;;  %v1907_v40 = vrot.slane %v1804_v7, 2  ;;  %v3708_v24 = vadd.f32 %v293_v58, %v239_v52  ;;  %v271_v4 = vld [vmem:[%s4805_s1 + $0x98] sm:$0xff] }
  0xb1   : > { %v390_v60 = vmul.f32 %v2714_v11, %v3107_v47  ;;  %v896_v19 = vadd.f32 %v796_v38, %v651_v51  ;;  %v1664_v26 = vsel %vm531_vm0, %v1661_v35, %v1663_v9  ;;  %v470_v42 = vmul.f32 %v2717_v12, %v3220_v59  ;;  %v217_v38 = vld [vmem:[%s2633_s21 + $0x98] sm:$0xff] }
  0xb2   : > { %v1779_v44 = vadd.f32 %v1702_v1, %v1535_v6  ;;  %v4910_v3 = vrot.slane %v3583_v54, 2  ;;  %v715_v58 = vmul.f32 %v2719_v13, %v3220_v59  ;;  %v948_v47 = vmul.f32 %v2722_v14, %v3348_v45  ;;  %v216_v1 = vld [vmem:[%s2633_s21 + $0x90] sm:$0xff] }
  0xb3   : > { %v1028_v52 = vmul.f32 %v2725_v15, %v3458_v29  ;;  %v964_v34 = vadd.f32 %v932_v49, %v896_v19  ;;  %v590_v35 = vrot.slane %v470_v42, 1  ;;  %v1272_v9 = vmul.f32 %v2750_v27, %v3458_v29 }
  0xb4   : > { %v1908_v33 = vsel %vm776_vm1, %v4910_v3, %v1907_v40  ;;  %v2023_v2 = vadd.f32 %v1946_v21, %v1779_v44  ;;  %v835_v53 = vrot.slane %v715_v58, 2  ;;  %v1504_v41 = vmul.f32 %v2754_v31, %v3592_v32 }
  0xb5   : > { %v1147_v54 = vrot.slane %v1028_v52, 1  ;;  %v1584_v59 = vmul.f32 %v2772_v39, %v3708_v24  ;;  %v1208_v21 = vadd.f32 %v1108_v5, %v964_v34  ;;  %v4911_v49 = vrot.slane %v3603_v61, 1 }
  0xb6   : > { %2262 = vmatmul.mubr.f32.gmra.mrb[12].mxu1 %v2023_v2  ;;  %v1391_v62 = vrot.slane %v1272_v9, 2  ;;  %v1828_v17 = vmul.f32 %v2778_v43, %v3708_v24  ;;  %v4912_v6 = vrot.slane %v3612_v50, 2  ;;  %v4913_v61 = vrot.slane %v3623_v28, 1 }
  0xb7   : > { %v591_v8 = vsel %vm531_vm0, %v4911_v49, %v590_v35  ;;  %2267 = vmatprep.mubr.f32.mxu1 %v4884_v0  ;;  %v1703_v40 = vrot.slane %v1584_v59, 1  ;;  %v1452_v44 = vadd.f32 %v1352_v23, %v1208_v21  ;;  %v4914_v19 = vrot.slane %v3632_v63, 2 }
  0xb8   : > { %v667_v7 = vadd.f32 %v591_v8, %v390_v60  ;;  %v836_v5 = vsel %vm776_vm1, %v4912_v6, %v835_v53  ;;  %v1148_v51 = vsel %vm531_vm0, %v4913_v61, %v1147_v54  ;;  %v1947_v3 = vrot.slane %v1828_v17, 2 }
  0xb9   : > { %v1392_v42 = vsel %vm776_vm1, %v4914_v19, %v1391_v62  ;;  %v3755_v58 = vadd.f32 %v270_v36, %v216_v1  ;;  %v4915_v60 = vrot.slane %v3652_v16, 1  ;;  %v3760_v2 = vadd.f32 %v271_v4, %v217_v38 }
  0xba   : > { %v912_v52 = vadd.f32 %v836_v5, %v667_v7  ;;  %v375_v28 = vmul.f32 %v2714_v11, %v3267_v57  ;;  %v1520_v34 = vadd.f32 %v1488_v30, %v1452_v44  ;;  %v4916_v23 = vrot.slane %v3661_v46, 2  ;;  %v294_v44 = vld [vmem:[%s4805_s1 + $0x150] sm:$0xff] }
  0xbb   : > { %v1704_v50 = vsel %vm531_vm0, %v4915_v60, %v1703_v40  ;;  %v447_v35 = vmul.f32 %v2717_v12, %v3267_v57  ;;  %v3771_v9 = vmul.f32 %v2717_v12, %v3272_v55  ;;  %v692_v53 = vmul.f32 %v2719_v13, %v3267_v57  ;;  %v240_v40 = vld [vmem:[%s2633_s21 + $0x150] sm:$0xff]  ;;  %v241_v60 = vld [vmem:[%s2633_s21 + $0x158] sm:$0xff] }
  0xbc   : > { %v1948_v63 = vsel %vm776_vm1, %v4916_v23, %v1947_v3  ;;  %v980_v16 = vadd.f32 %v948_v47, %v912_v52  ;;  %v3777_v54 = vmul.f32 %v2719_v13, %v3272_v55  ;;  %v933_v46 = vmul.f32 %v2722_v14, %v3511_v48 }
  0xbd   : > { %v1764_v30 = vadd.f32 %v1664_v26, %v1520_v34  ;;  %v552_v59 = vrot.slane %v447_v35, 1  ;;  %v553_v1 = vrot.slane %v3771_v9, 1  ;;  %v1005_v36 = vmul.f32 %v2725_v15, %v3511_v48 }
  0xbe   : > { %v1224_v21 = vadd.f32 %v1148_v51, %v980_v16  ;;  %v797_v49 = vrot.slane %v692_v53, 2  ;;  %v798_v47 = vrot.slane %v3777_v54, 2  ;;  %v3787_v57 = vmul.f32 %v2725_v15, %v3513_v56 }
  0xbf   : > { %v2008_v8 = vadd.f32 %v1908_v33, %v1764_v30  ;;  %v554_v26 = vsel %vm531_vm0, %v552_v59, %v553_v1  ;;  %v1109_v62 = vrot.slane %v1005_v36, 1  ;;  %v1249_v17 = vmul.f32 %v2750_v27, %v3511_v48 }
  0xc0   : > { %v1468_v38 = vadd.f32 %v1392_v42, %v1224_v21  ;;  %v652_v4 = vadd.f32 %v554_v26, %v375_v28  ;;  %v799_v7 = vsel %vm776_vm1, %v797_v49, %v798_v47  ;;  %v4862_v6 = vrot.slane %v3787_v57, 1  ;;  %v295_v28 = vld [vmem:[%s4805_s1 + $0x158] sm:$0xff] }
  0xc1   : > { %2172 = vmatmul.mubr.f32.gmra.mrb[14].mxu0 %v2008_v8  ;;  %v3800_v33 = vmul.f32 %v2750_v27, %v3513_v56  ;;  %v1353_v5 = vrot.slane %v1249_v17, 2  ;;  %v1489_v61 = vmul.f32 %v2754_v31, %v3755_v58  ;;  %v1561_v51 = vmul.f32 %v2772_v39, %v3755_v58 }
  0xc2   : > { %v1536_v19 = vadd.f32 %v1504_v41, %v1468_v38  ;;  %2177 = vmatprep.mubr.f32.mxu0 %v4884_v0  ;;  %v897_v42 = vadd.f32 %v799_v7, %v652_v4  ;;  %v1111_v3 = vsel %vm531_vm0, %v1109_v62, %v4862_v6  ;;  %v3816_v52 = vmul.f32 %v2772_v39, %v3760_v2 }
  0xc3   : > { %v4861_v34 = vrot.slane %v3800_v33, 2  ;;  %v1665_v23 = vrot.slane %v1561_v51, 1  ;;  %v1805_v41 = vmul.f32 %v2778_v43, %v3755_v58  ;;  %v3827_v35 = vmul.f32 %v2778_v43, %v3760_v2 }
  0xc4   : > { %v1780_v16 = vadd.f32 %v1704_v50, %v1536_v19  ;;  %v965_v53 = vadd.f32 %v933_v46, %v897_v42  ;;  %v4860_v30 = vrot.slane %v3816_v52, 1  ;;  %v3830_v59 = vadd.f32 %v294_v44, %v240_v40 }
  0xc5   : > { %v1355_v36 = vsel %vm776_vm1, %v1353_v5, %v4861_v34  ;;  %v1909_v21 = vrot.slane %v1805_v41, 2  ;;  %v4859_v49 = vrot.slane %v3827_v35, 2  ;;  %v3836_v8 = vadd.f32 %v295_v28, %v241_v60 }
  0xc6   : > { %v2024_v26 = vadd.f32 %v1948_v63, %v1780_v16  ;;  %v1209_v62 = vadd.f32 %v1111_v3, %v965_v53  ;;  %v1667_v50 = vsel %vm531_vm0, %v1665_v23, %v4860_v30  ;;  %v391_v46 = vmul.f32 %v2714_v11, %v3342_v37 }
  0xc7   : > { %v1911_v17 = vsel %vm776_vm1, %v1909_v21, %v4859_v49  ;;  %v471_v38 = vmul.f32 %v2717_v12, %v3342_v37  ;;  %v3850_v4 = vmul.f32 %v2717_v12, %v3348_v45  ;;  %v716_v63 = vmul.f32 %v2719_v13, %v3342_v37 }
  0xc8   : > { %2268 = vmatmul.mubr.f32.gmra.mrb[14].mxu1 %v2024_v26  ;;  %v1453_v7 = vadd.f32 %v1355_v36, %v1209_v62  ;;  %v3856_v5 = vmul.f32 %v2719_v13, %v3348_v45  ;;  %v949_v51 = vmul.f32 %v2722_v14, %v3589_v20  ;;  %v1029_v40 = vmul.f32 %v2725_v15, %v3589_v20 }
  0xc9   : > { %2273 = vmatprep.mubr.f32.mxu1 %v4884_v0  ;;  %v592_v44 = vrot.slane %v471_v38, 1  ;;  %v4855_v19 = vrot.slane %v3850_v4, 1  ;;  %v837_v42 = vrot.slane %v716_v63, 2  ;;  %v3866_v37 = vmul.f32 %v2725_v15, %v3592_v32  ;;  %v218_v38 = vld [vmem:[%s2633_s21 + $0xa0] sm:$0x3] }
  0xca   : > { %v1521_v3 = vadd.f32 %v1489_v61, %v1453_v7  ;;  %v4854_v60 = vrot.slane %v3856_v5, 2  ;;  %v1149_v28 = vrot.slane %v1029_v40, 1  ;;  %v1273_v23 = vmul.f32 %v2750_v27, %v3589_v20  ;;  %v272_v63 = vld [vmem:[%s4805_s1 + $0xa0] sm:$0x3] }
  0xcb   : > { %v594_v41 = vsel %vm531_vm0, %v592_v44, %v4855_v19  ;;  %v4853_v16 = vrot.slane %v3866_v37, 1  ;;  %v3877_v53 = vmul.f32 %v2750_v27, %v3592_v32  ;;  %v1505_v36 = vmul.f32 %v2754_v31, %v3830_v59 }
  0xcc   : > { %v1765_v61 = vadd.f32 %v1667_v50, %v1521_v3  ;;  %v668_v21 = vadd.f32 %v594_v41, %v391_v46  ;;  %v839_v26 = vsel %vm776_vm1, %v837_v42, %v4854_v60  ;;  %v1393_v62 = vrot.slane %v1273_v23, 2 }
  0xcd   : > { %v1151_v7 = vsel %vm531_vm0, %v1149_v28, %v4853_v16  ;;  %v4858_v40 = vrot.slane %v3877_v53, 2  ;;  %v1585_v50 = vmul.f32 %v2772_v39, %v3830_v59  ;;  %v3896_v46 = vmul.f32 %v2772_v39, %v3836_v8 }
  0xce   : > { %v2009_v44 = vadd.f32 %v1911_v17, %v1765_v61  ;;  %v913_v42 = vadd.f32 %v839_v26, %v668_v21  ;;  %v1829_v3 = vmul.f32 %v2778_v43, %v3830_v59  ;;  %v3902_v23 = vmul.f32 %v2778_v43, %v3836_v8 }
  0xcf   : > { %v1395_v28 = vsel %vm776_vm1, %v1393_v62, %v4858_v40  ;;  %v1705_v41 = vrot.slane %v1585_v50, 1  ;;  %v4857_v16 = vrot.slane %v3896_v46, 1  ;;  %v3908_v60 = vadd.f32 %v272_v63, %v218_v38 }
  0xd0   : > { %2178 = vmatmul.mubr.f32.gmra.mrb[16].mxu0 %v2009_v44  ;;  %v981_v17 = vadd.f32 %v949_v51, %v913_v42  ;;  %v1949_v61 = vrot.slane %v1829_v3, 2  ;;  %v4856_v21 = vrot.slane %v3902_v23, 2  ;;  %v376_v26 = vmul.f32 %v2714_v11, %v3272_v55  ;;  %v242_v42 = vld [vmem:[%s2633_s21 + $0x160] sm:$0x3] }
  0xd1   : > { %v1707_v19 = vsel %vm531_vm0, %v1705_v41, %v4857_v16  ;;  %2183 = vmatprep.mubr.f32.mxu0 %v4884_v0  ;;  %v449_v62 = vmul.f32 %v2717_v12, %v3420_v22  ;;  %v694_v38 = vmul.f32 %v2719_v13, %v3420_v22  ;;  %v934_v51 = vmul.f32 %v2722_v14, %v3513_v56  ;;  %v296_v3 = vld [vmem:[%s4805_s1 + $0x160] sm:$0x3] }
  0xd2   : > { %v1225_v63 = vadd.f32 %v1151_v7, %v981_v17  ;;  %v1951_v55 = vsel %vm776_vm1, %v1949_v61, %v4856_v21  ;;  %v1007_v50 = vmul.f32 %v2725_v15, %v3664_v25  ;;  %v1251_v44 = vmul.f32 %v2750_v27, %v3664_v25 }
  0xd3   : > { %v555_v22 = vrot.slane %v449_v62, 1  ;;  %v800_v41 = vrot.slane %v694_v38, 2  ;;  %v1490_v7 = vmul.f32 %v2754_v31, %v3760_v2  ;;  %v1563_v17 = vmul.f32 %v2772_v39, %v3908_v60 }
  0xd4   : > { %v1469_v61 = vadd.f32 %v1395_v28, %v1225_v63  ;;  %v1112_v21 = vrot.slane %v1007_v50, 1  ;;  %v1356_v16 = vrot.slane %v1251_v44, 2  ;;  %v1807_v40 = vmul.f32 %v2778_v43, %v3908_v60 }
  0xd5   : > { %v556_v49 = vsel %vm531_vm0, %v553_v1, %v555_v22  ;;  %v801_v62 = vsel %vm776_vm1, %v798_v47, %v800_v41  ;;  %v1668_v38 = vrot.slane %v1563_v17, 1  ;;  %v3946_v30 = vadd.f32 %v296_v3, %v242_v42  ;;  %v219_v42 = vld [vmem:[%s2633_s21 + $0xa8] sm:$0xff] }
  0xd6   : > { %v1537_v34 = vadd.f32 %v1505_v36, %v1469_v61  ;;  %v653_v6 = vadd.f32 %v556_v49, %v376_v26  ;;  %v4917_v28 = vrot.slane %v3787_v57, 1  ;;  %v4918_v50 = vrot.slane %v3800_v33, 2 }
  0xd7   : > { %v4919_v9 = vrot.slane %v3816_v52, 1  ;;  %v1912_v54 = vrot.slane %v1807_v40, 2  ;;  %v392_v47 = vmul.f32 %v2714_v11, %v3348_v45  ;;  %v473_v49 = vmul.f32 %v2717_v12, %v3458_v29 }
  0xd8   : > { %v1113_v63 = vsel %vm531_vm0, %v4917_v28, %v1112_v21  ;;  %v1357_v44 = vsel %vm776_vm1, %v4918_v50, %v1356_v16  ;;  %v1781_v36 = vadd.f32 %v1707_v19, %v1537_v34  ;;  %v898_v57 = vadd.f32 %v801_v62, %v653_v6 }
  0xd9   : > { %v1669_v1 = vsel %vm531_vm0, %v4919_v9, %v1668_v38  ;;  %v718_v21 = vmul.f32 %v2719_v13, %v3458_v29  ;;  %v950_v33 = vmul.f32 %v2722_v14, %v3592_v32  ;;  %v4920_v52 = vrot.slane %v3827_v35, 2  ;;  %v273_v35 = vld [vmem:[%s4805_s1 + $0xa8] sm:$0xff] }
  0xda   : > { %v595_v40 = vrot.slane %v473_v49, 1  ;;  %v1031_v45 = vmul.f32 %v2725_v15, %v3708_v24  ;;  %v1275_v26 = vmul.f32 %v2750_v27, %v3708_v24  ;;  %v2025_v34 = vadd.f32 %v1951_v55, %v1781_v36  ;;  %v220_v55 = vld [vmem:[%s2633_s21 + $0xb0] sm:$0xff] }
  0xdb   : > { %v1913_v16 = vsel %vm776_vm1, %v4920_v52, %v1912_v54  ;;  %v966_v6 = vadd.f32 %v934_v51, %v898_v57  ;;  %v840_v19 = vrot.slane %v718_v21, 2  ;;  %v1506_v29 = vmul.f32 %v2754_v31, %v3836_v8  ;;  %v274_v51 = vld [vmem:[%s4805_s1 + $0xb0] sm:$0xff] }
  0xdc   : > { %v4921_v3 = vrot.slane %v3850_v4, 1  ;;  %v1152_v41 = vrot.slane %v1031_v45, 1  ;;  %v1396_v17 = vrot.slane %v1275_v26, 2  ;;  %v1587_v61 = vmul.f32 %v2772_v39, %v3946_v30  ;;  %2274 = vmatmul.mubr.f32.gmra.mrb[16].mxu1 %v2025_v34 }
  0xdd   : > { %v1210_v62 = vadd.f32 %v1113_v63, %v966_v6  ;;  %v4922_v28 = vrot.slane %v3856_v5, 2  ;;  %v1831_v4 = vmul.f32 %v2778_v43, %v3946_v30  ;;  %2279 = vmatprep.mubr.f32.mxu1 %v4884_v0  ;;  %v4923_v9 = vrot.slane %v3866_v37, 1 }
  0xde   : > { %v596_v22 = vsel %vm531_vm0, %v4921_v3, %v595_v40  ;;  %v4924_v49 = vrot.slane %v3877_v53, 2  ;;  %v1708_v57 = vrot.slane %v1587_v61, 1  ;;  %v3999_v63 = vadd.f32 %v273_v35, %v219_v42 }
  0xdf   : > { %v669_v38 = vadd.f32 %v596_v22, %v392_v47  ;;  %v841_v50 = vsel %vm776_vm1, %v4922_v28, %v840_v19  ;;  %v1153_v54 = vsel %vm531_vm0, %v4923_v9, %v1152_v41  ;;  %v1454_v47 = vadd.f32 %v1357_v44, %v1210_v62 }
  0xe0   : > { %v1397_v36 = vsel %vm776_vm1, %v4924_v49, %v1396_v17  ;;  %v1952_v21 = vrot.slane %v1831_v4, 2  ;;  %v4001_v52 = vadd.f32 %v274_v51, %v220_v55  ;;  %v4925_v40 = vrot.slane %v3896_v46, 1 }
  0xe1   : > { %v914_v5 = vadd.f32 %v841_v50, %v669_v38  ;;  %v377_v37 = vmul.f32 %v2714_v11, %v3511_v48  ;;  %v450_v53 = vmul.f32 %v2717_v12, %v3511_v48  ;;  %v4012_v26 = vmul.f32 %v2717_v12, %v3513_v56 }
  0xe2   : > { %v1709_v45 = vsel %vm531_vm0, %v4925_v40, %v1708_v57  ;;  %v1522_v34 = vadd.f32 %v1490_v7, %v1454_v47  ;;  %v4926_v6 = vrot.slane %v3902_v23, 2  ;;  %v695_v46 = vmul.f32 %v2719_v13, %v3511_v48  ;;  %v243_v57 = vld [vmem:[%s2633_s21 + $0x168] sm:$0xff] }
  0xe3   : > { %v982_v44 = vadd.f32 %v950_v33, %v914_v5  ;;  %v557_v42 = vrot.slane %v450_v53, 1  ;;  %v558_v35 = vrot.slane %v4012_v26, 1  ;;  %v4022_v3 = vmul.f32 %v2719_v13, %v3513_v56  ;;  %v297_v47 = vld [vmem:[%s4805_s1 + $0x168] sm:$0xff]  ;;  %v298_v53 = vld [vmem:[%s4805_s1 + $0x170] sm:$0xff] }
  0xe4   : > { %v1953_v19 = vsel %vm776_vm1, %v4926_v6, %v1952_v21  ;;  %v935_v22 = vmul.f32 %v2722_v14, %v3755_v58  ;;  %v1766_v41 = vadd.f32 %v1669_v1, %v1522_v34  ;;  %v802_v33 = vrot.slane %v695_v46, 2 }
  0xe5   : > { %v1226_v7 = vadd.f32 %v1153_v54, %v982_v44  ;;  %v1008_v23 = vmul.f32 %v2725_v15, %v3755_v58  ;;  %v559_v48 = vsel %vm531_vm0, %v557_v42, %v558_v35  ;;  %v803_v17 = vrot.slane %v4022_v3, 2 }
  0xe6   : > { %v4034_v61 = vmul.f32 %v2725_v15, %v3760_v2  ;;  %v1252_v55 = vmul.f32 %v2750_v27, %v3755_v58  ;;  %v2010_v1 = vadd.f32 %v1913_v16, %v1766_v41  ;;  %v654_v62 = vadd.f32 %v559_v48, %v377_v37  ;;  %v244_v37 = vld [vmem:[%s2633_s21 + $0x170] sm:$0xff] }
  0xe7   : > { %v1470_v51 = vadd.f32 %v1397_v36, %v1226_v7  ;;  %v1114_v38 = vrot.slane %v1008_v23, 1  ;;  %v804_v28 = vsel %vm776_vm1, %v802_v33, %v803_v17  ;;  %v4044_v4 = vmul.f32 %v2750_v27, %v3760_v2 }
  0xe8   : > { %v1115_v50 = vrot.slane %v4034_v61, 1  ;;  %v1358_v9 = vrot.slane %v1252_v55, 2  ;;  %2184 = vmatmul.mubr.f32.gmra.mrb[18].mxu0 %v2010_v1  ;;  %v899_v49 = vadd.f32 %v804_v28, %v654_v62  ;;  %v1491_v16 = vmul.f32 %v2754_v31, %v3999_v63 }
  0xe9   : > { %v1538_v54 = vadd.f32 %v1506_v29, %v1470_v51  ;;  %v1564_v36 = vmul.f32 %v2772_v39, %v3999_v63  ;;  %2189 = vmatprep.mubr.f32.mxu0 %v4884_v0  ;;  %v1359_v29 = vrot.slane %v4044_v4, 2  ;;  %v4061_v21 = vmul.f32 %v2772_v39, %v4001_v52 }
  0xea   : > { %v1116_v5 = vsel %vm531_vm0, %v1114_v38, %v1115_v50  ;;  %v1808_v40 = vmul.f32 %v2778_v43, %v3999_v63  ;;  %v967_v44 = vadd.f32 %v935_v22, %v899_v49  ;;  %v4071_v46 = vmul.f32 %v2778_v43, %v4001_v52 }
  0xeb   : > { %v1782_v34 = vadd.f32 %v1709_v45, %v1538_v54  ;;  %v1670_v6 = vrot.slane %v1564_v36, 1  ;;  %v1360_v42 = vsel %vm776_vm1, %v1358_v9, %v1359_v29  ;;  %v1671_v41 = vrot.slane %v4061_v21, 1 }
  0xec   : > { %v1914_v7 = vrot.slane %v1808_v40, 2  ;;  %v4077_v33 = vadd.f32 %v297_v47, %v243_v57  ;;  %v1211_v48 = vadd.f32 %v1116_v5, %v967_v44  ;;  %v4869_v55 = vrot.slane %v4071_v46, 2 }
  0xed   : > { %v2026_v23 = vadd.f32 %v1953_v19, %v1782_v34  ;;  %v4080_v45 = vadd.f32 %v298_v53, %v244_v37  ;;  %v1672_v22 = vsel %vm531_vm0, %v1670_v6, %v1671_v41  ;;  %v393_v1 = vmul.f32 %v2714_v11, %v3589_v20 }
  0xee   : > { %v474_v51 = vmul.f32 %v2717_v12, %v3589_v20  ;;  %v4091_v62 = vmul.f32 %v2717_v12, %v3592_v32  ;;  %v1455_v19 = vadd.f32 %v1360_v42, %v1211_v48  ;;  %v1916_v38 = vsel %vm776_vm1, %v1914_v7, %v4869_v55 }
  0xef   : > { %2280 = vmatmul.mubr.f32.gmra.mrb[18].mxu1 %v2026_v23  ;;  %v719_v28 = vmul.f32 %v2719_v13, %v3589_v20  ;;  %v4100_v9 = vmul.f32 %v2719_v13, %v3592_v32  ;;  %v951_v36 = vmul.f32 %v2722_v14, %v3830_v59  ;;  %v1032_v57 = vmul.f32 %v2725_v15, %v3830_v59 }
  0xf0   : > { %2285 = vmatprep.mubr.f32.mxu1 %v4884_v0  ;;  %v597_v54 = vrot.slane %v474_v51, 1  ;;  %v4867_v49 = vrot.slane %v4091_v62, 1  ;;  %v1523_v47 = vadd.f32 %v1491_v16, %v1455_v19  ;;  %v4111_v40 = vmul.f32 %v2725_v15, %v3836_v8 }
  0xf1   : > { %v842_v5 = vrot.slane %v719_v28, 2  ;;  %v4866_v20 = vrot.slane %v4100_v9, 2  ;;  %v1154_v53 = vrot.slane %v1032_v57, 1  ;;  %v1276_v34 = vmul.f32 %v2750_v27, %v3830_v59  ;;  %v221_v28 = vld [vmem:[%s2633_s21 + $0xb8] sm:$0x3] }
  0xf2   : > { %v599_v37 = vsel %vm531_vm0, %v597_v54, %v4867_v49  ;;  %v4120_v44 = vmul.f32 %v2750_v27, %v3836_v8  ;;  %v1767_v16 = vadd.f32 %v1672_v22, %v1523_v47  ;;  %v4863_v7 = vrot.slane %v4111_v40, 1  ;;  %v275_v22 = vld [vmem:[%s4805_s1 + $0xb8] sm:$0x3] }
  0xf3   : > { %v670_v6 = vadd.f32 %v599_v37, %v393_v1  ;;  %v844_v42 = vsel %vm776_vm1, %v842_v5, %v4866_v20  ;;  %v1398_v23 = vrot.slane %v1276_v34, 2  ;;  %v1507_v51 = vmul.f32 %v2754_v31, %v4077_v33  ;;  %v245_v20 = vld [vmem:[%s2633_s21 + $0x178] sm:$0x3] }
  0xf4   : > { %v4864_v48 = vrot.slane %v4120_v44, 2  ;;  %v1588_v19 = vmul.f32 %v2772_v39, %v4077_v33  ;;  %v2011_v1 = vadd.f32 %v1916_v38, %v1767_v16  ;;  %v1156_v57 = vsel %vm531_vm0, %v1154_v53, %v4863_v7  ;;  %v299_v49 = vld [vmem:[%s4805_s1 + $0x178] sm:$0x3] }
  0xf5   : > { %v915_v54 = vadd.f32 %v844_v42, %v670_v6  ;;  %v4140_v47 = vmul.f32 %v2772_v39, %v4080_v45  ;;  %v1832_v34 = vmul.f32 %v2778_v43, %v4077_v33  ;;  %v4149_v38 = vmul.f32 %v2778_v43, %v4080_v45 }
  0xf6   : > { %v1400_v5 = vsel %vm776_vm1, %v1398_v23, %v4864_v48  ;;  %v1710_v37 = vrot.slane %v1588_v19, 1  ;;  %2190 = vmatmul.mubr.f32.gmra.mrb[20].mxu0 %v2011_v1  ;;  %v4152_v6 = vadd.f32 %v275_v22, %v221_v28  ;;  %v378_v42 = vmul.f32 %v2714_v11, %v3513_v56 }
  0xf7   : > { %v983_v16 = vadd.f32 %v951_v36, %v915_v54  ;;  %v4865_v53 = vrot.slane %v4140_v47, 1  ;;  %v1954_v7 = vrot.slane %v1832_v34, 2  ;;  %v4868_v23 = vrot.slane %v4149_v38, 2  ;;  %2195 = vmatprep.mubr.f32.mxu0 %v4884_v0 }
  0xf8   : > { %v452_v19 = vmul.f32 %v2717_v12, %v3664_v25  ;;  %v697_v1 = vmul.f32 %v2719_v13, %v3664_v25  ;;  %v936_v56 = vmul.f32 %v2722_v14, %v3760_v2  ;;  %v1010_v22 = vmul.f32 %v2725_v15, %v3908_v60 }
  0xf9   : > { %v1227_v36 = vadd.f32 %v1156_v57, %v983_v16  ;;  %v1712_v28 = vsel %vm531_vm0, %v1710_v37, %v4865_v53  ;;  %v1956_v54 = vsel %vm776_vm1, %v1954_v7, %v4868_v23  ;;  %v1254_v25 = vmul.f32 %v2750_v27, %v3908_v60 }
  0xfa   : > { %v560_v34 = vrot.slane %v452_v19, 1  ;;  %v805_v48 = vrot.slane %v697_v1, 2  ;;  %v1117_v16 = vrot.slane %v1010_v22, 1  ;;  %v1492_v37 = vmul.f32 %v2754_v31, %v4001_v52 }
  0xfb   : > { %v1471_v57 = vadd.f32 %v1400_v5, %v1227_v36  ;;  %v1566_v53 = vmul.f32 %v2772_v39, %v4152_v6  ;;  %v1361_v19 = vrot.slane %v1254_v25, 2  ;;  %v1810_v1 = vmul.f32 %v2778_v43, %v4152_v6 }
  0xfc   : > { %v561_v7 = vsel %vm531_vm0, %v558_v35, %v560_v34  ;;  %v806_v5 = vsel %vm776_vm1, %v803_v17, %v805_v48  ;;  %v1118_v23 = vsel %vm531_vm0, %v1115_v50, %v1117_v16  ;;  %v4196_v34 = vadd.f32 %v299_v49, %v245_v20 }
  0xfd   : > { %v1539_v36 = vadd.f32 %v1507_v51, %v1471_v57  ;;  %v655_v22 = vadd.f32 %v561_v7, %v378_v42  ;;  %v1673_v55 = vrot.slane %v1566_v53, 1  ;;  %v1362_v26 = vsel %vm776_vm1, %v1359_v29, %v1361_v19 }
  0xfe   : > { %v1917_v35 = vrot.slane %v1810_v1, 2  ;;  %v394_v3 = vmul.f32 %v2714_v11, %v3592_v32  ;;  %v476_v61 = vmul.f32 %v2717_v12, %v3708_v24  ;;  %v4927_v50 = vrot.slane %v4071_v46, 2 }
  0xff   : > { %v1783_v17 = vadd.f32 %v1712_v28, %v1539_v36  ;;  %v900_v48 = vadd.f32 %v806_v5, %v655_v22  ;;  %v1674_v51 = vsel %vm531_vm0, %v1671_v41, %v1673_v55  ;;  %v721_v29 = vmul.f32 %v2719_v13, %v3708_v24 }
 0x100   : > { %v1918_v4 = vsel %vm776_vm1, %v4927_v50, %v1917_v35  ;;  %v952_v49 = vmul.f32 %v2722_v14, %v3836_v8  ;;  %v1034_v32 = vmul.f32 %v2725_v15, %v3946_v30  ;;  %v600_v53 = vrot.slane %v476_v61, 1 }
 0x101   : > { %v2027_v20 = vadd.f32 %v1956_v54, %v1783_v17  ;;  %v968_v21 = vadd.f32 %v936_v56, %v900_v48  ;;  %v1278_v41 = vmul.f32 %v2750_v27, %v3946_v30  ;;  %v845_v55 = vrot.slane %v721_v29, 2 }
 0x102   : > { %v1157_v42 = vrot.slane %v1034_v32, 1  ;;  %v1508_v46 = vmul.f32 %v2754_v31, %v4080_v45  ;;  %v1590_v24 = vmul.f32 %v2772_v39, %v4196_v34  ;;  %v4928_v25 = vrot.slane %v4091_v62, 1 }
 0x103   : > { %2286 = vmatmul.mubr.f32.gmra.mrb[20].mxu1 %v2027_v20  ;;  %v1212_v28 = vadd.f32 %v1118_v23, %v968_v21  ;;  %v1401_v54 = vrot.slane %v1278_v41, 2  ;;  %v1834_v56 = vmul.f32 %v2778_v43, %v4196_v34  ;;  %v4929_v7 = vrot.slane %v4100_v9, 2 }
 0x104   : > { %v601_v57 = vsel %vm531_vm0, %v4928_v25, %v600_v53  ;;  %2291 = vmatprep.mubr.f32.mxu1 %v4884_v0  ;;  %v4930_v19 = vrot.slane %v4111_v40, 1  ;;  %v1713_v23 = vrot.slane %v1590_v24, 1  ;;  %v4931_v62 = vrot.slane %v4120_v44, 2 }
 0x105   : > { %v671_v16 = vadd.f32 %v601_v57, %v394_v3  ;;  %v846_v5 = vsel %vm776_vm1, %v4929_v7, %v845_v55  ;;  %v1456_v36 = vadd.f32 %v1362_v26, %v1212_v28  ;;  %v1957_v35 = vrot.slane %v1834_v56, 2 }
 0x106   : > { %v1158_v1 = vsel %vm531_vm0, %v4930_v19, %v1157_v42  ;;  %v1402_v22 = vsel %vm776_vm1, %v4931_v62, %v1401_v54  ;;  %v379_v17 = vmul.f32 %v2714_v11, %v3755_v58  ;;  %v4932_v3 = vrot.slane %v4140_v47, 1 }
 0x107   : > { %v916_v48 = vadd.f32 %v846_v5, %v671_v16  ;;  %v453_v40 = vmul.f32 %v2717_v12, %v3755_v58  ;;  %v4244_v61 = vmul.f32 %v2717_v12, %v3760_v2  ;;  %v1524_v26 = vadd.f32 %v1492_v37, %v1456_v36  ;;  %v300_v36 = vld [vmem:[%s4805_s1 + $0x180] sm:$0xff] }
 0x108   : > { %v1714_v9 = vsel %vm531_vm0, %v4932_v3, %v1713_v23  ;;  %v4933_v44 = vrot.slane %v4149_v38, 2  ;;  %v698_v29 = vmul.f32 %v2719_v13, %v3755_v58  ;;  %v4253_v47 = vmul.f32 %v2719_v13, %v3760_v2  ;;  %v246_v23 = vld [vmem:[%s2633_s21 + $0x180] sm:$0xff]  ;;  %v301_v3 = vld [vmem:[%s4805_s1 + $0x188] sm:$0xff] }
 0x109   : > { %v984_v32 = vadd.f32 %v952_v49, %v916_v48  ;;  %v562_v20 = vrot.slane %v453_v40, 1  ;;  %v563_v21 = vrot.slane %v4244_v61, 1  ;;  %v937_v53 = vmul.f32 %v2722_v14, %v3999_v63  ;;  %v247_v48 = vld [vmem:[%s2633_s21 + $0x188] sm:$0xff] }
 0x10a   : > { %v1958_v50 = vsel %vm776_vm1, %v4933_v44, %v1957_v35  ;;  %v1768_v41 = vadd.f32 %v1674_v51, %v1524_v26  ;;  %v807_v37 = vrot.slane %v698_v29, 2  ;;  %v808_v38 = vrot.slane %v4253_v47, 2 }
 0x10b   : > { %v1011_v55 = vmul.f32 %v2725_v15, %v3999_v63  ;;  %v1228_v58 = vadd.f32 %v1158_v1, %v984_v32  ;;  %v564_v42 = vsel %vm531_vm0, %v562_v20, %v563_v21  ;;  %v4266_v49 = vmul.f32 %v2725_v15, %v4001_v52 }
 0x10c   : > { %v1255_v51 = vmul.f32 %v2750_v27, %v3999_v63  ;;  %v2012_v24 = vadd.f32 %v1918_v4, %v1768_v41  ;;  %v656_v28 = vadd.f32 %v564_v42, %v379_v17  ;;  %v809_v25 = vsel %vm776_vm1, %v807_v37, %v808_v38 }
 0x10d   : > { %v1119_v57 = vrot.slane %v1011_v55, 1  ;;  %v1472_v54 = vadd.f32 %v1402_v22, %v1228_v58  ;;  %v1120_v56 = vrot.slane %v4266_v49, 1  ;;  %v4276_v16 = vmul.f32 %v2750_v27, %v4001_v52 }
 0x10e   : > { %v1363_v7 = vrot.slane %v1255_v51, 2  ;;  %2196 = vmatmul.mubr.f32.gmra.mrb[22].mxu0 %v2012_v24  ;;  %v901_v5 = vadd.f32 %v809_v25, %v656_v28  ;;  %v1493_v4 = vmul.f32 %v2754_v31, %v2824_v10  ;;  %v1567_v19 = vmul.f32 %v2772_v39, %v2824_v10  ;;  %v2131_v28 = vpop.f32.mrb[0].mxu0 }
 0x10f   : > { %v4285_v1 = vmul.f32 %v2772_v39, %v2827_v18  ;;  %v1540_v62 = vadd.f32 %v1508_v46, %v1472_v54  ;;  %2201 = vmatprep.mubr.f32.mxu0 %v4884_v0  ;;  %v1121_v22 = vsel %vm531_vm0, %v1119_v57, %v1120_v56  ;;  %v1364_v35 = vrot.slane %v4276_v16, 2  ;;  %2322 = vst [vmem:[%s4310_s30] sm:$0xff] %v2131_v28 }
 0x110   : > { %v1811_v17 = vmul.f32 %v2778_v43, %v2824_v10  ;;  %v969_v40 = vadd.f32 %v937_v53, %v901_v5  ;;  %v1675_v26 = vrot.slane %v1567_v19, 1  ;;  %v4305_v44 = vmul.f32 %v2778_v43, %v2827_v18 }
 0x111   : > { %v1676_v46 = vrot.slane %v4285_v1, 1  ;;  %v1784_v29 = vadd.f32 %v1714_v9, %v1540_v62  ;;  %v1365_v32 = vsel %vm776_vm1, %v1363_v7, %v1364_v35  ;;  %v4315_v53 = vadd.f32 %v300_v36, %v246_v23  ;;  %v4341_v7 = vpop.f32.mrb[1].mxu0 }
 0x112   : > { %v1919_v20 = vrot.slane %v1811_v17, 2  ;;  %v1213_v41 = vadd.f32 %v1121_v22, %v969_v40  ;;  %v4876_v55 = vrot.slane %v4305_v44, 2  ;;  %v4321_v58 = vadd.f32 %v301_v3, %v247_v48  ;;  %2324 = vst.msk [vmem:[%s4310_s30 + $0x8] sm:$0xff] %vm2323_vm2, %v4341_v7 }
 0x113   : > { %v1677_v37 = vsel %vm531_vm0, %v1675_v26, %v1676_v46  ;;  %v2028_v42 = vadd.f32 %v1958_v50, %v1784_v29  ;;  %v395_v9 = vmul.f32 %v2714_v11, %v3830_v59  ;;  %v477_v51 = vmul.f32 %v2717_v12, %v3830_v59 }
 0x114   : > { %v4329_v24 = vmul.f32 %v2717_v12, %v3836_v8  ;;  %v1457_v25 = vadd.f32 %v1365_v32, %v1213_v41  ;;  %v1921_v57 = vsel %vm776_vm1, %v1919_v20, %v4876_v55  ;;  %v722_v54 = vmul.f32 %v2719_v13, %v3830_v59 }
 0x115   : > { %v4338_v50 = vmul.f32 %v2719_v13, %v3836_v8  ;;  %2292 = vmatmul.mubr.f32.gmra.mrb[22].mxu1 %v2028_v42  ;;  %v602_v5 = vrot.slane %v477_v51, 1  ;;  %v953_v23 = vmul.f32 %v2722_v14, %v4077_v33  ;;  %v1035_v36 = vmul.f32 %v2725_v15, %v4077_v33 }
 0x116   : > { %v4875_v19 = vrot.slane %v4329_v24, 1  ;;  %2297 = vmatprep.mubr.f32.mxu1 %v4884_v0  ;;  %v1525_v59 = vadd.f32 %v1493_v4, %v1457_v25  ;;  %v847_v62 = vrot.slane %v722_v54, 2  ;;  %v4352_v17 = vmul.f32 %v2725_v15, %v4080_v45 }
 0x117   : > { %v4874_v22 = vrot.slane %v4338_v50, 2  ;;  %v1159_v3 = vrot.slane %v1035_v36, 1  ;;  %v1279_v40 = vmul.f32 %v2750_v27, %v4077_v33  ;;  %v4361_v26 = vmul.f32 %v2750_v27, %v4080_v45 }
 0x118   : > { %v604_v48 = vsel %vm531_vm0, %v602_v5, %v4875_v19  ;;  %v1769_v4 = vadd.f32 %v1677_v37, %v1525_v59  ;;  %v4872_v20 = vrot.slane %v4352_v17, 1  ;;  %v1509_v51 = vmul.f32 %v2754_v31, %v4315_v53 }
 0x119   : > { %v672_v29 = vadd.f32 %v604_v48, %v395_v9  ;;  %v849_v32 = vsel %vm776_vm1, %v847_v62, %v4874_v22  ;;  %v1403_v41 = vrot.slane %v1279_v40, 2  ;;  %v4871_v42 = vrot.slane %v4361_v26, 2 }
 0x11a   : > { %v1591_v28 = vmul.f32 %v2772_v39, %v4315_v53  ;;  %v2013_v25 = vadd.f32 %v1921_v57, %v1769_v4  ;;  %v1161_v37 = vsel %vm531_vm0, %v1159_v3, %v4872_v20  ;;  %v4377_v9 = vmul.f32 %v2772_v39, %v4321_v58  ;;  %v4934_v20 = vld [vmem:[#allocation4_spill] sm:$0xff] }
 0x11b   : > { %v917_v54 = vadd.f32 %v849_v32, %v672_v29  ;;  %v1405_v5 = vsel %vm776_vm1, %v1403_v41, %v4871_v42  ;;  %v1835_v59 = vmul.f32 %v2778_v43, %v4315_v53  ;;  %v4386_v57 = vmul.f32 %v2778_v43, %v4321_v58 }
 0x11c   : > { %v1715_v36 = vrot.slane %v1591_v28, 1  ;;  %2202 = vmatmul.mubr.f32.gmra.mrb[24].mxu0 %v2013_v25  ;;  %v4870_v48 = vrot.slane %v4377_v9, 1  ;;  %v380_v3 = vmul.f32 %v2714_v11, %v3760_v2  ;;  %v455_v40 = vmul.f32 %v2717_v12, %v3908_v60 }
 0x11d   : > { %v985_v62 = vadd.f32 %v953_v23, %v917_v54  ;;  %v1959_v4 = vrot.slane %v1835_v59, 2  ;;  %v4873_v29 = vrot.slane %v4386_v57, 2  ;;  %2207 = vmatprep.mubr.f32.mxu0 %v4884_v0  ;;  %v700_v32 = vmul.f32 %v2719_v13, %v3908_v60 }
 0x11e   : > { %v938_v23 = vmul.f32 %v2722_v14, %v4001_v52  ;;  %v1717_v28 = vsel %vm531_vm0, %v1715_v36, %v4870_v48  ;;  %v565_v2 = vrot.slane %v455_v40, 1  ;;  %v1013_v25 = vmul.f32 %v2725_v15, %v4152_v6  ;;  %v302_v36 = vld [vmem:[%s4805_s1 + $0x190] sm:$0x3] }
 0x11f   : > { %v1229_v41 = vadd.f32 %v1161_v37, %v985_v62  ;;  %v1961_v54 = vsel %vm776_vm1, %v1959_v4, %v4873_v29  ;;  %v810_v59 = vrot.slane %v700_v32, 2  ;;  %v1257_v60 = vmul.f32 %v2750_v27, %v4152_v6  ;;  %v248_v62 = vld [vmem:[%s2633_s21 + $0x190] sm:$0x3]  ;;  %v2227_v32 = vpop.f32.mrb[0].mxu1 }
 0x120   : > { %v1494_v37 = vmul.f32 %v2754_v31, %v2827_v18  ;;  %v566_v48 = vsel %vm531_vm0, %v563_v21, %v565_v2  ;;  %v1122_v42 = vrot.slane %v1013_v25, 1  ;;  %v1569_v4 = vmul.f32 %v2772_v39, %v4934_v20  ;;  %2355 = vst [vmem:[%s4310_s30 + $0x100] sm:$0xff] %v2227_v32 }
 0x121   : > { %v1473_v40 = vadd.f32 %v1405_v5, %v1229_v41  ;;  %v657_v29 = vadd.f32 %v566_v48, %v380_v3  ;;  %v811_v22 = vsel %vm776_vm1, %v808_v38, %v810_v59  ;;  %v1366_v19 = vrot.slane %v1257_v60, 2  ;;  %v4426_v5 = vpop.f32.mrb[1].mxu1 }
 0x122   : > { %v1813_v55 = vmul.f32 %v2778_v43, %v4934_v20  ;;  %v1123_v21 = vsel %vm531_vm0, %v1120_v56, %v1122_v42  ;;  %v1678_v41 = vrot.slane %v1569_v4, 1  ;;  %v4431_v2 = vadd.f32 %v302_v36, %v248_v62  ;;  %2356 = vst.msk [vmem:[%s4310_s30 + $0x108] sm:$0xff] %vm2323_vm2, %v4426_v5 }
 0x123   : > { %v1541_v61 = vadd.f32 %v1509_v51, %v1473_v40  ;;  %v902_v48 = vadd.f32 %v811_v22, %v657_v29  ;;  %v1367_v47 = vsel %vm776_vm1, %v1364_v35, %v1366_v19  ;;  %v396_v3 = vmul.f32 %v2714_v11, %v3836_v8 }
 0x124   : > { %v1922_v38 = vrot.slane %v1813_v55, 2  ;;  %v1679_v51 = vsel %vm531_vm0, %v1676_v46, %v1678_v41  ;;  %v479_v49 = vmul.f32 %v2717_v12, %v3946_v30  ;;  %v724_v56 = vmul.f32 %v2719_v13, %v3946_v30 }
 0x125   : > { %v1785_v25 = vadd.f32 %v1717_v28, %v1541_v61  ;;  %v970_v22 = vadd.f32 %v938_v23, %v902_v48  ;;  %v4935_v16 = vrot.slane %v4305_v44, 2  ;;  %v954_v55 = vmul.f32 %v2722_v14, %v4080_v45 }
 0x126   : > { %v1037_v8 = vmul.f32 %v2725_v15, %v4196_v34  ;;  %v605_v19 = vrot.slane %v479_v49, 1  ;;  %v850_v46 = vrot.slane %v724_v56, 2  ;;  %v1281_v42 = vmul.f32 %v2750_v27, %v4196_v34 }
 0x127   : > { %v1923_v35 = vsel %vm776_vm1, %v4935_v16, %v1922_v38  ;;  %v2029_v1 = vadd.f32 %v1961_v54, %v1785_v25  ;;  %v1214_v29 = vadd.f32 %v1123_v21, %v970_v22  ;;  %v1510_v30 = vmul.f32 %v2754_v31, %v4321_v58  ;;  %v2137_v25 = vpop.f32.mrb[2].mxu0 }
 0x128   : > { %v1162_v28 = vrot.slane %v1037_v8, 1  ;;  %v1593_v44 = vmul.f32 %v2772_v39, %v4431_v2  ;;  %v4936_v23 = vrot.slane %v4329_v24, 1  ;;  %v4937_v54 = vrot.slane %v4338_v50, 2  ;;  %2325 = vst [vmem:[%s4310_s30 + $0x10] sm:$0xff] %v2137_v25 }
 0x129   : > { %2298 = vmatmul.mubr.f32.gmra.mrb[24].mxu1 %v2029_v1  ;;  %v1406_v62 = vrot.slane %v1281_v42, 2  ;;  %v1837_v36 = vmul.f32 %v2778_v43, %v4431_v2  ;;  %v1458_v40 = vadd.f32 %v1367_v47, %v1214_v29  ;;  %v4938_v32 = vrot.slane %v4352_v17, 1 }
 0x12a   : > { %v606_v59 = vsel %vm531_vm0, %v4936_v23, %v605_v19  ;;  %v851_v60 = vsel %vm776_vm1, %v4937_v54, %v850_v46  ;;  %2303 = vmatprep.mubr.f32.mxu1 %v4884_v0  ;;  %v1718_v24 = vrot.slane %v1593_v44, 1  ;;  %v4939_v21 = vrot.slane %v4361_v26, 2  ;;  %v4485_v26 = vpop.f32.mrb[3].mxu0 }
 0x12b   : > { %v673_v4 = vadd.f32 %v606_v59, %v396_v3  ;;  %v1163_v61 = vsel %vm531_vm0, %v4938_v32, %v1162_v28  ;;  %v1962_v41 = vrot.slane %v1837_v36, 2  ;;  %v381_v48 = vmul.f32 %v2714_v11, %v3999_v63  ;;  %v249_v32 = vld [vmem:[%s2633_s21 + $0x198] sm:$0xff]  ;;  %2326 = vst.msk [vmem:[%s4310_s30 + $0x18] sm:$0xff] %vm2323_vm2, %v4485_v26 }
 0x12c   : > { %v1407_v50 = vsel %vm776_vm1, %v4939_v21, %v1406_v62  ;;  %v456_v38 = vmul.f32 %v2717_v12, %v3999_v63  ;;  %v1526_v49 = vadd.f32 %v1494_v37, %v1458_v40  ;;  %v4940_v3 = vrot.slane %v4377_v9, 1 }
 0x12d   : > { %v918_v47 = vadd.f32 %v851_v60, %v673_v4  ;;  %v4482_v56 = vmul.f32 %v2717_v12, %v4001_v52  ;;  %v4941_v22 = vrot.slane %v4386_v57, 2  ;;  %v701_v37 = vmul.f32 %v2719_v13, %v3999_v63  ;;  %v4942_v4 = vld [vmem:[#allocation2_spill] sm:$0xff] }
 0x12e   : > { %v1719_v17 = vsel %vm531_vm0, %v4940_v3, %v1718_v24  ;;  %v567_v8 = vrot.slane %v456_v38, 1  ;;  %v4494_v9 = vmul.f32 %v2719_v13, %v4001_v52  ;;  %v1770_v1 = vadd.f32 %v1679_v51, %v1526_v49  ;;  %v2233_v38 = vpop.f32.mrb[2].mxu1 }
 0x12f   : > { %v1963_v16 = vsel %vm776_vm1, %v4941_v22, %v1962_v41  ;;  %v986_v19 = vadd.f32 %v954_v55, %v918_v47  ;;  %v568_v46 = vrot.slane %v4482_v56, 1  ;;  %v939_v42 = vmul.f32 %v2722_v14, %v2824_v10  ;;  %v4943_v41 = vld [vmem:[#allocation3_spill] sm:$0xff]  ;;  %v250_v22 = vld [vmem:[%s2633_s21 + $0x1a0] sm:$0xff]  ;;  %2357 = vst [vmem:[%s4310_s30 + $0x110] sm:$0xff] %v2233_v38 }
 0x130   : > { %v812_v29 = vrot.slane %v701_v37, 2  ;;  %v813_v57 = vrot.slane %v4494_v9, 2  ;;  %v1014_v28 = vmul.f32 %v2725_v15, %v2824_v10  ;;  %v4504_v63 = vmul.f32 %v2725_v15, %v2827_v18  ;;  %v4547_v37 = vpop.f32.mrb[3].mxu1 }
 0x131   : > { %v2014_v44 = vadd.f32 %v1923_v35, %v1770_v1  ;;  %v1230_v23 = vadd.f32 %v1163_v61, %v986_v19  ;;  %v569_v51 = vsel %vm531_vm0, %v567_v8, %v568_v46  ;;  %v1258_v55 = vmul.f32 %v2750_v27, %v2824_v10  ;;  %v303_v61 = vld [vmem:[%s4805_s1 + $0x198] sm:$0xff]  ;;  %v304_v8 = vld [vmem:[%s4805_s1 + $0x1a0] sm:$0xff]  ;;  %2358 = vst.msk [vmem:[%s4310_s30 + $0x118] sm:$0xff] %vm2323_vm2, %v4547_v37 }
 0x132   : > { %v658_v59 = vadd.f32 %v569_v51, %v381_v48  ;;  %v814_v54 = vsel %vm776_vm1, %v812_v29, %v813_v57  ;;  %v1124_v60 = vrot.slane %v1014_v28, 1  ;;  %v1125_v62 = vrot.slane %v4504_v63, 1 }
 0x133   : > { %2208 = vmatmul.mubr.f32.gmra.mrb[26].mxu0 %v2014_v44  ;;  %v1474_v36 = vadd.f32 %v1407_v50, %v1230_v23  ;;  %v4517_v35 = vmul.f32 %v2750_v27, %v2827_v18  ;;  %v1368_v40 = vrot.slane %v1258_v55, 2  ;;  %v1495_v10 = vmul.f32 %v2754_v31, %v4942_v4 }
 0x134   : > { %2213 = vmatprep.mubr.f32.mxu0 %v4884_v0  ;;  %v903_v24 = vadd.f32 %v814_v54, %v658_v59  ;;  %v1126_v21 = vsel %vm531_vm0, %v1124_v60, %v1125_v62  ;;  %v1570_v50 = vmul.f32 %v2772_v39, %v4942_v4  ;;  %v4533_v48 = vmul.f32 %v2772_v39, %v4943_v41 }
 0x135   : > { %v1542_v25 = vadd.f32 %v1510_v30, %v1474_v36  ;;  %v1369_v49 = vrot.slane %v4517_v35, 2  ;;  %v1814_v47 = vmul.f32 %v2778_v43, %v4942_v4  ;;  %v4540_v3 = vmul.f32 %v2778_v43, %v4943_v41 }
 0x136   : > { %v971_v1 = vadd.f32 %v939_v42, %v903_v24  ;;  %v1680_v19 = vrot.slane %v1570_v50, 1  ;;  %v1681_v30 = vrot.slane %v4533_v48, 1  ;;  %v357_v29 = vadd.f32 %v303_v61, %v249_v32 }
 0x137   : > { %v1786_v28 = vadd.f32 %v1719_v17, %v1542_v25  ;;  %v1370_v44 = vsel %vm776_vm1, %v1368_v40, %v1369_v49  ;;  %v1924_v23 = vrot.slane %v1814_v47, 2  ;;  %v1925_v51 = vrot.slane %v4540_v3, 2 }
 0x138   : > { %v1215_v55 = vadd.f32 %v1126_v21, %v971_v1  ;;  %v1682_v59 = vsel %vm531_vm0, %v1680_v19, %v1681_v30  ;;  %v4557_v54 = vadd.f32 %v304_v8, %v250_v22  ;;  %v397_v42 = vmul.f32 %v2714_v11, %v4077_v33  ;;  %v2143_v8 = vpop.f32.mrb[4].mxu0 }
 0x139   : > { %v2030_v60 = vadd.f32 %v1963_v16, %v1786_v28  ;;  %v1926_v17 = vsel %vm776_vm1, %v1924_v23, %v1925_v51  ;;  %v480_v36 = vmul.f32 %v2717_v12, %v4077_v33  ;;  %v4568_v40 = vmul.f32 %v2717_v12, %v4080_v45  ;;  %2327 = vst [vmem:[%s4310_s30 + $0x20] sm:$0xff] %v2143_v8 }
 0x13a   : > { %v1459_v4 = vadd.f32 %v1370_v44, %v1215_v55  ;;  %v725_v32 = vmul.f32 %v2719_v13, %v4077_v33  ;;  %v4574_v61 = vmul.f32 %v2719_v13, %v4080_v45  ;;  %v955_v16 = vmul.f32 %v2722_v14, %v4315_v53 }
 0x13b   : > { %2304 = vmatmul.mubr.f32.gmra.mrb[26].mxu1 %v2030_v60  ;;  %v607_v24 = vrot.slane %v480_v36, 1  ;;  %v608_v21 = vrot.slane %v4568_v40, 1  ;;  %v1038_v50 = vmul.f32 %v2725_v15, %v4315_v53  ;;  %v4583_v38 = vmul.f32 %v2725_v15, %v4321_v58 }
 0x13c   : > { %2309 = vmatprep.mubr.f32.mxu1 %v4884_v0  ;;  %v1527_v33 = vadd.f32 %v1495_v10, %v1459_v4  ;;  %v852_v25 = vrot.slane %v725_v32, 2  ;;  %v853_v47 = vrot.slane %v4574_v61, 2  ;;  %v1282_v22 = vmul.f32 %v2750_v27, %v4315_v53  ;;  %v4598_v10 = vpop.f32.mrb[5].mxu0 }
 0x13d   : > { %v609_v1 = vsel %vm531_vm0, %v607_v24, %v608_v21  ;;  %v1164_v19 = vrot.slane %v1038_v50, 1  ;;  %v1165_v28 = vrot.slane %v4583_v38, 1  ;;  %v4595_v44 = vmul.f32 %v2750_v27, %v4321_v58  ;;  %2328 = vst.msk [vmem:[%s4310_s30 + $0x28] sm:$0xff] %vm2323_vm2, %v4598_v10 }
 0x13e   : > { %v1771_v23 = vadd.f32 %v1682_v59, %v1527_v33  ;;  %v674_v55 = vadd.f32 %v609_v1, %v397_v42  ;;  %v854_v53 = vsel %vm776_vm1, %v852_v25, %v853_v47  ;;  %v1408_v60 = vrot.slane %v1282_v22, 2 }
 0x13f   : > { %v4877_v36 = vrot.slane %v4595_v44, 2  ;;  %v1594_v4 = vmul.f32 %v2772_v39, %v357_v29  ;;  %v4607_v50 = vmul.f32 %v2772_v39, %v4557_v54  ;;  %v1838_v8 = vmul.f32 %v2778_v43, %v357_v29 }
 0x140   : > { %v2015_v32 = vadd.f32 %v1926_v17, %v1771_v23  ;;  %v919_v24 = vadd.f32 %v854_v53, %v674_v55  ;;  %v1166_v59 = vsel %vm531_vm0, %v1164_v19, %v1165_v28  ;;  %v1511_v33 = vmul.f32 %v2754_v31, %v357_v29 }
 0x141   : > { %v1410_v42 = vsel %vm776_vm1, %v1408_v60, %v4877_v36  ;;  %v4619_v17 = vmul.f32 %v2778_v43, %v4557_v54  ;;  %v1720_v22 = vrot.slane %v1594_v4, 1  ;;  %v382_v1 = vmul.f32 %v2714_v11, %v4001_v52 }
 0x142   : > { %2214 = vmatmul.mubr.f32.gmra.mrb[28].mxu0 %v2015_v32  ;;  %v987_v25 = vadd.f32 %v955_v16, %v919_v24  ;;  %v458_v23 = vmul.f32 %v2717_v12, %v4152_v6  ;;  %v1721_v19 = vrot.slane %v4607_v50, 1  ;;  %v1964_v55 = vrot.slane %v1838_v8, 2 }
 0x143   : > { %2219 = vmatprep.mubr.f32.mxu0 %v4884_v0  ;;  %v703_v29 = vmul.f32 %v2719_v13, %v4152_v6  ;;  %v1016_v53 = vmul.f32 %v2725_v15, %v4934_v20  ;;  %v1965_v16 = vrot.slane %v4619_v17, 2  ;;  %v1260_v52 = vmul.f32 %v2750_v27, %v4934_v20 }
 0x144   : > { %v1231_v60 = vadd.f32 %v1166_v59, %v987_v25  ;;  %v570_v4 = vrot.slane %v458_v23, 1  ;;  %v1722_v59 = vsel %vm531_vm0, %v1720_v22, %v1721_v19  ;;  %v940_v20 = vmul.f32 %v2722_v14, %v2827_v18 }
 0x145   : > { %v815_v32 = vrot.slane %v703_v29, 2  ;;  %v1127_v24 = vrot.slane %v1016_v53, 1  ;;  %v1371_v6 = vrot.slane %v1260_v52, 2  ;;  %v2239_v29 = vpop.f32.mrb[4].mxu1  ;;  %v1966_v56 = vsel %vm776_vm1, %v1964_v55, %v1965_v16 }
 0x146   : > { %v1475_v8 = vadd.f32 %v1410_v42, %v1231_v60  ;;  %v571_v36 = vsel %vm531_vm0, %v568_v46, %v570_v4  ;;  %v4944_v46 = vld [vmem:[#allocation5_spill] sm:$0xff]  ;;  %v251_v60 = vld [vmem:[%s2633_s21 + $0x1a8] sm:$0x3]  ;;  %2359 = vst [vmem:[%s4310_s30 + $0x120] sm:$0xff] %v2239_v29  ;;  %v2241_v9 = vpop.f32.mrb[5].mxu1  ;;  %v482_v22 = vmul.f32 %v2717_v12, %v4196_v34  ;;  %v398_v4 = vmul.f32 %v2714_v11, %v4080_v45 }
 0x147   : > { %v659_v25 = vadd.f32 %v571_v36, %v382_v1  ;;  %v816_v23 = vsel %vm776_vm1, %v813_v57, %v815_v32  ;;  %v1572_v42 = vmul.f32 %v2772_v39, %v4944_v46  ;;  %v305_v36 = vld [vmem:[%s4805_s1 + $0x1a8] sm:$0x3]  ;;  %v1128_v18 = vsel %vm531_vm0, %v1125_v62, %v1127_v24  ;;  %2360 = vst.msk [vmem:[%s4310_s30 + $0x128] sm:$0xff] %vm2323_vm2, %v2241_v9 }
 0x148   : > { %v1543_v53 = vadd.f32 %v1511_v33, %v1475_v8  ;;  %v1816_v33 = vmul.f32 %v2778_v43, %v4944_v46  ;;  %v1372_v55 = vsel %vm776_vm1, %v1369_v49, %v1371_v6  ;;  %v727_v52 = vmul.f32 %v2719_v13, %v4196_v34 }
 0x149   : > { %v904_v57 = vadd.f32 %v816_v23, %v659_v25  ;;  %v359_v32 = vadd.f32 %v305_v36, %v251_v60  ;;  %v610_v62 = vrot.slane %v482_v22, 1  ;;  %v1040_v24 = vmul.f32 %v2725_v15, %v4431_v2 }
 0x14a   : > { %v1787_v1 = vadd.f32 %v1722_v59, %v1543_v53  ;;  %v1683_v25 = vrot.slane %v1572_v42, 1  ;;  %v855_v12 = vrot.slane %v727_v52, 2  ;;  %v1284_v35 = vmul.f32 %v2750_v27, %v4431_v2 }
 0x14b   : > { %v972_v63 = vadd.f32 %v940_v20, %v904_v57  ;;  %v1496_v11 = vmul.f32 %v2754_v31, %v4943_v41  ;;  %v611_v13 = vsel %vm531_vm0, %v608_v21, %v610_v62  ;;  %v1167_v45 = vrot.slane %v1040_v24, 1 }
 0x14c   : > { %v2031_v8 = vadd.f32 %v1966_v56, %v1787_v1  ;;  %v1927_v15 = vrot.slane %v1816_v33, 2  ;;  %v675_v34 = vadd.f32 %v611_v13, %v398_v4  ;;  %v856_v27 = vsel %vm776_vm1, %v853_v47, %v855_v12 }
 0x14d   : > { %v1216_v59 = vadd.f32 %v1128_v18, %v972_v63  ;;  %v956_v2 = vmul.f32 %v2722_v14, %v4321_v58  ;;  %v1411_v49 = vrot.slane %v1284_v35, 2  ;;  %v1596_v40 = vmul.f32 %v2772_v39, %v359_v32  ;;  %v2149_v58 = vpop.f32.mrb[6].mxu0 }
 0x14e   : > { %2310 = vmatmul.mubr.f32.gmra.mrb[28].mxu1 %v2031_v8  ;;  %v1684_v21 = vsel %vm531_vm0, %v1681_v30, %v1683_v25  ;;  %v920_v6 = vadd.f32 %v856_v27, %v675_v34  ;;  %v1168_v39 = vsel %vm531_vm0, %v1165_v28, %v1167_v45  ;;  %v1928_v7 = vsel %vm776_vm1, %v1925_v51, %v1927_v15  ;;  %v2151_v26 = vpop.f32.mrb[7].mxu0  ;;  %v2245_v10 = vpop.f32.mrb[6].mxu1 }
 0x14f   : > { %2315 = vmatprep.mubr.f32.mxu1 %v4884_v0  ;;  %v1460_v41 = vadd.f32 %v1372_v55, %v1216_v59  ;;  %v1840_v0 = vmul.f32 %v2778_v43, %v359_v32  ;;  %2329 = vst [vmem:[%s4310_s30 + $0x30] sm:$0xff] %v2149_v58  ;;  %v4945_v37 = vrot.slane %v4595_v44, 2  ;;  %v1723_v61 = vrot.slane %v1596_v40, 1  ;;  %2330 = vst.msk [vmem:[%s4310_s30 + $0x38] sm:$0xff] %vm2323_vm2, %v2151_v26 }
 0x150   : > { %v988_v5 = vadd.f32 %v956_v2, %v920_v6  ;;  %v1512_v43 = vmul.f32 %v2754_v31, %v4557_v54  ;;  %2361 = vst [vmem:[%s4310_s30 + $0x130] sm:$0xff] %v2245_v10  ;;  %v2247_v31 = vpop.f32.mrb[7].mxu1 }
 0x151   : > { %v1528_v14 = vadd.f32 %v1496_v11, %v1460_v41  ;;  %v1412_v30 = vsel %vm776_vm1, %v4945_v37, %v1411_v49  ;;  %v1967_v51 = vrot.slane %v1840_v0, 2  ;;  %v1724_v28 = vsel %vm531_vm0, %v1721_v19, %v1723_v61  ;;  %2362 = vst.msk [vmem:[%s4310_s30 + $0x138] sm:$0xff] %vm2323_vm2, %v2247_v31 }
 0x152   : > { %v1232_v38 = vadd.f32 %v1168_v39, %v988_v5 }
 0x153   : > { %v1772_v48 = vadd.f32 %v1684_v21, %v1528_v14  ;;  %v1968_v23 = vsel %vm776_vm1, %v1965_v16, %v1967_v51 }
 0x154   : > { %v1476_v47 = vadd.f32 %v1412_v30, %v1232_v38 }
 0x155   : > { %v2016_v3 = vadd.f32 %v1928_v7, %v1772_v48 }
 0x156   : > { %v1544_v44 = vadd.f32 %v1512_v43, %v1476_v47  ;;  %v2155_v50 = vpop.f32.mrb[8].mxu0 }
 0x157   : > { %2220 = vmatmul.mubr.f32.gmra.mrb[30].mxu0 %v2016_v3  ;;  %2331 = vst [vmem:[%s4310_s30 + $0x40] sm:$0xff] %v2155_v50  ;;  %v2157_v19 = vpop.f32.mrb[9].mxu0 }
 0x158   : > { %v1788_v54 = vadd.f32 %v1724_v28, %v1544_v44  ;;  %2332 = vst.msk [vmem:[%s4310_s30 + $0x48] sm:$0xff] %vm2323_vm2, %v2157_v19 }
 0x15a   : > { %v2032_v20 = vadd.f32 %v1968_v23, %v1788_v54 }
 0x15c   : > { %2316 = vmatmul.mubr.f32.gmra.mrb[30].mxu1 %v2032_v20 }
 0x162   : > { %v2251_v17 = vpop.f32.mrb[8].mxu1 }
 0x163   : > { %2363 = vst [vmem:[%s4310_s30 + $0x140] sm:$0xff] %v2251_v17  ;;  %v2253_v16 = vpop.f32.mrb[9].mxu1 }
 0x164   : > { %2364 = vst.msk [vmem:[%s4310_s30 + $0x148] sm:$0xff] %vm2323_vm2, %v2253_v16 }
 0x16e   : > { %v2161_v29 = vpop.f32.mrb[10].mxu0 }
 0x16f   : > { %2333 = vst [vmem:[%s4310_s30 + $0x50] sm:$0xff] %v2161_v29  ;;  %v2163_v53 = vpop.f32.mrb[11].mxu0 }
 0x170   : > { %2334 = vst.msk [vmem:[%s4310_s30 + $0x58] sm:$0xff] %vm2323_vm2, %v2163_v53 }
 0x174   : > { %v2257_v56 = vpop.f32.mrb[10].mxu1 }
 0x175   : > { %2365 = vst [vmem:[%s4310_s30 + $0x150] sm:$0xff] %v2257_v56  ;;  %v2259_v46 = vpop.f32.mrb[11].mxu1 }
 0x176   : > { %2366 = vst.msk [vmem:[%s4310_s30 + $0x158] sm:$0xff] %vm2323_vm2, %v2259_v46 }
 0x17c   : > { %v2167_v42 = vpop.f32.mrb[12].mxu0 }
 0x17d   : > { %2335 = vst [vmem:[%s4310_s30 + $0x60] sm:$0xff] %v2167_v42  ;;  %v2169_v60 = vpop.f32.mrb[13].mxu0 }
 0x17e   : > { %2336 = vst.msk [vmem:[%s4310_s30 + $0x68] sm:$0xff] %vm2323_vm2, %v2169_v60 }
 0x189   : > { %v2263_v36 = vpop.f32.mrb[12].mxu1 }
 0x18a   : > { %2367 = vst [vmem:[%s4310_s30 + $0x160] sm:$0xff] %v2263_v36  ;;  %v2265_v9 = vpop.f32.mrb[13].mxu1 }
 0x18b   : > { %2368 = vst.msk [vmem:[%s4310_s30 + $0x168] sm:$0xff] %vm2323_vm2, %v2265_v9 }
 0x194   : > { %v2173_v57 = vpop.f32.mrb[14].mxu0 }
 0x195   : > { %2337 = vst [vmem:[%s4310_s30 + $0x70] sm:$0xff] %v2173_v57  ;;  %v2175_v18 = vpop.f32.mrb[15].mxu0 }
 0x196   : > { %2338 = vst.msk [vmem:[%s4310_s30 + $0x78] sm:$0xff] %vm2323_vm2, %v2175_v18 }
 0x19b   : > { %v2269_v33 = vpop.f32.mrb[14].mxu1 }
 0x19c   : > { %2369 = vst [vmem:[%s4310_s30 + $0x170] sm:$0xff] %v2269_v33  ;;  %v2271_v22 = vpop.f32.mrb[15].mxu1 }
 0x19d   : > { %2370 = vst.msk [vmem:[%s4310_s30 + $0x178] sm:$0xff] %vm2323_vm2, %v2271_v22 }
 0x1a3   : > { %v2179_v1 = vpop.f32.mrb[16].mxu0 }
 0x1a4   : > { %2339 = vst [vmem:[%s4310_s30 + $0x80] sm:$0xff] %v2179_v1  ;;  %v2181_v55 = vpop.f32.mrb[17].mxu0 }
 0x1a5   : > { %2340 = vst.msk [vmem:[%s4310_s30 + $0x88] sm:$0xff] %vm2323_vm2, %v2181_v55 }
 0x1af   : > { %v2275_v4 = vpop.f32.mrb[16].mxu1 }
 0x1b0   : > { %2371 = vst [vmem:[%s4310_s30 + $0x180] sm:$0xff] %v2275_v4  ;;  %v2277_v52 = vpop.f32.mrb[17].mxu1 }
 0x1b1   : > { %2372 = vst.msk [vmem:[%s4310_s30 + $0x188] sm:$0xff] %vm2323_vm2, %v2277_v52 }
 0x1bb   : > { %v2185_v63 = vpop.f32.mrb[18].mxu0 }
 0x1bc   : > { %2341 = vst [vmem:[%s4310_s30 + $0x90] sm:$0xff] %v2185_v63  ;;  %v2187_v32 = vpop.f32.mrb[19].mxu0 }
 0x1bd   : > { %2342 = vst.msk [vmem:[%s4310_s30 + $0x98] sm:$0xff] %vm2323_vm2, %v2187_v32 }
 0x1c2   : > { %v2281_v62 = vpop.f32.mrb[18].mxu1 }
 0x1c3   : > { %2373 = vst [vmem:[%s4310_s30 + $0x190] sm:$0xff] %v2281_v62  ;;  %v2283_v24 = vpop.f32.mrb[19].mxu1 }
 0x1c4   : > { %2374 = vst.msk [vmem:[%s4310_s30 + $0x198] sm:$0xff] %vm2323_vm2, %v2283_v24 }
 0x1c9   : > { %v2191_v8 = vpop.f32.mrb[20].mxu0 }
 0x1ca   : > { %2343 = vst [vmem:[%s4310_s30 + $0xa0] sm:$0xff] %v2191_v8  ;;  %v2193_v25 = vpop.f32.mrb[21].mxu0 }
 0x1cb   : > { %2344 = vst.msk [vmem:[%s4310_s30 + $0xa8] sm:$0xff] %vm2323_vm2, %v2193_v25 }
 0x1d6   : > { %v2287_v12 = vpop.f32.mrb[20].mxu1 }
 0x1d7   : > { %2375 = vst [vmem:[%s4310_s30 + $0x1a0] sm:$0xff] %v2287_v12  ;;  %v2289_v35 = vpop.f32.mrb[21].mxu1 }
 0x1d8   : > { %2376 = vst.msk [vmem:[%s4310_s30 + $0x1a8] sm:$0xff] %vm2323_vm2, %v2289_v35 }
 0x1e1   : > { %v2197_v59 = vpop.f32.mrb[22].mxu0 }
 0x1e2   : > { %2345 = vst [vmem:[%s4310_s30 + $0xb0] sm:$0xff] %v2197_v59  ;;  %v2199_v11 = vpop.f32.mrb[23].mxu0 }
 0x1e3   : > { %2346 = vst.msk [vmem:[%s4310_s30 + $0xb8] sm:$0xff] %vm2323_vm2, %v2199_v11 }
 0x1e8   : > { %v2293_v13 = vpop.f32.mrb[22].mxu1 }
 0x1e9   : > { %2377 = vst [vmem:[%s4310_s30 + $0x1b0] sm:$0xff] %v2293_v13  ;;  %v2295_v45 = vpop.f32.mrb[23].mxu1 }
 0x1ea   : > { %2378 = vst.msk [vmem:[%s4310_s30 + $0x1b8] sm:$0xff] %vm2323_vm2, %v2295_v45 }
 0x1ef   : > { %v2203_v15 = vpop.f32.mrb[24].mxu0 }
 0x1f0   : > { %2347 = vst [vmem:[%s4310_s30 + $0xc0] sm:$0xff] %v2203_v15  ;;  %v2205_v34 = vpop.f32.mrb[25].mxu0 }
 0x1f1   : > { %2348 = vst.msk [vmem:[%s4310_s30 + $0xc8] sm:$0xff] %vm2323_vm2, %v2205_v34 }
 0x1fc   : > { %v2299_v27 = vpop.f32.mrb[24].mxu1 }
 0x1fd   : > { %2379 = vst [vmem:[%s4310_s30 + $0x1c0] sm:$0xff] %v2299_v27  ;;  %v2301_v2 = vpop.f32.mrb[25].mxu1 }
 0x1fe   : > { %2380 = vst.msk [vmem:[%s4310_s30 + $0x1c8] sm:$0xff] %vm2323_vm2, %v2301_v2 }
 0x206   : > { %v2209_v41 = vpop.f32.mrb[26].mxu0 }
 0x207   : > { %2349 = vst [vmem:[%s4310_s30 + $0xd0] sm:$0xff] %v2209_v41  ;;  %v2211_v49 = vpop.f32.mrb[27].mxu0 }
 0x208   : > { %2350 = vst.msk [vmem:[%s4310_s30 + $0xd8] sm:$0xff] %vm2323_vm2, %v2211_v49 }
 0x20e   : > { %v2305_v40 = vpop.f32.mrb[26].mxu1 }
 0x20f   : > { %2381 = vst [vmem:[%s4310_s30 + $0x1d0] sm:$0xff] %v2305_v40  ;;  %v2307_v21 = vpop.f32.mrb[27].mxu1 }
 0x210   : > { %2382 = vst.msk [vmem:[%s4310_s30 + $0x1d8] sm:$0xff] %vm2323_vm2, %v2307_v21 }
 0x215   : > { %v2215_v6 = vpop.f32.mrb[28].mxu0 }
 0x216   : > { %2351 = vst [vmem:[%s4310_s30 + $0xe0] sm:$0xff] %v2215_v6  ;;  %v2217_v14 = vpop.f32.mrb[29].mxu0 }
 0x217   : > { %2352 = vst.msk [vmem:[%s4310_s30 + $0xe8] sm:$0xff] %vm2323_vm2, %v2217_v14 }
 0x221   : > { %v2311_v39 = vpop.f32.mrb[28].mxu1 }
 0x222   : > { %2383 = vst [vmem:[%s4310_s30 + $0x1e0] sm:$0xff] %v2311_v39  ;;  %v2313_v0 = vpop.f32.mrb[29].mxu1 }
 0x223   : > { %2384 = vst.msk [vmem:[%s4310_s30 + $0x1e8] sm:$0xff] %vm2323_vm2, %v2313_v0 }
 0x22a   : > { %v2221_v58 = vpop.f32.mrb[30].mxu0 }
 0x22b   : > { %2353 = vst [vmem:[%s4310_s30 + $0xf0] sm:$0xff] %v2221_v58  ;;  %v2223_v7 = vpop.f32.mrb[31].mxu0 }
 0x22c   : > { %2354 = vst.msk [vmem:[%s4310_s30 + $0xf8] sm:$0xff] %vm2323_vm2, %v2223_v7 }
 0x22f   : > { %v2317_v5 = vpop.f32.mrb[30].mxu1 }
 0x230   : > { %2385 = vst [vmem:[%s4310_s30 + $0x1f0] sm:$0xff] %v2317_v5  ;;  %v2319_v26 = vpop.f32.mrb[31].mxu1 }
 0x231   : > { %2386 = vst.msk [vmem:[%s4310_s30 + $0x1f8] sm:$0xff] %vm2323_vm2, %v2319_v26 }
 0x232 PF: > { %s14_s15 = sadd.s32 1, %s2517_s15  }
 0x233   : > { %p11_p4 = scmp.ge.s32.totalorder %s14_s15, 4  }
 0x235   :  { %13 = sbr.rel (!%p11_p4) target bundleno = 1 (0x1), region = 66 }

// kernel: linear_attention_forward.4
= control target key start
LH: loop header
LB: loop body
LE: loop exit
PB: predicated region body
PF: predicated region fallthrough
CT: control target
= control target key end

     0   :  { %s7873_s9 = smov 0   ;;  %s11825_s0 = inlined_call_operand.vmem [shape: f32[2,256,192], index: 0, kind: input, shape index: {}]   ;;  %s11826_s1 = inlined_call_operand.vmem [shape: f32[128,256], index: 1, kind: input, shape index: {}]   ;;  %s11827_s2 = inlined_call_operand.vmem [shape: f32[2,256,128], index: 2, kind: output, shape index: {}]  }
   0x1 LB: > { %s5192_s10 = sadd.s32 4294967295, %s7849_s9   ;;  %p5196_p0 = scmp.ge.s32.totalorder %s7849_s9, 1  ;;  %s7849_s9 = sphi %s7873_s9, %s12_s9  }
   0x2   : > { %p112_p1 = scmp.lt.s32.totalorder %s7849_s9, 3 }
   0x4   : > { %p113_p2 = pnand %p5196_p0, %p112_p1 }
   0x6   : > { %116 = sbr.rel (%p113_p2) target bundleno = 1790 (0x6fe), region = 28 }
   0xd   : > { %p134_p3 = scmp.lt.s32.totalorder %s5192_s10, 1  ;;  %v209_v0 = vld [vmem:[%s11826_s1 + $0x8] sm:$0xff]  ;;  %s7851_s17 = smov 64   ;;  %vm661_vm0 = vcmask 130048   ;;  %vm5006_vm3 = vcmask 261120   ;;  %vm5039_vm4 = vcmask 392192  }
   0xe   : > { %577 = vmatprep.mubr.f32.mxu1 %v209_v0  ;;  %432 = vmatprep.mubr.f32.mxu0 %v209_v0  ;;  %s7852_s24 = smov 112   ;;  %s7853_s5 = smov 96   ;;  %vm8722_vm1 = vmpackc.low %vm661_vm0, %vm661_vm0  ;;  %vm5072_vm5 = vcmask 523264  }
   0xf   : > { %s12483_s10 = smov (!%p134_p3, %s5192_s10), 1  ;;  %s7854_s6 = smov 80  }
  0x10   : > { %s5395_s13 = sshll.u32 %s12483_s10, 9  ;;  %s7857_s7 = smov 48  }
  0x11   : > { %s7890_s16 = scalar_lea.vmem %s11825_s0, %s5395_s13  ;;  %s5396_s8 = sshll.u32 %s12483_s10, 8 }
  0x12   : > { %v177_v1 = vld [vmem:[%s7890_s16 + $0x108] sm:$0xff]  ;;  %v179_v2 = vld [vmem:[%s7890_s16 + $0x118] sm:$0xff]  ;;  %v7895_v3 = vld [vmem:[%s7890_s16] sm:$0xff]  ;;  %s11639_s13 = scalar_lea.vmem %s11827_s2, %s5396_s8 }
  0x13   : > { %v6613_v4 = vpack.c.bf16 %v179_v2, %v177_v1  ;;  %v7898_v5 = vld [vmem:[%s7890_s16 + $0x10] sm:$0xff]  ;;  %v145_v6 = vld [vmem:[%s7890_s16 + $0x8] sm:$0xff]  ;;  %v147_v7 = vld [vmem:[%s7890_s16 + $0x18] sm:$0xff] }
  0x14   : > { %v6980_v8 = vpack.i.bf16 %v7898_v5, %v7895_v3  ;;  %v6615_v9 = vpack.c.bf16 %v147_v7, %v145_v6  ;;  %v7905_v10 = vld [vmem:[%s7890_s16 + $0x40] sm:$0xff]  ;;  %v7908_v11 = vld [vmem:[%s7890_s16 + $0x50] sm:$0xff]  ;;  %v181_v12 = vld [vmem:[%s7890_s16 + $0x128] sm:$0xff] }
  0x15   : > { %6614 = vmatprep.subr.bf16.mxu1 %v6613_v4  ;;  %v6990_v13 = vpack.i.bf16 %v7908_v11, %v7905_v10  ;;  %v183_v14 = vld [vmem:[%s7890_s16 + $0x138] sm:$0xff]  ;;  %v7915_v15 = vld [vmem:[%s7890_s16 + $0x20] sm:$0xff]  ;;  %v7918_v16 = vld [vmem:[%s7890_s16 + $0x30] sm:$0xff] }
  0x16   : > { %6981 = vrot.lane.b32.xlu0 %v6980_v8, %s7851_s17  ;;  %6616 = vmatpush3.bf16.msra.mxu1 %v6615_v9  ;;  %v6617_v17 = vpack.c.bf16 %v183_v14, %v181_v12  ;;  %v6985_v18 = vpack.i.bf16 %v7918_v16, %v7915_v15  ;;  %v149_v19 = vld [vmem:[%s7890_s16 + $0x28] sm:$0xff]  ;;  %v151_v20 = vld [vmem:[%s7890_s16 + $0x38] sm:$0xff]  ;;  %v7926_v21 = vld [vmem:[%s7890_s16 + $0x60] sm:$0xff] }
  0x17   : > { %6991 = vrot.lane.b32.xlu1 %v6990_v13, %s7851_s17  ;;  %v6619_v22 = vpack.c.bf16 %v151_v20, %v149_v19  ;;  %v7930_v23 = vld [vmem:[%s7890_s16 + $0x70] sm:$0xff]  ;;  %v185_v24 = vld [vmem:[%s7890_s16 + $0x148] sm:$0xff]  ;;  %v187_v25 = vld [vmem:[%s7890_s16 + $0x158] sm:$0xff] }
  0x18   : > { %6618 = vmatprep.subr.bf16.mxu1 %v6617_v17  ;;  %v6995_v26 = vpack.i.bf16 %v7930_v23, %v7926_v21  ;;  %v6621_v27 = vpack.c.bf16 %v187_v25, %v185_v24  ;;  %v7937_v28 = vld [vmem:[%s7890_s16 + $0x80] sm:$0xff]  ;;  %v7940_v29 = vld [vmem:[%s7890_s16 + $0x90] sm:$0xff]  ;;  %v153_v30 = vld [vmem:[%s7890_s16 + $0x48] sm:$0xff] }
  0x19   : > { %11906 = vst [vmem:[#allocation2_spill] sm:$0xff] %v7940_v29  ;;  %v155_v31 = vld [vmem:[%s7890_s16 + $0x58] sm:$0xff]  ;;  %v7945_v32 = vld [vmem:[%s7890_s16 + $0xa0] sm:$0xff]  ;;  %v7948_v33 = vld [vmem:[%s7890_s16 + $0xb0] sm:$0xff]  ;;  %v7000_v34 = vpack.i.bf16 %v7940_v29, %v7937_v28 }
  0x1a   : > { %11907 = vst [vmem:[#allocation3_spill] sm:$0xff] %v7948_v33  ;;  %6986 = vrot.lane.b32.xlu0 %v6985_v18, %s7851_s17  ;;  %6620 = vmatpush3.bf16.msra.mxu1 %v6619_v22  ;;  %v6623_v35 = vpack.c.bf16 %v155_v31, %v153_v30  ;;  %v189_v36 = vld [vmem:[%s7890_s16 + $0x168] sm:$0xff]  ;;  %v191_v37 = vld [vmem:[%s7890_s16 + $0x178] sm:$0xff]  ;;  %v7956_v38 = vld [vmem:[%s7890_s16 + $0xc0] sm:$0xff]  ;;  %v7005_v39 = vpack.i.bf16 %v7948_v33, %v7945_v32 }
  0x1b   : > { %6996 = vrot.lane.b32.xlu1 %v6995_v26, %s7851_s17  ;;  %6622 = vmatprep.subr.bf16.mxu1 %v6621_v27  ;;  %v6625_v40 = vpack.c.bf16 %v191_v37, %v189_v36  ;;  %v7962_v41 = vld [vmem:[%s7890_s16 + $0xd0] sm:$0xff]  ;;  %v157_v42 = vld [vmem:[%s7890_s16 + $0x68] sm:$0xff]  ;;  %v159_v43 = vld [vmem:[%s7890_s16 + $0x78] sm:$0xff] }
  0x1c   : > { %v7967_v44 = vld [vmem:[%s7890_s16 + $0xe0] sm:$0xff]  ;;  %v7970_v45 = vld [vmem:[%s7890_s16 + $0xf0] sm:$0xff]  ;;  %v193_v46 = vld [vmem:[%s7890_s16 + $0x188] sm:$0xff]  ;;  %v7010_v48 = vpack.i.bf16 %v7962_v41, %v7956_v38  ;;  %v6627_v49 = vpack.c.bf16 %v159_v43, %v157_v42 }
  0x1d   : > { %v195_v47 = vld [vmem:[%s7890_s16 + $0x198] sm:$0xff]  ;;  %v7978_v50 = vld [vmem:[%s7890_s16 + $0x100] sm:$0xff]  ;;  %v7981_v51 = vld [vmem:[%s7890_s16 + $0x110] sm:$0xff]  ;;  %v7015_v52 = vpack.i.bf16 %v7970_v45, %v7967_v44 }
  0x1e   : > { %7001 = vrot.lane.b32.xlu0 %v7000_v34, %s7851_s17  ;;  %6624 = vmatpush3.bf16.msra.mxu1 %v6623_v35  ;;  %11908 = vst [vmem:[#allocation4_spill] sm:$0xff] %v7981_v51  ;;  %v6629_v53 = vpack.c.bf16 %v195_v47, %v193_v46  ;;  %v161_v54 = vld [vmem:[%s7890_s16 + $0x88] sm:$0xff]  ;;  %v163_v55 = vld [vmem:[%s7890_s16 + $0x98] sm:$0xff]  ;;  %v7989_v56 = vld [vmem:[%s7890_s16 + $0x120] sm:$0xff]  ;;  %v7020_v60 = vpack.i.bf16 %v7981_v51, %v7978_v50 }
  0x1f   : > { %7006 = vrot.lane.b32.xlu1 %v7005_v39, %s7851_s17  ;;  %6626 = vmatprep.subr.bf16.mxu1 %v6625_v40  ;;  %v7992_v57 = vld [vmem:[%s7890_s16 + $0x130] sm:$0xff]  ;;  %v197_v58 = vld [vmem:[%s7890_s16 + $0x1a8] sm:$0xff]  ;;  %v199_v59 = vld [vmem:[%s7890_s16 + $0x1b8] sm:$0xff]  ;;  %v6631_v61 = vpack.c.bf16 %v163_v55, %v161_v54 }
  0x20   : > { %11909 = vst [vmem:[#allocation5_spill] sm:$0xff] %v7992_v57  ;;  %v165_v62 = vld [vmem:[%s7890_s16 + $0xa8] sm:$0xff]  ;;  %v167_v63 = vld [vmem:[%s7890_s16 + $0xb8] sm:$0xff]  ;;  %v7025_v0 = vpack.i.bf16 %v7992_v57, %v7989_v56  ;;  %v6633_v1 = vpack.c.bf16 %v199_v59, %v197_v58  ;;  %v8006_v4 = vld [vmem:[%s7890_s16 + $0x140] sm:$0xff] }
  0x21   : > { %v201_v2 = vld [vmem:[%s7890_s16 + $0x1c8] sm:$0xff]  ;;  %v8009_v6 = vld [vmem:[%s7890_s16 + $0x150] sm:$0xff]  ;;  %v203_v7 = vld [vmem:[%s7890_s16 + $0x1d8] sm:$0xff]  ;;  %v6635_v12 = vpack.c.bf16 %v167_v63, %v165_v62 }
  0x22   : > { %7011 = vrot.lane.b32.xlu0 %v7010_v48, %s7851_s17  ;;  %6628 = vmatpush3.bf16.msra.mxu1 %v6627_v49  ;;  %v8013_v8 = vld [vmem:[%s7890_s16 + $0x160] sm:$0xff]  ;;  %v8016_v9 = vld [vmem:[%s7890_s16 + $0x170] sm:$0xff]  ;;  %v7030_v13 = vpack.i.bf16 %v8009_v6, %v8006_v4  ;;  %v169_v14 = vld [vmem:[%s7890_s16 + $0xc8] sm:$0xff]  ;;  %v6637_v18 = vpack.c.bf16 %v203_v7, %v201_v2 }
  0x23   : > { %7016 = vrot.lane.b32.xlu1 %v7015_v52, %s7851_s17  ;;  %6630 = vmatprep.subr.bf16.mxu1 %v6629_v53  ;;  %v171_v17 = vld [vmem:[%s7890_s16 + $0xd8] sm:$0xff]  ;;  %v7035_v19 = vpack.i.bf16 %v8016_v9, %v8013_v8  ;;  %v205_v20 = vld [vmem:[%s7890_s16 + $0x1e8] sm:$0xff]  ;;  %v8028_v22 = vld [vmem:[%s7890_s16 + $0x180] sm:$0xff] }
  0x24   : > { %v8031_v24 = vld [vmem:[%s7890_s16 + $0x190] sm:$0xff]  ;;  %v207_v25 = vld [vmem:[%s7890_s16 + $0x1f8] sm:$0xff]  ;;  %v8035_v26 = vld [vmem:[%s7890_s16 + $0x1a0] sm:$0xff]  ;;  %v6639_v30 = vpack.c.bf16 %v171_v17, %v169_v14 }
  0x25   : > { %11910 = vst [vmem:[#allocation6_spill] sm:$0xff] %v8031_v24  ;;  %v8038_v27 = vld [vmem:[%s7890_s16 + $0x1b0] sm:$0xff]  ;;  %v173_v31 = vld [vmem:[%s7890_s16 + $0xe8] sm:$0xff]  ;;  %v7040_v34 = vpack.i.bf16 %v8031_v24, %v8028_v22  ;;  %v6641_v35 = vpack.c.bf16 %v207_v25, %v205_v20  ;;  %v175_v36 = vld [vmem:[%s7890_s16 + $0xf8] sm:$0xff] }
  0x26   : > { %7021 = vrot.lane.b32.xlu0 %v7020_v60, %s7851_s17  ;;  %6632 = vmatpush3.bf16.msra.mxu1 %v6631_v61  ;;  %v7045_v37 = vpack.i.bf16 %v8038_v27, %v8035_v26  ;;  %v8049_v39 = vld [vmem:[%s7890_s16 + $0x1c0] sm:$0xff]  ;;  %v8052_v40 = vld [vmem:[%s7890_s16 + $0x1d0] sm:$0xff]  ;;  %v6643_v46 = vpack.c.bf16 %v175_v36, %v173_v31  ;;  %v8075_v52 = vld [vmem:[%s11826_s1 + $0x18] sm:$0xff] }
  0x27   : > { %7026 = vrot.lane.b32.xlu1 %v7025_v0, %s7851_s17  ;;  %6634 = vmatprep.subr.bf16.mxu1 %v6633_v1  ;;  %v8055_v42 = vld [vmem:[%s7890_s16 + $0x1e0] sm:$0xff]  ;;  %v8058_v43 = vld [vmem:[%s7890_s16 + $0x1f0] sm:$0xff]  ;;  %v7050_v47 = vpack.i.bf16 %v8052_v40, %v8049_v39  ;;  %v8090_v54 = vld [vmem:[%s11826_s1 + $0x28] sm:$0xff] }
  0x28   : > { %v7055_v48 = vpack.i.bf16 %v8058_v43, %v8055_v42  ;;  %v8069_v49 = vld [vmem:[%s11826_s1] sm:$0xff]  ;;  %v8083_v53 = vld [vmem:[%s11826_s1 + $0x10] sm:$0xff]  ;;  %v8106_v58 = vld [vmem:[%s11826_s1 + $0x38] sm:$0xff] }
  0x29   : > { %v8099_v55 = vld [vmem:[%s11826_s1 + $0x20] sm:$0xff]  ;;  %v8115_v59 = vld [vmem:[%s11826_s1 + $0x30] sm:$0xff]  ;;  %v8122_v60 = vld [vmem:[%s11826_s1 + $0x48] sm:$0xff] }
  0x2a   : > { %6636 = vmatpush3.bf16.msra.mxu1 %v6635_v12  ;;  %7031 = vrot.lane.b32.xlu0 %v7030_v13, %s7851_s17  ;;  %v8131_v61 = vld [vmem:[%s11826_s1 + $0x40] sm:$0xff]  ;;  %v8138_v62 = vld [vmem:[%s11826_s1 + $0x58] sm:$0xff]  ;;  %v8147_v63 = vld [vmem:[%s11826_s1 + $0x50] sm:$0xff] }
  0x2b   : > { %6638 = vmatprep.subr.bf16.mxu1 %v6637_v18  ;;  %7036 = vrot.lane.b32.xlu1 %v7035_v19, %s7851_s17  ;;  %v8154_v0 = vld [vmem:[%s11826_s1 + $0x68] sm:$0xff]  ;;  %v8163_v1 = vld [vmem:[%s11826_s1 + $0x60] sm:$0xff]  ;;  %v8170_v2 = vld [vmem:[%s11826_s1 + $0x78] sm:$0xff] }
  0x2c   : > { %11911 = vst [vmem:[#allocation7_spill] sm:$0xff] %v8170_v2  ;;  %v8179_v7 = vld [vmem:[%s11826_s1 + $0x70] sm:$0xff]  ;;  %v8186_v12 = vld [vmem:[%s11826_s1 + $0x88] sm:$0xff]  ;;  %v8195_v13 = vld [vmem:[%s11826_s1 + $0x80] sm:$0xff] }
  0x2d   : > { %11912 = vst [vmem:[#allocation8_spill] sm:$0xff] %v8179_v7  ;;  %11913 = vst [vmem:[#allocation9_spill] sm:$0xff] %v8186_v12  ;;  %v8202_v14 = vld [vmem:[%s11826_s1 + $0x98] sm:$0xff]  ;;  %v8211_v17 = vld [vmem:[%s11826_s1 + $0x90] sm:$0xff] }
  0x2e   : > { %6640 = vmatpush3.bf16.msra.mxu1 %v6639_v30  ;;  %7041 = vrot.lane.b32.xlu0 %v7040_v34, %s7851_s17  ;;  %11914 = vst [vmem:[#allocation10_spill] sm:$0xff] %v8195_v13  ;;  %11915 = vst [vmem:[#allocation11_spill] sm:$0xff] %v8202_v14  ;;  %v8218_v18 = vld [vmem:[%s11826_s1 + $0xa8] sm:$0xff]  ;;  %v8227_v19 = vld [vmem:[%s11826_s1 + $0xa0] sm:$0xff] }
  0x2f   : > { %6642 = vmatprep.subr.bf16.mxu1 %v6641_v35  ;;  %7046 = vrot.lane.b32.xlu1 %v7045_v37, %s7851_s17  ;;  %11916 = vst [vmem:[#allocation12_spill] sm:$0xff] %v8211_v17  ;;  %11917 = vst [vmem:[#allocation13_spill] sm:$0xff] %v8218_v18  ;;  %v8234_v20 = vld [vmem:[%s11826_s1 + $0xb8] sm:$0xff]  ;;  %v8243_v25 = vld [vmem:[%s11826_s1 + $0xb0] sm:$0xff] }
  0x30   : > { %11918 = vst [vmem:[#allocation14_spill] sm:$0xff] %v8227_v19  ;;  %11919 = vst [vmem:[#allocation15_spill] sm:$0xff] %v8234_v20  ;;  %v8250_v30 = vld [vmem:[%s11826_s1 + $0xc8] sm:$0xff]  ;;  %v8259_v31 = vld [vmem:[%s11826_s1 + $0xc0] sm:$0xff] }
  0x31   : > { %11920 = vst [vmem:[#allocation16_spill] sm:$0xff] %v8243_v25  ;;  %11921 = vst [vmem:[#allocation17_spill] sm:$0xff] %v8250_v30  ;;  %v8266_v34 = vld [vmem:[%s11826_s1 + $0xd8] sm:$0xff]  ;;  %v8275_v35 = vld [vmem:[%s11826_s1 + $0xd0] sm:$0xff] }
  0x32   : > { %6644 = vmatpush3.bf16.msra.mxu1 %v6643_v46  ;;  %7051 = vrot.lane.b32.xlu0 %v7050_v47, %s7851_s17  ;;  %11922 = vst [vmem:[#allocation18_spill] sm:$0xff] %v8259_v31  ;;  %11923 = vst [vmem:[#allocation19_spill] sm:$0xff] %v8266_v34  ;;  %v8282_v36 = vld [vmem:[%s11826_s1 + $0xe8] sm:$0xff]  ;;  %v8291_v37 = vld [vmem:[%s11826_s1 + $0xe0] sm:$0xff] }
  0x33   : > { %7056 = vrot.lane.b32.xlu1 %v7055_v48, %s7851_s17  ;;  %11924 = vst [vmem:[#allocation20_spill] sm:$0xff] %v8275_v35  ;;  %11925 = vst [vmem:[#allocation21_spill] sm:$0xff] %v8282_v36  ;;  %v8298_v46 = vld [vmem:[%s11826_s1 + $0xf8] sm:$0xff]  ;;  %v8307_v47 = vld [vmem:[%s11826_s1 + $0xf0] sm:$0xff] }
  0x34   : > { %11926 = vst [vmem:[#allocation22_spill] sm:$0xff] %v8291_v37  ;;  %11927 = vst [vmem:[#allocation23_spill] sm:$0xff] %v8298_v46 }
  0x35   : > { %578 = vmatmul.mubr.f32.vlgmr.msra.gmra.mrb[0].mxu1 %v8069_v49  ;;  %11928 = vst [vmem:[#allocation24_spill] sm:$0xff] %v8307_v47 }
  0x36   : > { %582 = vmatprep.mubr.f32.mxu1 %v8075_v52  ;;  %1546 = vrot.lane.b32.xlu0 %v7898_v5, %s7852_s24 }
  0x37   : > { %1544 = vrot.lane.b32.xlu1 %v7895_v3, %s7852_s24 }
  0x39   : > { %583 = vmatmul.mubr.f32.gmra.mrb[2].mxu1 %v8083_v53 }
  0x3a   : > { %587 = vmatprep.mubr.f32.mxu1 %v8090_v54  ;;  %1552 = vrot.lane.b32.xlu0 %v7905_v10, %s7852_s24 }
  0x3b   : > { %1548 = vrot.lane.b32.xlu1 %v7915_v15, %s7852_s24 }
  0x3d   : > { %588 = vmatmul.mubr.f32.gmra.mrb[4].mxu1 %v8099_v55 }
  0x3e   : > { %592 = vmatprep.mubr.f32.mxu1 %v8106_v58  ;;  %1556 = vrot.lane.b32.xlu0 %v7926_v21, %s7852_s24 }
  0x3f   : > { %1550 = vrot.lane.b32.xlu1 %v7918_v16, %s7852_s24 }
  0x41   : > { %593 = vmatmul.mubr.f32.gmra.mrb[6].mxu1 %v8115_v59 }
  0x42   : > { %597 = vmatprep.mubr.f32.mxu1 %v8122_v60  ;;  %1560 = vrot.lane.b32.xlu0 %v7937_v28, %s7852_s24 }
  0x43   : > { %1554 = vrot.lane.b32.xlu1 %v7908_v11, %s7852_s24 }
  0x45   : > { %598 = vmatmul.mubr.f32.gmra.mrb[8].mxu1 %v8131_v61 }
  0x46   : > { %602 = vmatprep.mubr.f32.mxu1 %v8138_v62  ;;  %1564 = vrot.lane.b32.xlu0 %v7945_v32, %s7852_s24 }
  0x47   : > { %1558 = vrot.lane.b32.xlu1 %v7930_v23, %s7852_s24 }
  0x49   : > { %603 = vmatmul.mubr.f32.gmra.mrb[10].mxu1 %v8147_v63 }
  0x4a   : > { %607 = vmatprep.mubr.f32.mxu1 %v8154_v0  ;;  %1568 = vrot.lane.b32.xlu0 %v7956_v38, %s7852_s24 }
  0x4b   : > { %1562 = vrot.lane.b32.xlu1 %v7940_v29, %s7852_s24 }
  0x4d   : > { %608 = vmatmul.mubr.f32.gmra.mrb[12].mxu1 %v8163_v1 }
  0x4e   : > { %612 = vmatprep.mubr.f32.mxu1 %v8170_v2  ;;  %1572 = vrot.lane.b32.xlu0 %v7967_v44, %s7852_s24 }
  0x4f   : > { %1566 = vrot.lane.b32.xlu1 %v7948_v33, %s7852_s24 }
  0x51   : > { %613 = vmatmul.mubr.f32.gmra.mrb[14].mxu1 %v8179_v7 }
  0x52   : > { %617 = vmatprep.mubr.f32.mxu1 %v8186_v12  ;;  %1576 = vrot.lane.b32.xlu0 %v7978_v50, %s7852_s24 }
  0x53   : > { %1570 = vrot.lane.b32.xlu1 %v7962_v41, %s7852_s24 }
  0x55   : > { %618 = vmatmul.mubr.f32.gmra.mrb[16].mxu1 %v8195_v13 }
  0x56   : > { %622 = vmatprep.mubr.f32.mxu1 %v8202_v14  ;;  %1580 = vrot.lane.b32.xlu0 %v7989_v56, %s7852_s24 }
  0x57   : > { %1574 = vrot.lane.b32.xlu1 %v7970_v45, %s7852_s24 }
  0x59   : > { %623 = vmatmul.mubr.f32.gmra.mrb[18].mxu1 %v8211_v17 }
  0x5a   : > { %627 = vmatprep.mubr.f32.mxu1 %v8218_v18  ;;  %1584 = vrot.lane.b32.xlu0 %v8006_v4, %s7852_s24 }
  0x5b   : > { %1578 = vrot.lane.b32.xlu1 %v7981_v51, %s7852_s24 }
  0x5d   : > { %628 = vmatmul.mubr.f32.gmra.mrb[20].mxu1 %v8227_v19 }
  0x5e   : > { %632 = vmatprep.mubr.f32.mxu1 %v8234_v20  ;;  %1588 = vrot.lane.b32.xlu0 %v8013_v8, %s7852_s24 }
  0x5f   : > { %1582 = vrot.lane.b32.xlu1 %v7992_v57, %s7852_s24 }
  0x61   : > { %633 = vmatmul.mubr.f32.gmra.mrb[22].mxu1 %v8243_v25 }
  0x62   : > { %637 = vmatprep.mubr.f32.mxu1 %v8250_v30  ;;  %1592 = vrot.lane.b32.xlu0 %v8028_v22, %s7852_s24 }
  0x63   : > { %1586 = vrot.lane.b32.xlu1 %v8009_v6, %s7852_s24 }
  0x65   : > { %638 = vmatmul.mubr.f32.gmra.mrb[24].mxu1 %v8259_v31 }
  0x66   : > { %642 = vmatprep.mubr.f32.mxu1 %v8266_v34  ;;  %1596 = vrot.lane.b32.xlu0 %v8035_v26, %s7852_s24 }
  0x67   : > { %1590 = vrot.lane.b32.xlu1 %v8016_v9, %s7852_s24 }
  0x69   : > { %643 = vmatmul.mubr.f32.gmra.mrb[26].mxu1 %v8275_v35 }
  0x6a   : > { %647 = vmatprep.mubr.f32.mxu1 %v8282_v36  ;;  %1600 = vrot.lane.b32.xlu0 %v8049_v39, %s7852_s24 }
  0x6b   : > { %1594 = vrot.lane.b32.xlu1 %v8031_v24, %s7852_s24 }
  0x6d   : > { %648 = vmatmul.mubr.f32.gmra.mrb[28].mxu1 %v8291_v37 }
  0x6e   : > { %652 = vmatprep.mubr.f32.mxu1 %v8298_v46  ;;  %1604 = vrot.lane.b32.xlu0 %v8055_v42, %s7852_s24 }
  0x6f   : > { %1598 = vrot.lane.b32.xlu1 %v8038_v27, %s7852_s24 }
  0x71   : > { %653 = vmatmul.mubr.f32.gmra.mrb[30].mxu1 %v8307_v47 }
  0x72   : > { %2574 = vrot.lane.b32.xlu0 %v7915_v15, %s7853_s5 }
  0x73   : > { %1602 = vrot.lane.b32.xlu1 %v8052_v40, %s7852_s24 }
  0x76   : > { %2588 = vrot.lane.b32.xlu0 %v7940_v29, %s7853_s5 }
  0x77   : > { %1606 = vrot.lane.b32.xlu1 %v8058_v43, %s7852_s24 }
  0x7a   : > { %2592 = vrot.lane.b32.xlu0 %v7948_v33, %s7853_s5 }
  0x7b   : > { %2570 = vrot.lane.b32.xlu1 %v7895_v3, %s7853_s5 }
  0x7e   : > { %2594 = vrot.lane.b32.xlu0 %v7956_v38, %s7853_s5 }
  0x7f   : > { %2572 = vrot.lane.b32.xlu1 %v7898_v5, %s7853_s5 }
  0x82   : > { %2598 = vrot.lane.b32.xlu0 %v7967_v44, %s7853_s5 }
  0x83   : > { %2576 = vrot.lane.b32.xlu1 %v7918_v16, %s7853_s5 }
  0x86   : > { %2604 = vrot.lane.b32.xlu0 %v7981_v51, %s7853_s5 }
  0x87   : > { %2578 = vrot.lane.b32.xlu1 %v7905_v10, %s7853_s5 }
  0x88   : > { %v6982_v48 = vpop.permute.xlu0 %6981 }
  0x89   : > { %v6992_v47 = vpop.permute.xlu1 %6991  ;;  %v6984_v30 = vunpack.i.h.bf16 %v6982_v48  ;;  %v6983_v25 = vunpack.i.l.bf16 %v6982_v48 }
  0x8a   : > { %2608 = vrot.lane.b32.xlu0 %v7992_v57, %s7853_s5 }
  0x8b   : > { %2580 = vrot.lane.b32.xlu1 %v7908_v11, %s7853_s5  ;;  %v6583_v33 = vpack.c.bf16 %v6984_v30, %v6983_v25 }
  0x8c   : > { %v6987_v46 = vpop.permute.xlu0 %6986 }
  0x8d   : > { %v8342_v37 = vpop.permute.xlu1 %6996  ;;  %v6989_v13 = vunpack.i.h.bf16 %v6987_v46 }
  0x8e   : > { %2610 = vrot.lane.b32.xlu0 %v8006_v4, %s7853_s5 }
  0x8f   : > { %2582 = vrot.lane.b32.xlu1 %v7926_v21, %s7853_s5 }
  0x90   : > { %v8348_v36 = vpop.permute.xlu0 %7001 }
  0x91   : > { %v8350_v35 = vpop.permute.xlu1 %7006 }
  0x92   : > { %2614 = vrot.lane.b32.xlu0 %v8013_v8, %s7853_s5 }
  0x93   : > { %2584 = vrot.lane.b32.xlu1 %v7930_v23, %s7853_s5 }
  0x94   : > { %v8356_v34 = vpop.permute.xlu0 %7011 }
  0x95   : > { %v8358_v31 = vpop.permute.xlu1 %7016 }
  0x96   : > { %2620 = vrot.lane.b32.xlu0 %v8031_v24, %s7853_s5  ;;  %v6988_v24 = vunpack.i.l.bf16 %v6987_v46  ;;  %v6993_v46 = vunpack.i.l.bf16 %v6992_v47 }
  0x97   : > { %2586 = vrot.lane.b32.xlu1 %v7937_v28, %s7853_s5 }
  0x98   : > { %v7022_v57 = vpop.permute.xlu0 %7021  ;;  %v6587_v25 = vpack.c.bf16 %v6989_v13, %v6988_v24 }
  0x99   : > { %v7027_v51 = vpop.permute.xlu1 %7026  ;;  %v7024_v20 = vunpack.i.h.bf16 %v7022_v57  ;;  %v7023_v19 = vunpack.i.l.bf16 %v7022_v57 }
  0x9a   : > { %v7029_v18 = vunpack.i.h.bf16 %v7027_v51  ;;  %v7028_v17 = vunpack.i.l.bf16 %v7027_v51  ;;  %2624 = vrot.lane.b32.xlu0 %v8038_v27, %s7853_s5 }
  0x9b   : > { %v6581_v14 = vpack.c.bf16 %v7024_v20, %v7023_v19  ;;  %2590 = vrot.lane.b32.xlu1 %v7945_v32, %s7853_s5  ;;  %v6994_v20 = vunpack.i.h.bf16 %v6992_v47 }
  0x9c   : > { %v7032_v12 = vpop.permute.xlu0 %7031  ;;  %v6585_v7 = vpack.c.bf16 %v7029_v18, %v7028_v17 }
  0x9d   : > { %6582 = vmatprep.subr.bf16.mxu0 %v6581_v14  ;;  %v7034_v29 = vunpack.i.h.bf16 %v7032_v12  ;;  %v7033_v48 = vunpack.i.l.bf16 %v7032_v12  ;;  %v7037_v2 = vpop.permute.xlu1 %7036 }
  0x9e   : > { %6584 = vmatpush3.bf16.msra.mxu0 %v6583_v33  ;;  %2626 = vrot.lane.b32.xlu0 %v8049_v39, %s7853_s5  ;;  %v7039_v51 = vunpack.i.h.bf16 %v7037_v2  ;;  %v7038_v57 = vunpack.i.l.bf16 %v7037_v2  ;;  %v6998_v2 = vunpack.i.l.bf16 %v8342_v37 }
  0x9f   : > { %6586 = vmatprep.subr.bf16.mxu0 %v6585_v7  ;;  %v6589_v19 = vpack.c.bf16 %v7034_v29, %v7033_v48  ;;  %2596 = vrot.lane.b32.xlu1 %v7962_v41, %s7853_s5  ;;  %v6999_v29 = vunpack.i.h.bf16 %v8342_v37  ;;  %v6591_v7 = vpack.c.bf16 %v6994_v20, %v6993_v46  ;;  %v7004_v48 = vunpack.i.h.bf16 %v8348_v36 }
  0xa0   : > { %v7042_v30 = vpop.permute.xlu0 %7041  ;;  %v6593_v14 = vpack.c.bf16 %v7039_v51, %v7038_v57  ;;  %v7003_v51 = vunpack.i.l.bf16 %v8348_v36 }
  0xa1   : > { %v7047_v17 = vpop.permute.xlu1 %7046  ;;  %v7044_v33 = vunpack.i.h.bf16 %v7042_v30  ;;  %v7043_v12 = vunpack.i.l.bf16 %v7042_v30  ;;  %v6595_v57 = vpack.c.bf16 %v6999_v29, %v6998_v2  ;;  %v7009_v30 = vunpack.i.h.bf16 %v8350_v35 }
  0xa2   : > { %6588 = vmatpush3.bf16.msra.mxu0 %v6587_v25  ;;  %2630 = vrot.lane.b32.xlu0 %v8055_v42, %s7853_s5  ;;  %v7049_v24 = vunpack.i.h.bf16 %v7047_v17  ;;  %v7048_v13 = vunpack.i.l.bf16 %v7047_v17  ;;  %v7008_v17 = vunpack.i.l.bf16 %v8350_v35  ;;  %v6599_v36 = vpack.c.bf16 %v7004_v48, %v7003_v51  ;;  %v11945_v48 = vld [vmem:[#allocation19_spill] sm:$0xff] }
  0xa3   : > { %6590 = vmatprep.subr.bf16.mxu0 %v6589_v19  ;;  %2600 = vrot.lane.b32.xlu1 %v7970_v45, %s7853_s5  ;;  %v6597_v47 = vpack.c.bf16 %v7044_v33, %v7043_v12  ;;  %v7014_v29 = vunpack.i.h.bf16 %v8356_v34  ;;  %v7013_v2 = vunpack.i.l.bf16 %v8356_v34 }
  0xa4   : > { %v7052_v37 = vpop.permute.xlu0 %7051  ;;  %v6601_v25 = vpack.c.bf16 %v7049_v24, %v7048_v13  ;;  %v7018_v24 = vunpack.i.l.bf16 %v8358_v31 }
  0xa5   : > { %v7057_v18 = vpop.permute.xlu1 %7056  ;;  %v7054_v20 = vunpack.i.h.bf16 %v7052_v37  ;;  %v7053_v46 = vunpack.i.l.bf16 %v7052_v37  ;;  %v6607_v13 = vpack.c.bf16 %v7014_v29, %v7013_v2 }
  0xa6   : > { %6592 = vmatpush3.bf16.msra.mxu0 %v6591_v7  ;;  %3580 = vrot.lane.b32.xlu0 %v7895_v3, %s7854_s6  ;;  %v7058_v12 = vunpack.i.l.bf16 %v7057_v18  ;;  %v6603_v7 = vpack.c.bf16 %v7009_v30, %v7008_v17  ;;  %v11949_v17 = vld [vmem:[#allocation23_spill] sm:$0xff] }
  0xa7   : > { %6594 = vmatprep.subr.bf16.mxu0 %v6593_v14  ;;  %2602 = vrot.lane.b32.xlu1 %v7978_v50, %s7853_s5  ;;  %v6605_v14 = vpack.c.bf16 %v7054_v20, %v7053_v46  ;;  %v11947_v20 = vld [vmem:[#allocation21_spill] sm:$0xff] }
  0xa9   : > { %v8384_v19 = vpop.permute.xlu1 %1544 }
  0xaa   : > { %6596 = vmatpush3.bf16.msra.mxu0 %v6595_v57  ;;  %3584 = vrot.lane.b32.xlu0 %v7915_v15, %s7854_s6  ;;  %v7059_v15 = vunpack.i.h.bf16 %v7057_v18  ;;  %v7019_v18 = vunpack.i.h.bf16 %v8358_v31  ;;  %v11946_v57 = vld [vmem:[#allocation20_spill] sm:$0xff] }
  0xab   : > { %6598 = vmatprep.subr.bf16.mxu0 %v6597_v47  ;;  %2606 = vrot.lane.b32.xlu1 %v7989_v56, %s7853_s5 }
  0xad   : > { %v8392_v33 = vpop.permute.xlu1 %1548 }
  0xae   : > { %6600 = vmatpush3.bf16.msra.mxu0 %v6599_v36  ;;  %3588 = vrot.lane.b32.xlu0 %v7905_v10, %s7854_s6  ;;  %v6609_v10 = vpack.c.bf16 %v7059_v15, %v7058_v12  ;;  %v11950_v36 = vld [vmem:[#allocation6_spill] sm:$0xff] }
  0xaf   : > { %6602 = vmatprep.subr.bf16.mxu0 %v6601_v25  ;;  %2612 = vrot.lane.b32.xlu1 %v8009_v6, %s7853_s5  ;;  %v11948_v25 = vld [vmem:[#allocation22_spill] sm:$0xff] }
  0xb1   : > { %v8400_v35 = vpop.permute.xlu1 %1550 }
  0xb2   : > { %6604 = vmatpush3.bf16.msra.mxu0 %v6603_v7  ;;  %3592 = vrot.lane.b32.xlu0 %v7926_v21, %s7854_s6  ;;  %v6611_v21 = vpack.c.bf16 %v7019_v18, %v7018_v24 }
  0xb3   : > { %6606 = vmatprep.subr.bf16.mxu0 %v6605_v14  ;;  %2616 = vrot.lane.b32.xlu1 %v8016_v9, %s7853_s5 }
  0xb5   : > { %v8408_v47 = vpop.permute.xlu1 %1554 }
  0xb6   : > { %6608 = vmatpush3.bf16.msra.mxu0 %v6607_v13  ;;  %3596 = vrot.lane.b32.xlu0 %v7937_v28, %s7854_s6 }
  0xb7   : > { %6610 = vmatprep.subr.bf16.mxu0 %v6609_v10  ;;  %2618 = vrot.lane.b32.xlu1 %v8028_v22, %s7853_s5 }
  0xb9   : > { %v8414_v34 = vpop.permute.xlu1 %1558 }
  0xba   : > { %6612 = vmatpush3.bf16.msra.mxu0 %v6611_v21  ;;  %3600 = vrot.lane.b32.xlu0 %v7945_v32, %s7854_s6 }
  0xbb   : > { %2622 = vrot.lane.b32.xlu1 %v8035_v26, %s7853_s5 }
  0xbd   : > { %433 = vmatmul.mubr.f32.vlgmr.msra.gmra.mrb[0].mxu0 %v8069_v49  ;;  %v8421_v31 = vpop.permute.xlu1 %1562  ;;  %v8484_v49 = vpop.permute.xlu0 %1546 }
  0xbe   : > { %437 = vmatprep.mubr.f32.mxu0 %v8075_v52  ;;  %3604 = vrot.lane.b32.xlu0 %v7956_v38, %s7854_s6  ;;  %v11934_v52 = vld [vmem:[#allocation10_spill] sm:$0xff] }
  0xbf   : > { %2628 = vrot.lane.b32.xlu1 %v8052_v40, %s7853_s5 }
  0xc1   : > { %438 = vmatmul.mubr.f32.gmra.mrb[2].mxu0 %v8083_v53  ;;  %v8429_v28 = vpop.permute.xlu1 %1566  ;;  %v11935_v53 = vld [vmem:[#allocation11_spill] sm:$0xff] }
  0xc2   : > { %442 = vmatprep.mubr.f32.mxu0 %v8090_v54  ;;  %3608 = vrot.lane.b32.xlu0 %v7967_v44, %s7854_s6  ;;  %v11936_v54 = vld [vmem:[#allocation12_spill] sm:$0xff] }
  0xc3   : > { %2632 = vrot.lane.b32.xlu1 %v8058_v43, %s7853_s5 }
  0xc5   : > { %443 = vmatmul.mubr.f32.gmra.mrb[4].mxu0 %v8099_v55  ;;  %v8437_v32 = vpop.permute.xlu1 %1570  ;;  %v11937_v55 = vld [vmem:[#allocation13_spill] sm:$0xff] }
  0xc6   : > { %447 = vmatprep.mubr.f32.mxu0 %v8106_v58  ;;  %3612 = vrot.lane.b32.xlu0 %v7978_v50, %s7854_s6  ;;  %v11929_v50 = vld [vmem:[#allocation7_spill] sm:$0xff]  ;;  %v8498_v58 = vpop.permute.xlu0 %1552 }
  0xc7   : > { %3582 = vrot.lane.b32.xlu1 %v7898_v5, %s7854_s6 }
  0xc9   : > { %448 = vmatmul.mubr.f32.gmra.mrb[6].mxu0 %v8115_v59  ;;  %v8445_v38 = vpop.permute.xlu1 %1574  ;;  %v11938_v59 = vld [vmem:[#allocation14_spill] sm:$0xff] }
  0xca   : > { %452 = vmatprep.mubr.f32.mxu0 %v8122_v60  ;;  %3616 = vrot.lane.b32.xlu0 %v7989_v56, %s7854_s6  ;;  %v11931_v56 = vld [vmem:[#allocation8_spill] sm:$0xff]  ;;  %v11939_v60 = vld [vmem:[#allocation15_spill] sm:$0xff] }
  0xcb   : > { %3586 = vrot.lane.b32.xlu1 %v7918_v16, %s7854_s6 }
  0xcd   : > { %453 = vmatmul.mubr.f32.gmra.mrb[8].mxu0 %v8131_v61  ;;  %v8453_v44 = vpop.permute.xlu1 %1578  ;;  %v8510_v61 = vpop.permute.xlu0 %1556 }
  0xce   : > { %457 = vmatprep.mubr.f32.mxu0 %v8138_v62  ;;  %3620 = vrot.lane.b32.xlu0 %v8006_v4, %s7854_s6  ;;  %v11941_v62 = vld [vmem:[#allocation16_spill] sm:$0xff] }
  0xcf   : > { %3590 = vrot.lane.b32.xlu1 %v7908_v11, %s7854_s6  ;;  %v11930_v11 = vld [vmem:[#allocation2_spill] sm:$0xff] }
  0xd1   : > { %458 = vmatmul.mubr.f32.gmra.mrb[10].mxu0 %v8147_v63  ;;  %v8461_v5 = vpop.permute.xlu1 %1582  ;;  %v8522_v51 = vpop.permute.xlu0 %1560 }
  0xd2   : > { %462 = vmatprep.mubr.f32.mxu0 %v8154_v0  ;;  %3624 = vrot.lane.b32.xlu0 %v8013_v8, %s7854_s6  ;;  %v11932_v8 = vld [vmem:[#allocation9_spill] sm:$0xff] }
  0xd3   : > { %3594 = vrot.lane.b32.xlu1 %v7930_v23, %s7854_s6  ;;  %v11933_v23 = vld [vmem:[#allocation3_spill] sm:$0xff]  ;;  %v11942_v0 = vld [vmem:[#allocation17_spill] sm:$0xff] }
  0xd5   : > { %463 = vmatmul.mubr.f32.gmra.mrb[12].mxu0 %v8163_v1  ;;  %v8469_v16 = vpop.permute.xlu1 %1586  ;;  %v8532_v46 = vpop.permute.xlu0 %1564 }
  0xd6   : > { %467 = vmatprep.mubr.f32.mxu0 %v11929_v50  ;;  %3628 = vrot.lane.b32.xlu0 %v8028_v22, %s7854_s6 }
  0xd7   : > { %3598 = vrot.lane.b32.xlu1 %v11930_v11, %s7854_s6 }
  0xd9   : > { %468 = vmatmul.mubr.f32.gmra.mrb[14].mxu0 %v11931_v56  ;;  %v8477_v4 = vpop.permute.xlu1 %1590  ;;  %v8543_v12 = vpop.permute.xlu0 %1568 }
  0xda   : > { %472 = vmatprep.mubr.f32.mxu0 %v11932_v8  ;;  %3632 = vrot.lane.b32.xlu0 %v8035_v26, %s7854_s6 }
  0xdb   : > { %3602 = vrot.lane.b32.xlu1 %v11933_v23, %s7854_s6 }
  0xdd   : > { %473 = vmatmul.mubr.f32.gmra.mrb[16].mxu0 %v11934_v52  ;;  %v8487_v22 = vpop.permute.xlu1 %1594  ;;  %v8551_v14 = vpop.permute.xlu0 %1572 }
  0xde   : > { %477 = vmatprep.mubr.f32.mxu0 %v11935_v53  ;;  %3636 = vrot.lane.b32.xlu0 %v8049_v39, %s7854_s6 }
  0xdf   : > { %3606 = vrot.lane.b32.xlu1 %v7962_v41, %s7854_s6  ;;  %v11940_v41 = vld [vmem:[#allocation4_spill] sm:$0xff] }
  0xe1   : > { %478 = vmatmul.mubr.f32.gmra.mrb[18].mxu0 %v11936_v54  ;;  %v8495_v26 = vpop.permute.xlu1 %1598  ;;  %v8559_v7 = vpop.permute.xlu0 %1576 }
  0xe2   : > { %482 = vmatprep.mubr.f32.mxu0 %v11937_v55  ;;  %3640 = vrot.lane.b32.xlu0 %v8055_v42, %s7854_s6  ;;  %v11943_v42 = vld [vmem:[#allocation5_spill] sm:$0xff] }
  0xe3   : > { %3610 = vrot.lane.b32.xlu1 %v7970_v45, %s7854_s6  ;;  %v11944_v45 = vld [vmem:[#allocation18_spill] sm:$0xff] }
  0xe5   : > { %483 = vmatmul.mubr.f32.gmra.mrb[20].mxu0 %v11938_v59  ;;  %v8505_v39 = vpop.permute.xlu1 %1602  ;;  %v8563_v13 = vpop.permute.xlu0 %1580 }
  0xe6   : > { %487 = vmatprep.mubr.f32.mxu0 %v11939_v60 }
  0xe7   : > { %3614 = vrot.lane.b32.xlu1 %v11940_v41, %s7854_s6 }
  0xe9   : > { %488 = vmatmul.mubr.f32.gmra.mrb[22].mxu0 %v11941_v62  ;;  %v8513_v63 = vpop.permute.xlu1 %1606  ;;  %v8571_v53 = vpop.permute.xlu0 %1584 }
  0xea   : > { %492 = vmatprep.mubr.f32.mxu0 %v11942_v0 }
  0xeb   : > { %3618 = vrot.lane.b32.xlu1 %v11943_v42, %s7854_s6 }
  0xed   : > { %493 = vmatmul.mubr.f32.gmra.mrb[24].mxu0 %v11944_v45  ;;  %v8519_v1 = vpop.permute.xlu1 %2570  ;;  %v8577_v62 = vpop.permute.xlu0 %1588 }
  0xee   : > { %497 = vmatprep.mubr.f32.mxu0 %v11945_v48 }
  0xef   : > { %3622 = vrot.lane.b32.xlu1 %v8009_v6, %s7854_s6  ;;  %v11951_v6 = vld [vmem:[#allocation24_spill] sm:$0xff] }
  0xf1   : > { %498 = vmatmul.mubr.f32.gmra.mrb[26].mxu0 %v11946_v57  ;;  %v8527_v37 = vpop.permute.xlu1 %2572 }
  0xf2   : > { %502 = vmatprep.mubr.f32.mxu0 %v11947_v20 }
  0xf3   : > { %3626 = vrot.lane.b32.xlu1 %v8016_v9, %s7854_s6 }
  0xf5   : > { %503 = vmatmul.mubr.f32.gmra.mrb[28].mxu0 %v11948_v25  ;;  %v8535_v30 = vpop.permute.xlu1 %2576 }
  0xf6   : > { %507 = vmatprep.mubr.f32.mxu0 %v11949_v17 }
  0xf7   : > { %3630 = vrot.lane.b32.xlu1 %v11950_v36, %s7854_s6 }
  0xf9   : > { %508 = vmatmul.mubr.f32.gmra.mrb[30].mxu0 %v11951_v6  ;;  %v8541_v15 = vpop.permute.xlu1 %2578  ;;  %v8589_v6 = vpop.permute.xlu0 %1592 }
  0xfa   : > { %5973 = vmatprep.mubr.msk.f32.mxu0 %vm661_vm0, %v7895_v3 }
  0xfb   : > { %3634 = vrot.lane.b32.xlu1 %v8038_v27, %s7854_s6 }
  0xfd   : > { %v8547_v9 = vpop.permute.xlu1 %2580 }
  0xff   : > { %3638 = vrot.lane.b32.xlu1 %v8052_v40, %s7854_s6 }
 0x101   : > { %v8553_v29 = vpop.permute.xlu1 %2582 }
 0x103   : > { %3642 = vrot.lane.b32.xlu1 %v8058_v43, %s7854_s6 }
 0x105   : > { %v8557_v2 = vpop.permute.xlu1 %2584 }
 0x108   : > { %v5509_v10 = vpop.f32.mrb[0].mxu1 }
 0x109   : > { %v5510_v18 = vpop.f32.mrb[1].mxu1  ;;  %v8561_v24 = vpop.permute.xlu1 %2586 }
 0x10a   : > { %v5511_v27 = vadd.f32 %v5510_v18, %v5509_v10 }
 0x10c   : > { %v5512_v21 = vpop.f32.mrb[2].mxu1 }
 0x10d   : > { %v5513_v40 = vpop.f32.mrb[3].mxu1  ;;  %v8565_v50 = vpop.permute.xlu1 %2590 }
 0x10e   : > { %11952 = vst [vmem:[#allocation7_spill] sm:$0xff] %v8565_v50  ;;  %v5514_v11 = vadd.f32 %v5513_v40, %v5512_v21 }
 0x110   : > { %v5515_v56 = vpop.f32.mrb[4].mxu1  ;;  %v8567_v8 = vpack.i.bf16 %v5514_v11, %v5511_v27  ;;  %v6693_v43 = vpack.c.bf16 %v5514_v11, %v5511_v27 }
 0x111   : > { %v5516_v23 = vpop.f32.mrb[5].mxu1  ;;  %v8569_v52 = vpop.permute.xlu1 %2596 }
 0x112   : > { %11953 = vst [vmem:[#allocation2_spill] sm:$0xff] %v8569_v52  ;;  %v5517_v54 = vadd.f32 %v5516_v23, %v5515_v56  ;;  %7061 = vrot.lane.b32.xlu1 %v8567_v8, %s7852_s24  ;;  %6694 = vmatprep.subr.bf16.mxu1 %v6693_v43  ;;  %v8599_v56 = vpop.permute.xlu0 %1596 }
 0x113   : > { %6696 = vmatpush3.bf16.msra.mxu1 %v6693_v43 }
 0x114   : > { %v5518_v55 = vpop.f32.mrb[6].mxu1 }
 0x115   : > { %v5519_v59 = vpop.f32.mrb[7].mxu1  ;;  %v8575_v60 = vpop.permute.xlu1 %2600 }
 0x116   : > { %11954 = vst [vmem:[#allocation8_spill] sm:$0xff] %v8575_v60  ;;  %v5520_v41 = vadd.f32 %v5519_v59, %v5518_v55 }
 0x118   : > { %v5521_v0 = vpop.f32.mrb[8].mxu1  ;;  %v8579_v42 = vpack.i.bf16 %v5520_v41, %v5517_v54  ;;  %v6697_v45 = vpack.c.bf16 %v5520_v41, %v5517_v54 }
 0x119   : > { %v5522_v48 = vpop.f32.mrb[9].mxu1  ;;  %v8581_v57 = vpop.permute.xlu1 %2602 }
 0x11a   : > { %11955 = vst [vmem:[#allocation9_spill] sm:$0xff] %v8581_v57  ;;  %v5523_v20 = vadd.f32 %v5522_v48, %v5521_v0  ;;  %7066 = vrot.lane.b32.xlu0 %v8579_v42, %s7852_s24  ;;  %6698 = vmatprep.subr.bf16.mxu1 %v6697_v45 }
 0x11b   : > { %6700 = vmatpush3.bf16.msra.mxu1 %v6697_v45 }
 0x11c   : > { %v5524_v25 = vpop.f32.mrb[10].mxu1 }
 0x11d   : > { %v5525_v17 = vpop.f32.mrb[11].mxu1  ;;  %v8587_v36 = vpop.permute.xlu1 %2606 }
 0x11e   : > { %11956 = vst [vmem:[#allocation3_spill] sm:$0xff] %v8587_v36  ;;  %v5526_v10 = vadd.f32 %v5525_v17, %v5524_v25  ;;  %7071 = vrot.lane.b32.xlu0 %v8567_v8, %s7853_s5 }
 0x120   : > { %v5527_v18 = vpop.f32.mrb[12].mxu1  ;;  %v8593_v27 = vpack.i.bf16 %v5526_v10, %v5523_v20  ;;  %v6701_v3 = vpack.c.bf16 %v5526_v10, %v5523_v20  ;;  %v8607_v20 = vpop.permute.xlu0 %1600 }
 0x121   : > { %v5528_v21 = vpop.f32.mrb[13].mxu1  ;;  %v8595_v40 = vpop.permute.xlu1 %2612 }
 0x122   : > { %11957 = vst [vmem:[#allocation10_spill] sm:$0xff] %v8593_v27  ;;  %11958 = vst [vmem:[#allocation11_spill] sm:$0xff] %v8595_v40  ;;  %v5529_v11 = vadd.f32 %v5528_v21, %v5527_v18  ;;  %7076 = vrot.lane.b32.xlu1 %v8593_v27, %s7852_s24  ;;  %6702 = vmatprep.subr.bf16.mxu1 %v6701_v3 }
 0x123   : > { %6704 = vmatpush3.bf16.msra.mxu1 %v6701_v3 }
 0x124   : > { %v5530_v43 = vpop.f32.mrb[14].mxu1  ;;  %v8615_v21 = vpop.permute.xlu0 %1604 }
 0x125   : > { %v5531_v23 = vpop.f32.mrb[15].mxu1  ;;  %v8601_v54 = vpop.permute.xlu1 %2616 }
 0x126   : > { %11959 = vst [vmem:[#allocation12_spill] sm:$0xff] %v8601_v54  ;;  %v5532_v55 = vadd.f32 %v5531_v23, %v5530_v43 }
 0x128   : > { %v5533_v59 = vpop.f32.mrb[16].mxu1  ;;  %v8603_v41 = vpack.i.bf16 %v5532_v55, %v5529_v11  ;;  %v6705_v0 = vpack.c.bf16 %v5532_v55, %v5529_v11 }
 0x129   : > { %v5534_v45 = vpop.f32.mrb[17].mxu1  ;;  %v8605_v48 = vpop.permute.xlu1 %2618 }
 0x12a   : > { %11960 = vst [vmem:[#allocation13_spill] sm:$0xff] %v8603_v41  ;;  %11961 = vst [vmem:[#allocation14_spill] sm:$0xff] %v8605_v48  ;;  %v5535_v25 = vadd.f32 %v5534_v45, %v5533_v59  ;;  %7101 = vrot.lane.b32.xlu0 %v8603_v41, %s7853_s5  ;;  %7081 = vrot.lane.b32.xlu1 %v8603_v41, %s7852_s24 }
 0x12b   : > { %6706 = vmatprep.subr.bf16.mxu1 %v6705_v0 }
 0x12c   : > { %v5536_v17 = vpop.f32.mrb[18].mxu1  ;;  %6708 = vmatpush3.bf16.msra.mxu1 %v6705_v0 }
 0x12d   : > { %v5537_v10 = vpop.f32.mrb[19].mxu1  ;;  %v8613_v18 = vpop.permute.xlu1 %2622 }
 0x12e   : > { %11962 = vst [vmem:[#allocation15_spill] sm:$0xff] %v8613_v18  ;;  %v5538_v3 = vadd.f32 %v5537_v10, %v5536_v17  ;;  %v8625_v17 = vpop.permute.xlu0 %2574 }
 0x130   : > { %v5539_v11 = vpop.f32.mrb[20].mxu1  ;;  %v8617_v43 = vpack.i.bf16 %v5538_v3, %v5535_v25  ;;  %v6709_v23 = vpack.c.bf16 %v5538_v3, %v5535_v25 }
 0x131   : > { %v5540_v55 = vpop.f32.mrb[21].mxu1  ;;  %v8619_v59 = vpop.permute.xlu1 %2628 }
 0x132   : > { %11963 = vst [vmem:[#allocation4_spill] sm:$0xff] %v8617_v43  ;;  %11964 = vst [vmem:[#allocation16_spill] sm:$0xff] %v8619_v59  ;;  %v5541_v45 = vadd.f32 %v5540_v55, %v5539_v11  ;;  %7086 = vrot.lane.b32.xlu1 %v8617_v43, %s7852_s24  ;;  %6710 = vmatprep.subr.bf16.mxu1 %v6709_v23 }
 0x133   : > { %6712 = vmatpush3.bf16.msra.mxu1 %v6709_v23  ;;  %v8637_v23 = vpop.permute.xlu0 %2588 }
 0x134   : > { %v5542_v0 = vpop.f32.mrb[22].mxu1  ;;  %11968 = vst [vmem:[#allocation19_spill] sm:$0xff] %v8637_v23 }
 0x135   : > { %v5543_v41 = vpop.f32.mrb[23].mxu1  ;;  %v8623_v48 = vpop.permute.xlu1 %2632 }
 0x136   : > { %11965 = vst [vmem:[#allocation17_spill] sm:$0xff] %v8623_v48  ;;  %v5544_v10 = vadd.f32 %v5543_v41, %v5542_v0  ;;  %7091 = vrot.lane.b32.xlu1 %v8579_v42, %s7853_s5 }
 0x137   : > { %v8645_v40 = vpop.permute.xlu0 %2592 }
 0x138   : > { %v5545_v25 = vpop.f32.mrb[24].mxu1  ;;  %v8629_v3 = vpack.i.bf16 %v5544_v10, %v5541_v45  ;;  %v6713_v59 = vpack.c.bf16 %v5544_v10, %v5541_v45  ;;  %11972 = vst [vmem:[#allocation23_spill] sm:$0xff] %v8645_v40 }
 0x139   : > { %v5546_v11 = vpop.f32.mrb[25].mxu1  ;;  %v8631_v55 = vpop.permute.xlu1 %3582 }
 0x13a   : > { %11966 = vst [vmem:[#allocation5_spill] sm:$0xff] %v8629_v3  ;;  %11967 = vst [vmem:[#allocation18_spill] sm:$0xff] %v8631_v55  ;;  %v5547_v18 = vadd.f32 %v5546_v11, %v5545_v25  ;;  %7106 = vrot.lane.b32.xlu0 %v8629_v3, %s7852_s24  ;;  %7096 = vrot.lane.b32.xlu1 %v8593_v27, %s7853_s5 }
 0x13b   : > { %6714 = vmatprep.subr.bf16.mxu1 %v6713_v59 }
 0x13c   : > { %v5548_v41 = vpop.f32.mrb[26].mxu1  ;;  %6716 = vmatpush3.bf16.msra.mxu1 %v6713_v59 }
 0x13d   : > { %v5549_v0 = vpop.f32.mrb[27].mxu1  ;;  %v8639_v48 = vpop.permute.xlu1 %3586 }
 0x13e   : > { %11969 = vst [vmem:[#allocation20_spill] sm:$0xff] %v8639_v48  ;;  %v5550_v54 = vadd.f32 %v5549_v0, %v5548_v41 }
 0x140   : > { %v5551_v45 = vpop.f32.mrb[28].mxu1  ;;  %v8641_v10 = vpack.i.bf16 %v5550_v54, %v5547_v18  ;;  %v6717_v55 = vpack.c.bf16 %v5550_v54, %v5547_v18  ;;  %v8653_v54 = vpop.permute.xlu0 %2594 }
 0x141   : > { %v5552_v25 = vpop.f32.mrb[29].mxu1  ;;  %v8643_v11 = vpop.permute.xlu1 %3590  ;;  %11974 = vst [vmem:[#allocation24_spill] sm:$0xff] %v8653_v54 }
 0x142   : > { %11970 = vst [vmem:[#allocation21_spill] sm:$0xff] %v8641_v10  ;;  %11971 = vst [vmem:[#allocation22_spill] sm:$0xff] %v8643_v11  ;;  %v5553_v36 = vadd.f32 %v5552_v25, %v5551_v45  ;;  %7111 = vrot.lane.b32.xlu1 %v8641_v10, %s7852_s24  ;;  %6718 = vmatprep.subr.bf16.mxu1 %v6717_v55 }
 0x143   : > { %6720 = vmatpush3.bf16.msra.mxu1 %v6717_v55 }
 0x144   : > { %v5554_v59 = vpop.f32.mrb[30].mxu1 }
 0x145   : > { %v5555_v27 = vpop.f32.mrb[31].mxu1  ;;  %v8649_v57 = vpop.permute.xlu1 %3594 }
 0x146   : > { %11973 = vst [vmem:[#allocation6_spill] sm:$0xff] %v8649_v57  ;;  %v5556_v41 = vadd.f32 %v5555_v27, %v5554_v59  ;;  %7116 = vrot.lane.b32.xlu1 %v8617_v43, %s7853_s5  ;;  %v8665_v27 = vpop.permute.xlu0 %2598 }
 0x147   : > { %11978 = vst [vmem:[#allocation28_spill] sm:$0xff] %v8665_v27 }
 0x148   : > { %v8655_v18 = vpack.i.bf16 %v5556_v41, %v5553_v36  ;;  %v6721_v0 = vpack.c.bf16 %v5556_v41, %v5553_v36 }
 0x149   : > { %v8657_v11 = vpop.permute.xlu1 %3598 }
 0x14a   : > { %11975 = vst [vmem:[#allocation25_spill] sm:$0xff] %v8655_v18  ;;  %11976 = vst [vmem:[#allocation26_spill] sm:$0xff] %v8657_v11  ;;  %7121 = vrot.lane.b32.xlu0 %v8655_v18, %s7852_s24  ;;  %7131 = vrot.lane.b32.xlu1 %v8641_v10, %s7853_s5  ;;  %v8675_v45 = vpop.permute.xlu0 %2604 }
 0x14b   : > { %6722 = vmatprep.subr.bf16.mxu1 %v6721_v0  ;;  %11980 = vst [vmem:[#allocation30_spill] sm:$0xff] %v8675_v45 }
 0x14c   : > { %6724 = vmatpush3.bf16.msra.mxu1 %v6721_v0 }
 0x14d   : > { %v8663_v55 = vpop.permute.xlu1 %3602 }
 0x14e   : > { %11977 = vst [vmem:[#allocation27_spill] sm:$0xff] %v8663_v55  ;;  %7126 = vrot.lane.b32.xlu0 %v8629_v3, %s7853_s5  ;;  %7136 = vrot.lane.b32.xlu1 %v8655_v18, %s7853_s5  ;;  %v8681_v41 = vpop.permute.xlu0 %2608 }
 0x14f   : > { %11983 = vst [vmem:[#allocation33_spill] sm:$0xff] %v8681_v41 }
 0x151   : > { %v8671_v36 = vpop.permute.xlu1 %3606 }
 0x152   : > { %11979 = vst [vmem:[#allocation29_spill] sm:$0xff] %v8671_v36  ;;  %7141 = vrot.lane.b32.xlu0 %v8567_v8, %s7854_s6  ;;  %v8685_v43 = vpop.permute.xlu0 %2610 }
 0x153   : > { %11985 = vst [vmem:[#allocation35_spill] sm:$0xff] %v8685_v43 }
 0x155   : > { %v8677_v25 = vpop.permute.xlu1 %3610 }
 0x156   : > { %11981 = vst [vmem:[#allocation31_spill] sm:$0xff] %v8677_v25  ;;  %v8689_v18 = vpop.permute.xlu0 %2614 }
 0x157   : > { %11987 = vst [vmem:[#allocation37_spill] sm:$0xff] %v8689_v18 }
 0x159   : > { %v8679_v59 = vpop.permute.xlu1 %3614 }
 0x15a   : > { %11982 = vst [vmem:[#allocation32_spill] sm:$0xff] %v8679_v59  ;;  %v8693_v36 = vpop.permute.xlu0 %2620 }
 0x15b   : > { %11989 = vst [vmem:[#allocation39_spill] sm:$0xff] %v8693_v36 }
 0x15d   : > { %v8683_v0 = vpop.permute.xlu1 %3618 }
 0x15e   : > { %11984 = vst [vmem:[#allocation34_spill] sm:$0xff] %v8683_v0  ;;  %v8697_v55 = vpop.permute.xlu0 %2624 }
 0x15f   : > { %11991 = vst [vmem:[#allocation41_spill] sm:$0xff] %v8697_v55 }
 0x161   : > { %v8687_v3 = vpop.permute.xlu1 %3622 }
 0x162   : > { %11986 = vst [vmem:[#allocation36_spill] sm:$0xff] %v8687_v3  ;;  %v8701_v59 = vpop.permute.xlu0 %2626 }
 0x163   : > { %11993 = vst [vmem:[#allocation43_spill] sm:$0xff] %v8701_v59 }
 0x165   : > { %v8691_v10 = vpop.permute.xlu1 %3626 }
 0x166   : > { %11988 = vst [vmem:[#allocation38_spill] sm:$0xff] %v8691_v10  ;;  %v8705_v0 = vpop.permute.xlu0 %2630 }
 0x167   : > { %11995 = vst [vmem:[#allocation45_spill] sm:$0xff] %v8705_v0 }
 0x169   : > { %v8695_v8 = vpop.permute.xlu1 %3630 }
 0x16a   : > { %11990 = vst [vmem:[#allocation40_spill] sm:$0xff] %v8695_v8  ;;  %v8709_v3 = vpop.permute.xlu0 %3580 }
 0x16b   : > { %11997 = vst [vmem:[#allocation47_spill] sm:$0xff] %v8709_v3 }
 0x16d   : > { %v8699_v25 = vpop.permute.xlu1 %3634 }
 0x16e   : > { %11992 = vst [vmem:[#allocation42_spill] sm:$0xff] %v8699_v25  ;;  %v8714_v8 = vpop.permute.xlu0 %3584 }
 0x16f   : > { %11999 = vst [vmem:[#allocation49_spill] sm:$0xff] %v8714_v8 }
 0x171   : > { %v8703_v11 = vpop.permute.xlu1 %3638 }
 0x172   : > { %11994 = vst [vmem:[#allocation44_spill] sm:$0xff] %v8703_v11  ;;  %v8716_v25 = vpop.permute.xlu0 %3588 }
 0x173   : > { %12000 = vst [vmem:[#allocation50_spill] sm:$0xff] %v8716_v25 }
 0x175   : > { %v8707_v57 = vpop.permute.xlu1 %3642 }
 0x176   : > { %11996 = vst [vmem:[#allocation46_spill] sm:$0xff] %v8707_v57  ;;  %v8718_v41 = vpop.permute.xlu0 %3592 }
 0x177   : > { %12001 = vst [vmem:[#allocation51_spill] sm:$0xff] %v8718_v41 }
 0x184   : > { %v7062_v48 = vpop.permute.xlu1 %7061 }
 0x185   : > { %v7064_v10 = vunpack.i.h.bf16 %v7062_v48  ;;  %v7063_v18 = vunpack.i.l.bf16 %v7062_v48 }
 0x187   : > { %v8711_v36 = vpack.c.bf16 %v7064_v10, %v7063_v18 }
 0x189   : > { %11998 = vst [vmem:[#allocation48_spill] sm:$0xff] %v8711_v36  ;;  %6774 = vmatprep.subr.bf16.mxu1 %v8711_v36 }
 0x190   : > { %v5429_v59 = vpop.f32.mrb[0].mxu0 }
 0x191   : > { %v5430_v55 = vpop.f32.mrb[1].mxu0 }
 0x192   : > { %v5431_v11 = vadd.f32 %v5430_v55, %v5429_v59  ;;  %v8730_v55 = vpop.permute.xlu0 %3596 }
 0x193   : > { %12004 = vst [vmem:[#allocation52_spill] sm:$0xff] %v8730_v55 }
 0x194   : > { %v5432_v43 = vpop.f32.mrb[2].mxu0 }
 0x195   : > { %v5433_v0 = vpop.f32.mrb[3].mxu0 }
 0x196   : > { %v5434_v57 = vadd.f32 %v5433_v0, %v5432_v43  ;;  %v8735_v36 = vpop.permute.xlu0 %3600 }
 0x197   : > { %12005 = vst [vmem:[#allocation53_spill] sm:$0xff] %v8735_v36 }
 0x198   : > { %v5435_v3 = vpop.f32.mrb[4].mxu0  ;;  %v7155_v45 = vpack.i.bf16 %v5434_v57, %v5431_v11  ;;  %v6645_v60 = vpack.c.bf16 %v5434_v57, %v5431_v11 }
 0x199   : > { %v5436_v10 = vpop.f32.mrb[5].mxu0 }
 0x19a   : > { %v5437_v18 = vadd.f32 %v5436_v10, %v5435_v3  ;;  %7156 = vrot.lane.b32.xlu1 %v7155_v45, %s7854_s6  ;;  %7146 = vrot.lane.b32.xlu0 %v7155_v45, %s7852_s24 }
 0x19b   : > { %6647 = vmatprep.subr.msk.bf16.mxu0 %vm8722_vm1, %v6645_v60 }
 0x19c   : > { %6650 = vmatpush3.bf16.xpose.msk.msra.mxu0 %vm8722_vm1, %v6645_v60  ;;  %v5438_v57 = vpop.f32.mrb[6].mxu0 }
 0x19d   : > { %v5439_v43 = vpop.f32.mrb[7].mxu0 }
 0x19e   : > { %v5440_v11 = vadd.f32 %v5439_v43, %v5438_v57  ;;  %7151 = vrot.lane.b32.xlu0 %v7155_v45, %s7853_s5  ;;  %v8743_v45 = vpop.permute.xlu0 %3604 }
 0x19f   : > { %12006 = vst [vmem:[#allocation54_spill] sm:$0xff] %v8743_v45 }
 0x1a0   : > { %v5441_v59 = vpop.f32.mrb[8].mxu0  ;;  %v7160_v0 = vpack.i.bf16 %v5440_v11, %v5437_v18  ;;  %v6651_v3 = vpack.c.bf16 %v5440_v11, %v5437_v18 }
 0x1a1   : > { %v5442_v10 = vpop.f32.mrb[9].mxu0 }
 0x1a2   : > { %v5443_v41 = vadd.f32 %v5442_v10, %v5441_v59  ;;  %7161 = vrot.lane.b32.xlu1 %v7160_v0, %s7852_s24  ;;  %6653 = vmatprep.subr.msk.bf16.mxu0 %vm8722_vm1, %v6651_v3  ;;  %v8751_v10 = vpop.permute.xlu0 %3608 }
 0x1a3   : > { %12007 = vst [vmem:[#allocation55_spill] sm:$0xff] %v8751_v10 }
 0x1a4   : > { %6656 = vmatpush3.bf16.xpose.msk.msra.mxu0 %vm8722_vm1, %v6651_v3  ;;  %v5444_v60 = vpop.f32.mrb[10].mxu0 }
 0x1a5   : > { %v5445_v55 = vpop.f32.mrb[11].mxu0 }
 0x1a6   : > { %v5446_v57 = vadd.f32 %v5445_v55, %v5444_v60  ;;  %7166 = vrot.lane.b32.xlu1 %v7160_v0, %s7853_s5 }
 0x1a8   : > { %v5447_v18 = vpop.f32.mrb[12].mxu0  ;;  %v7175_v43 = vpack.i.bf16 %v5446_v57, %v5443_v41  ;;  %v6657_v11 = vpack.c.bf16 %v5446_v57, %v5443_v41 }
 0x1a9   : > { %v5448_v36 = vpop.f32.mrb[13].mxu0 }
 0x1aa   : > { %v5449_v59 = vadd.f32 %v5448_v36, %v5447_v18  ;;  %7171 = vrot.lane.b32.xlu1 %v7160_v0, %s7854_s6  ;;  %7176 = vrot.lane.b32.xlu0 %v7175_v43, %s7852_s24 }
 0x1ab   : > { %6659 = vmatprep.subr.msk.bf16.mxu0 %vm8722_vm1, %v6657_v11 }
 0x1ac   : > { %6662 = vmatpush3.bf16.xpose.msk.msra.mxu0 %vm8722_vm1, %v6657_v11  ;;  %v5450_v55 = vpop.f32.mrb[14].mxu0  ;;  %v8758_v11 = vpop.permute.xlu0 %3612 }
 0x1ad   : > { %v5451_v3 = vpop.f32.mrb[15].mxu0  ;;  %12008 = vst [vmem:[#allocation56_spill] sm:$0xff] %v8758_v11 }
 0x1ae   : > { %v5452_v60 = vadd.f32 %v5451_v3, %v5450_v55  ;;  %7181 = vrot.lane.b32.xlu1 %v7175_v43, %s7853_s5  ;;  %7186 = vrot.lane.b32.xlu0 %v7175_v43, %s7854_s6 }
 0x1b0   : > { %v5453_v36 = vpop.f32.mrb[16].mxu0  ;;  %v7190_v41 = vpack.i.bf16 %v5452_v60, %v5449_v59  ;;  %v6663_v0 = vpack.c.bf16 %v5452_v60, %v5449_v59 }
 0x1b1   : > { %v5454_v57 = vpop.f32.mrb[17].mxu0 }
 0x1b2   : > { %v5455_v18 = vadd.f32 %v5454_v57, %v5453_v36  ;;  %7191 = vrot.lane.b32.xlu1 %v7190_v41, %s7852_s24  ;;  %6665 = vmatprep.subr.msk.bf16.mxu0 %vm8722_vm1, %v6663_v0  ;;  %v8763_v36 = vpop.permute.xlu0 %3616 }
 0x1b3   : > { %12009 = vst [vmem:[#allocation57_spill] sm:$0xff] %v8763_v36 }
 0x1b4   : > { %6668 = vmatpush3.bf16.xpose.msk.msra.mxu0 %vm8722_vm1, %v6663_v0  ;;  %v5456_v55 = vpop.f32.mrb[18].mxu0 }
 0x1b5   : > { %v5457_v3 = vpop.f32.mrb[19].mxu0 }
 0x1b6   : > { %v5458_v10 = vadd.f32 %v5457_v3, %v5456_v55  ;;  %7196 = vrot.lane.b32.xlu1 %v7190_v41, %s7853_s5 }
 0x1b8   : > { %v5459_v43 = vpop.f32.mrb[20].mxu0  ;;  %v7205_v45 = vpack.i.bf16 %v5458_v10, %v5455_v18  ;;  %v6669_v59 = vpack.c.bf16 %v5458_v10, %v5455_v18  ;;  %v8773_v10 = vpop.permute.xlu0 %3620 }
 0x1b9   : > { %v5460_v60 = vpop.f32.mrb[21].mxu0  ;;  %12010 = vst [vmem:[#allocation58_spill] sm:$0xff] %v8773_v10 }
 0x1ba   : > { %v5461_v57 = vadd.f32 %v5460_v60, %v5459_v43  ;;  %7201 = vrot.lane.b32.xlu1 %v7190_v41, %s7854_s6  ;;  %7206 = vrot.lane.b32.xlu0 %v7205_v45, %s7852_s24 }
 0x1bb   : > { %6671 = vmatprep.subr.msk.bf16.mxu0 %vm8722_vm1, %v6669_v59 }
 0x1bc   : > { %6674 = vmatpush3.bf16.xpose.msk.msra.mxu0 %vm8722_vm1, %v6669_v59  ;;  %v5462_v0 = vpop.f32.mrb[22].mxu0 }
 0x1bd   : > { %v5463_v55 = vpop.f32.mrb[23].mxu0 }
 0x1be   : > { %v5464_v3 = vadd.f32 %v5463_v55, %v5462_v0  ;;  %7211 = vrot.lane.b32.xlu1 %v7205_v45, %s7853_s5  ;;  %7216 = vrot.lane.b32.xlu0 %v7205_v45, %s7854_s6  ;;  %v8780_v55 = vpop.permute.xlu0 %3624 }
 0x1bf   : > { %12011 = vst [vmem:[#allocation59_spill] sm:$0xff] %v8780_v55 }
 0x1c0   : > { %v5465_v18 = vpop.f32.mrb[24].mxu0  ;;  %v7220_v43 = vpack.i.bf16 %v5464_v3, %v5461_v57  ;;  %v6675_v41 = vpack.c.bf16 %v5464_v3, %v5461_v57 }
 0x1c1   : > { %v5466_v60 = vpop.f32.mrb[25].mxu0 }
 0x1c2   : > { %v5467_v36 = vadd.f32 %v5466_v60, %v5465_v18  ;;  %7221 = vrot.lane.b32.xlu1 %v7220_v43, %s7852_s24  ;;  %6677 = vmatprep.subr.msk.bf16.mxu0 %vm8722_vm1, %v6675_v41 }
 0x1c4   : > { %6680 = vmatpush3.bf16.xpose.msk.msra.mxu0 %vm8722_vm1, %v6675_v41  ;;  %v5468_v59 = vpop.f32.mrb[26].mxu0  ;;  %v8787_v41 = vpop.permute.xlu0 %3628 }
 0x1c5   : > { %v5469_v0 = vpop.f32.mrb[27].mxu0  ;;  %12012 = vst [vmem:[#allocation60_spill] sm:$0xff] %v8787_v41 }
 0x1c6   : > { %v5470_v45 = vadd.f32 %v5469_v0, %v5468_v59  ;;  %7226 = vrot.lane.b32.xlu1 %v7220_v43, %s7853_s5 }
 0x1c8   : > { %v5471_v10 = vpop.f32.mrb[28].mxu0  ;;  %v7235_v11 = vpack.i.bf16 %v5470_v45, %v5467_v36  ;;  %v6681_v57 = vpack.c.bf16 %v5470_v45, %v5467_v36 }
 0x1c9   : > { %v5472_v3 = vpop.f32.mrb[29].mxu0 }
 0x1ca   : > { %v5473_v18 = vadd.f32 %v5472_v3, %v5471_v10  ;;  %7231 = vrot.lane.b32.xlu1 %v7220_v43, %s7854_s6  ;;  %7236 = vrot.lane.b32.xlu0 %v7235_v11, %s7852_s24  ;;  %v8793_v43 = vpop.permute.xlu0 %3632 }
 0x1cb   : > { %6683 = vmatprep.subr.msk.bf16.mxu0 %vm8722_vm1, %v6681_v57  ;;  %12013 = vst [vmem:[#allocation61_spill] sm:$0xff] %v8793_v43 }
 0x1cc   : > { %6686 = vmatpush3.bf16.xpose.msk.msra.mxu0 %vm8722_vm1, %v6681_v57  ;;  %v5474_v60 = vpop.f32.mrb[30].mxu0  ;;  %v7813_v57 = vld [vmem:[%s7890_s16 + $0x20] sm:$0xff] }
 0x1cd   : > { %v5475_v59 = vpop.f32.mrb[31].mxu0 }
 0x1ce   : > { %v5476_v0 = vadd.f32 %v5475_v59, %v5474_v60  ;;  %7241 = vrot.lane.b32.xlu1 %v7235_v11, %s7853_s5  ;;  %7246 = vrot.lane.b32.xlu0 %v7235_v11, %s7854_s6  ;;  %v8801_v45 = vpop.permute.xlu0 %3636  ;;  %v7812_v11 = vld [vmem:[%s7890_s16 + $0x10] sm:$0xff]  ;;  %v7815_v60 = vld [vmem:[%s7890_s16 + $0x40] sm:$0xff] }
 0x1cf   : > { %12014 = vst [vmem:[#allocation62_spill] sm:$0xff] %v8801_v45  ;;  %v7816_v59 = vld [vmem:[%s7890_s16 + $0x50] sm:$0xff] }
 0x1d0   : > { %v7250_v36 = vpack.i.bf16 %v5476_v0, %v5473_v18  ;;  %v6687_v10 = vpack.c.bf16 %v5476_v0, %v5473_v18  ;;  %v7814_v18 = vld [vmem:[%s7890_s16 + $0x30] sm:$0xff] }
 0x1d2   : > { %7251 = vrot.lane.b32.xlu1 %v7250_v36, %s7852_s24  ;;  %6689 = vmatprep.subr.msk.bf16.mxu0 %vm8722_vm1, %v6687_v10  ;;  %v8808_v3 = vpop.permute.xlu0 %3640  ;;  %s7856_s24 = smov 32  }
 0x1d3   : > { %12015 = vst [vmem:[#allocation63_spill] sm:$0xff] %v8808_v3  ;;  %v7838_v3 = vld [vmem:[%s7890_s16 + $0x1b0] sm:$0xff] }
 0x1d4   : > { %6692 = vmatpush3.bf16.xpose.msk.msra.mxu0 %vm8722_vm1, %v6687_v10  ;;  %v7817_v10 = vld [vmem:[%s7890_s16 + $0x60] sm:$0xff] }
 0x1d6   : > { %7256 = vrot.lane.b32.xlu1 %v7250_v36, %s7853_s5  ;;  %v8818_v0 = vpop.permute.xlu0 %7066 }
 0x1d7   : > { %12016 = vst [vmem:[#allocation64_spill] sm:$0xff] %v8818_v0 }
 0x1da   : > { %7261 = vrot.lane.b32.xlu1 %v7250_v36, %s7854_s6  ;;  %v8820_v36 = vpop.permute.xlu1 %7076 }
 0x1db   : > { %5974 = vmatmul.mubr.msk.f32.vlgmr.msra.gmra.mrb[32].mxu0 %vm661_vm0, %v7812_v11  ;;  %12017 = vst [vmem:[#allocation65_spill] sm:$0xff] %v8820_v36  ;;  %v7819_v11 = vld [vmem:[%s7890_s16 + $0x80] sm:$0xff] }
 0x1dc   : > { %5976 = vmatprep.mubr.msk.f32.mxu0 %vm661_vm0, %v7813_v57  ;;  %v8828_v57 = vpop.permute.xlu0 %7071 }
 0x1dd   : > { %12018 = vst [vmem:[#allocation66_spill] sm:$0xff] %v8828_v57  ;;  %v7824_v57 = vld [vmem:[%s7890_s16 + $0xd0] sm:$0xff] }
 0x1de   : > { %7266 = vrot.lane.b32.xlu1 %v8579_v42, %s7854_s6  ;;  %v7818_v42 = vld [vmem:[%s7890_s16 + $0x70] sm:$0xff] }
 0x1df   : > { %5977 = vmatmul.mubr.msk.f32.gmra.mrb[34].mxu0 %vm661_vm0, %v7814_v18  ;;  %v8830_v18 = vpop.permute.xlu1 %7081 }
 0x1e0   : > { %5979 = vmatprep.mubr.msk.f32.mxu0 %vm661_vm0, %v7815_v60  ;;  %12019 = vst [vmem:[#allocation67_spill] sm:$0xff] %v8830_v18  ;;  %v7820_v60 = vld [vmem:[%s7890_s16 + $0x90] sm:$0xff] }
 0x1e1   : > { %v7826_v18 = vld [vmem:[%s7890_s16 + $0xf0] sm:$0xff] }
 0x1e3   : > { %5980 = vmatmul.mubr.msk.f32.gmra.mrb[36].mxu0 %vm661_vm0, %v7816_v59  ;;  %v7821_v59 = vld [vmem:[%s7890_s16 + $0xa0] sm:$0xff]  ;;  %v8840_v36 = vpop.permute.xlu1 %7086 }
 0x1e4   : > { %5982 = vmatprep.mubr.msk.f32.mxu0 %vm661_vm0, %v7817_v10  ;;  %v7822_v10 = vld [vmem:[%s7890_s16 + $0xb0] sm:$0xff]  ;;  %12021 = vst [vmem:[#allocation69_spill] sm:$0xff] %v8840_v36  ;;  %v7829_v36 = vld [vmem:[%s7890_s16 + $0x120] sm:$0xff] }
 0x1e7   : > { %5983 = vmatmul.mubr.msk.f32.gmra.mrb[38].mxu0 %vm661_vm0, %v7818_v42  ;;  %v8838_v42 = vpop.permute.xlu0 %7101 }
 0x1e8   : > { %5985 = vmatprep.mubr.msk.f32.mxu0 %vm661_vm0, %v7819_v11  ;;  %12020 = vst [vmem:[#allocation68_spill] sm:$0xff] %v8838_v42  ;;  %v7823_v11 = vld [vmem:[%s7890_s16 + $0xc0] sm:$0xff] }
 0x1e9   : > { %v7827_v42 = vld [vmem:[%s7890_s16 + $0x100] sm:$0xff] }
 0x1eb   : > { %5986 = vmatmul.mubr.msk.f32.gmra.mrb[40].mxu0 %vm661_vm0, %v7820_v60  ;;  %v7825_v60 = vld [vmem:[%s7890_s16 + $0xe0] sm:$0xff] }
 0x1ec   : > { %5988 = vmatprep.mubr.msk.f32.mxu0 %vm661_vm0, %v7821_v59  ;;  %v8848_v59 = vpop.permute.xlu0 %7106 }
 0x1ed   : > { %12022 = vst [vmem:[#allocation70_spill] sm:$0xff] %v8848_v59  ;;  %v7830_v59 = vld [vmem:[%s7890_s16 + $0x130] sm:$0xff] }
 0x1ef   : > { %5989 = vmatmul.mubr.msk.f32.gmra.mrb[42].mxu0 %vm661_vm0, %v7822_v10  ;;  %v8850_v10 = vpop.permute.xlu1 %7091 }
 0x1f0   : > { %5991 = vmatprep.mubr.msk.f32.mxu0 %vm661_vm0, %v7823_v11  ;;  %12023 = vst [vmem:[#allocation71_spill] sm:$0xff] %v8850_v10 }
 0x1f3   : > { %5992 = vmatmul.mubr.msk.f32.gmra.mrb[44].mxu0 %vm661_vm0, %v7824_v57  ;;  %v8856_v11 = vpop.permute.xlu1 %7096  ;;  %v7828_v57 = vld [vmem:[%s7890_s16 + $0x110] sm:$0xff] }
 0x1f4   : > { %5994 = vmatprep.mubr.msk.f32.mxu0 %vm661_vm0, %v7825_v60  ;;  %12024 = vst [vmem:[#allocation72_spill] sm:$0xff] %v8856_v11  ;;  %v8860_v60 = vpop.permute.xlu0 %7121  ;;  %v7832_v11 = vld [vmem:[%s7890_s16 + $0x150] sm:$0xff] }
 0x1f5   : > { %12025 = vst [vmem:[#allocation73_spill] sm:$0xff] %v8860_v60  ;;  %v7833_v60 = vld [vmem:[%s7890_s16 + $0x160] sm:$0xff] }
 0x1f7   : > { %5995 = vmatmul.mubr.msk.f32.gmra.mrb[46].mxu0 %vm661_vm0, %v7826_v18  ;;  %v8864_v10 = vpop.permute.xlu1 %7111  ;;  %v7831_v18 = vld [vmem:[%s7890_s16 + $0x140] sm:$0xff] }
 0x1f8   : > { %5997 = vmatprep.mubr.msk.f32.mxu0 %vm661_vm0, %v7827_v42  ;;  %12026 = vst [vmem:[#allocation74_spill] sm:$0xff] %v8864_v10  ;;  %v8870_v42 = vpop.permute.xlu0 %7126 }
 0x1f9   : > { %12027 = vst [vmem:[#allocation75_spill] sm:$0xff] %v8870_v42  ;;  %v7836_v42 = vld [vmem:[%s7890_s16 + $0x190] sm:$0xff] }
 0x1fb   : > { %5998 = vmatmul.mubr.msk.f32.gmra.mrb[48].mxu0 %vm661_vm0, %v7828_v57  ;;  %v8874_v57 = vpop.permute.xlu1 %7116 }
 0x1fc   : > { %6000 = vmatprep.mubr.msk.f32.mxu0 %vm661_vm0, %v7829_v36  ;;  %12028 = vst [vmem:[#allocation76_spill] sm:$0xff] %v8874_v57  ;;  %v7834_v36 = vld [vmem:[%s7890_s16 + $0x170] sm:$0xff]  ;;  %v8880_v10 = vpop.permute.xlu0 %7141 }
 0x1fd   : > { %12029 = vst [vmem:[#allocation77_spill] sm:$0xff] %v8880_v10 }
 0x1ff   : > { %6001 = vmatmul.mubr.msk.f32.gmra.mrb[50].mxu0 %vm661_vm0, %v7830_v59  ;;  %v8882_v59 = vpop.permute.xlu1 %7131 }
 0x200   : > { %6003 = vmatprep.mubr.msk.f32.mxu0 %vm661_vm0, %v7831_v18  ;;  %12030 = vst [vmem:[#allocation78_spill] sm:$0xff] %v8882_v59  ;;  %v7835_v18 = vld [vmem:[%s7890_s16 + $0x180] sm:$0xff] }
 0x203   : > { %6004 = vmatmul.mubr.msk.f32.gmra.mrb[52].mxu0 %vm661_vm0, %v7832_v11  ;;  %v8888_v11 = vpop.permute.xlu1 %7136 }
 0x204   : > { %6006 = vmatprep.mubr.msk.f32.mxu0 %vm661_vm0, %v7833_v60  ;;  %12031 = vst [vmem:[#allocation79_spill] sm:$0xff] %v8888_v11  ;;  %v7837_v60 = vld [vmem:[%s7890_s16 + $0x1a0] sm:$0xff]  ;;  %v7842_v11 = vld [vmem:[%s7890_s16 + $0x1f0] sm:$0xff] }
 0x207   : > { %6007 = vmatmul.mubr.msk.f32.gmra.mrb[54].mxu0 %vm661_vm0, %v7834_v36 }
 0x208   : > { %6009 = vmatprep.mubr.msk.f32.mxu0 %vm661_vm0, %v7835_v18  ;;  %v7839_v18 = vld [vmem:[%s7890_s16 + $0x1c0] sm:$0xff] }
 0x20b   : > { %6010 = vmatmul.mubr.msk.f32.gmra.mrb[56].mxu0 %vm661_vm0, %v7836_v42  ;;  %v7840_v42 = vld [vmem:[%s7890_s16 + $0x1d0] sm:$0xff] }
 0x20c   : > { %v7147_v57 = vpop.permute.xlu0 %7146  ;;  %6012 = vmatprep.mubr.msk.f32.mxu0 %vm661_vm0, %v7837_v60  ;;  %v8894_v59 = vpop.permute.xlu1 %7156 }
 0x20d   : > { %v7149_v36 = vunpack.i.h.bf16 %v7147_v57  ;;  %v7148_v0 = vunpack.i.l.bf16 %v7147_v57 }
 0x20f   : > { %v6725_v10 = vpack.c.bf16 %v7149_v36, %v7148_v0  ;;  %6013 = vmatmul.mubr.msk.f32.gmra.mrb[58].mxu0 %vm661_vm0, %v7838_v3  ;;  %v7841_v0 = vld [vmem:[%s7890_s16 + $0x1e0] sm:$0xff]  ;;  %s7855_s16 = smov 16  }
 0x210   : > { %6015 = vmatprep.mubr.msk.f32.mxu0 %vm661_vm0, %v7839_v18  ;;  %v7152_v18 = vpop.permute.xlu0 %7151 }
 0x211   : > { %6727 = vmatprep.subr.msk.bf16.mxu0 %vm8722_vm1, %v6725_v10 }
 0x212   : > { %6730 = vmatpush3.bf16.xpose.msk.msra.mxu0 %vm8722_vm1, %v6725_v10 }
 0x213   : > { %6016 = vmatmul.mubr.msk.f32.gmra.mrb[60].mxu0 %vm661_vm0, %v7840_v42 }
 0x214   : > { %v7162_v57 = vpop.permute.xlu1 %7161  ;;  %6018 = vmatprep.mubr.msk.f32.mxu0 %vm661_vm0, %v7841_v0 }
 0x215   : > { %v7164_v60 = vunpack.i.h.bf16 %v7162_v57  ;;  %v7163_v3 = vunpack.i.l.bf16 %v7162_v57 }
 0x217   : > { %v6731_v36 = vpack.c.bf16 %v7164_v60, %v7163_v3  ;;  %6019 = vmatmul.mubr.msk.f32.gmra.mrb[62].mxu0 %vm661_vm0, %v7842_v11 }
 0x218   : > { %6133 = vmatprep.mubr.msk.f32.mxu0 %vm661_vm0, %v8384_v19  ;;  %v7167_v45 = vpop.permute.xlu1 %7166 }
 0x219   : > { %6733 = vmatprep.subr.msk.bf16.mxu0 %vm8722_vm1, %v6731_v36 }
 0x21a   : > { %6736 = vmatpush3.bf16.xpose.msk.msra.mxu0 %vm8722_vm1, %v6731_v36 }
 0x21c   : > { %v8914_v10 = vpop.permute.xlu1 %7171  ;;  %v7177_v42 = vpop.permute.xlu0 %7176 }
 0x21d   : > { %v7179_v0 = vunpack.i.h.bf16 %v7177_v42  ;;  %v7178_v57 = vunpack.i.l.bf16 %v7177_v42 }
 0x21f   : > { %v6737_v60 = vpack.c.bf16 %v7179_v0, %v7178_v57 }
 0x220   : > { %v7182_v3 = vpop.permute.xlu1 %7181  ;;  %v8920_v55 = vpop.permute.xlu0 %7186 }
 0x221   : > { %6739 = vmatprep.subr.msk.bf16.mxu0 %vm8722_vm1, %v6737_v60 }
 0x222   : > { %6742 = vmatpush3.bf16.xpose.msk.msra.mxu0 %vm8722_vm1, %v6737_v60 }
 0x224   : > { %v7192_v19 = vpop.permute.xlu1 %7191 }
 0x225   : > { %v7194_v11 = vunpack.i.h.bf16 %v7192_v19  ;;  %v7193_v43 = vunpack.i.l.bf16 %v7192_v19 }
 0x227   : > { %v6743_v41 = vpack.c.bf16 %v7194_v11, %v7193_v43 }
 0x228   : > { %v7197_v36 = vpop.permute.xlu1 %7196 }
 0x229   : > { %6745 = vmatprep.subr.msk.bf16.mxu0 %vm8722_vm1, %v6743_v41 }
 0x22a   : > { %6748 = vmatpush3.bf16.xpose.msk.msra.mxu0 %vm8722_vm1, %v6743_v41 }
 0x22c   : > { %v8926_v42 = vpop.permute.xlu1 %7201  ;;  %v7207_v0 = vpop.permute.xlu0 %7206 }
 0x22d   : > { %v7209_v57 = vunpack.i.h.bf16 %v7207_v0  ;;  %v7208_v25 = vunpack.i.l.bf16 %v7207_v0 }
 0x22f   : > { %v6749_v8 = vpack.c.bf16 %v7209_v57, %v7208_v25 }
 0x230   : > { %v7212_v60 = vpop.permute.xlu1 %7211  ;;  %v8932_v52 = vpop.permute.xlu0 %7216 }
 0x231   : > { %6751 = vmatprep.subr.msk.bf16.mxu0 %vm8722_vm1, %v6749_v8  ;;  %12032 = vst [vmem:[#allocation80_spill] sm:$0xff] %v8932_v52 }
 0x232   : > { %6754 = vmatpush3.bf16.xpose.msk.msra.mxu0 %vm8722_vm1, %v6749_v8 }
 0x234   : > { %v7222_v43 = vpop.permute.xlu1 %7221 }
 0x235   : > { %v7224_v19 = vunpack.i.h.bf16 %v7222_v43  ;;  %v7223_v11 = vunpack.i.l.bf16 %v7222_v43 }
 0x237   : > { %v6755_v27 = vpack.c.bf16 %v7224_v19, %v7223_v11  ;;  %v7154_v19 = vunpack.i.h.bf16 %v7152_v18  ;;  %v7153_v11 = vunpack.i.l.bf16 %v7152_v18  ;;  %v12041_v18 = vld [vmem:[#allocation9_spill] sm:$0xff] }
 0x238   : > { %v7227_v41 = vpop.permute.xlu1 %7226 }
 0x239   : > { %6757 = vmatprep.subr.msk.bf16.mxu0 %vm8722_vm1, %v6755_v27 }
 0x23a   : > { %6760 = vmatpush3.bf16.xpose.msk.msra.mxu0 %vm8722_vm1, %v6755_v27  ;;  %v6805_v27 = vpack.c.bf16 %v7154_v19, %v7153_v11  ;;  %v12044_v11 = vld [vmem:[#allocation33_spill] sm:$0xff] }
 0x23c   : > { %v8938_v25 = vpop.permute.xlu1 %7231  ;;  %v7237_v0 = vpop.permute.xlu0 %7236 }
 0x23d   : > { %v7239_v57 = vunpack.i.h.bf16 %v7237_v0  ;;  %v7238_v54 = vunpack.i.l.bf16 %v7237_v0  ;;  %v7168_v0 = vunpack.i.l.bf16 %v7167_v45 }
 0x23f   : > { %v6761_v40 = vpack.c.bf16 %v7239_v57, %v7238_v54  ;;  %v7169_v54 = vunpack.i.h.bf16 %v7167_v45  ;;  %v12040_v45 = vld [vmem:[#allocation8_spill] sm:$0xff] }
 0x240   : > { %v7242_v8 = vpop.permute.xlu1 %7241 }
 0x241   : > { %6763 = vmatprep.subr.msk.bf16.mxu0 %vm8722_vm1, %v6761_v40  ;;  %v6811_v57 = vpack.c.bf16 %v7169_v54, %v7168_v0 }
 0x242   : > { %6766 = vmatpush3.bf16.xpose.msk.msra.mxu0 %vm8722_vm1, %v6761_v40 }
 0x244   : > { %v7252_v43 = vpop.permute.xlu1 %7251 }
 0x245   : > { %v7254_v52 = vunpack.i.h.bf16 %v7252_v43  ;;  %v7253_v50 = vunpack.i.l.bf16 %v7252_v43 }
 0x247   : > { %v6767_v23 = vpack.c.bf16 %v7254_v52, %v7253_v50  ;;  %v7184_v50 = vunpack.i.h.bf16 %v7182_v3  ;;  %v7183_v52 = vunpack.i.l.bf16 %v7182_v3 }
 0x249   : > { %6769 = vmatprep.subr.msk.bf16.mxu0 %vm8722_vm1, %v6767_v23  ;;  %v6817_v40 = vpack.c.bf16 %v7184_v50, %v7183_v52  ;;  %v12045_v50 = vld [vmem:[#allocation35_spill] sm:$0xff] }
 0x24a   : > { %6772 = vmatpush3.bf16.xpose.msk.msra.mxu0 %vm8722_vm1, %v6767_v23  ;;  %v7234_v23 = vunpack.i.h.bf16 %v8938_v25 }
 0x24b   : > { %6807 = vmatprep.subr.msk.bf16.mxu0 %vm8722_vm1, %v6805_v27 }
 0x251   : > { %6134 = vmatmul.mubr.msk.f32.vlgmr.msra.gmra.mrb[64].mxu0 %vm661_vm0, %v8484_v49  ;;  %v7198_v49 = vunpack.i.l.bf16 %v7197_v36 }
 0x252   : > { %6136 = vmatprep.mubr.msk.f32.mxu0 %vm661_vm0, %v8392_v33  ;;  %6810 = vmatpush3.bf16.xpose.msk.msra.mxu0 %vm8722_vm1, %v6805_v27  ;;  %v7199_v33 = vunpack.i.h.bf16 %v7197_v36 }
 0x253   : > { %6813 = vmatprep.subr.msk.bf16.mxu0 %vm8722_vm1, %v6811_v57 }
 0x255   : > { %6137 = vmatmul.mubr.msk.f32.gmra.mrb[66].mxu0 %vm661_vm0, %v8400_v35  ;;  %v6823_v35 = vpack.c.bf16 %v7199_v33, %v7198_v49 }
 0x256   : > { %6139 = vmatprep.mubr.msk.f32.mxu0 %vm661_vm0, %v8498_v58  ;;  %v7213_v58 = vunpack.i.l.bf16 %v7212_v60 }
 0x259   : > { %6140 = vmatmul.mubr.msk.f32.gmra.mrb[68].mxu0 %vm661_vm0, %v8408_v47  ;;  %v7214_v47 = vunpack.i.h.bf16 %v7212_v60  ;;  %v12042_v60 = vld [vmem:[#allocation30_spill] sm:$0xff] }
 0x25a   : > { %6142 = vmatprep.mubr.msk.f32.mxu0 %vm661_vm0, %v8510_v61  ;;  %6816 = vmatpush3.bf16.xpose.msk.msra.mxu0 %vm8722_vm1, %v6811_v57  ;;  %v7228_v61 = vunpack.i.l.bf16 %v7227_v41 }
 0x25b   : > { %6819 = vmatprep.subr.msk.bf16.mxu0 %vm8722_vm1, %v6817_v40 }
 0x25d   : > { %6143 = vmatmul.mubr.msk.f32.gmra.mrb[70].mxu0 %vm661_vm0, %v8414_v34  ;;  %v6829_v34 = vpack.c.bf16 %v7214_v47, %v7213_v58  ;;  %v12046_v47 = vld [vmem:[#allocation11_spill] sm:$0xff] }
 0x25e   : > { %6145 = vmatprep.mubr.msk.f32.mxu0 %vm661_vm0, %v8522_v51  ;;  %v7243_v51 = vunpack.i.l.bf16 %v7242_v8 }
 0x261   : > { %6146 = vmatmul.mubr.msk.f32.gmra.mrb[72].mxu0 %vm661_vm0, %v8421_v31  ;;  %v7229_v31 = vunpack.i.h.bf16 %v7227_v41 }
 0x262   : > { %6148 = vmatprep.mubr.msk.f32.mxu0 %vm661_vm0, %v8532_v46  ;;  %6822 = vmatpush3.bf16.xpose.msk.msra.mxu0 %vm8722_vm1, %v6817_v40 }
 0x263   : > { %6825 = vmatprep.subr.msk.bf16.mxu0 %vm8722_vm1, %v6823_v35 }
 0x265   : > { %6149 = vmatmul.mubr.msk.f32.gmra.mrb[74].mxu0 %vm661_vm0, %v8429_v28  ;;  %v6835_v28 = vpack.c.bf16 %v7229_v31, %v7228_v61  ;;  %v12047_v31 = vld [vmem:[#allocation37_spill] sm:$0xff] }
 0x266   : > { %6151 = vmatprep.mubr.msk.f32.mxu0 %vm661_vm0, %v8543_v12 }
 0x269   : > { %6152 = vmatmul.mubr.msk.f32.gmra.mrb[76].mxu0 %vm661_vm0, %v8437_v32  ;;  %v7244_v32 = vunpack.i.h.bf16 %v7242_v8  ;;  %v7247_v8 = vpop.permute.xlu0 %7246 }
 0x26a   : > { %6154 = vmatprep.mubr.msk.f32.mxu0 %vm661_vm0, %v8551_v14  ;;  %6828 = vmatpush3.bf16.xpose.msk.msra.mxu0 %vm8722_vm1, %v6823_v35  ;;  %v7174_v14 = vunpack.i.h.bf16 %v8914_v10  ;;  %v7249_v27 = vunpack.i.h.bf16 %v7247_v8  ;;  %v7248_v54 = vunpack.i.l.bf16 %v7247_v8 }
 0x26b   : > { %6831 = vmatprep.subr.msk.bf16.mxu0 %vm8722_vm1, %v6829_v34 }
 0x26c   : > { %v6921_v33 = vpack.c.bf16 %v7249_v27, %v7248_v54 }
 0x26d   : > { %6155 = vmatmul.mubr.msk.f32.gmra.mrb[78].mxu0 %vm661_vm0, %v8445_v38  ;;  %v6841_v38 = vpack.c.bf16 %v7244_v32, %v7243_v51 }
 0x26e   : > { %6157 = vmatprep.mubr.msk.f32.mxu0 %vm661_vm0, %v8559_v7  ;;  %v7189_v7 = vunpack.i.h.bf16 %v8920_v55 }
 0x271   : > { %6158 = vmatmul.mubr.msk.f32.gmra.mrb[80].mxu0 %vm661_vm0, %v8453_v44  ;;  %v7257_v44 = vpop.permute.xlu1 %7256 }
 0x272   : > { %6160 = vmatprep.mubr.msk.f32.mxu0 %vm661_vm0, %v8563_v13  ;;  %6834 = vmatpush3.bf16.xpose.msk.msra.mxu0 %vm8722_vm1, %v6829_v34  ;;  %v7259_v46 = vunpack.i.h.bf16 %v7257_v44  ;;  %v7258_v12 = vunpack.i.l.bf16 %v7257_v44  ;;  %v658_v13 = vlaneseq  ;;  %v12048_v44 = vld [vmem:[#allocation12_spill] sm:$0xff] }
 0x273   : > { %6837 = vmatprep.subr.msk.bf16.mxu0 %vm8722_vm1, %v6835_v28 }
 0x275   : > { %6161 = vmatmul.mubr.msk.f32.gmra.mrb[82].mxu0 %vm661_vm0, %v8461_v5  ;;  %v6847_v5 = vpack.c.bf16 %v7259_v46, %v7258_v12  ;;  %v7262_v58 = vpop.permute.xlu1 %7261  ;;  %v12049_v12 = vld [vmem:[#allocation14_spill] sm:$0xff] }
 0x276   : > { %6163 = vmatprep.mubr.msk.f32.mxu0 %vm661_vm0, %v8571_v53  ;;  %v12035_v53 = vld [vmem:[#allocation80_spill] sm:$0xff]  ;;  %v7263_v32 = vunpack.i.l.bf16 %v7262_v58 }
 0x279   : > { %6164 = vmatmul.mubr.msk.f32.gmra.mrb[84].mxu0 %vm661_vm0, %v8469_v16  ;;  %v7159_v16 = vunpack.i.h.bf16 %v8894_v59 }
 0x27a   : > { %6166 = vmatprep.mubr.msk.f32.mxu0 %vm661_vm0, %v8577_v62  ;;  %6840 = vmatpush3.bf16.xpose.msk.msra.mxu0 %vm8722_vm1, %v6835_v28  ;;  %v7219_v62 = vunpack.i.h.bf16 %v12035_v53  ;;  %v7264_v28 = vunpack.i.h.bf16 %v7262_v58  ;;  %v12064_v58 = vld [vmem:[#allocation6_spill] sm:$0xff] }
 0x27b   : > { %6843 = vmatprep.subr.msk.bf16.mxu0 %vm8722_vm1, %v6841_v38 }
 0x27d   : > { %6167 = vmatmul.mubr.msk.f32.gmra.mrb[86].mxu0 %vm661_vm0, %v8477_v4  ;;  %v7158_v4 = vunpack.i.l.bf16 %v8894_v59 }
 0x27e   : > { %6169 = vmatprep.mubr.msk.f32.mxu0 %vm661_vm0, %v8589_v6  ;;  %v12036_v6 = vld [vmem:[#allocation23_spill] sm:$0xff] }
 0x281   : > { %6170 = vmatmul.mubr.msk.f32.gmra.mrb[88].mxu0 %vm661_vm0, %v8487_v22  ;;  %v6885_v22 = vpack.c.bf16 %v7159_v16, %v7158_v4  ;;  %v6927_v16 = vpack.c.bf16 %v7264_v28, %v7263_v32 }
 0x282   : > { %6172 = vmatprep.mubr.msk.f32.mxu0 %vm661_vm0, %v8599_v56  ;;  %6846 = vmatpush3.bf16.xpose.msk.msra.mxu0 %vm8722_vm1, %v6841_v38  ;;  %v9092_v56 = vand.u32 127, %v658_v13 }
 0x283   : > { %6849 = vmatprep.subr.msk.bf16.mxu0 %vm8722_vm1, %v6847_v5 }
 0x284   : > { %vm660_vm2 = vcmp.lt.s32.totalorder %v9092_v56, 64 }
 0x285   : > { %6173 = vmatmul.mubr.msk.f32.gmra.mrb[90].mxu0 %vm661_vm0, %v8495_v26  ;;  %v7173_v26 = vunpack.i.l.bf16 %v8914_v10 }
 0x286   : > { %6175 = vmatprep.mubr.msk.f32.mxu0 %vm661_vm0, %v8607_v20 }
 0x289   : > { %6176 = vmatmul.mubr.msk.f32.gmra.mrb[92].mxu0 %vm661_vm0, %v8505_v39  ;;  %v6891_v39 = vpack.c.bf16 %v7174_v14, %v7173_v26  ;;  %v12050_v14 = vld [vmem:[#allocation39_spill] sm:$0xff] }
 0x28a   : > { %6178 = vmatprep.mubr.msk.f32.mxu0 %vm661_vm0, %v8615_v21  ;;  %6852 = vmatpush3.bf16.xpose.msk.msra.mxu0 %vm8722_vm1, %v6847_v5  ;;  %v12038_v21 = vld [vmem:[#allocation2_spill] sm:$0xff] }
 0x28b   : > { %6887 = vmatprep.subr.msk.bf16.mxu0 %vm8722_vm1, %v6885_v22 }
 0x28d   : > { %6179 = vmatmul.mubr.msk.f32.gmra.mrb[94].mxu0 %vm661_vm0, %v8513_v63  ;;  %v7188_v63 = vunpack.i.l.bf16 %v8920_v55  ;;  %v7233_v55 = vunpack.i.l.bf16 %v8938_v25  ;;  %v12043_v25 = vld [vmem:[#allocation3_spill] sm:$0xff] }
 0x28e   : > { %6293 = vmatprep.mubr.msk.f32.mxu0 %vm661_vm0, %v8519_v1 }
 0x28f   : > { %v6897_v1 = vpack.c.bf16 %v7189_v7, %v7188_v63 }
 0x291   : > { %6294 = vmatmul.mubr.msk.f32.vlgmr.msra.gmra.mrb[96].mxu0 %vm661_vm0, %v8527_v37  ;;  %v7204_v37 = vunpack.i.h.bf16 %v8926_v42 }
 0x292   : > { %6296 = vmatprep.mubr.msk.f32.mxu0 %vm661_vm0, %v8625_v17  ;;  %6890 = vmatpush3.bf16.xpose.msk.msra.mxu0 %vm8722_vm1, %v6885_v22  ;;  %v12039_v17 = vld [vmem:[#allocation28_spill] sm:$0xff] }
 0x293   : > { %6893 = vmatprep.subr.msk.bf16.mxu0 %vm8722_vm1, %v6891_v39 }
 0x295   : > { %6297 = vmatmul.mubr.msk.f32.gmra.mrb[98].mxu0 %vm661_vm0, %v8535_v30  ;;  %v7203_v30 = vunpack.i.l.bf16 %v8926_v42  ;;  %v6915_v42 = vpack.c.bf16 %v7234_v23, %v7233_v55  ;;  %v12057_v23 = vld [vmem:[#allocation47_spill] sm:$0xff] }
 0x296   : > { %6299 = vmatprep.mubr.msk.f32.mxu0 %vm661_vm0, %v8541_v15 }
 0x297   : > { %v6903_v15 = vpack.c.bf16 %v7204_v37, %v7203_v30  ;;  %v12052_v37 = vld [vmem:[#allocation41_spill] sm:$0xff] }
 0x299   : > { %6300 = vmatmul.mubr.msk.f32.gmra.mrb[100].mxu0 %vm661_vm0, %v8547_v9  ;;  %v12033_v9 = vld [vmem:[#allocation19_spill] sm:$0xff] }
 0x29a   : > { %6302 = vmatprep.mubr.msk.f32.mxu0 %vm661_vm0, %v8553_v29  ;;  %6896 = vmatpush3.bf16.xpose.msk.msra.mxu0 %vm8722_vm1, %v6891_v39  ;;  %v12034_v29 = vld [vmem:[#allocation7_spill] sm:$0xff] }
 0x29b   : > { %6899 = vmatprep.subr.msk.bf16.mxu0 %vm8722_vm1, %v6897_v1  ;;  %v12051_v39 = vld [vmem:[#allocation15_spill] sm:$0xff] }
 0x29d   : > { %6303 = vmatmul.mubr.msk.f32.gmra.mrb[102].mxu0 %vm661_vm0, %v8557_v2  ;;  %v7218_v2 = vunpack.i.l.bf16 %v12035_v53  ;;  %v12054_v53 = vld [vmem:[#allocation16_spill] sm:$0xff] }
 0x29e   : > { %6305 = vmatprep.mubr.msk.f32.mxu0 %vm661_vm0, %v8561_v24  ;;  %v12037_v24 = vld [vmem:[#allocation24_spill] sm:$0xff] }
 0x29f   : > { %v6909_v20 = vpack.c.bf16 %v7219_v62, %v7218_v2  ;;  %v12055_v2 = vld [vmem:[#allocation45_spill] sm:$0xff] }
 0x2a1   : > { %6306 = vmatmul.mubr.msk.f32.gmra.mrb[104].mxu0 %vm661_vm0, %v12033_v9 }
 0x2a2   : > { %6308 = vmatprep.mubr.msk.f32.mxu0 %vm661_vm0, %v12034_v29  ;;  %6902 = vmatpush3.bf16.xpose.msk.msra.mxu0 %vm8722_vm1, %v6897_v1 }
 0x2a3   : > { %6905 = vmatprep.subr.msk.bf16.mxu0 %vm8722_vm1, %v6903_v15 }
 0x2a5   : > { %6309 = vmatmul.mubr.msk.f32.gmra.mrb[106].mxu0 %vm661_vm0, %v12036_v6 }
 0x2a6   : > { %6311 = vmatprep.mubr.msk.f32.mxu0 %vm661_vm0, %v12037_v24 }
 0x2a9   : > { %6312 = vmatmul.mubr.msk.f32.gmra.mrb[108].mxu0 %vm661_vm0, %v12038_v21  ;;  %v12056_v21 = vld [vmem:[#allocation17_spill] sm:$0xff] }
 0x2aa   : > { %6314 = vmatprep.mubr.msk.f32.mxu0 %vm661_vm0, %v12039_v17  ;;  %6908 = vmatpush3.bf16.xpose.msk.msra.mxu0 %vm8722_vm1, %v6903_v15  ;;  %v12053_v15 = vld [vmem:[#allocation43_spill] sm:$0xff] }
 0x2ab   : > { %6911 = vmatprep.subr.msk.bf16.mxu0 %vm8722_vm1, %v6909_v20 }
 0x2ad   : > { %6315 = vmatmul.mubr.msk.f32.gmra.mrb[110].mxu0 %vm661_vm0, %v12040_v45 }
 0x2ae   : > { %v5975_v59 = vpop.f32.mrb[32].mxu0  ;;  %6317 = vmatprep.mubr.msk.f32.mxu0 %vm661_vm0, %v12041_v18 }
 0x2af   : > { %v9111_v10 = vsel %vm660_vm2, %v5975_v59, -1e+30  ;;  %v840_v3 = vpop.f32.mrb[33].mxu0  ;;  %v12058_v59 = vld [vmem:[#allocation18_spill] sm:$0xff] }
 0x2b0   : > { %v9115_v36 = vsel %vm660_vm2, %v840_v3, -1e+30  ;;  %1033 = vmax.xlane.f32.xlu1 %v9111_v10  ;;  %v12059_v3 = vld [vmem:[#allocation49_spill] sm:$0xff] }
 0x2b1   : > { %1031 = vmax.xlane.f32.xlu0 %v9115_v36  ;;  %6318 = vmatmul.mubr.msk.f32.gmra.mrb[112].mxu0 %vm661_vm0, %v12042_v60 }
 0x2b2   : > { %v5978_v41 = vpop.f32.mrb[34].mxu0  ;;  %6320 = vmatprep.mubr.msk.f32.mxu0 %vm661_vm0, %v12043_v25  ;;  %6914 = vmatpush3.bf16.xpose.msk.msra.mxu0 %vm8722_vm1, %v6909_v20  ;;  %v12060_v25 = vld [vmem:[#allocation20_spill] sm:$0xff] }
 0x2b3   : > { %v9127_v43 = vsel %vm660_vm2, %v5978_v41, -1e+30  ;;  %6917 = vmatprep.subr.msk.bf16.mxu0 %vm8722_vm1, %v6915_v42  ;;  %v850_v19 = vpop.f32.mrb[35].mxu0 }
 0x2b4   : > { %v9136_v0 = vsel %vm660_vm2, %v850_v19, -1e+30  ;;  %v12061_v19 = vld [vmem:[#allocation50_spill] sm:$0xff] }
 0x2b5   : > { %1037 = vmax.xlane.f32.xlu0 %v9127_v43  ;;  %6321 = vmatmul.mubr.msk.f32.gmra.mrb[114].mxu0 %vm661_vm0, %v12044_v11 }
 0x2b6   : > { %v5981_v57 = vpop.f32.mrb[36].mxu0  ;;  %6323 = vmatprep.mubr.msk.f32.mxu0 %vm661_vm0, %v12045_v50 }
 0x2b7   : > { %v860_v52 = vpop.f32.mrb[37].mxu0  ;;  %v9148_v49 = vsel %vm660_vm2, %v5981_v57, -1e+30  ;;  %v12062_v57 = vld [vmem:[#allocation22_spill] sm:$0xff] }
 0x2b8   : > { %v9142_v40 = vsel %vm660_vm2, %v860_v52, -1e+30  ;;  %v12063_v52 = vld [vmem:[#allocation51_spill] sm:$0xff] }
 0x2b9   : > { %1035 = vmax.xlane.f32.xlu0 %v9136_v0  ;;  %1039 = vmax.xlane.f32.xlu1 %v9142_v40 }
 0x2ba   : > { %v5984_v35 = vpop.f32.mrb[38].mxu0  ;;  %6324 = vmatmul.mubr.msk.f32.gmra.mrb[116].mxu0 %vm661_vm0, %v12046_v47 }
 0x2bb   : > { %v870_v34 = vpop.f32.mrb[39].mxu0  ;;  %6326 = vmatprep.mubr.msk.f32.mxu0 %vm661_vm0, %v12047_v31  ;;  %6920 = vmatpush3.bf16.xpose.msk.msra.mxu0 %vm8722_vm1, %v6915_v42  ;;  %v9166_v51 = vsel %vm660_vm2, %v5984_v35, -1e+30  ;;  %v12065_v31 = vld [vmem:[#allocation52_spill] sm:$0xff] }
 0x2bc   : > { %v9158_v61 = vsel %vm660_vm2, %v870_v34, -1e+30  ;;  %6923 = vmatprep.subr.msk.bf16.mxu0 %vm8722_vm1, %v6921_v33 }
 0x2bd   : > { %1041 = vmax.xlane.f32.xlu0 %v9148_v49  ;;  %1043 = vmax.xlane.f32.xlu1 %v9158_v61 }
 0x2be   : > { %v5987_v38 = vpop.f32.mrb[40].mxu0  ;;  %6327 = vmatmul.mubr.msk.f32.gmra.mrb[118].mxu0 %vm661_vm0, %v12048_v44  ;;  %v12066_v44 = vld [vmem:[#allocation26_spill] sm:$0xff] }
 0x2bf   : > { %v880_v46 = vpop.f32.mrb[41].mxu0  ;;  %6329 = vmatprep.mubr.msk.f32.mxu0 %vm661_vm0, %v12049_v12  ;;  %v9180_v4 = vsel %vm660_vm2, %v5987_v38, -1e+30  ;;  %v12067_v12 = vld [vmem:[#allocation53_spill] sm:$0xff] }
 0x2c0   : > { %v9174_v5 = vsel %vm660_vm2, %v880_v46, -1e+30 }
 0x2c1   : > { %1045 = vmax.xlane.f32.xlu0 %v9166_v51  ;;  %1047 = vmax.xlane.f32.xlu1 %v9174_v5 }
 0x2c2   : > { %v5990_v22 = vpop.f32.mrb[42].mxu0  ;;  %6330 = vmatmul.mubr.msk.f32.gmra.mrb[120].mxu0 %vm661_vm0, %v12050_v14 }
 0x2c3   : > { %v890_v26 = vpop.f32.mrb[43].mxu0  ;;  %6332 = vmatprep.mubr.msk.f32.mxu0 %vm661_vm0, %v12051_v39  ;;  %6926 = vmatpush3.bf16.xpose.msk.msra.mxu0 %vm8722_vm1, %v6921_v33  ;;  %v9198_v63 = vsel %vm660_vm2, %v5990_v22, -1e+30 }
 0x2c4   : > { %v9190_v7 = vsel %vm660_vm2, %v890_v26, -1e+30  ;;  %6929 = vmatprep.subr.msk.bf16.mxu0 %vm8722_vm1, %v6927_v16  ;;  %v12068_v26 = vld [vmem:[#allocation27_spill] sm:$0xff] }
 0x2c5   : > { %1049 = vmax.xlane.f32.xlu0 %v9180_v4  ;;  %1051 = vmax.xlane.f32.xlu1 %v9190_v7 }
 0x2c6   : > { %v5993_v1 = vpop.f32.mrb[44].mxu0  ;;  %6333 = vmatmul.mubr.msk.f32.gmra.mrb[122].mxu0 %vm661_vm0, %v12052_v37 }
 0x2c7   : > { %v900_v30 = vpop.f32.mrb[45].mxu0  ;;  %6335 = vmatprep.mubr.msk.f32.mxu0 %vm661_vm0, %v12053_v15  ;;  %v9212_v29 = vsel %vm660_vm2, %v5993_v1, -1e+30  ;;  %v12069_v1 = vld [vmem:[#allocation54_spill] sm:$0xff] }
 0x2c8   : > { %v9206_v9 = vsel %vm660_vm2, %v900_v30, -1e+30 }
 0x2c9   : > { %1053 = vmax.xlane.f32.xlu0 %v9198_v63  ;;  %1055 = vmax.xlane.f32.xlu1 %v9206_v9 }
 0x2ca   : > { %v5996_v13 = vpop.f32.mrb[46].mxu0  ;;  %6336 = vmatmul.mubr.msk.f32.gmra.mrb[124].mxu0 %vm661_vm0, %v12054_v53 }
 0x2cb   : > { %v910_v62 = vpop.f32.mrb[47].mxu0  ;;  %6338 = vmatprep.mubr.msk.f32.mxu0 %vm661_vm0, %v12055_v2  ;;  %6932 = vmatpush3.bf16.xpose.msk.msra.mxu0 %vm8722_vm1, %v6927_v16  ;;  %v9228_v24 = vsel %vm660_vm2, %v5996_v13, -1e+30  ;;  %v12070_v13 = vld [vmem:[#allocation29_spill] sm:$0xff] }
 0x2cc   : > { %v9222_v6 = vsel %vm660_vm2, %v910_v62, -1e+30  ;;  %v12071_v62 = vld [vmem:[#allocation55_spill] sm:$0xff] }
 0x2cd   : > { %1057 = vmax.xlane.f32.xlu0 %v9212_v29  ;;  %1059 = vmax.xlane.f32.xlu1 %v9222_v6 }
 0x2ce   : > { %v5999_v20 = vpop.f32.mrb[48].mxu0  ;;  %6339 = vmatmul.mubr.msk.f32.gmra.mrb[126].mxu0 %vm661_vm0, %v12056_v21  ;;  %v12072_v21 = vld [vmem:[#allocation31_spill] sm:$0xff] }
 0x2cf   : > { %v920_v17 = vpop.f32.mrb[49].mxu0  ;;  %6453 = vmatprep.mubr.msk.f32.mxu0 %vm661_vm0, %v12057_v23  ;;  %v9242_v55 = vsel %vm660_vm2, %v5999_v20, -1e+30  ;;  %v12074_v23 = vld [vmem:[#allocation32_spill] sm:$0xff] }
 0x2d0   : > { %v9236_v48 = vsel %vm660_vm2, %v920_v17, -1e+30  ;;  %v12073_v17 = vld [vmem:[#allocation56_spill] sm:$0xff] }
 0x2d1   : > { %1061 = vmax.xlane.f32.xlu0 %v9228_v24  ;;  %1063 = vmax.xlane.f32.xlu1 %v9236_v48 }
 0x2d2   : > { %v6002_v45 = vpop.f32.mrb[50].mxu0  ;;  %6454 = vmatmul.mubr.msk.f32.vlgmr.msra.gmra.mrb[128].mxu0 %vm661_vm0, %v12058_v59  ;;  %v12076_v59 = vld [vmem:[#allocation34_spill] sm:$0xff] }
 0x2d3   : > { %v930_v18 = vpop.f32.mrb[51].mxu0  ;;  %6456 = vmatprep.mubr.msk.f32.mxu0 %vm661_vm0, %v12059_v3  ;;  %v9256_v60 = vsel %vm660_vm2, %v6002_v45, -1e+30  ;;  %v12075_v45 = vld [vmem:[#allocation57_spill] sm:$0xff]  ;;  %v12078_v3 = vld [vmem:[#allocation36_spill] sm:$0xff] }
 0x2d4   : > { %v9250_v42 = vsel %vm660_vm2, %v930_v18, -1e+30  ;;  %v12077_v18 = vld [vmem:[#allocation58_spill] sm:$0xff] }
 0x2d5   : > { %1065 = vmax.xlane.f32.xlu0 %v9242_v55  ;;  %1067 = vmax.xlane.f32.xlu1 %v9250_v42 }
 0x2d6   : > { %v6005_v41 = vpop.f32.mrb[52].mxu0  ;;  %6457 = vmatmul.mubr.msk.f32.gmra.mrb[130].mxu0 %vm661_vm0, %v12060_v25  ;;  %v12080_v25 = vld [vmem:[#allocation38_spill] sm:$0xff] }
 0x2d7   : > { %v940_v8 = vpop.f32.mrb[53].mxu0  ;;  %6459 = vmatprep.mubr.msk.f32.mxu0 %vm661_vm0, %v12061_v19  ;;  %v9270_v27 = vsel %vm660_vm2, %v6005_v41, -1e+30  ;;  %v12079_v41 = vld [vmem:[#allocation59_spill] sm:$0xff]  ;;  %v12082_v19 = vld [vmem:[#allocation40_spill] sm:$0xff] }
 0x2d8   : > { %v9264_v11 = vsel %vm660_vm2, %v940_v8, -1e+30  ;;  %v12081_v8 = vld [vmem:[#allocation60_spill] sm:$0xff] }
 0x2d9   : > { %1069 = vmax.xlane.f32.xlu0 %v9256_v60  ;;  %1071 = vmax.xlane.f32.xlu1 %v9264_v11 }
 0x2da   : > { %v6008_v54 = vpop.f32.mrb[54].mxu0  ;;  %6460 = vmatmul.mubr.msk.f32.gmra.mrb[132].mxu0 %vm661_vm0, %v12062_v57  ;;  %v12084_v57 = vld [vmem:[#allocation42_spill] sm:$0xff] }
 0x2db   : > { %v950_v50 = vpop.f32.mrb[55].mxu0  ;;  %6462 = vmatprep.mubr.msk.f32.mxu0 %vm661_vm0, %v12063_v52  ;;  %v9284_v35 = vsel %vm660_vm2, %v6008_v54, -1e+30  ;;  %v12083_v54 = vld [vmem:[#allocation61_spill] sm:$0xff]  ;;  %v12086_v52 = vld [vmem:[#allocation44_spill] sm:$0xff] }
 0x2dc   : > { %v9278_v33 = vsel %vm660_vm2, %v950_v50, -1e+30  ;;  %v12085_v50 = vld [vmem:[#allocation62_spill] sm:$0xff] }
 0x2dd   : > { %1073 = vmax.xlane.f32.xlu0 %v9270_v27  ;;  %1075 = vmax.xlane.f32.xlu1 %v9278_v33 }
 0x2de   : > { %v6011_v47 = vpop.f32.mrb[56].mxu0  ;;  %6463 = vmatmul.mubr.msk.f32.gmra.mrb[134].mxu0 %vm661_vm0, %v12064_v58  ;;  %v12088_v58 = vld [vmem:[#allocation46_spill] sm:$0xff] }
 0x2df   : > { %v960_v34 = vpop.f32.mrb[57].mxu0  ;;  %6465 = vmatprep.mubr.msk.f32.mxu0 %vm661_vm0, %v12065_v31  ;;  %v9298_v32 = vsel %vm660_vm2, %v6011_v47, -1e+30  ;;  %v12087_v47 = vld [vmem:[#allocation63_spill] sm:$0xff] }
 0x2e0   : > { %v9292_v28 = vsel %vm660_vm2, %v960_v34, -1e+30 }
 0x2e1   : > { %1077 = vmax.xlane.f32.xlu0 %v9284_v35  ;;  %1079 = vmax.xlane.f32.xlu1 %v9292_v28 }
 0x2e2   : > { %v6014_v38 = vpop.f32.mrb[58].mxu0  ;;  %6466 = vmatmul.mubr.msk.f32.gmra.mrb[136].mxu0 %vm661_vm0, %v12066_v44 }
 0x2e3   : > { %v970_v46 = vpop.f32.mrb[59].mxu0  ;;  %6468 = vmatprep.mubr.msk.f32.mxu0 %vm661_vm0, %v12067_v12  ;;  %v9312_v22 = vsel %vm660_vm2, %v6014_v38, -1e+30 }
 0x2e4   : > { %v9306_v16 = vsel %vm660_vm2, %v970_v46, -1e+30 }
 0x2e5   : > { %1081 = vmax.xlane.f32.xlu0 %v9298_v32  ;;  %1083 = vmax.xlane.f32.xlu1 %v9306_v16 }
 0x2e6   : > { %v6017_v14 = vpop.f32.mrb[60].mxu0  ;;  %6469 = vmatmul.mubr.msk.f32.gmra.mrb[138].mxu0 %vm661_vm0, %v12068_v26 }
 0x2e7   : > { %v980_v39 = vpop.f32.mrb[61].mxu0  ;;  %6471 = vmatprep.mubr.msk.f32.mxu0 %vm661_vm0, %v12069_v1  ;;  %v9326_v30 = vsel %vm660_vm2, %v6017_v14, -1e+30 }
 0x2e8   : > { %v9320_v37 = vsel %vm660_vm2, %v980_v39, -1e+30 }
 0x2e9   : > { %1085 = vmax.xlane.f32.xlu0 %v9312_v22  ;;  %1087 = vmax.xlane.f32.xlu1 %v9320_v37 }
 0x2ea   : > { %v6020_v15 = vpop.f32.mrb[62].mxu0  ;;  %6472 = vmatmul.mubr.msk.f32.gmra.mrb[140].mxu0 %vm661_vm0, %v12070_v13 }
 0x2eb   : > { %v990_v53 = vpop.f32.mrb[63].mxu0  ;;  %6474 = vmatprep.mubr.msk.f32.mxu0 %vm661_vm0, %v12071_v62  ;;  %v9340_v20 = vsel %vm660_vm2, %v6020_v15, -1e+30 }
 0x2ec   : > { %v9334_v2 = vsel %vm660_vm2, %v990_v53, -1e+30 }
 0x2ed   : > { %1089 = vmax.xlane.f32.xlu0 %v9326_v30  ;;  %1091 = vmax.xlane.f32.xlu1 %v9334_v2 }
 0x2ee   : > { %6475 = vmatmul.mubr.msk.f32.gmra.mrb[142].mxu0 %vm661_vm0, %v12072_v21 }
 0x2ef   : > { %6477 = vmatprep.mubr.msk.f32.mxu0 %vm661_vm0, %v12073_v17 }
 0x2f1   : > { %1093 = vmax.xlane.f32.xlu0 %v9340_v20 }
 0x2f2   : > { %6478 = vmatmul.mubr.msk.f32.gmra.mrb[144].mxu0 %vm661_vm0, %v12074_v23 }
 0x2f3   : > { %6480 = vmatprep.mubr.msk.f32.mxu0 %vm661_vm0, %v12075_v45 }
 0x2f6   : > { %6481 = vmatmul.mubr.msk.f32.gmra.mrb[146].mxu0 %vm661_vm0, %v12076_v59 }
 0x2f7   : > { %6483 = vmatprep.mubr.msk.f32.mxu0 %vm661_vm0, %v12077_v18 }
 0x2fa   : > { %6484 = vmatmul.mubr.msk.f32.gmra.mrb[148].mxu0 %vm661_vm0, %v12078_v3  ;;  %v9422_v3 = vpop.permute.xlu1 %7266 }
 0x2fb   : > { %6486 = vmatprep.mubr.msk.f32.mxu0 %vm661_vm0, %v12079_v41  ;;  %12089 = vst [vmem:[#allocation19_spill] sm:$0xff] %v9422_v3  ;;  %v12095_v3 = vld [vmem:[#allocation48_spill] sm:$0xff] }
 0x2fe   : > { %6487 = vmatmul.mubr.msk.f32.gmra.mrb[150].mxu0 %vm661_vm0, %v12080_v25 }
 0x2ff   : > { %6489 = vmatprep.mubr.msk.f32.mxu0 %vm661_vm0, %v12081_v8 }
 0x302   : > { %6490 = vmatmul.mubr.msk.f32.gmra.mrb[152].mxu0 %vm661_vm0, %v12082_v19 }
 0x303   : > { %6492 = vmatprep.mubr.msk.f32.mxu0 %vm661_vm0, %v12083_v54 }
 0x306   : > { %6493 = vmatmul.mubr.msk.f32.gmra.mrb[154].mxu0 %vm661_vm0, %v12084_v57 }
 0x307   : > { %6495 = vmatprep.mubr.msk.f32.mxu0 %vm661_vm0, %v12085_v50 }
 0x30a   : > { %6496 = vmatmul.mubr.msk.f32.gmra.mrb[156].mxu0 %vm661_vm0, %v12086_v52 }
 0x30b   : > { %6498 = vmatprep.mubr.msk.f32.mxu0 %vm661_vm0, %v12087_v47 }
 0x30e   : > { %6499 = vmatmul.mubr.msk.f32.gmra.mrb[158].mxu0 %vm661_vm0, %v12088_v58 }
 0x324   : > { %v6135_v34 = vpop.f32.mrb[64].mxu0 }
 0x325   : > { %v9379_v31 = vsel %vm660_vm2, %v6135_v34, -1e+30  ;;  %v1802_v38 = vpop.f32.mrb[65].mxu0 }
 0x326   : > { %v9383_v44 = vsel %vm660_vm2, %v1802_v38, -1e+30  ;;  %1995 = vmax.xlane.f32.xlu1 %v9379_v31 }
 0x327   : > { %1993 = vmax.xlane.f32.xlu0 %v9383_v44 }
 0x328   : > { %v6138_v46 = vpop.f32.mrb[66].mxu0 }
 0x329   : > { %v9389_v12 = vsel %vm660_vm2, %v6138_v46, -1e+30  ;;  %v1812_v14 = vpop.f32.mrb[67].mxu0 }
 0x32a   : > { %v9394_v1 = vsel %vm660_vm2, %v1812_v14, -1e+30 }
 0x32b   : > { %1999 = vmax.xlane.f32.xlu0 %v9389_v12 }
 0x32c   : > { %v6141_v26 = vpop.f32.mrb[68].mxu0 }
 0x32d   : > { %v1822_v39 = vpop.f32.mrb[69].mxu0  ;;  %v9404_v62 = vsel %vm660_vm2, %v6141_v26, -1e+30 }
 0x32e   : > { %v9398_v15 = vsel %vm660_vm2, %v1822_v39, -1e+30 }
 0x32f   : > { %1997 = vmax.xlane.f32.xlu0 %v9394_v1  ;;  %2001 = vmax.xlane.f32.xlu1 %v9398_v15 }
 0x330   : > { %v6144_v13 = vpop.f32.mrb[70].mxu0 }
 0x331   : > { %v1832_v53 = vpop.f32.mrb[71].mxu0  ;;  %v9414_v45 = vsel %vm660_vm2, %v6144_v13, -1e+30 }
 0x332   : > { %v9408_v21 = vsel %vm660_vm2, %v1832_v53, -1e+30 }
 0x333   : > { %2003 = vmax.xlane.f32.xlu0 %v9404_v62  ;;  %2005 = vmax.xlane.f32.xlu1 %v9408_v21 }
 0x334   : > { %v6147_v17 = vpop.f32.mrb[72].mxu0 }
 0x335   : > { %v1842_v23 = vpop.f32.mrb[73].mxu0  ;;  %v9426_v25 = vsel %vm660_vm2, %v6147_v17, -1e+30 }
 0x336   : > { %v9418_v59 = vsel %vm660_vm2, %v1842_v23, -1e+30 }
 0x337   : > { %2007 = vmax.xlane.f32.xlu0 %v9414_v45  ;;  %2009 = vmax.xlane.f32.xlu1 %v9418_v59 }
 0x338   : > { %v6150_v18 = vpop.f32.mrb[74].mxu0 }
 0x339   : > { %v1852_v41 = vpop.f32.mrb[75].mxu0  ;;  %v9436_v50 = vsel %vm660_vm2, %v6150_v18, -1e+30 }
 0x33a   : > { %v9430_v8 = vsel %vm660_vm2, %v1852_v41, -1e+30 }
 0x33b   : > { %2011 = vmax.xlane.f32.xlu0 %v9426_v25  ;;  %2013 = vmax.xlane.f32.xlu1 %v9430_v8 }
 0x33c   : > { %v6153_v19 = vpop.f32.mrb[76].mxu0 }
 0x33d   : > { %v1034_v54 = vpop.xlane.xlu1 %1033  ;;  %v1862_v57 = vpop.f32.mrb[77].mxu0  ;;  %v9448_v39 = vsel %vm660_vm2, %v6153_v19, -1e+30 }
 0x33e   : > { %v1096_v52 = vsub.f32 %v9111_v10, %v1034_v54  ;;  %v1032_v47 = vpop.xlane.xlu0 %1031  ;;  %v9441_v58 = vsel %vm660_vm2, %v1862_v57, -1e+30 }
 0x33f   : > { %v1095_v34 = vsub.f32 %v9115_v36, %v1032_v47  ;;  %2015 = vmax.xlane.f32.xlu0 %v9436_v50  ;;  %2017 = vmax.xlane.f32.xlu1 %v9441_v58 }
 0x340   : > { %v1129_v38 = vmul.f32 1.442695, %v1096_v52  ;;  %v6156_v46 = vpop.f32.mrb[78].mxu0 }
 0x341   : > { %v1127_v14 = vmul.f32 1.442695, %v1095_v34  ;;  %v1872_v26 = vpop.f32.mrb[79].mxu0  ;;  %v9459_v23 = vsel %vm660_vm2, %v6156_v46, -1e+30 }
 0x342   : > { %v1038_v10 = vpop.xlane.xlu0 %1037  ;;  %v9452_v13 = vsel %vm660_vm2, %v1872_v26, -1e+30 }
 0x343   : > { %7300 = vpow2.f32 %v1127_v14  ;;  %2019 = vmax.xlane.f32.xlu0 %v9448_v39  ;;  %2021 = vmax.xlane.f32.xlu1 %v9452_v13  ;;  %v1098_v36 = vsub.f32 %v9127_v43, %v1038_v10 }
 0x344   : > { %7302 = vpow2.f32 %v1129_v38  ;;  %v6159_v53 = vpop.f32.mrb[80].mxu0  ;;  %v12090_v38 = vld [vmem:[#allocation64_spill] sm:$0xff] }
 0x345   : > { %v1882_v17 = vpop.f32.mrb[81].mxu0  ;;  %v1133_v43 = vmul.f32 1.442695, %v1098_v36  ;;  %v7069_v46 = vunpack.i.h.bf16 %v12090_v38  ;;  %v9472_v14 = vsel %vm660_vm2, %v6159_v53, -1e+30 }
 0x346   : > { %v1036_v18 = vpop.xlane.xlu0 %1035  ;;  %v1040_v41 = vpop.xlane.xlu1 %1039  ;;  %v9463_v19 = vsel %vm660_vm2, %v1882_v17, -1e+30  ;;  %12091 = vst [vmem:[#allocation7_spill] sm:$0xff] %v9472_v14 }
 0x347   : > { %v1097_v54 = vsub.f32 %v9136_v0, %v1036_v18  ;;  %v1099_v57 = vsub.f32 %v9142_v40, %v1040_v41  ;;  %2023 = vmax.xlane.f32.xlu0 %v9459_v23  ;;  %2025 = vmax.xlane.f32.xlu1 %v9463_v19  ;;  %v7068_v0 = vunpack.i.l.bf16 %v12090_v38  ;;  %v12093_v38 = vld [vmem:[#allocation65_spill] sm:$0xff] }
 0x348   : > { %v6162_v52 = vpop.f32.mrb[82].mxu0 }
 0x349   : > { %v1131_v47 = vmul.f32 1.442695, %v1097_v54  ;;  %v1135_v34 = vmul.f32 1.442695, %v1099_v57  ;;  %v1892_v18 = vpop.f32.mrb[83].mxu0 }
 0x34a   : > { %v1042_v26 = vpop.xlane.xlu0 %1041  ;;  %v1044_v10 = vpop.xlane.xlu1 %1043  ;;  %v9480_v36 = vsel %vm660_vm2, %v1892_v18, -1e+30 }
 0x34b   : > { %7304 = vpow2.f32 %v1131_v47  ;;  %v1100_v40 = vsub.f32 %v9148_v49, %v1042_v26  ;;  %v1101_v17 = vsub.f32 %v9158_v61, %v1044_v10  ;;  %2027 = vmax.xlane.f32.xlu0 %v9472_v14  ;;  %12092 = vst [vmem:[#allocation80_spill] sm:$0xff] %v9480_v36  ;;  %2029 = vmax.xlane.f32.xlu1 %v9480_v36  ;;  %v7079_v49 = vunpack.i.h.bf16 %v12093_v38 }
 0x34c   : > { %7306 = vpow2.f32 %v1133_v43  ;;  %v6165_v41 = vpop.f32.mrb[84].mxu0  ;;  %v7078_v61 = vunpack.i.l.bf16 %v12093_v38  ;;  %v9487_v26 = vsel %vm660_vm2, %v6162_v52, -1e+30 }
 0x34d   : > { %v7301_v53 = vpop.eup %7300  ;;  %7308 = vpow2.f32 %v1135_v34  ;;  %v1137_v54 = vmul.f32 1.442695, %v1100_v40  ;;  %v1139_v57 = vmul.f32 1.442695, %v1101_v17  ;;  %v1902_v40 = vpop.f32.mrb[85].mxu0  ;;  %v6777_v17 = vpack.c.bf16 %v7069_v46, %v7068_v0 }
 0x34e   : > { %v7303_v47 = vpop.eup %7302  ;;  %6053 = vmatprep.mubr.f32.mxu1 %v7301_v53  ;;  %v1046_v43 = vpop.xlane.xlu0 %1045  ;;  %v9494_v38 = vsel %vm660_vm2, %v1902_v40, -1e+30  ;;  %v9501_v46 = vsel %vm660_vm2, %v6165_v41, -1e+30 }
 0x34f   : > { %v1048_v10 = vpop.xlane.xlu1 %1047  ;;  %7310 = vpow2.f32 %v1137_v54  ;;  %v1102_v18 = vsub.f32 %v9166_v51, %v1046_v43  ;;  %6054 = vmatmul.mubr.f32.vlgmr.msra.gmra.mrb[32].mxu1 %v7303_v47  ;;  %2031 = vmax.xlane.f32.xlu0 %v9487_v26  ;;  %12094 = vst [vmem:[#allocation23_spill] sm:$0xff] %v9494_v38  ;;  %v12096_v51 = vld [vmem:[#allocation67_spill] sm:$0xff]  ;;  %12097 = vst [vmem:[#allocation24_spill] sm:$0xff] %v9501_v46  ;;  %v6781_v43 = vpack.c.bf16 %v7079_v49, %v7078_v61  ;;  %v12098_v61 = vld [vmem:[#allocation69_spill] sm:$0xff] }
 0x350   : > { %v1103_v34 = vsub.f32 %v9174_v5, %v1048_v10  ;;  %6776 = vmatpush3.bf16.msra.mxu1 %v12095_v3  ;;  %v6168_v52 = vpop.f32.mrb[86].mxu0  ;;  %7312 = vpow2.f32 %v1139_v57  ;;  %2033 = vmax.xlane.f32.xlu1 %v9494_v38  ;;  %v7084_v5 = vunpack.i.h.bf16 %v12096_v51  ;;  %v7083_v10 = vunpack.i.l.bf16 %v12096_v51 }
 0x351   : > { %v1141_v36 = vmul.f32 1.442695, %v1102_v18  ;;  %6778 = vmatprep.subr.bf16.mxu1 %v6777_v17  ;;  %v1912_v18 = vpop.f32.mrb[87].mxu0  ;;  %v7089_v51 = vunpack.i.h.bf16 %v12098_v61 }
 0x352   : > { %v1143_v14 = vmul.f32 1.442695, %v1103_v34  ;;  %v1050_v0 = vpop.xlane.xlu0 %1049 }
 0x353   : > { %v1052_v54 = vpop.xlane.xlu1 %1051  ;;  %7314 = vpow2.f32 %v1141_v36  ;;  %v1104_v3 = vsub.f32 %v9180_v4, %v1050_v0  ;;  %2035 = vmax.xlane.f32.xlu0 %v9501_v46  ;;  %v7088_v36 = vunpack.i.l.bf16 %v12098_v61 }
 0x354   : > { %v1105_v57 = vsub.f32 %v9190_v7, %v1052_v54  ;;  %6780 = vmatpush3.bf16.msra.mxu1 %v6777_v17  ;;  %v9507_v34 = vpop.f32.mrb[88].mxu0  ;;  %7316 = vpow2.f32 %v1143_v14  ;;  %1191 = vadd.xlane.f32.xlu1 %v7301_v53  ;;  %v9517_v53 = vsel %vm660_vm2, %v1912_v18, -1e+30 }
 0x355   : > { %v7305_v40 = vpop.eup %7304  ;;  %v1145_v41 = vmul.f32 1.442695, %v1104_v3  ;;  %6782 = vmatprep.subr.bf16.mxu1 %v6781_v43  ;;  %v1922_v14 = vpop.f32.mrb[89].mxu0  ;;  %v6785_v3 = vpack.c.bf16 %v7084_v5, %v7083_v10  ;;  %12099 = vst [vmem:[#allocation2_spill] sm:$0xff] %v9517_v53  ;;  %v6789_v18 = vpack.c.bf16 %v7089_v51, %v7088_v36 }
 0x356   : > { %v1147_v38 = vmul.f32 1.442695, %v1105_v57  ;;  %v7307_v49 = vpop.eup %7306  ;;  %6056 = vmatprep.mubr.f32.mxu1 %v7305_v40  ;;  %v1054_v4 = vpop.xlane.xlu0 %1053 }
 0x357   : > { %v1056_v7 = vpop.xlane.xlu1 %1055  ;;  %v9511_v0 = vpop.eup %7308  ;;  %7318 = vpow2.f32 %v1145_v41  ;;  %v1106_v17 = vsub.f32 %v9198_v63, %v1054_v4  ;;  %6057 = vmatmul.mubr.f32.gmra.mrb[34].mxu1 %v7307_v49  ;;  %1193 = vadd.xlane.f32.xlu0 %v7303_v47  ;;  %v9528_v47 = vsel %vm660_vm2, %v6168_v52, -1e+30 }
 0x358   : > { %v1107_v54 = vsub.f32 %v9206_v9, %v1056_v7  ;;  %6784 = vmatpush3.bf16.msra.mxu1 %v6781_v43  ;;  %6059 = vmatprep.mubr.f32.mxu1 %v9511_v0  ;;  %v9520_v57 = vpop.f32.mrb[90].mxu0  ;;  %7320 = vpow2.f32 %v1147_v38  ;;  %v12100_v9 = vld [vmem:[#allocation70_spill] sm:$0xff]  ;;  %12101 = vst [vmem:[#allocation28_spill] sm:$0xff] %v9528_v47 }
 0x359   : > { %v9522_v61 = vpop.eup %7310  ;;  %v1149_v41 = vmul.f32 1.442695, %v1106_v17  ;;  %6786 = vmatprep.subr.bf16.mxu1 %v6785_v3  ;;  %2037 = vmax.xlane.f32.xlu1 %v9517_v53  ;;  %v7109_v5 = vunpack.i.h.bf16 %v12100_v9  ;;  %v7108_v7 = vunpack.i.l.bf16 %v12100_v9 }
 0x35a   : > { %v1151_v63 = vmul.f32 1.442695, %v1107_v54  ;;  %v1058_v10 = vpop.xlane.xlu0 %1057  ;;  %v9530_v4 = vpop.eup %7312 }
 0x35b   : > { %v1060_v43 = vpop.xlane.xlu1 %1059  ;;  %7322 = vpow2.f32 %v1149_v41  ;;  %v1108_v38 = vsub.f32 %v9212_v29, %v1058_v10  ;;  %v9535_v54 = vpop.f32.mrb[91].mxu0  ;;  %6060 = vmatmul.mubr.f32.gmra.mrb[36].mxu1 %v9522_v61  ;;  %2039 = vmax.xlane.f32.xlu0 %v9528_v47  ;;  %v12102_v29 = vld [vmem:[#allocation74_spill] sm:$0xff] }
 0x35c   : > { %v1109_v17 = vsub.f32 %v9222_v6, %v1060_v43  ;;  %6788 = vmatpush3.bf16.msra.mxu1 %v6785_v3  ;;  %6062 = vmatprep.mubr.f32.mxu1 %v9530_v4  ;;  %v9540_v52 = vpop.f32.mrb[92].mxu0  ;;  %7324 = vpow2.f32 %v1151_v63  ;;  %v7114_v6 = vunpack.i.h.bf16 %v12102_v29  ;;  %v7113_v9 = vunpack.i.l.bf16 %v12102_v29 }
 0x35d   : > { %v9542_v51 = vpop.eup %7314  ;;  %v1153_v36 = vmul.f32 1.442695, %v1108_v38  ;;  %6790 = vmatprep.subr.bf16.mxu1 %v6789_v18  ;;  %1195 = vadd.xlane.f32.xlu1 %v7305_v40  ;;  %v9550_v46 = vpop.f32.mrb[93].mxu0  ;;  %v6793_v63 = vpack.c.bf16 %v7109_v5, %v7108_v7  ;;  %v9555_v40 = vsel %vm660_vm2, %v1922_v14, -1e+30 }
 0x35e   : > { %v1155_v41 = vmul.f32 1.442695, %v1109_v17  ;;  %v1062_v10 = vpop.xlane.xlu0 %1061  ;;  %v9546_v53 = vpop.eup %7316  ;;  %12103 = vst [vmem:[#allocation8_spill] sm:$0xff] %v9555_v40  ;;  %v6797_v7 = vpack.c.bf16 %v7114_v6, %v7113_v9 }
 0x35f   : > { %v1064_v43 = vpop.xlane.xlu1 %1063  ;;  %7326 = vpow2.f32 %v1153_v36  ;;  %v1110_v3 = vsub.f32 %v9228_v24, %v1062_v10  ;;  %6063 = vmatmul.mubr.f32.gmra.mrb[38].mxu1 %v9542_v51  ;;  %1197 = vadd.xlane.f32.xlu0 %v7307_v49  ;;  %v12104_v36 = vld [vmem:[#allocation73_spill] sm:$0xff]  ;;  %v9567_v49 = vsel %vm660_vm2, %v9507_v34, -1e+30 }
 0x360   : > { %v1111_v47 = vsub.f32 %v9236_v48, %v1064_v43  ;;  %6792 = vmatpush3.bf16.msra.mxu1 %v6789_v18  ;;  %6065 = vmatprep.mubr.f32.mxu1 %v9546_v53  ;;  %v9558_v38 = vpop.f32.mrb[94].mxu0  ;;  %7328 = vpow2.f32 %v1155_v41  ;;  %v7124_v5 = vunpack.i.h.bf16 %v12104_v36  ;;  %12105 = vst [vmem:[#allocation9_spill] sm:$0xff] %v9567_v49  ;;  %v7123_v10 = vunpack.i.l.bf16 %v12104_v36 }
 0x361   : > { %v9560_v17 = vpop.eup %7318  ;;  %v1157_v24 = vmul.f32 1.442695, %v1110_v3  ;;  %6794 = vmatprep.subr.bf16.mxu1 %v6793_v63  ;;  %2041 = vmax.xlane.f32.xlu1 %v9555_v40  ;;  %v9574_v43 = vpop.f32.mrb[95].mxu0 }
 0x362   : > { %v1159_v48 = vmul.f32 1.442695, %v1111_v47  ;;  %v1066_v14 = vpop.xlane.xlu0 %1065  ;;  %v9569_v29 = vpop.eup %7320 }
 0x363   : > { %v1068_v18 = vpop.xlane.xlu1 %1067  ;;  %7330 = vpow2.f32 %v1157_v24  ;;  %v1112_v47 = vsub.f32 %v9242_v55, %v1066_v14  ;;  %6066 = vmatmul.mubr.f32.gmra.mrb[40].mxu1 %v9560_v17  ;;  %2043 = vmax.xlane.f32.xlu0 %v9567_v49  ;;  %v12106_v55 = vld [vmem:[#allocation66_spill] sm:$0xff] }
 0x364   : > { %v1113_v41 = vsub.f32 %v9250_v42, %v1068_v18  ;;  %6796 = vmatpush3.bf16.msra.mxu1 %v6793_v63  ;;  %6068 = vmatprep.mubr.f32.mxu1 %v9569_v29  ;;  %v9579_v34 = vpop.f32.mrb[96].mxu0  ;;  %7332 = vpow2.f32 %v1159_v48  ;;  %v7074_v42 = vunpack.i.h.bf16 %v12106_v55  ;;  %v7073_v24 = vunpack.i.l.bf16 %v12106_v55 }
 0x365   : > { %v9581_v6 = vpop.eup %7322  ;;  %v1161_v9 = vmul.f32 1.442695, %v1112_v47  ;;  %6798 = vmatprep.subr.bf16.mxu1 %v6797_v7  ;;  %1199 = vadd.xlane.f32.xlu1 %v9511_v0  ;;  %v9590_v40 = vpop.f32.mrb[97].mxu0  ;;  %v6801_v48 = vpack.c.bf16 %v7124_v5, %v7123_v10  ;;  %v9597_v0 = vsel %vm660_vm2, %v9535_v54, -1e+30 }
 0x366   : > { %v1163_v3 = vmul.f32 1.442695, %v1113_v41  ;;  %v1070_v36 = vpop.xlane.xlu0 %1069  ;;  %v9586_v18 = vpop.eup %7324 }
 0x367   : > { %v1072_v14 = vpop.xlane.xlu1 %1071  ;;  %7334 = vpow2.f32 %v1161_v9  ;;  %v1114_v63 = vsub.f32 %v9256_v60, %v1070_v36  ;;  %6069 = vmatmul.mubr.f32.gmra.mrb[42].mxu1 %v9581_v6  ;;  %1201 = vadd.xlane.f32.xlu0 %v9522_v61  ;;  %v9608_v61 = vsel %vm660_vm2, %v9520_v57, -1e+30 }
 0x368   : > { %v1115_v49 = vsub.f32 %v9264_v11, %v1072_v14  ;;  %6800 = vmatpush3.bf16.msra.mxu1 %v6797_v7  ;;  %6071 = vmatprep.mubr.f32.mxu1 %v9586_v18  ;;  %v9600_v47 = vpop.f32.mrb[98].mxu0  ;;  %7336 = vpow2.f32 %v1163_v3 }
 0x369   : > { %v9602_v60 = vpop.eup %7326  ;;  %v1165_v11 = vmul.f32 1.442695, %v1114_v63  ;;  %6802 = vmatprep.subr.bf16.mxu1 %v6801_v48  ;;  %2045 = vmax.xlane.f32.xlu1 %v9597_v0  ;;  %v9614_v3 = vpop.f32.mrb[99].mxu0 }
 0x36a   : > { %v1167_v41 = vmul.f32 1.442695, %v1115_v49  ;;  %v1074_v54 = vpop.xlane.xlu0 %1073  ;;  %v9610_v7 = vpop.eup %7328  ;;  %v9617_v49 = vpack.c.bf16 %v7074_v42, %v7073_v24 }
 0x36b   : > { %v1076_v5 = vpop.xlane.xlu1 %1075  ;;  %7338 = vpow2.f32 %v1165_v11  ;;  %v1116_v10 = vsub.f32 %v9270_v27, %v1074_v54  ;;  %6072 = vmatmul.mubr.f32.gmra.mrb[44].mxu1 %v9602_v60  ;;  %2047 = vmax.xlane.f32.xlu0 %v9608_v61  ;;  %v9638_v11 = vsel %vm660_vm2, %v9550_v46, -1e+30 }
 0x36c   : > { %v1117_v9 = vsub.f32 %v9278_v33, %v1076_v5  ;;  %6804 = vmatpush3.bf16.msra.mxu1 %v6801_v48  ;;  %6074 = vmatprep.mubr.f32.mxu1 %v9610_v7  ;;  %v9621_v57 = vpop.f32.mrb[100].mxu0  ;;  %7340 = vpow2.f32 %v1167_v41 }
 0x36d   : > { %v9623_v55 = vpop.eup %7330  ;;  %v1169_v36 = vmul.f32 1.442695, %v1116_v10  ;;  %6854 = vmatprep.subr.bf16.mxu1 %v9617_v49  ;;  %1203 = vadd.xlane.f32.xlu1 %v9530_v4  ;;  %v9631_v48 = vpop.f32.mrb[101].mxu0 }
 0x36e   : > { %v1171_v27 = vmul.f32 1.442695, %v1117_v9  ;;  %v1078_v33 = vpop.xlane.xlu0 %1077  ;;  %v9627_v42 = vpop.eup %7332 }
 0x36f   : > { %v1080_v14 = vpop.xlane.xlu1 %1079  ;;  %7342 = vpow2.f32 %v1169_v36  ;;  %v1118_v24 = vsub.f32 %v9284_v35, %v1078_v33  ;;  %6075 = vmatmul.mubr.f32.gmra.mrb[46].mxu1 %v9623_v55  ;;  %1205 = vadd.xlane.f32.xlu0 %v9542_v51  ;;  %v9649_v51 = vsel %vm660_vm2, %v9540_v52, -1e+30 }
 0x370   : > { %v1119_v63 = vsub.f32 %v9292_v28, %v1080_v14  ;;  %6077 = vmatprep.mubr.f32.mxu1 %v9627_v42  ;;  %v9641_v4 = vpop.f32.mrb[102].mxu0  ;;  %7344 = vpow2.f32 %v1171_v27 }
 0x371   : > { %v9643_v41 = vpop.eup %7334  ;;  %v1173_v35 = vmul.f32 1.442695, %v1118_v24  ;;  %2049 = vmax.xlane.f32.xlu1 %v9638_v11  ;;  %v9655_v36 = vpop.f32.mrb[103].mxu0 }
 0x372   : > { %v1175_v28 = vmul.f32 1.442695, %v1119_v63  ;;  %v1082_v54 = vpop.xlane.xlu0 %1081  ;;  %v9651_v46 = vpop.eup %7336 }
 0x373   : > { %v1084_v5 = vpop.xlane.xlu1 %1083  ;;  %7346 = vpow2.f32 %v1173_v35  ;;  %v1120_v10 = vsub.f32 %v9298_v32, %v1082_v54  ;;  %6078 = vmatmul.mubr.f32.gmra.mrb[48].mxu1 %v9643_v41  ;;  %2051 = vmax.xlane.f32.xlu0 %v9649_v51 }
 0x374   : > { %v1121_v9 = vsub.f32 %v9306_v16, %v1084_v5  ;;  %6080 = vmatprep.mubr.f32.mxu1 %v9651_v46  ;;  %v9660_v27 = vpop.f32.mrb[104].mxu0  ;;  %7348 = vpow2.f32 %v1175_v28  ;;  %v9676_v28 = vsel %vm660_vm2, %v9574_v43, -1e+30 }
 0x375   : > { %v9662_v52 = vpop.eup %7338  ;;  %v1177_v33 = vmul.f32 1.442695, %v1120_v10  ;;  %1207 = vadd.xlane.f32.xlu1 %v9546_v53  ;;  %v9669_v54 = vpop.f32.mrb[105].mxu0  ;;  %12107 = vst [vmem:[#allocation30_spill] sm:$0xff] %v9676_v28 }
 0x376   : > { %v1179_v14 = vmul.f32 1.442695, %v1121_v9  ;;  %v1086_v32 = vpop.xlane.xlu0 %1085  ;;  %v9665_v16 = vpop.eup %7340 }
 0x377   : > { %v1088_v24 = vpop.xlane.xlu1 %1087  ;;  %7350 = vpow2.f32 %v1177_v33  ;;  %v1122_v63 = vsub.f32 %v9312_v22, %v1086_v32  ;;  %6081 = vmatmul.mubr.f32.gmra.mrb[50].mxu1 %v9662_v52  ;;  %1209 = vadd.xlane.f32.xlu0 %v9560_v17  ;;  %v9687_v17 = vsel %vm660_vm2, %v9558_v38, -1e+30 }
 0x378   : > { %v1123_v35 = vsub.f32 %v9320_v37, %v1088_v24  ;;  %6083 = vmatprep.mubr.f32.mxu1 %v9665_v16  ;;  %v9679_v53 = vpop.f32.mrb[106].mxu0  ;;  %7352 = vpow2.f32 %v1179_v14  ;;  %12108 = vst [vmem:[#allocation3_spill] sm:$0xff] %v9687_v17 }
 0x379   : > { %v9681_v5 = vpop.eup %7342  ;;  %v1181_v22 = vmul.f32 1.442695, %v1122_v63  ;;  %2053 = vmax.xlane.f32.xlu1 %v9676_v28  ;;  %v9689_v9 = vpop.f32.mrb[107].mxu0 }
 0x37a   : > { %v1183_v37 = vmul.f32 1.442695, %v1123_v35  ;;  %v1090_v10 = vpop.xlane.xlu0 %1089  ;;  %v9691_v43 = vpop.eup %7344 }
 0x37b   : > { %7354 = vpow2.f32 %v1181_v22  ;;  %v1124_v33 = vsub.f32 %v9326_v30, %v1090_v10  ;;  %v1092_v32 = vpop.xlane.xlu1 %1091  ;;  %6084 = vmatmul.mubr.f32.gmra.mrb[52].mxu1 %v9681_v5  ;;  %2055 = vmax.xlane.f32.xlu0 %v9687_v17 }
 0x37c   : > { %v1125_v14 = vsub.f32 %v9334_v2, %v1092_v32  ;;  %6086 = vmatprep.mubr.f32.mxu1 %v9691_v43  ;;  %v9698_v24 = vpop.f32.mrb[108].mxu0  ;;  %7356 = vpow2.f32 %v1183_v37  ;;  %v9719_v32 = vsel %vm660_vm2, %v9579_v34, -1e+30 }
 0x37d   : > { %v9700_v38 = vpop.eup %7346  ;;  %v1185_v63 = vmul.f32 1.442695, %v1124_v33  ;;  %1211 = vadd.xlane.f32.xlu1 %v9569_v29  ;;  %v9703_v35 = vpop.f32.mrb[109].mxu0  ;;  %12109 = vst [vmem:[#allocation33_spill] sm:$0xff] %v9719_v32 }
 0x37e   : > { %v1187_v30 = vmul.f32 1.442695, %v1125_v14  ;;  %v1094_v22 = vpop.xlane.xlu0 %1093  ;;  %v9705_v10 = vpop.eup %7348  ;;  %v9741_v14 = vsel %vm660_vm2, %v9590_v40, -1e+30  ;;  %v9757_v40 = vsel %vm660_vm2, %v9631_v48, -1e+30 }
 0x37f   : > { %7358 = vpow2.f32 %v1185_v63  ;;  %v1126_v17 = vsub.f32 %v9340_v20, %v1094_v22  ;;  %6087 = vmatmul.mubr.f32.gmra.mrb[54].mxu1 %v9700_v38  ;;  %1213 = vadd.xlane.f32.xlu0 %v9581_v6  ;;  %v9728_v6 = vsel %vm660_vm2, %v9600_v47, -1e+30  ;;  %12111 = vst [vmem:[#allocation11_spill] sm:$0xff] %v9741_v14  ;;  %12112 = vst [vmem:[#allocation37_spill] sm:$0xff] %v9757_v40 }
 0x380   : > { %6089 = vmatprep.mubr.f32.mxu1 %v9705_v10  ;;  %v9711_v2 = vpop.f32.mrb[110].mxu0  ;;  %7360 = vpow2.f32 %v1187_v30  ;;  %12110 = vst [vmem:[#allocation35_spill] sm:$0xff] %v9728_v6 }
 0x381   : > { %v9713_v37 = vpop.eup %7350  ;;  %v1189_v29 = vmul.f32 1.442695, %v1126_v17  ;;  %1215 = vadd.xlane.f32.xlu1 %v9586_v18  ;;  %v2898_v33 = vpop.f32.mrb[111].mxu0 }
 0x382   : > { %v9721_v20 = vpop.eup %7352 }
 0x383   : > { %7362 = vpow2.f32 %v1189_v29  ;;  %6090 = vmatmul.mubr.f32.gmra.mrb[56].mxu1 %v9713_v37  ;;  %3021 = vmax.xlane.f32.xlu0 %v9719_v32 }
 0x384   : > { %6092 = vmatprep.mubr.f32.mxu1 %v9721_v20  ;;  %v9731_v18 = vpop.f32.mrb[112].mxu0 }
 0x385   : > { %v9733_v17 = vpop.eup %7354  ;;  %3025 = vmax.xlane.f32.xlu1 %v9728_v6  ;;  %v9736_v34 = vpop.f32.mrb[113].mxu0 }
 0x386   : > { %v7357_v63 = vpop.eup %7356 }
 0x387   : > { %6093 = vmatmul.mubr.f32.gmra.mrb[58].mxu1 %v9733_v17  ;;  %3019 = vmax.xlane.f32.xlu0 %v9741_v14 }
 0x388   : > { %6095 = vmatprep.mubr.f32.mxu1 %v7357_v63  ;;  %v9745_v47 = vpop.f32.mrb[114].mxu0 }
 0x389   : > { %v9747_v30 = vpop.eup %7358  ;;  %1219 = vadd.xlane.f32.xlu1 %v9610_v7  ;;  %v9750_v22 = vpop.f32.mrb[115].mxu0  ;;  %v9767_v7 = vsel %vm660_vm2, %v9614_v3, -1e+30  ;;  %v9785_v3 = vsel %vm660_vm2, %v9621_v57, -1e+30 }
 0x38a   : > { %v7361_v29 = vpop.eup %7360  ;;  %12113 = vst [vmem:[#allocation12_spill] sm:$0xff] %v9767_v7  ;;  %12114 = vst [vmem:[#allocation14_spill] sm:$0xff] %v9785_v3  ;;  %v9803_v57 = vsel %vm660_vm2, %v9641_v4, -1e+30 }
 0x38b   : > { %6096 = vmatmul.mubr.f32.gmra.mrb[60].mxu1 %v9747_v30  ;;  %1217 = vadd.xlane.f32.xlu0 %v9602_v60  ;;  %12116 = vst [vmem:[#allocation15_spill] sm:$0xff] %v9803_v57 }
 0x38c   : > { %6098 = vmatprep.mubr.f32.mxu1 %v7361_v29 }
 0x38d   : > { %v9759_v6 = vpop.eup %7362  ;;  %3027 = vmax.xlane.f32.xlu1 %v9757_v40  ;;  %v9762_v14 = vpop.f32.mrb[116].mxu0 }
 0x38e   : > { %v9769_v32 = vpop.f32.mrb[117].mxu0 }
 0x38f   : > { %6099 = vmatmul.mubr.f32.gmra.mrb[62].mxu1 %v9759_v6  ;;  %3023 = vmax.xlane.f32.xlu0 %v9767_v7 }
 0x391   : > { %1223 = vadd.xlane.f32.xlu1 %v9627_v42  ;;  %v9774_v60 = vpop.f32.mrb[118].mxu0  ;;  %v9791_v42 = vsel %vm660_vm2, %v9660_v27, -1e+30 }
 0x392   : > { %v9776_v48 = vpop.f32.mrb[119].mxu0  ;;  %12115 = vst [vmem:[#allocation39_spill] sm:$0xff] %v9791_v42 }
 0x393   : > { %1221 = vadd.xlane.f32.xlu0 %v9623_v55 }
 0x395   : > { %1227 = vadd.xlane.f32.xlu1 %v9651_v46  ;;  %v9780_v40 = vpop.f32.mrb[120].mxu0 }
 0x396   : > { %v2948_v28 = vpop.f32.mrb[121].mxu0 }
 0x397   : > { %3029 = vmax.xlane.f32.xlu0 %v9785_v3 }
 0x399   : > { %3037 = vmax.xlane.f32.xlu1 %v9791_v42  ;;  %v9794_v55 = vpop.f32.mrb[122].mxu0 }
 0x39a   : > { %v2958_v46 = vpop.f32.mrb[123].mxu0 }
 0x39b   : > { %1225 = vadd.xlane.f32.xlu0 %v9643_v41  ;;  %v9812_v41 = vsel %vm660_vm2, %v9655_v36, -1e+30 }
 0x39c   : > { %12117 = vst [vmem:[#allocation41_spill] sm:$0xff] %v9812_v41 }
 0x39d   : > { %1231 = vadd.xlane.f32.xlu1 %v9665_v16  ;;  %v9798_v7 = vpop.f32.mrb[124].mxu0 }
 0x39e   : > { %v2968_v3 = vpop.f32.mrb[125].mxu0 }
 0x39f   : > { %3033 = vmax.xlane.f32.xlu0 %v9803_v57 }
 0x3a1   : > { %1235 = vadd.xlane.f32.xlu1 %v9691_v43  ;;  %v9807_v27 = vpop.f32.mrb[126].mxu0  ;;  %v9825_v43 = vsel %vm660_vm2, %v2898_v33, -1e+30 }
 0x3a2   : > { %v9814_v16 = vpop.f32.mrb[127].mxu0  ;;  %12118 = vst [vmem:[#allocation43_spill] sm:$0xff] %v9825_v43 }
 0x3a3   : > { %3031 = vmax.xlane.f32.xlu0 %v9812_v41  ;;  %v9833_v41 = vsel %vm660_vm2, %v9669_v54, -1e+30  ;;  %v9849_v54 = vsel %vm660_vm2, %v9679_v53, -1e+30 }
 0x3a4   : > { %12119 = vst [vmem:[#allocation16_spill] sm:$0xff] %v9833_v41 }
 0x3a5   : > { %1239 = vadd.xlane.f32.xlu1 %v9705_v10  ;;  %v9818_v4 = vpop.f32.mrb[128].mxu0 }
 0x3a6   : > { %v9820_v42 = vpop.f32.mrb[129].mxu0 }
 0x3a7   : > { %1229 = vadd.xlane.f32.xlu0 %v9662_v52 }
 0x3a9   : > { %3047 = vmax.xlane.f32.xlu1 %v9825_v43  ;;  %v9828_v36 = vpop.f32.mrb[130].mxu0 }
 0x3aa   : > { %v9835_v10 = vpop.f32.mrb[131].mxu0 }
 0x3ab   : > { %3035 = vmax.xlane.f32.xlu0 %v9833_v41 }
 0x3ad   : > { %1243 = vadd.xlane.f32.xlu1 %v9721_v20  ;;  %v9839_v52 = vpop.f32.mrb[132].mxu0 }
 0x3ae   : > { %12120 = vst [vmem:[#allocation45_spill] sm:$0xff] %v9839_v52  ;;  %v9841_v57 = vpop.f32.mrb[133].mxu0 }
 0x3af   : > { %12121 = vst [vmem:[#allocation17_spill] sm:$0xff] %v9841_v57  ;;  %1233 = vadd.xlane.f32.xlu0 %v9681_v5 }
 0x3b1   : > { %1247 = vadd.xlane.f32.xlu1 %v7357_v63  ;;  %v9844_v33 = vpop.f32.mrb[134].mxu0  ;;  %v9861_v63 = vsel %vm660_vm2, %v9689_v9, -1e+30 }
 0x3b2   : > { %12122 = vst [vmem:[#allocation47_spill] sm:$0xff] %v9844_v33  ;;  %v9851_v43 = vpop.f32.mrb[135].mxu0 }
 0x3b3   : > { %12123 = vst [vmem:[#allocation18_spill] sm:$0xff] %v9851_v43  ;;  %3041 = vmax.xlane.f32.xlu0 %v9849_v54  ;;  %v1996_v41 = vpop.xlane.xlu1 %1995 }
 0x3b4   : > { %v2058_v20 = vsub.f32 %v9379_v31, %v1996_v41  ;;  %v1994_v52 = vpop.xlane.xlu0 %1993  ;;  %v9868_v31 = vsel %vm660_vm2, %v2948_v28, -1e+30 }
 0x3b5   : > { %1251 = vadd.xlane.f32.xlu1 %v7361_v29  ;;  %v2057_v57 = vsub.f32 %v9383_v44, %v1994_v52  ;;  %v9856_v5 = vpop.f32.mrb[136].mxu0 }
 0x3b6   : > { %v2091_v53 = vmul.f32 1.442695, %v2058_v20  ;;  %v9863_v33 = vpop.f32.mrb[137].mxu0 }
 0x3b7   : > { %v2089_v43 = vmul.f32 1.442695, %v2057_v57  ;;  %3039 = vmax.xlane.f32.xlu0 %v9861_v63  ;;  %v9879_v57 = vsel %vm660_vm2, %v2958_v46, -1e+30 }
 0x3b8   : > { %v2000_v29 = vpop.xlane.xlu0 %1999  ;;  %12126 = vst [vmem:[#allocation50_spill] sm:$0xff] %v9879_v57 }
 0x3b9   : > { %7364 = vpow2.f32 %v2089_v43  ;;  %3067 = vmax.xlane.f32.xlu1 %v9868_v31  ;;  %v9871_v44 = vpop.f32.mrb[138].mxu0  ;;  %v2060_v9 = vsub.f32 %v9389_v12, %v2000_v29  ;;  %v9889_v12 = vsel %vm660_vm2, %v9698_v24, -1e+30 }
 0x3ba   : > { %12124 = vst [vmem:[#allocation49_spill] sm:$0xff] %v9871_v44  ;;  %7366 = vpow2.f32 %v2091_v53  ;;  %v9874_v41 = vpop.f32.mrb[139].mxu0  ;;  %v12129_v44 = vld [vmem:[#allocation71_spill] sm:$0xff] }
 0x3bb   : > { %12125 = vst [vmem:[#allocation20_spill] sm:$0xff] %v9874_v41  ;;  %1237 = vadd.xlane.f32.xlu0 %v9700_v38  ;;  %v2095_v38 = vmul.f32 1.442695, %v2060_v9 }
 0x3bc   : > { %v1998_v52 = vpop.xlane.xlu0 %1997  ;;  %v2002_v28 = vpop.xlane.xlu1 %2001 }
 0x3bd   : > { %3071 = vmax.xlane.f32.xlu1 %v9879_v57  ;;  %v2059_v43 = vsub.f32 %v9394_v1, %v1998_v52  ;;  %v9883_v20 = vpop.f32.mrb[140].mxu0  ;;  %v2061_v53 = vsub.f32 %v9398_v15, %v2002_v28  ;;  %v7094_v57 = vunpack.i.h.bf16 %v12129_v44  ;;  %v7093_v1 = vunpack.i.l.bf16 %v12129_v44 }
 0x3be   : > { %12127 = vst [vmem:[#allocation22_spill] sm:$0xff] %v9883_v20  ;;  %v9891_v29 = vpop.f32.mrb[141].mxu0  ;;  %v9898_v52 = vsel %vm660_vm2, %v2968_v3, -1e+30 }
 0x3bf   : > { %12128 = vst [vmem:[#allocation51_spill] sm:$0xff] %v9891_v29  ;;  %v2093_v46 = vmul.f32 1.442695, %v2059_v43  ;;  %v2097_v41 = vmul.f32 1.442695, %v2061_v53  ;;  %3045 = vmax.xlane.f32.xlu0 %v9889_v12 }
 0x3c0   : > { %v2004_v15 = vpop.xlane.xlu0 %2003  ;;  %v2006_v28 = vpop.xlane.xlu1 %2005  ;;  %v9908_v53 = vsel %vm660_vm2, %v9703_v35, -1e+30 }
 0x3c1   : > { %7368 = vpow2.f32 %v2093_v46  ;;  %3075 = vmax.xlane.f32.xlu1 %v9898_v52  ;;  %v2062_v24 = vsub.f32 %v9404_v62, %v2004_v15  ;;  %v9902_v9 = vpop.f32.mrb[142].mxu0  ;;  %v2063_v43 = vsub.f32 %v9408_v21, %v2006_v28  ;;  %v12132_v15 = vld [vmem:[#allocation72_spill] sm:$0xff]  ;;  %v9921_v21 = vsel %vm660_vm2, %v9807_v27, -1e+30 }
 0x3c2   : > { %12130 = vst [vmem:[#allocation6_spill] sm:$0xff] %v9902_v9  ;;  %7370 = vpow2.f32 %v2095_v38  ;;  %v9910_v44 = vpop.f32.mrb[143].mxu0  ;;  %v7099_v9 = vunpack.i.h.bf16 %v12132_v15  ;;  %v6857_v28 = vpack.c.bf16 %v7094_v57, %v7093_v1  ;;  %v12133_v1 = vld [vmem:[#allocation68_spill] sm:$0xff] }
 0x3c3   : > { %12131 = vst [vmem:[#allocation52_spill] sm:$0xff] %v9910_v44  ;;  %v9912_v3 = vpop.eup %7364  ;;  %7372 = vpow2.f32 %v2097_v41  ;;  %v2099_v46 = vmul.f32 1.442695, %v2062_v24  ;;  %v2101_v29 = vmul.f32 1.442695, %v2063_v43  ;;  %3043 = vmax.xlane.f32.xlu0 %v9908_v53  ;;  %v7098_v41 = vunpack.i.l.bf16 %v12132_v15 }
 0x3c4   : > { %v9915_v62 = vpop.eup %7366  ;;  %v2008_v35 = vpop.xlane.xlu0 %2007  ;;  %6213 = vmatprep.mubr.f32.mxu1 %v9912_v3 }
 0x3c5   : > { %v2010_v38 = vpop.xlane.xlu1 %2009  ;;  %7374 = vpow2.f32 %v2099_v46  ;;  %3081 = vmax.xlane.f32.xlu1 %v9921_v21  ;;  %v2064_v24 = vsub.f32 %v9414_v45, %v2008_v35  ;;  %v9927_v43 = vpop.f32.mrb[144].mxu0  ;;  %6214 = vmatmul.mubr.f32.vlgmr.msra.gmra.mrb[64].mxu1 %v9915_v62  ;;  %v7104_v46 = vunpack.i.h.bf16 %v12133_v1  ;;  %v7103_v45 = vunpack.i.l.bf16 %v12133_v1 }
 0x3c6   : > { %v2065_v44 = vsub.f32 %v9418_v59, %v2010_v38  ;;  %6856 = vmatpush3.bf16.msra.mxu1 %v9617_v49  ;;  %v9932_v27 = vpop.f32.mrb[145].mxu0  ;;  %7376 = vpow2.f32 %v2101_v29  ;;  %v9940_v59 = vsel %vm660_vm2, %v9814_v16, -1e+30  ;;  %v9950_v38 = vsel %vm660_vm2, %v9711_v2, -1e+30 }
 0x3c7   : > { %v2103_v20 = vmul.f32 1.442695, %v2064_v24  ;;  %6858 = vmatprep.subr.bf16.mxu1 %v6857_v28  ;;  %1241 = vadd.xlane.f32.xlu0 %v9713_v37  ;;  %v9964_v2 = vsel %vm660_vm2, %v9820_v42, -1e+30 }
 0x3c8   : > { %v2105_v57 = vmul.f32 1.442695, %v2065_v44  ;;  %v2012_v15 = vpop.xlane.xlu0 %2011  ;;  %v6861_v44 = vpack.c.bf16 %v7099_v9, %v7098_v41 }
 0x3c9   : > { %v2014_v35 = vpop.xlane.xlu1 %2013  ;;  %7378 = vpow2.f32 %v2103_v20  ;;  %3079 = vmax.xlane.f32.xlu1 %v9940_v59  ;;  %v2066_v49 = vsub.f32 %v9426_v25, %v2012_v15  ;;  %v9944_v29 = vpop.f32.mrb[146].mxu0 }
 0x3ca   : > { %12134 = vst [vmem:[#allocation26_spill] sm:$0xff] %v9944_v29  ;;  %v2067_v37 = vsub.f32 %v9430_v8, %v2014_v35  ;;  %6860 = vmatpush3.bf16.msra.mxu1 %v6857_v28  ;;  %v9952_v16 = vpop.f32.mrb[147].mxu0  ;;  %7380 = vpow2.f32 %v2105_v57  ;;  %v12136_v8 = vld [vmem:[#allocation76_spill] sm:$0xff] }
 0x3cb   : > { %12135 = vst [vmem:[#allocation53_spill] sm:$0xff] %v9952_v16  ;;  %v9954_v24 = vpop.eup %7368  ;;  %v2107_v20 = vmul.f32 1.442695, %v2066_v49  ;;  %6862 = vmatprep.subr.bf16.mxu1 %v6861_v44  ;;  %3049 = vmax.xlane.f32.xlu0 %v9950_v38  ;;  %v7119_v9 = vunpack.i.h.bf16 %v12136_v8  ;;  %v7118_v41 = vunpack.i.l.bf16 %v12136_v8  ;;  %v6865_v8 = vpack.c.bf16 %v7104_v46, %v7103_v45 }
 0x3cc   : > { %v2109_v1 = vmul.f32 1.442695, %v2067_v37  ;;  %v9957_v25 = vpop.eup %7370  ;;  %v2016_v28 = vpop.xlane.xlu0 %2015  ;;  %6216 = vmatprep.mubr.f32.mxu1 %v9954_v24 }
 0x3cd   : > { %v2018_v57 = vpop.xlane.xlu1 %2017  ;;  %v9967_v15 = vpop.eup %7372  ;;  %7382 = vpow2.f32 %v2107_v20  ;;  %4029 = vmax.xlane.f32.xlu1 %v9964_v2  ;;  %v2068_v35 = vsub.f32 %v9436_v50, %v2016_v28  ;;  %6217 = vmatmul.mubr.f32.gmra.mrb[66].mxu1 %v9957_v25  ;;  %v12138_v50 = vld [vmem:[#allocation75_spill] sm:$0xff] }
 0x3ce   : > { %v9971_v49 = vpop.f32.mrb[148].mxu0  ;;  %v2069_v37 = vsub.f32 %v9441_v58, %v2018_v57  ;;  %6864 = vmatpush3.bf16.msra.mxu1 %v6861_v44  ;;  %6219 = vmatprep.mubr.f32.mxu1 %v9967_v15  ;;  %7384 = vpow2.f32 %v2109_v1  ;;  %v7129_v28 = vunpack.i.h.bf16 %v12138_v50  ;;  %v9985_v58 = vsel %vm660_vm2, %v9835_v10, -1e+30 }
 0x3cf   : > { %12137 = vst [vmem:[#allocation27_spill] sm:$0xff] %v9971_v49  ;;  %v9975_v42 = vpop.f32.mrb[149].mxu0  ;;  %v9978_v29 = vpop.eup %7374  ;;  %v2111_v20 = vmul.f32 1.442695, %v2068_v35  ;;  %6866 = vmatprep.subr.bf16.mxu1 %v6865_v8  ;;  %1245 = vadd.xlane.f32.xlu0 %v9733_v17  ;;  %12139 = vst [vmem:[#allocation54_spill] sm:$0xff] %v9985_v58  ;;  %v6869_v44 = vpack.c.bf16 %v7119_v9, %v7118_v41  ;;  %v7128_v49 = vunpack.i.l.bf16 %v12138_v50 }
 0x3d0   : > { %v2113_v16 = vmul.f32 1.442695, %v2069_v37  ;;  %v2020_v46 = vpop.xlane.xlu0 %2019  ;;  %v9987_v57 = vpop.eup %7376  ;;  %v9999_v10 = vsel %vm660_vm2, %v9731_v18, -1e+30 }
 0x3d1   : > { %v2022_v45 = vpop.xlane.xlu1 %2021  ;;  %7386 = vpow2.f32 %v2111_v20  ;;  %4033 = vmax.xlane.f32.xlu1 %v9985_v58  ;;  %v2070_v1 = vsub.f32 %v9448_v39, %v2020_v46  ;;  %v9992_v17 = vpop.f32.mrb[150].mxu0  ;;  %6220 = vmatmul.mubr.f32.gmra.mrb[68].mxu1 %v9978_v29 }
 0x3d2   : > { %v2071_v35 = vsub.f32 %v9452_v13, %v2022_v45  ;;  %6868 = vmatpush3.bf16.msra.mxu1 %v6865_v8  ;;  %v10001_v9 = vpop.f32.mrb[151].mxu0  ;;  %6222 = vmatprep.mubr.f32.mxu1 %v9987_v57  ;;  %7388 = vpow2.f32 %v2113_v16  ;;  %v12141_v13 = vld [vmem:[#allocation78_spill] sm:$0xff] }
 0x3d3   : > { %12140 = vst [vmem:[#allocation29_spill] sm:$0xff] %v10001_v9  ;;  %v10004_v41 = vpop.eup %7378  ;;  %v2115_v39 = vmul.f32 1.442695, %v2070_v1  ;;  %6870 = vmatprep.subr.bf16.mxu1 %v6869_v44  ;;  %3053 = vmax.xlane.f32.xlu0 %v9999_v10  ;;  %v7134_v20 = vunpack.i.h.bf16 %v12141_v13  ;;  %v7133_v50 = vunpack.i.l.bf16 %v12141_v13  ;;  %v6873_v1 = vpack.c.bf16 %v7129_v28, %v7128_v49 }
 0x3d4   : > { %v2117_v37 = vmul.f32 1.442695, %v2071_v35  ;;  %v2024_v46 = vpop.xlane.xlu0 %2023  ;;  %v10009_v45 = vpop.eup %7380  ;;  %v10020_v35 = vsel %vm660_vm2, %v9736_v34, -1e+30 }
 0x3d5   : > { %v2026_v18 = vpop.xlane.xlu1 %2025  ;;  %7390 = vpow2.f32 %v2115_v39  ;;  %2153 = vadd.xlane.f32.xlu1 %v9912_v3  ;;  %v2072_v8 = vsub.f32 %v9459_v23, %v2024_v46  ;;  %v10013_v58 = vpop.f32.mrb[152].mxu0  ;;  %6223 = vmatmul.mubr.f32.gmra.mrb[70].mxu1 %v10004_v41 }
 0x3d6   : > { %12142 = vst [vmem:[#allocation55_spill] sm:$0xff] %v10013_v58  ;;  %v2073_v16 = vsub.f32 %v9463_v19, %v2026_v18  ;;  %6872 = vmatpush3.bf16.msra.mxu1 %v6869_v44  ;;  %v10022_v13 = vpop.f32.mrb[153].mxu0  ;;  %6225 = vmatprep.mubr.f32.mxu1 %v10009_v45  ;;  %7392 = vpow2.f32 %v2117_v37  ;;  %v12144_v19 = vld [vmem:[#allocation79_spill] sm:$0xff]  ;;  %v6877_v37 = vpack.c.bf16 %v7134_v20, %v7133_v50 }
 0x3d7   : > { %12143 = vst [vmem:[#allocation31_spill] sm:$0xff] %v10022_v13  ;;  %v10025_v3 = vpop.eup %7382  ;;  %v2119_v23 = vmul.f32 1.442695, %v2072_v8  ;;  %6874 = vmatprep.subr.bf16.mxu1 %v6873_v1  ;;  %3051 = vmax.xlane.f32.xlu0 %v10020_v35  ;;  %v7139_v49 = vunpack.i.h.bf16 %v12144_v19  ;;  %v7138_v28 = vunpack.i.l.bf16 %v12144_v19  ;;  %v12145_v44 = vld [vmem:[#allocation7_spill] sm:$0xff] }
 0x3d8   : > { %v2121_v39 = vmul.f32 1.442695, %v2073_v16  ;;  %v2028_v46 = vpop.xlane.xlu0 %2027  ;;  %v10030_v34 = vpop.eup %7384 }
 0x3d9   : > { %7394 = vpow2.f32 %v2119_v23  ;;  %2157 = vadd.xlane.f32.xlu1 %v9954_v24  ;;  %v2074_v18 = vsub.f32 %v12145_v44, %v2028_v46  ;;  %v10034_v13 = vpop.f32.mrb[154].mxu0  ;;  %6226 = vmatmul.mubr.f32.gmra.mrb[72].mxu1 %v10025_v3  ;;  %v2030_v8 = vpop.xlane.xlu1 %2029  ;;  %v12148_v23 = vld [vmem:[#allocation80_spill] sm:$0xff]  ;;  %v12149_v24 = vld [vmem:[#allocation77_spill] sm:$0xff] }
 0x3da   : > { %12146 = vst [vmem:[#allocation56_spill] sm:$0xff] %v10034_v13  ;;  %6876 = vmatpush3.bf16.msra.mxu1 %v6873_v1  ;;  %v10037_v16 = vpop.f32.mrb[155].mxu0  ;;  %6228 = vmatprep.mubr.f32.mxu1 %v10030_v34  ;;  %7396 = vpow2.f32 %v2121_v39  ;;  %v2075_v58 = vsub.f32 %v12148_v23, %v2030_v8  ;;  %v7144_v46 = vunpack.i.h.bf16 %v12149_v24  ;;  %v6881_v13 = vpack.c.bf16 %v7139_v49, %v7138_v28 }
 0x3db   : > { %12147 = vst [vmem:[#allocation32_spill] sm:$0xff] %v10037_v16  ;;  %v10040_v19 = vpop.eup %7386  ;;  %v2123_v9 = vmul.f32 1.442695, %v2074_v18  ;;  %6878 = vmatprep.subr.bf16.mxu1 %v6877_v37  ;;  %1249 = vadd.xlane.f32.xlu0 %v9747_v30  ;;  %v7143_v50 = vunpack.i.l.bf16 %v12149_v24  ;;  %v10056_v30 = vsel %vm660_vm2, %v9745_v47, -1e+30 }
 0x3dc   : > { %v2032_v44 = vpop.xlane.xlu0 %2031  ;;  %v10045_v20 = vpop.eup %7388  ;;  %v2125_v1 = vmul.f32 1.442695, %v2075_v58 }
 0x3dd   : > { %7398 = vpow2.f32 %v2123_v9  ;;  %2161 = vadd.xlane.f32.xlu1 %v9967_v15  ;;  %v2076_v39 = vsub.f32 %v9487_v26, %v2032_v44  ;;  %v10050_v18 = vpop.f32.mrb[156].mxu0  ;;  %6229 = vmatmul.mubr.f32.gmra.mrb[74].mxu1 %v10040_v19  ;;  %v2034_v49 = vpop.xlane.xlu1 %2033  ;;  %v12151_v26 = vld [vmem:[#allocation23_spill] sm:$0xff] }
 0x3de   : > { %6880 = vmatpush3.bf16.msra.mxu1 %v6877_v37  ;;  %v10058_v28 = vpop.f32.mrb[157].mxu0  ;;  %6231 = vmatprep.mubr.f32.mxu1 %v10045_v20  ;;  %7400 = vpow2.f32 %v2125_v1  ;;  %v2077_v9 = vsub.f32 %v12151_v26, %v2034_v49  ;;  %v12152_v37 = vld [vmem:[#allocation24_spill] sm:$0xff]  ;;  %v10075_v1 = vsel %vm660_vm2, %v9750_v22, -1e+30  ;;  %v12156_v26 = vld [vmem:[#allocation2_spill] sm:$0xff] }
 0x3df   : > { %12150 = vst [vmem:[#allocation57_spill] sm:$0xff] %v10058_v28  ;;  %v10061_v58 = vpop.eup %7390  ;;  %v2127_v15 = vmul.f32 1.442695, %v2076_v39  ;;  %6882 = vmatprep.subr.bf16.mxu1 %v6881_v13  ;;  %3057 = vmax.xlane.f32.xlu0 %v10056_v30  ;;  %v10070_v28 = vpack.c.bf16 %v7144_v46, %v7143_v50 }
 0x3e0   : > { %v2036_v8 = vpop.xlane.xlu0 %2035  ;;  %v7393_v23 = vpop.eup %7392  ;;  %v2129_v47 = vmul.f32 1.442695, %v2077_v9 }
 0x3e1   : > { %7402 = vpow2.f32 %v2127_v15  ;;  %2165 = vadd.xlane.f32.xlu1 %v9987_v57  ;;  %v2078_v24 = vsub.f32 %v12152_v37, %v2036_v8  ;;  %v10067_v44 = vpop.f32.mrb[158].mxu0  ;;  %6232 = vmatmul.mubr.f32.gmra.mrb[76].mxu1 %v10061_v58  ;;  %v10077_v39 = vpop.xlane.xlu1 %1191 }
 0x3e2   : > { %12153 = vst [vmem:[#allocation34_spill] sm:$0xff] %v10067_v44  ;;  %12154 = vst [vmem:[#allocation58_spill] sm:$0xff] %v10077_v39  ;;  %6884 = vmatpush3.bf16.msra.mxu1 %v6881_v13  ;;  %v10079_v49 = vpop.f32.mrb[159].mxu0  ;;  %6234 = vmatprep.mubr.f32.mxu1 %v7393_v23  ;;  %7404 = vpow2.f32 %v2129_v47 }
 0x3e3   : > { %12155 = vst [vmem:[#allocation36_spill] sm:$0xff] %v10079_v49  ;;  %v10081_v57 = vpop.eup %7394  ;;  %v2131_v15 = vmul.f32 1.442695, %v2078_v24  ;;  %6934 = vmatprep.subr.bf16.mxu1 %v10070_v28  ;;  %3055 = vmax.xlane.f32.xlu0 %v10075_v1  ;;  %v12157_v24 = vld [vmem:[#allocation28_spill] sm:$0xff]  ;;  %v10127_v49 = vsel %vm660_vm2, %v9774_v60, -1e+30 }
 0x3e4   : > { %v10085_v46 = vpop.xlane.xlu0 %1193  ;;  %v10087_v50 = vpop.eup %7396 }
 0x3e5   : > { %7406 = vpow2.f32 %v2131_v15  ;;  %2169 = vadd.xlane.f32.xlu1 %v10009_v45  ;;  %6235 = vmatmul.mubr.f32.gmra.mrb[78].mxu1 %v10081_v57  ;;  %v10101_v45 = vsel %vm660_vm2, %v9762_v14, -1e+30  ;;  %v10118_v14 = vsel %vm660_vm2, %v9769_v32, -1e+30 }
 0x3e6   : > { %v2038_v22 = vpop.xlane.xlu1 %2037  ;;  %6237 = vmatprep.mubr.f32.mxu1 %v10087_v50 }
 0x3e7   : > { %v7399_v13 = vpop.eup %7398  ;;  %v2079_v9 = vsub.f32 %v12156_v26, %v2038_v22  ;;  %1253 = vadd.xlane.f32.xlu0 %v9759_v6 }
 0x3e8   : > { %v2040_v8 = vpop.xlane.xlu0 %2039  ;;  %v10094_v47 = vpop.eup %7400 }
 0x3e9   : > { %v2133_v37 = vmul.f32 1.442695, %v2079_v9  ;;  %2173 = vadd.xlane.f32.xlu1 %v10030_v34  ;;  %v2080_v15 = vsub.f32 %v12157_v24, %v2040_v8  ;;  %6238 = vmatmul.mubr.f32.gmra.mrb[80].mxu1 %v7399_v13 }
 0x3ea   : > { %v10103_v39 = vpop.xlane.xlu1 %1195  ;;  %6240 = vmatprep.mubr.f32.mxu1 %v10094_v47 }
 0x3eb   : > { %12158 = vst [vmem:[#allocation59_spill] sm:$0xff] %v10103_v39  ;;  %v10106_v22 = vpop.eup %7402  ;;  %7408 = vpow2.f32 %v2133_v37  ;;  %v2135_v6 = vmul.f32 1.442695, %v2080_v15  ;;  %3061 = vmax.xlane.f32.xlu0 %v10101_v45  ;;  %v12159_v37 = vld [vmem:[#allocation8_spill] sm:$0xff] }
 0x3ec   : > { %v10109_v26 = vpop.xlane.xlu0 %1197  ;;  %v10111_v34 = vpop.eup %7404 }
 0x3ed   : > { %7410 = vpow2.f32 %v2135_v6  ;;  %2177 = vadd.xlane.f32.xlu1 %v10045_v20  ;;  %6241 = vmatmul.mubr.f32.gmra.mrb[82].mxu1 %v10106_v22  ;;  %v12160_v6 = vld [vmem:[#allocation9_spill] sm:$0xff] }
 0x3ee   : > { %v2042_v9 = vpop.xlane.xlu1 %2041  ;;  %6243 = vmatprep.mubr.f32.mxu1 %v10111_v34 }
 0x3ef   : > { %v7407_v8 = vpop.eup %7406  ;;  %v2081_v24 = vsub.f32 %v12159_v37, %v2042_v9  ;;  %3059 = vmax.xlane.f32.xlu0 %v10118_v14 }
 0x3f0   : > { %v2044_v15 = vpop.xlane.xlu0 %2043 }
 0x3f1   : > { %v2137_v39 = vmul.f32 1.442695, %v2081_v24  ;;  %2181 = vadd.xlane.f32.xlu1 %v7393_v23  ;;  %v2082_v20 = vsub.f32 %v12160_v6, %v2044_v15  ;;  %6244 = vmatmul.mubr.f32.gmra.mrb[84].mxu1 %v7407_v8  ;;  %v10139_v23 = vsel %vm660_vm2, %v9776_v48, -1e+30 }
 0x3f2   : > { %v10129_v32 = vpop.xlane.xlu1 %1199 }
 0x3f3   : > { %12161 = vst [vmem:[#allocation38_spill] sm:$0xff] %v10129_v32  ;;  %7412 = vpow2.f32 %v2137_v39  ;;  %v2139_v16 = vmul.f32 1.442695, %v2082_v20  ;;  %3065 = vmax.xlane.f32.xlu0 %v10127_v49 }
 0x3f4   : > { %v10132_v9 = vpop.xlane.xlu0 %1201 }
 0x3f5   : > { %v10134_v37 = vpop.eup %7408  ;;  %7414 = vpow2.f32 %v2139_v16  ;;  %2187 = vadd.xlane.f32.xlu1 %v7399_v13  ;;  %v10148_v13 = vsel %vm660_vm2, %v9780_v40, -1e+30 }
 0x3f6   : > { %6246 = vmatprep.mubr.f32.mxu1 %v10134_v37  ;;  %v2046_v60 = vpop.xlane.xlu1 %2045 }
 0x3f7   : > { %v7411_v24 = vpop.eup %7410  ;;  %v2083_v39 = vsub.f32 %v9597_v0, %v2046_v60  ;;  %3063 = vmax.xlane.f32.xlu0 %v10139_v23 }
 0x3f8   : > { %v2048_v15 = vpop.xlane.xlu0 %2047  ;;  %6247 = vmatmul.mubr.f32.gmra.mrb[86].mxu1 %v7411_v24 }
 0x3f9   : > { %v2141_v6 = vmul.f32 1.442695, %v2083_v39  ;;  %2195 = vadd.xlane.f32.xlu1 %v7407_v8  ;;  %v2084_v16 = vsub.f32 %v9608_v61, %v2048_v15  ;;  %v10160_v61 = vsel %vm660_vm2, %v9794_v55, -1e+30 }
 0x3fa   : > { %v10150_v48 = vpop.xlane.xlu1 %1203 }
 0x3fb   : > { %12162 = vst [vmem:[#allocation60_spill] sm:$0xff] %v10150_v48  ;;  %7416 = vpow2.f32 %v2141_v6  ;;  %v2143_v20 = vmul.f32 1.442695, %v2084_v16  ;;  %3069 = vmax.xlane.f32.xlu0 %v10148_v13 }
 0x3fc   : > { %v10153_v0 = vpop.xlane.xlu0 %1205 }
 0x3fd   : > { %v10155_v60 = vpop.eup %7412  ;;  %7418 = vpow2.f32 %v2143_v20  ;;  %2199 = vadd.xlane.f32.xlu1 %v7411_v24  ;;  %v10169_v24 = vsel %vm660_vm2, %v9798_v7, -1e+30 }
 0x3fe   : > { %6249 = vmatprep.mubr.f32.mxu1 %v10155_v60  ;;  %v2050_v40 = vpop.xlane.xlu1 %2049 }
 0x3ff   : > { %v7415_v8 = vpop.eup %7414  ;;  %v2085_v39 = vsub.f32 %v9638_v11, %v2050_v40  ;;  %3073 = vmax.xlane.f32.xlu0 %v10160_v61 }
 0x400   : > { %v2052_v15 = vpop.xlane.xlu0 %2051  ;;  %6250 = vmatmul.mubr.f32.gmra.mrb[88].mxu1 %v7415_v8 }
 0x401   : > { %v2145_v6 = vmul.f32 1.442695, %v2085_v39  ;;  %v2086_v16 = vsub.f32 %v9649_v51, %v2052_v15  ;;  %2203 = vadd.xlane.f32.xlu1 %v7415_v8  ;;  %v10181_v51 = vsel %vm660_vm2, %v9818_v4, -1e+30  ;;  %v12165_v39 = vld [vmem:[#allocation30_spill] sm:$0xff] }
 0x402   : > { %v10171_v55 = vpop.xlane.xlu1 %1207  ;;  %12164 = vst [vmem:[#allocation61_spill] sm:$0xff] %v10181_v51 }
 0x403   : > { %12163 = vst [vmem:[#allocation40_spill] sm:$0xff] %v10171_v55  ;;  %7420 = vpow2.f32 %v2145_v6  ;;  %v2147_v20 = vmul.f32 1.442695, %v2086_v16  ;;  %3077 = vmax.xlane.f32.xlu0 %v10169_v24  ;;  %v12166_v55 = vld [vmem:[#allocation3_spill] sm:$0xff] }
 0x404   : > { %v10174_v11 = vpop.xlane.xlu0 %1209 }
 0x405   : > { %v10176_v40 = vpop.eup %7416  ;;  %7422 = vpow2.f32 %v2147_v20 }
 0x406   : > { %6252 = vmatprep.mubr.f32.mxu1 %v10176_v40  ;;  %v2054_v7 = vpop.xlane.xlu1 %2053 }
 0x407   : > { %v7419_v8 = vpop.eup %7418  ;;  %v2087_v15 = vsub.f32 %v12165_v39, %v2054_v7  ;;  %4031 = vmax.xlane.f32.xlu0 %v10181_v51 }
 0x408   : > { %v2056_v6 = vpop.xlane.xlu0 %2055  ;;  %2207 = vadd.xlane.f32.xlu1 %v7419_v8  ;;  %6253 = vmatmul.mubr.f32.gmra.mrb[90].mxu1 %v7419_v8 }
 0x409   : > { %v2149_v16 = vmul.f32 1.442695, %v2087_v15  ;;  %v2088_v48 = vsub.f32 %v12166_v55, %v2056_v6  ;;  %v12169_v55 = vld [vmem:[#allocation33_spill] sm:$0xff] }
 0x40a   : > { %v10187_v20 = vpop.xlane.xlu1 %1211 }
 0x40b   : > { %12167 = vst [vmem:[#allocation42_spill] sm:$0xff] %v10187_v20  ;;  %7424 = vpow2.f32 %v2149_v16  ;;  %v2151_v32 = vmul.f32 1.442695, %v2088_v48  ;;  %2155 = vadd.xlane.f32.xlu0 %v9915_v62  ;;  %v12170_v16 = vld [vmem:[#allocation11_spill] sm:$0xff] }
 0x40c   : > { %v10190_v4 = vpop.xlane.xlu0 %1213 }
 0x40d   : > { %v10192_v44 = vpop.eup %7420  ;;  %7426 = vpow2.f32 %v2151_v32 }
 0x40e   : > { %6255 = vmatprep.mubr.f32.mxu1 %v10192_v44  ;;  %v10195_v7 = vpop.xlane.xlu1 %1215  ;;  %7428 = vrcp.f32 %v10085_v46  ;;  %v12175_v46 = vld [vmem:[#allocation12_spill] sm:$0xff] }
 0x40f   : > { %12168 = vst [vmem:[#allocation62_spill] sm:$0xff] %v10195_v7  ;;  %v7423_v39 = vpop.eup %7422  ;;  %2159 = vadd.xlane.f32.xlu0 %v9957_v25 }
 0x410   : > { %v3022_v8 = vpop.xlane.xlu0 %3021  ;;  %2211 = vadd.xlane.f32.xlu1 %v7423_v39  ;;  %6256 = vmatmul.mubr.f32.gmra.mrb[92].mxu1 %v7423_v39 }
 0x411   : > { %v3084_v15 = vsub.f32 %v12169_v55, %v3022_v8 }
 0x412   : > { %v3026_v48 = vpop.xlane.xlu1 %3025 }
 0x413   : > { %2163 = vadd.xlane.f32.xlu0 %v9978_v29  ;;  %v3117_v20 = vmul.f32 1.442695, %v3084_v15  ;;  %v12173_v29 = vld [vmem:[#allocation35_spill] sm:$0xff]  ;;  %v10214_v15 = vsel %vm660_vm2, %v9828_v36, -1e+30 }
 0x414   : > { %v3020_v62 = vpop.xlane.xlu0 %3019  ;;  %v3086_v8 = vsub.f32 %v12173_v29, %v3026_v48 }
 0x415   : > { %v10200_v6 = vpop.eup %7424  ;;  %v3083_v32 = vsub.f32 %v12170_v16, %v3020_v62  ;;  %v12174_v62 = vld [vmem:[#allocation37_spill] sm:$0xff] }
 0x416   : > { %6258 = vmatprep.mubr.f32.mxu1 %v10200_v6  ;;  %v10204_v7 = vpop.xlane.xlu1 %1219 }
 0x417   : > { %12171 = vst [vmem:[#allocation44_spill] sm:$0xff] %v10204_v7  ;;  %v7427_v51 = vpop.eup %7426  ;;  %v3115_v25 = vmul.f32 1.442695, %v3083_v32  ;;  %2167 = vadd.xlane.f32.xlu0 %v10004_v41 }
 0x418   : > { %v10208_v39 = vpop.xlane.xlu0 %1217  ;;  %2215 = vadd.xlane.f32.xlu1 %v7427_v51  ;;  %6259 = vmatmul.mubr.f32.gmra.mrb[94].mxu1 %v7427_v51  ;;  %v3121_v51 = vmul.f32 1.442695, %v3086_v8 }
 0x419   : > { %12172 = vst [vmem:[#allocation63_spill] sm:$0xff] %v10208_v39  ;;  %7430 = vpow2.f32 %v3115_v25 }
 0x41a   : > { %7432 = vpow2.f32 %v3117_v20  ;;  %v3028_v55 = vpop.xlane.xlu1 %3027  ;;  %v12177_v20 = vld [vmem:[#allocation17_spill] sm:$0xff] }
 0x41b   : > { %v3087_v16 = vsub.f32 %v12174_v62, %v3028_v55  ;;  %2171 = vadd.xlane.f32.xlu0 %v10025_v3  ;;  %v10225_v48 = vsel %vm660_vm2, %v12177_v20, -1e+30  ;;  %7434 = vrcp.f32 %v10109_v26  ;;  %v12179_v55 = vld [vmem:[#allocation19_spill] sm:$0xff] }
 0x41c   : > { %v3024_v41 = vpop.xlane.xlu0 %3023  ;;  %4035 = vmax.xlane.f32.xlu1 %v10214_v15  ;;  %v7269_v62 = vunpack.i.h.bf16 %v12179_v55  ;;  %v7268_v8 = vunpack.i.l.bf16 %v12179_v55 }
 0x41d   : > { %v3085_v32 = vsub.f32 %v12175_v46, %v3024_v41  ;;  %v3123_v29 = vmul.f32 1.442695, %v3087_v16  ;;  %v7429_v41 = vpop.eup %7428 }
 0x41e   : > { %v10220_v25 = vpop.xlane.xlu1 %1223 }
 0x41f   : > { %12176 = vst [vmem:[#allocation46_spill] sm:$0xff] %v10220_v25  ;;  %v3119_v36 = vmul.f32 1.442695, %v3085_v32  ;;  %2175 = vadd.xlane.f32.xlu0 %v10040_v19 }
 0x420   : > { %v10229_v3 = vpop.xlane.xlu0 %1221  ;;  %4037 = vmax.xlane.f32.xlu1 %v10225_v48 }
 0x421   : > { %12178 = vst [vmem:[#allocation64_spill] sm:$0xff] %v10229_v3  ;;  %7436 = vpow2.f32 %v3119_v36 }
 0x422   : > { %7438 = vpow2.f32 %v3121_v51  ;;  %v10234_v46 = vpop.xlane.xlu1 %1227  ;;  %v6055_v20 = vpop.f32.mrb[32].mxu1  ;;  %v12183_v51 = vld [vmem:[#allocation14_spill] sm:$0xff] }
 0x423   : > { %12180 = vst [vmem:[#allocation65_spill] sm:$0xff] %v10234_v46  ;;  %v10236_v16 = vpop.eup %7430  ;;  %7440 = vpow2.f32 %v3123_v29  ;;  %v10238_v19 = vmul.f32 %v7429_v41, %v6055_v20  ;;  %v10240_v26 = vpop.f32.mrb[33].mxu1  ;;  %2179 = vadd.xlane.f32.xlu0 %v10061_v58  ;;  %v6937_v46 = vpack.c.bf16 %v7269_v62, %v7268_v8 }
 0x424   : > { %12182 = vst [vmem:[#allocation67_spill] sm:$0xff] %v10240_v26  ;;  %v10243_v32 = vpop.eup %7432  ;;  %7442 = vrcp.f32 %v10132_v9  ;;  %v3030_v55 = vpop.xlane.xlu0 %3029  ;;  %6373 = vmatprep.mubr.f32.mxu1 %v10236_v16  ;;  %v12193_v26 = vld [vmem:[#allocation13_spill] sm:$0xff] }
 0x425   : > { %12181 = vst [vmem:[#allocation48_spill] sm:$0xff] %v10238_v19  ;;  %v3088_v36 = vsub.f32 %v12183_v51, %v3030_v55  ;;  %6374 = vmatmul.mubr.f32.vlgmr.msra.gmra.mrb[96].mxu1 %v10243_v32  ;;  %7444 = vrcp.f32 %v10153_v0  ;;  %v7435_v9 = vpop.eup %7434  ;;  %v12188_v51 = vld [vmem:[#allocation15_spill] sm:$0xff]  ;;  %v12242_v19 = vld [vmem:[#allocation50_spill] sm:$0xff] }
 0x426   : > { %v3038_v25 = vpop.xlane.xlu1 %3037  ;;  %6936 = vmatpush3.bf16.msra.mxu1 %v10070_v28 }
 0x427   : > { %v3125_v29 = vmul.f32 1.442695, %v3088_v36  ;;  %6938 = vmatprep.subr.bf16.mxu1 %v6937_v46  ;;  %2183 = vadd.xlane.f32.xlu0 %v10081_v57 }
 0x428   : > { %v10252_v58 = vpop.xlane.xlu0 %1225 }
 0x429   : > { %12184 = vst [vmem:[#allocation69_spill] sm:$0xff] %v10252_v58  ;;  %7446 = vpow2.f32 %v3125_v29 }
 0x42a   : > { %v10254_v41 = vpop.xlane.xlu1 %1231  ;;  %v6058_v20 = vpop.f32.mrb[34].mxu1  ;;  %6940 = vmatpush3.bf16.msra.mxu1 %v6937_v46  ;;  %7448 = vrcp.f32 %v10174_v11 }
 0x42b   : > { %12185 = vst [vmem:[#allocation70_spill] sm:$0xff] %v10254_v41  ;;  %v10256_v55 = vpop.eup %7436  ;;  %v10258_v62 = vmul.f32 %v7435_v9, %v6058_v20  ;;  %v10260_v8 = vpop.f32.mrb[35].mxu1  ;;  %2185 = vadd.xlane.f32.xlu0 %v10087_v50  ;;  %7450 = vrcp.f32 %v10190_v4  ;;  %v12192_v41 = vld [vmem:[#allocation41_spill] sm:$0xff] }
 0x42c   : > { %12187 = vst [vmem:[#allocation73_spill] sm:$0xff] %v10260_v8  ;;  %v10263_v28 = vpop.eup %7438  ;;  %v3034_v57 = vpop.xlane.xlu0 %3033  ;;  %6376 = vmatprep.mubr.f32.mxu1 %v10256_v55 }
 0x42d   : > { %12186 = vst [vmem:[#allocation74_spill] sm:$0xff] %v10258_v62  ;;  %v10267_v0 = vpop.eup %7440  ;;  %6377 = vmatmul.mubr.f32.gmra.mrb[98].mxu1 %v10263_v28  ;;  %v3090_v36 = vsub.f32 %v12188_v51, %v3034_v57 }
 0x42e   : > { %v7443_v46 = vpop.eup %7442  ;;  %v10271_v29 = vpop.xlane.xlu1 %1235  ;;  %6379 = vmatprep.mubr.f32.mxu1 %v10267_v0 }
 0x42f   : > { %12189 = vst [vmem:[#allocation66_spill] sm:$0xff] %v10271_v29  ;;  %v6061_v9 = vpop.f32.mrb[36].mxu1  ;;  %2191 = vadd.xlane.f32.xlu0 %v10106_v22  ;;  %v7445_v57 = vpop.eup %7444  ;;  %v3129_v51 = vmul.f32 1.442695, %v3090_v36 }
 0x430   : > { %v10274_v50 = vmul.f32 %v7443_v46, %v6061_v9  ;;  %v10276_v20 = vpop.f32.mrb[37].mxu1  ;;  %v3032_v11 = vpop.xlane.xlu0 %3031 }
 0x431   : > { %12191 = vst [vmem:[#allocation72_spill] sm:$0xff] %v10276_v20  ;;  %v3089_v7 = vsub.f32 %v12192_v41, %v3032_v11  ;;  %7276 = vrot.lane.b32.xlu1 %v12193_v26, %s7854_s6  ;;  %v12198_v26 = vld [vmem:[#allocation39_spill] sm:$0xff] }
 0x432   : > { %12190 = vst [vmem:[#allocation71_spill] sm:$0xff] %v10274_v50  ;;  %v10283_v29 = vpop.xlane.xlu1 %1239  ;;  %v6064_v58 = vpop.f32.mrb[38].mxu1  ;;  %v3092_v41 = vsub.f32 %v12198_v26, %v3038_v25 }
 0x433   : > { %12194 = vst [vmem:[#allocation68_spill] sm:$0xff] %v10283_v29  ;;  %v10285_v3 = vpop.eup %7446  ;;  %v3127_v46 = vmul.f32 1.442695, %v3089_v7  ;;  %v10287_v9 = vmul.f32 %v7445_v57, %v6064_v58  ;;  %v10289_v20 = vpop.f32.mrb[39].mxu1  ;;  %2189 = vadd.xlane.f32.xlu0 %v10094_v47  ;;  %v12201_v47 = vld [vmem:[#allocation16_spill] sm:$0xff] }
 0x434   : > { %12196 = vst [vmem:[#allocation75_spill] sm:$0xff] %v10289_v20  ;;  %v10292_v22 = vpop.xlane.xlu0 %1229  ;;  %6380 = vmatmul.mubr.f32.gmra.mrb[100].mxu1 %v10285_v3  ;;  %v7449_v4 = vpop.eup %7448 }
 0x435   : > { %12195 = vst [vmem:[#allocation76_spill] sm:$0xff] %v10287_v9  ;;  %12197 = vst [vmem:[#allocation78_spill] sm:$0xff] %v10292_v22  ;;  %7452 = vpow2.f32 %v3127_v46  ;;  %v7451_v20 = vpop.eup %7450  ;;  %v3133_v22 = vmul.f32 1.442695, %v3092_v41 }
 0x436   : > { %7454 = vpow2.f32 %v3129_v51  ;;  %v6067_v36 = vpop.f32.mrb[40].mxu1  ;;  %v10296_v11 = vpop.xlane.xlu1 %3047 }
 0x437   : > { %v10298_v29 = vmul.f32 %v7449_v4, %v6067_v36  ;;  %v10300_v7 = vpop.f32.mrb[41].mxu1  ;;  %2193 = vadd.xlane.f32.xlu0 %v10111_v34 }
 0x438   : > { %12200 = vst [vmem:[#allocation7_spill] sm:$0xff] %v10300_v7  ;;  %v3036_v58 = vpop.xlane.xlu0 %3035 }
 0x439   : > { %12199 = vst [vmem:[#allocation79_spill] sm:$0xff] %v10298_v29  ;;  %v3091_v57 = vsub.f32 %v12201_v47, %v3036_v58 }
 0x43a   : > { %v6070_v9 = vpop.f32.mrb[42].mxu1  ;;  %v10311_v4 = vpop.xlane.xlu1 %1243 }
 0x43b   : > { %v3131_v46 = vmul.f32 1.442695, %v3091_v57  ;;  %v10304_v39 = vmul.f32 %v7451_v20, %v6070_v9  ;;  %v10306_v25 = vpop.f32.mrb[43].mxu1  ;;  %2197 = vadd.xlane.f32.xlu0 %v10134_v37  ;;  %12205 = vst [vmem:[#allocation24_spill] sm:$0xff] %v10311_v4 }
 0x43c   : > { %12203 = vst [vmem:[#allocation77_spill] sm:$0xff] %v10306_v25  ;;  %v10309_v51 = vpop.xlane.xlu0 %1233 }
 0x43d   : > { %12202 = vst [vmem:[#allocation80_spill] sm:$0xff] %v10304_v39  ;;  %12204 = vst [vmem:[#allocation23_spill] sm:$0xff] %v10309_v51  ;;  %7456 = vpow2.f32 %v3131_v46 }
 0x43e   : > { %7458 = vpow2.f32 %v3133_v22  ;;  %v10313_v34 = vpop.f32.mrb[44].mxu1  ;;  %v10327_v22 = vpop.xlane.xlu1 %1247 }
 0x43f   : > { %12206 = vst [vmem:[#allocation2_spill] sm:$0xff] %v10313_v34  ;;  %v10315_v26 = vpop.eup %7452  ;;  %v10317_v36 = vpop.f32.mrb[45].mxu1  ;;  %2201 = vadd.xlane.f32.xlu0 %v10155_v60  ;;  %12209 = vst [vmem:[#allocation9_spill] sm:$0xff] %v10327_v22 }
 0x440   : > { %12207 = vst [vmem:[#allocation28_spill] sm:$0xff] %v10317_v36  ;;  %v10320_v20 = vpop.eup %7454  ;;  %v3042_v9 = vpop.xlane.xlu0 %3041  ;;  %6382 = vmatprep.mubr.f32.mxu1 %v10315_v26 }
 0x441   : > { %6383 = vmatmul.mubr.f32.gmra.mrb[102].mxu1 %v10320_v20  ;;  %v3094_v37 = vsub.f32 %v9849_v54, %v3042_v9 }
 0x442   : > { %v10325_v41 = vpop.f32.mrb[46].mxu1 }
 0x443   : > { %12208 = vst [vmem:[#allocation8_spill] sm:$0xff] %v10325_v41  ;;  %v10329_v58 = vpop.f32.mrb[47].mxu1  ;;  %2205 = vadd.xlane.f32.xlu0 %v10176_v40  ;;  %v3137_v57 = vmul.f32 1.442695, %v3094_v37  ;;  %v10345_v40 = vpop.xlane.xlu1 %1251 }
 0x444   : > { %12210 = vst [vmem:[#allocation30_spill] sm:$0xff] %v10329_v58  ;;  %v3040_v47 = vpop.xlane.xlu0 %3039  ;;  %12214 = vst [vmem:[#allocation35_spill] sm:$0xff] %v10345_v40 }
 0x445   : > { %v3093_v60 = vsub.f32 %v9861_v63, %v3040_v47 }
 0x446   : > { %v10333_v46 = vpop.f32.mrb[48].mxu1 }
 0x447   : > { %12211 = vst [vmem:[#allocation3_spill] sm:$0xff] %v10333_v46  ;;  %v10335_v4 = vpop.eup %7456  ;;  %v3135_v36 = vmul.f32 1.442695, %v3093_v60  ;;  %v10337_v25 = vpop.f32.mrb[49].mxu1  ;;  %2209 = vadd.xlane.f32.xlu0 %v10192_v44 }
 0x448   : > { %12212 = vst [vmem:[#allocation33_spill] sm:$0xff] %v10337_v25  ;;  %v10340_v54 = vpop.eup %7458  ;;  %v10342_v9 = vpop.xlane.xlu0 %1237  ;;  %6385 = vmatprep.mubr.f32.mxu1 %v10335_v4 }
 0x449   : > { %12213 = vst [vmem:[#allocation11_spill] sm:$0xff] %v10342_v9  ;;  %7460 = vpow2.f32 %v3135_v36  ;;  %6386 = vmatmul.mubr.f32.gmra.mrb[104].mxu1 %v10340_v54  ;;  %v10355_v60 = vpop.xlane.xlu1 %3067  ;;  %v12219_v36 = vld [vmem:[#allocation43_spill] sm:$0xff]  ;;  %v12222_v9 = vld [vmem:[#allocation18_spill] sm:$0xff] }
 0x44a   : > { %7462 = vpow2.f32 %v3137_v57  ;;  %v10348_v63 = vpop.f32.mrb[50].mxu1  ;;  %v3097_v40 = vsub.f32 %v12219_v36, %v10296_v11  ;;  %v12226_v36 = vld [vmem:[#allocation47_spill] sm:$0xff] }
 0x44b   : > { %12215 = vst [vmem:[#allocation37_spill] sm:$0xff] %v10348_v63  ;;  %v10350_v37 = vpop.f32.mrb[51].mxu1  ;;  %2213 = vadd.xlane.f32.xlu0 %v10200_v6 }
 0x44c   : > { %12216 = vst [vmem:[#allocation12_spill] sm:$0xff] %v10350_v37  ;;  %v3046_v47 = vpop.xlane.xlu0 %3045 }
 0x44d   : > { %v3096_v22 = vsub.f32 %v9889_v12, %v3046_v47  ;;  %v10374_v12 = vsel %vm660_vm2, %v12222_v9, -1e+30  ;;  %v3143_v47 = vmul.f32 1.442695, %v3097_v40  ;;  %v10390_v9 = vsel %vm660_vm2, %v12226_v36, -1e+30 }
 0x44e   : > { %v10353_v44 = vpop.f32.mrb[52].mxu1 }
 0x44f   : > { %12217 = vst [vmem:[#allocation17_spill] sm:$0xff] %v10353_v44  ;;  %v10358_v25 = vpop.f32.mrb[53].mxu1  ;;  %v3141_v6 = vmul.f32 1.442695, %v3096_v22 }
 0x450   : > { %12218 = vst [vmem:[#allocation19_spill] sm:$0xff] %v10358_v25  ;;  %v3044_v58 = vpop.xlane.xlu0 %3043 }
 0x451   : > { %v3095_v57 = vsub.f32 %v9908_v53, %v3044_v58  ;;  %v10379_v53 = vpop.xlane.xlu1 %3071 }
 0x452   : > { %v10363_v7 = vpop.f32.mrb[54].mxu1 }
 0x453   : > { %12220 = vst [vmem:[#allocation14_spill] sm:$0xff] %v10363_v7  ;;  %v10365_v37 = vpop.eup %7460  ;;  %v3139_v63 = vmul.f32 1.442695, %v3095_v57  ;;  %v10367_v46 = vpop.f32.mrb[55].mxu1 }
 0x454   : > { %12221 = vst [vmem:[#allocation15_spill] sm:$0xff] %v10367_v46  ;;  %v10369_v44 = vpop.eup %7462  ;;  %v10376_v11 = vpop.xlane.xlu0 %1241  ;;  %6388 = vmatprep.mubr.f32.mxu1 %v10365_v37 }
 0x455   : > { %12223 = vst [vmem:[#allocation41_spill] sm:$0xff] %v10376_v11  ;;  %7464 = vpow2.f32 %v3139_v63  ;;  %4041 = vmax.xlane.f32.xlu1 %v10374_v12  ;;  %6389 = vmatmul.mubr.f32.gmra.mrb[106].mxu1 %v10369_v44  ;;  %v10396_v46 = vpop.xlane.xlu1 %3075 }
 0x456   : > { %v10383_v22 = vpop.f32.mrb[56].mxu1  ;;  %7466 = vpow2.f32 %v3141_v6  ;;  %v10403_v6 = vsel %vm660_vm2, %v9863_v33, -1e+30 }
 0x457   : > { %12224 = vst [vmem:[#allocation13_spill] sm:$0xff] %v10383_v22  ;;  %v10385_v58 = vpop.f32.mrb[57].mxu1  ;;  %7468 = vpow2.f32 %v3143_v47 }
 0x458   : > { %12225 = vst [vmem:[#allocation39_spill] sm:$0xff] %v10385_v58  ;;  %v3050_v40 = vpop.xlane.xlu0 %3049 }
 0x459   : > { %v3098_v57 = vsub.f32 %v9950_v38, %v3050_v40  ;;  %4043 = vmax.xlane.f32.xlu1 %v10390_v9  ;;  %v10422_v58 = vpop.xlane.xlu1 %3081 }
 0x45a   : > { %v10394_v63 = vpop.f32.mrb[58].mxu1 }
 0x45b   : > { %12227 = vst [vmem:[#allocation16_spill] sm:$0xff] %v10394_v63  ;;  %v3145_v25 = vmul.f32 1.442695, %v3098_v57  ;;  %v10398_v22 = vpop.f32.mrb[59].mxu1  ;;  %v10417_v57 = vsel %vm660_vm2, %v9856_v5, -1e+30 }
 0x45c   : > { %12228 = vst [vmem:[#allocation43_spill] sm:$0xff] %v10398_v22  ;;  %v10405_v36 = vpop.xlane.xlu0 %1245 }
 0x45d   : > { %12229 = vst [vmem:[#allocation18_spill] sm:$0xff] %v10405_v36  ;;  %7470 = vpow2.f32 %v3145_v25  ;;  %4045 = vmax.xlane.f32.xlu1 %v10403_v6  ;;  %v12232_v25 = vld [vmem:[#allocation10_spill] sm:$0xff]  ;;  %v10439_v41 = vpop.xlane.xlu1 %3079 }
 0x45e   : > { %v10408_v38 = vpop.f32.mrb[60].mxu1 }
 0x45f   : > { %12230 = vst [vmem:[#allocation47_spill] sm:$0xff] %v10408_v38  ;;  %v10410_v47 = vpop.eup %7464  ;;  %v10412_v40 = vpop.f32.mrb[61].mxu1 }
 0x460   : > { %12231 = vst [vmem:[#allocation81_spill] sm:$0xff] %v10412_v40  ;;  %v3054_v22 = vpop.xlane.xlu0 %3053  ;;  %6391 = vmatprep.mubr.f32.mxu1 %v10410_v47  ;;  %v10420_v33 = vpop.eup %7466 }
 0x461   : > { %4047 = vmax.xlane.f32.xlu1 %v10417_v57  ;;  %7271 = vrot.lane.b32.xlu0 %v12232_v25, %s7854_s6  ;;  %v10427_v38 = vpop.eup %7468  ;;  %v3100_v40 = vsub.f32 %v9999_v10, %v3054_v22  ;;  %v10444_v22 = vpop.xlane.xlu1 %4029 }
 0x462   : > { %v10430_v63 = vpop.f32.mrb[62].mxu1  ;;  %6392 = vmatmul.mubr.f32.gmra.mrb[108].mxu1 %v10420_v33 }
 0x463   : > { %12233 = vst [vmem:[#allocation10_spill] sm:$0xff] %v10430_v63  ;;  %v10433_v5 = vpop.f32.mrb[63].mxu1  ;;  %6394 = vmatprep.mubr.f32.mxu1 %v10427_v38  ;;  %v3149_v11 = vmul.f32 1.442695, %v3100_v40  ;;  %v12236_v40 = vld [vmem:[#allocation21_spill] sm:$0xff] }
 0x464   : > { %12234 = vst [vmem:[#allocation82_spill] sm:$0xff] %v10433_v5  ;;  %v3052_v7 = vpop.xlane.xlu0 %3051 }
 0x465   : > { %v3099_v36 = vsub.f32 %v10020_v35, %v3052_v7 }
 0x467   : > { %v10437_v51 = vpop.eup %7470  ;;  %v3147_v25 = vmul.f32 1.442695, %v3099_v36  ;;  %v10452_v36 = vpop.xlane.xlu1 %4033 }
 0x468   : > { %v10441_v34 = vpop.xlane.xlu0 %1249  ;;  %6395 = vmatmul.mubr.f32.gmra.mrb[110].mxu1 %v10437_v51 }
 0x469   : > { %12235 = vst [vmem:[#allocation83_spill] sm:$0xff] %v10441_v34  ;;  %7472 = vpow2.f32 %v3147_v25 }
 0x46a   : > { %7474 = vpow2.f32 %v3149_v11 }
 0x46c   : > { %v3058_v10 = vpop.xlane.xlu0 %3057 }
 0x46d   : > { %v3102_v5 = vsub.f32 %v10056_v30, %v3058_v10 }
 0x46f   : > { %v3153_v7 = vmul.f32 1.442695, %v3102_v5 }
 0x470   : > { %v3056_v63 = vpop.xlane.xlu0 %3055 }
 0x471   : > { %v3101_v35 = vsub.f32 %v10075_v1, %v3056_v63  ;;  %v10460_v1 = vpop.xlane.xlu1 %2153 }
 0x472   : > { %7291 = vrot.lane.b32.xlu1 %v12236_v40, %s7854_s6  ;;  %12238 = vst [vmem:[#allocation84_spill] sm:$0xff] %v10460_v1  ;;  %v12239_v40 = vld [vmem:[#allocation45_spill] sm:$0xff]  ;;  %v3109_v1 = vsub.f32 %v12242_v19, %v10379_v53  ;;  %v3113_v53 = vsub.f32 %v9940_v59, %v10439_v41 }
 0x473   : > { %v10450_v39 = vpop.eup %7472  ;;  %v3151_v34 = vmul.f32 1.442695, %v3101_v35 }
 0x474   : > { %v10454_v29 = vpop.eup %7474  ;;  %v10456_v11 = vpop.xlane.xlu0 %1253  ;;  %6397 = vmatprep.mubr.f32.mxu1 %v10450_v39 }
 0x475   : > { %12237 = vst [vmem:[#allocation21_spill] sm:$0xff] %v10456_v11  ;;  %7476 = vpow2.f32 %v3151_v34  ;;  %6398 = vmatmul.mubr.f32.gmra.mrb[112].mxu1 %v10454_v29  ;;  %v10469_v11 = vsel %vm660_vm2, %v12239_v40, -1e+30  ;;  %v10471_v34 = vpop.xlane.xlu1 %2157 }
 0x476   : > { %7478 = vpow2.f32 %v3153_v7  ;;  %12240 = vst [vmem:[#allocation45_spill] sm:$0xff] %v10471_v34 }
 0x478   : > { %v3062_v30 = vpop.xlane.xlu0 %3061 }
 0x479   : > { %v3104_v63 = vsub.f32 %v10101_v45, %v3062_v30 }
 0x47b   : > { %v3157_v10 = vmul.f32 1.442695, %v3104_v63  ;;  %v10481_v63 = vpop.xlane.xlu1 %2161 }
 0x47c   : > { %v3060_v5 = vpop.xlane.xlu0 %3059  ;;  %12241 = vst [vmem:[#allocation85_spill] sm:$0xff] %v10481_v63 }
 0x47d   : > { %v3103_v25 = vsub.f32 %v10118_v14, %v3060_v5  ;;  %v3107_v14 = vsub.f32 %v9868_v31, %v10355_v60  ;;  %v3111_v31 = vsub.f32 %v9898_v52, %v10396_v46 }
 0x47f   : > { %v10464_v35 = vpop.eup %7476  ;;  %v3155_v50 = vmul.f32 1.442695, %v3103_v25  ;;  %v3163_v8 = vmul.f32 1.442695, %v3107_v14 }
 0x480   : > { %v10473_v7 = vpop.eup %7478  ;;  %v3066_v62 = vpop.xlane.xlu0 %3065  ;;  %4039 = vmax.xlane.f32.xlu0 %v10469_v11  ;;  %6400 = vmatprep.mubr.f32.mxu1 %v10464_v35 }
 0x481   : > { %7480 = vpow2.f32 %v3155_v50  ;;  %6401 = vmatmul.mubr.f32.gmra.mrb[114].mxu1 %v10473_v7  ;;  %v3106_v45 = vsub.f32 %v10127_v49, %v3066_v62  ;;  %v10491_v62 = vpop.xlane.xlu1 %2165 }
 0x482   : > { %7482 = vpow2.f32 %v3157_v10  ;;  %12243 = vst [vmem:[#allocation50_spill] sm:$0xff] %v10491_v62 }
 0x483   : > { %v3161_v25 = vmul.f32 1.442695, %v3106_v45  ;;  %v3167_v45 = vmul.f32 1.442695, %v3109_v1  ;;  %v3114_v1 = vsub.f32 %v9921_v21, %v10422_v58 }
 0x484   : > { %v3064_v30 = vpop.xlane.xlu0 %3063 }
 0x485   : > { %v3105_v5 = vsub.f32 %v10139_v23, %v3064_v30  ;;  %v10500_v30 = vpop.xlane.xlu1 %2169  ;;  %v3177_v58 = vmul.f32 1.442695, %v3114_v1 }
 0x486   : > { %12244 = vst [vmem:[#allocation86_spill] sm:$0xff] %v10500_v30 }
 0x487   : > { %v3159_v40 = vmul.f32 1.442695, %v3105_v5 }
 0x488   : > { %v3070_v50 = vpop.xlane.xlu0 %3069 }
 0x489   : > { %7484 = vpow2.f32 %v3159_v40  ;;  %v3108_v10 = vsub.f32 %v10148_v13, %v3070_v50  ;;  %v3171_v13 = vmul.f32 1.442695, %v3111_v31  ;;  %v12245_v50 = vld [vmem:[#allocation49_spill] sm:$0xff]  ;;  %v10527_v31 = vpop.xlane.xlu1 %2173 }
 0x48a   : > { %7486 = vpow2.f32 %v3161_v25  ;;  %v4093_v25 = vsub.f32 %v9964_v2, %v10444_v22  ;;  %v12246_v2 = vld [vmem:[#allocation4_spill] sm:$0xff]  ;;  %12247 = vst [vmem:[#allocation49_spill] sm:$0xff] %v10527_v31 }
 0x48b   : > { %v10487_v49 = vpop.eup %7480  ;;  %v3165_v60 = vmul.f32 1.442695, %v3108_v10  ;;  %7488 = vpow2.f32 %v3163_v8 }
 0x48c   : > { %v10493_v23 = vpop.eup %7482  ;;  %v3074_v14 = vpop.xlane.xlu0 %3073  ;;  %6403 = vmatprep.mubr.f32.mxu1 %v10487_v49  ;;  %v4125_v10 = vmul.f32 1.442695, %v4093_v25 }
 0x48d   : > { %7490 = vpow2.f32 %v3165_v60  ;;  %v3110_v19 = vsub.f32 %v10160_v61, %v3074_v14  ;;  %6404 = vmatmul.mubr.f32.gmra.mrb[116].mxu1 %v10493_v23  ;;  %v3175_v61 = vmul.f32 1.442695, %v3113_v53  ;;  %v12250_v14 = vld [vmem:[#allocation22_spill] sm:$0xff] }
 0x48e   : > { %7492 = vpow2.f32 %v3167_v45 }
 0x48f   : > { %v3169_v52 = vmul.f32 1.442695, %v3110_v19  ;;  %v10537_v19 = vsel %vm660_vm2, %v12250_v14, -1e+30  ;;  %v10575_v14 = vsel %vm660_vm2, %v9932_v27, -1e+30 }
 0x490   : > { %v3078_v46 = vpop.xlane.xlu0 %3077  ;;  %12258 = vst [vmem:[#allocation90_spill] sm:$0xff] %v10575_v14  ;;  %v10595_v27 = vsel %vm660_vm2, %v9927_v43, -1e+30 }
 0x491   : > { %7494 = vpow2.f32 %v3169_v52  ;;  %v3112_v8 = vsub.f32 %v10169_v24, %v3078_v46  ;;  %v10517_v24 = vsel %vm660_vm2, %v12245_v50, -1e+30  ;;  %v12252_v52 = vld [vmem:[#allocation5_spill] sm:$0xff] }
 0x492   : > { %7496 = vpow2.f32 %v3171_v13 }
 0x493   : > { %v10505_v5 = vpop.eup %7484  ;;  %v3173_v40 = vmul.f32 1.442695, %v3112_v8 }
 0x494   : > { %v10509_v59 = vpop.eup %7486  ;;  %v10511_v41 = vpop.xlane.xlu0 %4031  ;;  %6406 = vmatprep.mubr.f32.mxu1 %v10505_v5 }
 0x495   : > { %7498 = vpow2.f32 %v3173_v40  ;;  %6407 = vmatmul.mubr.f32.gmra.mrb[118].mxu1 %v10509_v59  ;;  %v10520_v21 = vpop.eup %7488  ;;  %v10559_v40 = vpop.xlane.xlu1 %2177 }
 0x496   : > { %4051 = vmax.xlane.f32.xlu1 %v10517_v24  ;;  %7281 = vrot.lane.b32.xlu0 %v12246_v2, %s7854_s6  ;;  %7500 = vpow2.f32 %v3175_v61  ;;  %v12254_v61 = vld [vmem:[#allocation6_spill] sm:$0xff] }
 0x497   : > { %v10525_v22 = vpop.eup %7490  ;;  %6409 = vmatprep.mubr.f32.mxu1 %v10520_v21  ;;  %7502 = vpow2.f32 %v3177_v58  ;;  %v10557_v25 = vsel %vm660_vm2, %v12254_v61, -1e+30  ;;  %12255 = vst [vmem:[#allocation6_spill] sm:$0xff] %v10559_v40 }
 0x498   : > { %v10530_v60 = vpop.xlane.xlu0 %2155  ;;  %v10532_v45 = vpop.f32.mrb[64].mxu1  ;;  %7504 = vpow2.f32 %v4125_v10 }
 0x499   : > { %12248 = vst [vmem:[#allocation4_spill] sm:$0xff] %v10530_v60  ;;  %12249 = vst [vmem:[#allocation87_spill] sm:$0xff] %v10532_v45  ;;  %v10539_v13 = vpop.f32.mrb[65].mxu1  ;;  %6410 = vmatmul.mubr.f32.gmra.mrb[120].mxu1 %v10525_v22  ;;  %v10542_v53 = vpop.eup %7492  ;;  %v12292_v45 = vld [vmem:[#allocation55_spill] sm:$0xff] }
 0x49a   : > { %12251 = vst [vmem:[#allocation22_spill] sm:$0xff] %v10539_v13  ;;  %4055 = vmax.xlane.f32.xlu1 %v10537_v19  ;;  %7286 = vrot.lane.b32.xlu0 %v12252_v52, %s7854_s6  ;;  %v10582_v61 = vpop.xlane.xlu1 %2181 }
 0x49b   : > { %v10547_v46 = vpop.eup %7494  ;;  %6412 = vmatprep.mubr.f32.mxu1 %v10542_v53  ;;  %12260 = vst [vmem:[#allocation92_spill] sm:$0xff] %v10582_v61 }
 0x49c   : > { %v10550_v8 = vpop.xlane.xlu0 %2159  ;;  %v10552_v1 = vpop.eup %7496 }
 0x49d   : > { %12253 = vst [vmem:[#allocation5_spill] sm:$0xff] %v10550_v8  ;;  %6413 = vmatmul.mubr.f32.gmra.mrb[122].mxu1 %v10547_v46 }
 0x49e   : > { %4059 = vmax.xlane.f32.xlu1 %v10557_v25  ;;  %6415 = vmatprep.mubr.f32.mxu1 %v10552_v1 }
 0x49f   : > { %v10564_v50 = vpop.eup %7498 }
 0x4a0   : > { %v10566_v58 = vpop.xlane.xlu0 %2163  ;;  %v10568_v2 = vpop.f32.mrb[66].mxu1 }
 0x4a1   : > { %12256 = vst [vmem:[#allocation88_spill] sm:$0xff] %v10566_v58  ;;  %12257 = vst [vmem:[#allocation89_spill] sm:$0xff] %v10568_v2  ;;  %v10570_v10 = vpop.eup %7500  ;;  %v10577_v52 = vpop.f32.mrb[67].mxu1  ;;  %6416 = vmatmul.mubr.f32.gmra.mrb[124].mxu1 %v10564_v50 }
 0x4a2   : > { %12259 = vst [vmem:[#allocation91_spill] sm:$0xff] %v10577_v52  ;;  %4061 = vmax.xlane.f32.xlu1 %v10575_v14  ;;  %6418 = vmatprep.mubr.f32.mxu1 %v10570_v10  ;;  %v10584_v40 = vpop.eup %7502  ;;  %v10611_v2 = vpop.xlane.xlu1 %2187 }
 0x4a3   : > { %v10590_v13 = vpop.eup %7504  ;;  %12268 = vst [vmem:[#allocation98_spill] sm:$0xff] %v10611_v2 }
 0x4a4   : > { %v10586_v31 = vpop.xlane.xlu0 %2167  ;;  %v10588_v30 = vpop.f32.mrb[68].mxu1 }
 0x4a5   : > { %12261 = vst [vmem:[#allocation93_spill] sm:$0xff] %v10586_v31  ;;  %12262 = vst [vmem:[#allocation94_spill] sm:$0xff] %v10588_v30  ;;  %v10597_v62 = vpop.f32.mrb[69].mxu1  ;;  %6419 = vmatmul.mubr.f32.gmra.mrb[126].mxu1 %v10584_v40  ;;  %v12266_v30 = vld [vmem:[#allocation53_spill] sm:$0xff]  ;;  %v12272_v31 = vld [vmem:[#allocation26_spill] sm:$0xff] }
 0x4a6   : > { %12263 = vst [vmem:[#allocation95_spill] sm:$0xff] %v10597_v62  ;;  %4063 = vmax.xlane.f32.xlu1 %v10595_v27  ;;  %6533 = vmatprep.mubr.f32.mxu1 %v10590_v13  ;;  %v10609_v14 = vsel %vm660_vm2, %v12266_v30, -1e+30  ;;  %v10628_v30 = vpop.xlane.xlu1 %2195 }
 0x4a7   : > { %12267 = vst [vmem:[#allocation53_spill] sm:$0xff] %v10609_v14  ;;  %12274 = vst [vmem:[#allocation102_spill] sm:$0xff] %v10628_v30 }
 0x4a8   : > { %v10602_v61 = vpop.xlane.xlu0 %2171  ;;  %v10604_v63 = vpop.f32.mrb[70].mxu1 }
 0x4a9   : > { %12264 = vst [vmem:[#allocation96_spill] sm:$0xff] %v10602_v61  ;;  %12265 = vst [vmem:[#allocation97_spill] sm:$0xff] %v10604_v63  ;;  %v10613_v43 = vpop.f32.mrb[71].mxu1  ;;  %v10623_v61 = vsel %vm660_vm2, %v12272_v31, -1e+30 }
 0x4aa   : > { %12269 = vst [vmem:[#allocation99_spill] sm:$0xff] %v10613_v43  ;;  %4065 = vmax.xlane.f32.xlu1 %v10609_v14  ;;  %v10637_v14 = vsel %vm660_vm2, %v9975_v42, -1e+30  ;;  %v12284_v42 = vld [vmem:[#allocation20_spill] sm:$0xff] }
 0x4ab   : > { %12277 = vst [vmem:[#allocation105_spill] sm:$0xff] %v10637_v14 }
 0x4ac   : > { %v10616_v62 = vpop.xlane.xlu0 %2175  ;;  %v10618_v52 = vpop.f32.mrb[72].mxu1 }
 0x4ad   : > { %12270 = vst [vmem:[#allocation100_spill] sm:$0xff] %v10616_v62  ;;  %12271 = vst [vmem:[#allocation101_spill] sm:$0xff] %v10618_v52  ;;  %v10625_v63 = vpop.f32.mrb[73].mxu1  ;;  %v12281_v62 = vld [vmem:[#allocation27_spill] sm:$0xff] }
 0x4ae   : > { %12273 = vst [vmem:[#allocation26_spill] sm:$0xff] %v10625_v63  ;;  %4067 = vmax.xlane.f32.xlu1 %v10623_v61  ;;  %v10649_v30 = vsel %vm660_vm2, %v12281_v62, -1e+30  ;;  %v10668_v62 = vsel %vm660_vm2, %v9992_v17, -1e+30 }
 0x4af   : > { %v10688_v17 = vsel %vm660_vm2, %v12292_v45, -1e+30 }
 0x4b0   : > { %v10630_v2 = vpop.xlane.xlu0 %2179  ;;  %v10632_v43 = vpop.f32.mrb[74].mxu1 }
 0x4b1   : > { %12275 = vst [vmem:[#allocation103_spill] sm:$0xff] %v10630_v2  ;;  %12276 = vst [vmem:[#allocation104_spill] sm:$0xff] %v10632_v43  ;;  %v10639_v52 = vpop.f32.mrb[75].mxu1  ;;  %v10651_v2 = vpop.xlane.xlu1 %2199 }
 0x4b2   : > { %12278 = vst [vmem:[#allocation106_spill] sm:$0xff] %v10639_v52  ;;  %4069 = vmax.xlane.f32.xlu1 %v10637_v14  ;;  %12282 = vst [vmem:[#allocation27_spill] sm:$0xff] %v10651_v2  ;;  %v10659_v52 = vsel %vm660_vm2, %v12284_v42, -1e+30  ;;  %v12289_v2 = vld [vmem:[#allocation51_spill] sm:$0xff] }
 0x4b3   : > { %v10679_v42 = vsel %vm660_vm2, %v12289_v2, -1e+30 }
 0x4b4   : > { %v10642_v31 = vpop.xlane.xlu0 %2183  ;;  %v10644_v63 = vpop.f32.mrb[76].mxu1 }
 0x4b5   : > { %12279 = vst [vmem:[#allocation107_spill] sm:$0xff] %v10642_v31  ;;  %12280 = vst [vmem:[#allocation108_spill] sm:$0xff] %v10644_v63  ;;  %v10653_v43 = vpop.f32.mrb[77].mxu1 }
 0x4b6   : > { %12283 = vst [vmem:[#allocation109_spill] sm:$0xff] %v10653_v43  ;;  %4071 = vmax.xlane.f32.xlu1 %v10649_v30  ;;  %v10674_v43 = vpop.xlane.xlu1 %2203 }
 0x4b7   : > { %12288 = vst [vmem:[#allocation112_spill] sm:$0xff] %v10674_v43 }
 0x4b8   : > { %v10661_v14 = vpop.f32.mrb[78].mxu1  ;;  %v10663_v31 = vpop.xlane.xlu0 %2185 }
 0x4b9   : > { %12285 = vst [vmem:[#allocation20_spill] sm:$0xff] %v10661_v14  ;;  %12286 = vst [vmem:[#allocation110_spill] sm:$0xff] %v10663_v31  ;;  %v10670_v63 = vpop.f32.mrb[79].mxu1  ;;  %4049 = vmax.xlane.f32.xlu0 %v10659_v52 }
 0x4ba   : > { %12287 = vst [vmem:[#allocation111_spill] sm:$0xff] %v10670_v63  ;;  %4075 = vmax.xlane.f32.xlu1 %v10668_v62  ;;  %v10694_v43 = vpop.xlane.xlu1 %2207 }
 0x4bb   : > { %12294 = vst [vmem:[#allocation114_spill] sm:$0xff] %v10694_v43 }
 0x4bc   : > { %v10681_v14 = vpop.xlane.xlu0 %2191  ;;  %v10683_v31 = vpop.f32.mrb[80].mxu1 }
 0x4bd   : > { %12290 = vst [vmem:[#allocation51_spill] sm:$0xff] %v10681_v14  ;;  %12291 = vst [vmem:[#allocation113_spill] sm:$0xff] %v10683_v31  ;;  %v10690_v63 = vpop.f32.mrb[81].mxu1  ;;  %4053 = vmax.xlane.f32.xlu0 %v10679_v42  ;;  %v12297_v14 = vld [vmem:[#allocation56_spill] sm:$0xff] }
 0x4be   : > { %12293 = vst [vmem:[#allocation55_spill] sm:$0xff] %v10690_v63  ;;  %4079 = vmax.xlane.f32.xlu1 %v10688_v17  ;;  %v10703_v31 = vsel %vm660_vm2, %v12297_v14, -1e+30  ;;  %v10708_v45 = vpop.xlane.xlu1 %2211 }
 0x4bf   : > { %12298 = vst [vmem:[#allocation56_spill] sm:$0xff] %v10703_v31  ;;  %12300 = vst [vmem:[#allocation118_spill] sm:$0xff] %v10708_v45 }
 0x4c0   : > { %v10696_v58 = vpop.xlane.xlu0 %2189  ;;  %v10698_v2 = vpop.f32.mrb[82].mxu1 }
 0x4c1   : > { %12295 = vst [vmem:[#allocation115_spill] sm:$0xff] %v10696_v58  ;;  %12296 = vst [vmem:[#allocation116_spill] sm:$0xff] %v10698_v2  ;;  %v10705_v8 = vpop.f32.mrb[83].mxu1  ;;  %v10717_v58 = vsel %vm660_vm2, %v10050_v18, -1e+30  ;;  %v12307_v2 = vld [vmem:[#allocation34_spill] sm:$0xff] }
 0x4c2   : > { %12299 = vst [vmem:[#allocation117_spill] sm:$0xff] %v10705_v8  ;;  %4083 = vmax.xlane.f32.xlu1 %v10703_v31  ;;  %12303 = vst [vmem:[#allocation121_spill] sm:$0xff] %v10717_v58  ;;  %v10722_v14 = vpop.xlane.xlu1 %2215  ;;  %v10729_v45 = vsel %vm660_vm2, %v12307_v2, -1e+30  ;;  %v12314_v2 = vld [vmem:[#allocation25_spill] sm:$0xff] }
 0x4c3   : > { %12305 = vst [vmem:[#allocation123_spill] sm:$0xff] %v10722_v14  ;;  %12308 = vst [vmem:[#allocation34_spill] sm:$0xff] %v10729_v45 }
 0x4c4   : > { %v10710_v63 = vpop.xlane.xlu0 %2193  ;;  %v10712_v34 = vpop.f32.mrb[84].mxu1 }
 0x4c5   : > { %12301 = vst [vmem:[#allocation119_spill] sm:$0xff] %v10710_v63  ;;  %12302 = vst [vmem:[#allocation120_spill] sm:$0xff] %v10712_v34  ;;  %v10719_v43 = vpop.f32.mrb[85].mxu1 }
 0x4c6   : > { %12304 = vst [vmem:[#allocation122_spill] sm:$0xff] %v10719_v43  ;;  %4087 = vmax.xlane.f32.xlu1 %v10717_v58  ;;  %v4036_v43 = vpop.xlane.xlu1 %4035 }
 0x4c8   : > { %v10724_v8 = vpop.xlane.xlu0 %2197 }
 0x4c9   : > { %12306 = vst [vmem:[#allocation124_spill] sm:$0xff] %v10724_v8 }
 0x4ca   : > { %4091 = vmax.xlane.f32.xlu1 %v10729_v45  ;;  %v10742_v8 = vpop.xlane.xlu1 %4037 }
 0x4cb   : > { %v10732_v63 = vpop.f32.mrb[86].mxu1 }
 0x4cc   : > { %12309 = vst [vmem:[#allocation125_spill] sm:$0xff] %v10732_v63  ;;  %v10734_v34 = vpop.f32.mrb[87].mxu1  ;;  %v10736_v18 = vpop.xlane.xlu0 %2201 }
 0x4cd   : > { %12310 = vst [vmem:[#allocation126_spill] sm:$0xff] %v10734_v34  ;;  %12311 = vst [vmem:[#allocation127_spill] sm:$0xff] %v10736_v18 }
 0x4ce   : > { %3181 = vadd.xlane.f32.xlu1 %v10243_v32  ;;  %v7277_v32 = vpop.permute.xlu1 %7276 }
 0x4cf   : > { %v7278_v58 = vunpack.i.l.bf16 %v7277_v32 }
 0x4d0   : > { %v10739_v60 = vpop.xlane.xlu0 %2205 }
 0x4d1   : > { %12312 = vst [vmem:[#allocation128_spill] sm:$0xff] %v10739_v60 }
 0x4d2   : > { %3185 = vadd.xlane.f32.xlu1 %v10263_v28 }
 0x4d3   : > { %v10744_v14 = vpop.f32.mrb[88].mxu1  ;;  %7296 = vrot.lane.b32.xlu0 %v12314_v2, %s7854_s6 }
 0x4d4   : > { %12313 = vst [vmem:[#allocation129_spill] sm:$0xff] %v10744_v14  ;;  %v10748_v45 = vpop.f32.mrb[89].mxu1  ;;  %v10750_v63 = vpop.xlane.xlu0 %2209  ;;  %v7279_v14 = vunpack.i.h.bf16 %v7277_v32 }
 0x4d5   : > { %12315 = vst [vmem:[#allocation25_spill] sm:$0xff] %v10748_v45  ;;  %12316 = vst [vmem:[#allocation130_spill] sm:$0xff] %v10750_v63 }
 0x4d6   : > { %3189 = vadd.xlane.f32.xlu1 %v10285_v3  ;;  %v6945_v63 = vpack.c.bf16 %v7279_v14, %v7278_v58  ;;  %v12320_v58 = vld [vmem:[#allocation29_spill] sm:$0xff] }
 0x4d8   : > { %v10753_v34 = vpop.xlane.xlu0 %2213 }
 0x4da   : > { %3193 = vadd.xlane.f32.xlu1 %v10320_v20 }
 0x4db   : > { %v10756_v60 = vpop.f32.mrb[90].mxu1 }
 0x4dc   : > { %v10758_v28 = vpop.f32.mrb[91].mxu1  ;;  %v7272_v18 = vpop.permute.xlu0 %7271 }
 0x4dd   : > { %v7274_v31 = vunpack.i.h.bf16 %v7272_v18  ;;  %v7273_v2 = vunpack.i.l.bf16 %v7272_v18 }
 0x4de   : > { %3197 = vadd.xlane.f32.xlu1 %v10340_v54  ;;  %v12319_v54 = vld [vmem:[#allocation52_spill] sm:$0xff] }
 0x4df   : > { %v6941_v45 = vpack.c.bf16 %v7274_v31, %v7273_v2  ;;  %v12324_v2 = vld [vmem:[#allocation32_spill] sm:$0xff] }
 0x4e1   : > { %6942 = vmatprep.subr.bf16.mxu1 %v6941_v45 }
 0x4e2   : > { %6944 = vmatpush3.bf16.msra.mxu1 %v6941_v45  ;;  %3201 = vadd.xlane.f32.xlu1 %v10369_v44  ;;  %v10776_v44 = vsel %vm660_vm2, %v12319_v54, -1e+30  ;;  %v10800_v14 = vpop.xlane.xlu1 %4041 }
 0x4e3   : > { %v10762_v3 = vpop.f32.mrb[92].mxu1  ;;  %6946 = vmatprep.subr.bf16.mxu1 %v6945_v63 }
 0x4e4   : > { %v10764_v20 = vpop.f32.mrb[93].mxu1 }
 0x4e5   : > { %12317 = vst [vmem:[#allocation131_spill] sm:$0xff] %v10764_v20 }
 0x4e6   : > { %3205 = vadd.xlane.f32.xlu1 %v10420_v33  ;;  %6948 = vmatpush3.bf16.msra.mxu1 %v6945_v63  ;;  %v10783_v33 = vsel %vm660_vm2, %v12320_v58, -1e+30  ;;  %v4096_v58 = vsub.f32 %v10214_v15, %v4036_v43 }
 0x4ea   : > { %3209 = vadd.xlane.f32.xlu1 %v10437_v51 }
 0x4eb   : > { %v10768_v32 = vpop.f32.mrb[94].mxu1 }
 0x4ec   : > { %v10770_v18 = vpop.f32.mrb[95].mxu1 }
 0x4ed   : > { %12318 = vst [vmem:[#allocation132_spill] sm:$0xff] %v10770_v18 }
 0x4ee   : > { %3213 = vadd.xlane.f32.xlu1 %v10454_v29  ;;  %v12321_v29 = vld [vmem:[#allocation31_spill] sm:$0xff] }
 0x4ef   : > { %v10792_v63 = vsel %vm660_vm2, %v12321_v29, -1e+30 }
 0x4f2   : > { %4057 = vmax.xlane.f32.xlu0 %v10776_v44  ;;  %3217 = vadd.xlane.f32.xlu1 %v10473_v7  ;;  %v12323_v7 = vld [vmem:[#allocation61_spill] sm:$0xff] }
 0x4f3   : > { %v4094_v45 = vsub.f32 %v12323_v7, %v10511_v41  ;;  %v4044_v7 = vpop.xlane.xlu1 %4043 }
 0x4f4   : > { %v4100_v56 = vsub.f32 %v10390_v9, %v4044_v7 }
 0x4f5   : > { %v4127_v54 = vmul.f32 1.442695, %v4094_v45 }
 0x4f6   : > { %4073 = vmax.xlane.f32.xlu0 %v10783_v33  ;;  %3221 = vadd.xlane.f32.xlu1 %v10493_v23  ;;  %v10805_v23 = vsel %vm660_vm2, %v12324_v2, -1e+30  ;;  %v4131_v2 = vmul.f32 1.442695, %v4096_v58 }
 0x4f7   : > { %7506 = vpow2.f32 %v4127_v54  ;;  %v10828_v43 = vpop.xlane.xlu1 %4045 }
 0x4f8   : > { %v10787_v51 = vpop.f32.mrb[96].mxu1  ;;  %7508 = vpow2.f32 %v4131_v2 }
 0x4f9   : > { %v10794_v31 = vpop.f32.mrb[97].mxu1 }
 0x4fa   : > { %12322 = vst [vmem:[#allocation52_spill] sm:$0xff] %v10794_v31  ;;  %4077 = vmax.xlane.f32.xlu0 %v10792_v63  ;;  %3225 = vadd.xlane.f32.xlu1 %v10509_v59  ;;  %v12325_v59 = vld [vmem:[#allocation57_spill] sm:$0xff] }
 0x4fb   : > { %v10815_v41 = vsel %vm660_vm2, %v12325_v59, -1e+30  ;;  %v4048_v54 = vpop.xlane.xlu1 %4047 }
 0x4fe   : > { %4081 = vmax.xlane.f32.xlu0 %v10805_v23  ;;  %3229 = vadd.xlane.f32.xlu1 %v10525_v22  ;;  %v12327_v22 = vld [vmem:[#allocation36_spill] sm:$0xff] }
 0x4ff   : > { %v10824_v15 = vsel %vm660_vm2, %v12327_v22, -1e+30  ;;  %v7292_v9 = vpop.permute.xlu1 %7291 }
 0x500   : > { %v10810_v29 = vpop.f32.mrb[98].mxu1  ;;  %v7293_v20 = vunpack.i.l.bf16 %v7292_v9 }
 0x501   : > { %v10817_v31 = vpop.f32.mrb[99].mxu1 }
 0x502   : > { %12326 = vst [vmem:[#allocation29_spill] sm:$0xff] %v10817_v31  ;;  %4085 = vmax.xlane.f32.xlu0 %v10815_v41  ;;  %3233 = vadd.xlane.f32.xlu1 %v10547_v46  ;;  %v10836_v46 = vpop.eup %7506 }
 0x503   : > { %v10842_v2 = vpop.eup %7508 }
 0x506   : > { %4089 = vmax.xlane.f32.xlu0 %v10824_v15  ;;  %3237 = vadd.xlane.f32.xlu1 %v10564_v50 }
 0x507   : > { %v10830_v45 = vpop.f32.mrb[100].mxu1 }
 0x508   : > { %v10832_v59 = vpop.f32.mrb[101].mxu1 }
 0x509   : > { %12328 = vst [vmem:[#allocation31_spill] sm:$0xff] %v10832_v59  ;;  %v4139_v59 = vmul.f32 1.442695, %v4100_v56  ;;  %v7294_v56 = vunpack.i.h.bf16 %v7292_v9 }
 0x50a   : > { %3179 = vadd.xlane.f32.xlu0 %v10236_v16  ;;  %3241 = vadd.xlane.f32.xlu1 %v10584_v40  ;;  %v4102_v16 = vsub.f32 %v10417_v57, %v4048_v54 }
 0x50c   : > { %v4143_v7 = vmul.f32 1.442695, %v4102_v16 }
 0x50d   : > { %v4040_v58 = vpop.xlane.xlu0 %4039 }
 0x50e   : > { %v4098_v22 = vsub.f32 %v10469_v11, %v4040_v58  ;;  %3183 = vadd.xlane.f32.xlu0 %v10256_v55  ;;  %4191 = vadd.xlane.f32.xlu1 %v10836_v46 }
 0x510   : > { %v4135_v50 = vmul.f32 1.442695, %v4098_v22 }
 0x511   : > { %v7282_v31 = vpop.permute.xlu0 %7281 }
 0x512   : > { %7510 = vpow2.f32 %v4135_v50  ;;  %v7284_v40 = vunpack.i.h.bf16 %v7282_v31  ;;  %v7283_v18 = vunpack.i.l.bf16 %v7282_v31  ;;  %3187 = vadd.xlane.f32.xlu0 %v10267_v0  ;;  %4195 = vadd.xlane.f32.xlu1 %v10842_v2  ;;  %v6957_v31 = vpack.c.bf16 %v7294_v56, %v7293_v20 }
 0x513   : > { %7512 = vpow2.f32 %v4139_v59 }
 0x514   : > { %v10847_v11 = vpop.f32.mrb[102].mxu1  ;;  %v6949_v55 = vpack.c.bf16 %v7284_v40, %v7283_v18  ;;  %7514 = vpow2.f32 %v4143_v7 }
 0x515   : > { %v7287_v58 = vpop.permute.xlu0 %7286  ;;  %v10849_v22 = vpop.f32.mrb[103].mxu1 }
 0x516   : > { %12329 = vst [vmem:[#allocation61_spill] sm:$0xff] %v10849_v22  ;;  %v7289_v57 = vunpack.i.h.bf16 %v7287_v58  ;;  %v7288_v54 = vunpack.i.l.bf16 %v7287_v58  ;;  %3191 = vadd.xlane.f32.xlu0 %v10315_v26  ;;  %6950 = vmatprep.subr.bf16.mxu1 %v6949_v55  ;;  %v12365_v22 = vld [vmem:[#allocation98_spill] sm:$0xff] }
 0x517   : > { %6952 = vmatpush3.bf16.msra.mxu1 %v6949_v55 }
 0x518   : > { %v6953_v0 = vpack.c.bf16 %v7289_v57, %v7288_v54 }
 0x51a   : > { %3195 = vadd.xlane.f32.xlu0 %v10335_v4  ;;  %6954 = vmatprep.subr.bf16.mxu1 %v6953_v0 }
 0x51b   : > { %6956 = vmatpush3.bf16.msra.mxu1 %v6953_v0 }
 0x51c   : > { %v10853_v18 = vpop.eup %7510  ;;  %v10855_v59 = vpop.f32.mrb[104].mxu1  ;;  %6958 = vmatprep.subr.bf16.mxu1 %v6957_v31 }
 0x51d   : > { %v10857_v50 = vpop.f32.mrb[105].mxu1  ;;  %4199 = vadd.xlane.f32.xlu1 %v10853_v18  ;;  %v10861_v26 = vpop.eup %7512 }
 0x51e   : > { %12330 = vst [vmem:[#allocation32_spill] sm:$0xff] %v10857_v50  ;;  %3199 = vadd.xlane.f32.xlu0 %v10365_v37  ;;  %v10865_v20 = vpop.eup %7514 }
 0x51f   : > { %6960 = vmatpush3.bf16.msra.mxu1 %v6957_v31 }
 0x521   : > { %4203 = vadd.xlane.f32.xlu1 %v10861_v26 }
 0x522   : > { %3203 = vadd.xlane.f32.xlu0 %v10410_v47 }
 0x523   : > { %v4052_v4 = vpop.xlane.xlu1 %4051 }
 0x524   : > { %v4104_v16 = vsub.f32 %v10517_v24, %v4052_v4 }
 0x525   : > { %4207 = vadd.xlane.f32.xlu1 %v10865_v20 }
 0x526   : > { %v4147_v40 = vmul.f32 1.442695, %v4104_v16  ;;  %3207 = vadd.xlane.f32.xlu0 %v10427_v38 }
 0x527   : > { %v4056_v9 = vpop.xlane.xlu1 %4055 }
 0x528   : > { %7516 = vpow2.f32 %v4147_v40  ;;  %v4106_v37 = vsub.f32 %v10537_v19, %v4056_v9  ;;  %v10871_v55 = vpop.f32.mrb[106].mxu1 }
 0x529   : > { %v10873_v7 = vpop.f32.mrb[107].mxu1 }
 0x52a   : > { %12331 = vst [vmem:[#allocation57_spill] sm:$0xff] %v10873_v7  ;;  %v4151_v58 = vmul.f32 1.442695, %v4106_v37  ;;  %3211 = vadd.xlane.f32.xlu0 %v10450_v39 }
 0x52b   : > { %v4060_v47 = vpop.xlane.xlu1 %4059 }
 0x52c   : > { %7518 = vpow2.f32 %v4151_v58  ;;  %v4108_v24 = vsub.f32 %v10557_v25, %v4060_v47  ;;  %v4097_v47 = vsub.f32 %v10225_v48, %v10742_v8  ;;  %v4101_v48 = vsub.f32 %v10403_v6, %v10828_v43 }
 0x52e   : > { %v4155_v56 = vmul.f32 1.442695, %v4108_v24  ;;  %3215 = vadd.xlane.f32.xlu0 %v10464_v35  ;;  %v4133_v24 = vmul.f32 1.442695, %v4097_v47 }
 0x52f   : > { %v10878_v57 = vpop.xlane.xlu1 %4061 }
 0x530   : > { %7520 = vpow2.f32 %v4155_v56 }
 0x532   : > { %v10880_v38 = vpop.eup %7516  ;;  %3219 = vadd.xlane.f32.xlu0 %v10487_v49 }
 0x533   : > { %4211 = vadd.xlane.f32.xlu1 %v10880_v38  ;;  %v4064_v19 = vpop.xlane.xlu1 %4063 }
 0x534   : > { %v4110_v54 = vsub.f32 %v10595_v27, %v4064_v19  ;;  %v12333_v27 = vld [vmem:[#allocation54_spill] sm:$0xff] }
 0x535   : > { %v10885_v39 = vpop.f32.mrb[108].mxu1  ;;  %v4095_v4 = vsub.f32 %v12333_v27, %v10452_v36 }
 0x536   : > { %v10887_v0 = vpop.eup %7518  ;;  %v4159_v25 = vmul.f32 1.442695, %v4110_v54  ;;  %v10889_v31 = vpop.f32.mrb[109].mxu1  ;;  %3223 = vadd.xlane.f32.xlu0 %v10505_v5 }
 0x537   : > { %12332 = vst [vmem:[#allocation36_spill] sm:$0xff] %v10889_v31  ;;  %4215 = vadd.xlane.f32.xlu1 %v10887_v0  ;;  %v10893_v35 = vpop.xlane.xlu1 %4065  ;;  %v4129_v58 = vmul.f32 1.442695, %v4095_v4 }
 0x538   : > { %7522 = vpow2.f32 %v4159_v25 }
 0x53a   : > { %v10895_v49 = vpop.eup %7520  ;;  %3227 = vadd.xlane.f32.xlu0 %v10520_v21 }
 0x53b   : > { %v10900_v16 = vpop.f32.mrb[110].mxu1  ;;  %4219 = vadd.xlane.f32.xlu1 %v10895_v49  ;;  %v4068_v40 = vpop.xlane.xlu1 %4067 }
 0x53c   : > { %v4112_v9 = vsub.f32 %v10623_v61, %v4068_v40  ;;  %v10904_v5 = vpop.f32.mrb[111].mxu1  ;;  %v4099_v61 = vsub.f32 %v10374_v12, %v10800_v14 }
 0x53d   : > { %12334 = vst [vmem:[#allocation54_spill] sm:$0xff] %v10904_v5 }
 0x53e   : > { %v4163_v37 = vmul.f32 1.442695, %v4112_v9  ;;  %3231 = vadd.xlane.f32.xlu0 %v10542_v53  ;;  %v4137_v54 = vmul.f32 1.442695, %v4099_v61 }
 0x53f   : > { %v10909_v21 = vpop.xlane.xlu1 %4069 }
 0x540   : > { %7524 = vpow2.f32 %v4163_v37 }
 0x541   : > { %7526 = vpow2.f32 %v4129_v58 }
 0x542   : > { %v10911_v36 = vpop.eup %7522  ;;  %3235 = vadd.xlane.f32.xlu0 %v10552_v1  ;;  %7528 = vpow2.f32 %v4133_v24 }
 0x543   : > { %4223 = vadd.xlane.f32.xlu1 %v10911_v36  ;;  %v4072_v56 = vpop.xlane.xlu1 %4071 }
 0x544   : > { %v4114_v53 = vsub.f32 %v10649_v30, %v4072_v56  ;;  %v4141_v30 = vmul.f32 1.442695, %v4101_v48  ;;  %v12336_v56 = vld [vmem:[#allocation56_spill] sm:$0xff] }
 0x546   : > { %v4167_v8 = vmul.f32 1.442695, %v4114_v53  ;;  %v4050_v19 = vpop.xlane.xlu0 %4049  ;;  %3239 = vadd.xlane.f32.xlu0 %v10570_v10 }
 0x547   : > { %v4076_v1 = vpop.xlane.xlu1 %4075  ;;  %v4103_v6 = vsub.f32 %v10659_v52, %v4050_v19 }
 0x548   : > { %7530 = vpow2.f32 %v4167_v8  ;;  %v4116_v25 = vsub.f32 %v10668_v62, %v4076_v1  ;;  %v10922_v27 = vpop.f32.mrb[112].mxu1 }
 0x549   : > { %v10924_v12 = vpop.f32.mrb[113].mxu1  ;;  %7532 = vpow2.f32 %v4137_v54  ;;  %v4145_v58 = vmul.f32 1.442695, %v4103_v6 }
 0x54a   : > { %12335 = vst [vmem:[#allocation133_spill] sm:$0xff] %v10924_v12  ;;  %v10926_v14 = vpop.eup %7524  ;;  %v4171_v4 = vmul.f32 1.442695, %v4116_v25  ;;  %v4054_v40 = vpop.xlane.xlu0 %4053  ;;  %4189 = vadd.xlane.f32.xlu0 %v10590_v13 }
 0x54b   : > { %4227 = vadd.xlane.f32.xlu1 %v10926_v14  ;;  %v4080_v10 = vpop.xlane.xlu1 %4079  ;;  %v7527_v43 = vpop.eup %7526  ;;  %v4105_v47 = vsub.f32 %v10679_v42, %v4054_v40  ;;  %v12337_v42 = vld [vmem:[#allocation121_spill] sm:$0xff] }
 0x54c   : > { %7534 = vpow2.f32 %v4171_v4  ;;  %v4118_v62 = vsub.f32 %v10688_v17, %v4080_v10  ;;  %v7529_v53 = vpop.eup %7528 }
 0x54d   : > { %7536 = vpow2.f32 %v4141_v30  ;;  %v4149_v17 = vmul.f32 1.442695, %v4105_v47 }
 0x54e   : > { %v4175_v9 = vmul.f32 1.442695, %v4118_v62  ;;  %v7297_v37 = vpop.permute.xlu0 %7296  ;;  %4193 = vadd.xlane.f32.xlu0 %v7527_v43 }
 0x54f   : > { %v7299_v24 = vunpack.i.h.bf16 %v7297_v37  ;;  %v7298_v61 = vunpack.i.l.bf16 %v7297_v37  ;;  %v4084_v13 = vpop.xlane.xlu1 %4083 }
 0x550   : > { %7538 = vpow2.f32 %v4175_v9  ;;  %v4120_v52 = vsub.f32 %v12336_v56, %v4084_v13  ;;  %v12339_v9 = vld [vmem:[#allocation34_spill] sm:$0xff] }
 0x551   : > { %v6961_v48 = vpack.c.bf16 %v7299_v24, %v7298_v61  ;;  %7540 = vpow2.f32 %v4145_v58 }
 0x552   : > { %v10934_v8 = vpop.eup %7530  ;;  %v4179_v19 = vmul.f32 1.442695, %v4120_v52  ;;  %4197 = vadd.xlane.f32.xlu0 %v7529_v53 }
 0x553   : > { %4231 = vadd.xlane.f32.xlu1 %v10934_v8  ;;  %v4088_v54 = vpop.xlane.xlu1 %4087  ;;  %6962 = vmatprep.subr.bf16.mxu1 %v6961_v48  ;;  %v7533_v30 = vpop.eup %7532 }
 0x554   : > { %7542 = vpow2.f32 %v4179_v19  ;;  %v4122_v1 = vsub.f32 %v12337_v42, %v4088_v54  ;;  %v10938_v25 = vpop.f32.mrb[114].mxu1  ;;  %6964 = vmatpush3.bf16.msra.mxu1 %v6961_v48 }
 0x555   : > { %v10940_v4 = vpop.f32.mrb[115].mxu1  ;;  %7544 = vpow2.f32 %v4149_v17  ;;  %v12341_v17 = vld [vmem:[#allocation4_spill] sm:$0xff] }
 0x556   : > { %12338 = vst [vmem:[#allocation56_spill] sm:$0xff] %v10940_v4  ;;  %v10942_v40 = vpop.eup %7534  ;;  %v4183_v6 = vmul.f32 1.442695, %v4122_v1  ;;  %4201 = vadd.xlane.f32.xlu0 %v7533_v30 }
 0x557   : > { %4235 = vadd.xlane.f32.xlu1 %v10942_v40  ;;  %v4092_v10 = vpop.xlane.xlu1 %4091  ;;  %6534 = vmatmul.mubr.f32.vlgmr.msra.gmra.mrb[128].mxu1 %v10836_v46  ;;  %v7537_v62 = vpop.eup %7536 }
 0x558   : > { %7546 = vpow2.f32 %v4183_v6  ;;  %v4124_v37 = vsub.f32 %v12339_v9, %v4092_v10  ;;  %6536 = vmatprep.mubr.f32.mxu1 %v7527_v43  ;;  %v12345_v10 = vld [vmem:[#allocation5_spill] sm:$0xff] }
 0x55a   : > { %v10947_v58 = vpop.eup %7538  ;;  %v4187_v47 = vmul.f32 1.442695, %v4124_v37  ;;  %4205 = vadd.xlane.f32.xlu0 %v7537_v62 }
 0x55b   : > { %4239 = vadd.xlane.f32.xlu1 %v10947_v58  ;;  %v10950_v24 = vpop.xlane.xlu1 %3181  ;;  %6537 = vmatmul.mubr.f32.gmra.mrb[130].mxu1 %v10842_v2  ;;  %v7541_v61 = vpop.eup %7540 }
 0x55c   : > { %7548 = vpow2.f32 %v4187_v47  ;;  %6539 = vmatprep.mubr.f32.mxu1 %v7529_v53  ;;  %v12347_v47 = vld [vmem:[#allocation88_spill] sm:$0xff] }
 0x55d   : > { %7550 = vrcp.f32 %v12341_v17 }
 0x55e   : > { %v10953_v13 = vpop.eup %7542  ;;  %4209 = vadd.xlane.f32.xlu0 %v7541_v61 }
 0x55f   : > { %4243 = vadd.xlane.f32.xlu1 %v10953_v13  ;;  %v10956_v46 = vpop.xlane.xlu1 %3185  ;;  %6540 = vmatmul.mubr.f32.gmra.mrb[132].mxu1 %v10853_v18  ;;  %v7545_v56 = vpop.eup %7544 }
 0x560   : > { %v10959_v43 = vpop.f32.mrb[116].mxu1  ;;  %6542 = vmatprep.mubr.f32.mxu1 %v7533_v30  ;;  %v12344_v30 = vld [vmem:[#allocation45_spill] sm:$0xff] }
 0x561   : > { %v10961_v52 = vpop.f32.mrb[117].mxu1  ;;  %7552 = vrcp.f32 %v12344_v30 }
 0x562   : > { %12340 = vst [vmem:[#allocation121_spill] sm:$0xff] %v10961_v52  ;;  %v10963_v48 = vpop.eup %7546  ;;  %4213 = vadd.xlane.f32.xlu0 %v7545_v56  ;;  %7554 = vrcp.f32 %v12345_v10 }
 0x563   : > { %4247 = vadd.xlane.f32.xlu1 %v10963_v48  ;;  %v10966_v2 = vpop.xlane.xlu1 %3189  ;;  %6543 = vmatmul.mubr.f32.gmra.mrb[134].mxu1 %v10861_v26  ;;  %7556 = vrcp.f32 %v12347_v47  ;;  %v12353_v47 = vld [vmem:[#allocation96_spill] sm:$0xff] }
 0x564   : > { %6545 = vmatprep.mubr.f32.mxu1 %v7537_v62 }
 0x566   : > { %v10969_v53 = vpop.eup %7548 }
 0x567   : > { %4251 = vadd.xlane.f32.xlu1 %v10969_v53  ;;  %v10972_v18 = vpop.xlane.xlu1 %3193  ;;  %6546 = vmatmul.mubr.f32.gmra.mrb[136].mxu1 %v10865_v20  ;;  %v7551_v9 = vpop.eup %7550 }
 0x568   : > { %v10975_v19 = vpop.f32.mrb[118].mxu1  ;;  %6548 = vmatprep.mubr.f32.mxu1 %v7541_v61 }
 0x569   : > { %v10978_v54 = vpop.f32.mrb[119].mxu1 }
 0x56a   : > { %12342 = vst [vmem:[#allocation34_spill] sm:$0xff] %v10978_v54  ;;  %v12352_v54 = vld [vmem:[#allocation91_spill] sm:$0xff] }
 0x56b   : > { %v10980_v42 = vpop.xlane.xlu1 %3197  ;;  %6549 = vmatmul.mubr.f32.gmra.mrb[138].mxu1 %v10880_v38  ;;  %v7553_v10 = vpop.eup %7552 }
 0x56c   : > { %v10983_v26 = vpop.f32.mrb[120].mxu1  ;;  %6551 = vmatprep.mubr.f32.mxu1 %v7545_v56  ;;  %v12349_v56 = vld [vmem:[#allocation87_spill] sm:$0xff]  ;;  %v2540_v52 = vmul.f32 %v7553_v10, %v12352_v54  ;;  %v7555_v4 = vpop.eup %7554  ;;  %v12357_v54 = vld [vmem:[#allocation94_spill] sm:$0xff] }
 0x56d   : > { %v10985_v1 = vpop.f32.mrb[121].mxu1  ;;  %v2539_v17 = vmul.f32 %v7551_v9, %v12349_v56  ;;  %v12354_v9 = vld [vmem:[#allocation89_spill] sm:$0xff] }
 0x56e   : > { %12343 = vst [vmem:[#allocation4_spill] sm:$0xff] %v10985_v1  ;;  %v2541_v56 = vmul.f32 %v7555_v4, %v12354_v9 }
 0x56f   : > { %v10988_v6 = vpop.xlane.xlu1 %3201  ;;  %6552 = vmatmul.mubr.f32.gmra.mrb[140].mxu1 %v10887_v0 }
 0x570   : > { %v10991_v20 = vpop.f32.mrb[122].mxu1 }
 0x571   : > { %v10994_v62 = vpop.f32.mrb[123].mxu1 }
 0x572   : > { %12346 = vst [vmem:[#allocation45_spill] sm:$0xff] %v10994_v62  ;;  %v12350_v62 = vld [vmem:[#allocation93_spill] sm:$0xff] }
 0x573   : > { %v10996_v37 = vpop.xlane.xlu1 %3205  ;;  %7558 = vrcp.f32 %v12350_v62 }
 0x574   : > { %v10998_v38 = vpop.f32.mrb[124].mxu1  ;;  %7560 = vrcp.f32 %v12353_v47  ;;  %v12358_v47 = vld [vmem:[#allocation53_spill] sm:$0xff] }
 0x575   : > { %v11001_v61 = vpop.f32.mrb[125].mxu1  ;;  %v4111_v7 = vsub.f32 %v12358_v47, %v10893_v35  ;;  %v12362_v35 = vld [vmem:[#allocation107_spill] sm:$0xff] }
 0x576   : > { %12348 = vst [vmem:[#allocation5_spill] sm:$0xff] %v11001_v61  ;;  %v12355_v61 = vld [vmem:[#allocation90_spill] sm:$0xff] }
 0x577   : > { %v11004_v30 = vpop.xlane.xlu1 %3209  ;;  %v4109_v12 = vsub.f32 %v12355_v61, %v10878_v57  ;;  %v12359_v61 = vld [vmem:[#allocation103_spill] sm:$0xff] }
 0x578   : > { %v11006_v0 = vpop.f32.mrb[126].mxu1  ;;  %4624 = vrot.lane.b32.xlu1 %v2539_v17, %s7855_s16  ;;  %v7557_v17 = vpop.eup %7556 }
 0x579   : > { %v11010_v1 = vpop.f32.mrb[127].mxu1  ;;  %v2543_v10 = vmul.f32 %v7557_v17, %v12357_v54 }
 0x57a   : > { %12351 = vst [vmem:[#allocation88_spill] sm:$0xff] %v11010_v1  ;;  %v12356_v1 = vld [vmem:[#allocation100_spill] sm:$0xff] }
 0x57b   : > { %v11018_v5 = vpop.xlane.xlu1 %3213  ;;  %7562 = vrcp.f32 %v12356_v1  ;;  %v4161_v1 = vmul.f32 1.442695, %v4111_v7 }
 0x57c   : > { %4626 = vrot.lane.b32.xlu1 %v2540_v52, %s7855_s16  ;;  %v4157_v52 = vmul.f32 1.442695, %v4109_v12 }
 0x57d   : > { %v7559_v9 = vpop.eup %7558 }
 0x57e   : > { %v7561_v17 = vpop.eup %7560 }
 0x57f   : > { %v4058_v31 = vpop.xlane.xlu0 %4057  ;;  %v11026_v57 = vpop.xlane.xlu1 %3217 }
 0x580   : > { %v4107_v62 = vsub.f32 %v10776_v44, %v4058_v31  ;;  %4628 = vrot.lane.b32.xlu1 %v2541_v56, %s7855_s16  ;;  %v12360_v44 = vld [vmem:[#allocation97_spill] sm:$0xff] }
 0x581   : > { %v2545_v31 = vmul.f32 %v7559_v9, %v12360_v44  ;;  %v12361_v56 = vld [vmem:[#allocation105_spill] sm:$0xff] }
 0x582   : > { %v4153_v4 = vmul.f32 1.442695, %v4107_v62  ;;  %v4113_v12 = vsub.f32 %v12361_v56, %v10909_v21  ;;  %v12363_v62 = vld [vmem:[#allocation101_spill] sm:$0xff]  ;;  %v12364_v21 = vld [vmem:[#allocation104_spill] sm:$0xff] }
 0x583   : > { %v4074_v50 = vpop.xlane.xlu0 %4073  ;;  %v2547_v47 = vmul.f32 %v7561_v17, %v12363_v62  ;;  %v12367_v17 = vld [vmem:[#allocation108_spill] sm:$0xff] }
 0x584   : > { %7564 = vpow2.f32 %v4153_v4  ;;  %4632 = vrot.lane.b32.xlu1 %v2543_v10, %s7855_s16  ;;  %v4165_v4 = vmul.f32 1.442695, %v4113_v12  ;;  %v4115_v10 = vsub.f32 %v10783_v33, %v4074_v50  ;;  %v12366_v12 = vld [vmem:[#allocation51_spill] sm:$0xff] }
 0x585   : > { %7566 = vrcp.f32 %v12359_v61  ;;  %v11037_v61 = vpop.xlane.xlu1 %3221  ;;  %v7563_v9 = vpop.eup %7562 }
 0x586   : > { %7568 = vpow2.f32 %v4157_v52  ;;  %v2549_v44 = vmul.f32 %v7563_v9, %v12364_v21  ;;  %v4169_v56 = vmul.f32 1.442695, %v4115_v10  ;;  %v12368_v10 = vld [vmem:[#allocation20_spill] sm:$0xff] }
 0x587   : > { %v4078_v54 = vpop.xlane.xlu0 %4077  ;;  %7570 = vrcp.f32 %v12362_v35 }
 0x588   : > { %4636 = vrot.lane.b32.xlu1 %v2545_v31, %s7855_s16  ;;  %7572 = vpow2.f32 %v4161_v1  ;;  %v4117_v31 = vsub.f32 %v10792_v63, %v4078_v54 }
 0x589   : > { %7574 = vpow2.f32 %v4165_v4  ;;  %v11043_v50 = vpop.xlane.xlu1 %3225 }
 0x58a   : > { %7576 = vrcp.f32 %v12365_v22  ;;  %v4173_v63 = vmul.f32 1.442695, %v4117_v31 }
 0x58b   : > { %v4082_v52 = vpop.xlane.xlu0 %4081  ;;  %7578 = vrcp.f32 %v12366_v12 }
 0x58c   : > { %4640 = vrot.lane.b32.xlu1 %v2547_v47, %s7855_s16  ;;  %7580 = vpow2.f32 %v4169_v56  ;;  %v4119_v54 = vsub.f32 %v10805_v23, %v4082_v52  ;;  %v12370_v56 = vld [vmem:[#allocation113_spill] sm:$0xff] }
 0x58d   : > { %7582 = vpow2.f32 %v4173_v63 }
 0x58e   : > { %v7565_v7 = vpop.eup %7564  ;;  %v4177_v9 = vmul.f32 1.442695, %v4119_v54 }
 0x58f   : > { %v7567_v35 = vpop.eup %7566  ;;  %v4086_v1 = vpop.xlane.xlu0 %4085  ;;  %4217 = vadd.xlane.f32.xlu0 %v7565_v7  ;;  %6554 = vmatprep.mubr.f32.mxu1 %v7565_v7 }
 0x590   : > { %v7569_v33 = vpop.eup %7568  ;;  %4644 = vrot.lane.b32.xlu1 %v2549_v44, %s7855_s16  ;;  %6555 = vmatmul.mubr.f32.gmra.mrb[142].mxu1 %v10895_v49  ;;  %v2551_v62 = vmul.f32 %v7567_v35, %v12367_v17  ;;  %v11053_v7 = vpop.xlane.xlu1 %3229  ;;  %v4121_v21 = vsub.f32 %v10815_v41, %v4086_v1  ;;  %v12369_v44 = vld [vmem:[#allocation102_spill] sm:$0xff]  ;;  %v12371_v41 = vld [vmem:[#allocation27_spill] sm:$0xff] }
 0x591   : > { %6557 = vmatprep.mubr.f32.mxu1 %v7569_v33  ;;  %v7571_v22 = vpop.eup %7570  ;;  %7584 = vrcp.f32 %v12369_v44 }
 0x592   : > { %v7573_v4 = vpop.eup %7572  ;;  %v2553_v49 = vmul.f32 %v7571_v22, %v12368_v10  ;;  %7586 = vpow2.f32 %v4177_v9  ;;  %v4181_v35 = vmul.f32 1.442695, %v4121_v21  ;;  %v12373_v22 = vld [vmem:[#allocation112_spill] sm:$0xff]  ;;  %v12375_v9 = vld [vmem:[#allocation114_spill] sm:$0xff] }
 0x593   : > { %v4090_v47 = vpop.xlane.xlu0 %4089  ;;  %4221 = vadd.xlane.f32.xlu0 %v7569_v33  ;;  %v7575_v52 = vpop.eup %7574  ;;  %7588 = vrcp.f32 %v12371_v41  ;;  %v12374_v10 = vld [vmem:[#allocation120_spill] sm:$0xff]  ;;  %v12379_v41 = vld [vmem:[#allocation123_spill] sm:$0xff] }
 0x594   : > { %4648 = vrot.lane.b32.xlu1 %v2551_v62, %s7855_s16  ;;  %6558 = vmatmul.mubr.f32.gmra.mrb[144].mxu1 %v10911_v36  ;;  %v7577_v36 = vpop.eup %7576  ;;  %v4123_v33 = vsub.f32 %v10824_v15, %v4090_v47  ;;  %v11066_v62 = vpop.xlane.xlu1 %3233  ;;  %7590 = vpow2.f32 %v4181_v35 }
 0x595   : > { %6560 = vmatprep.mubr.f32.mxu1 %v7573_v4  ;;  %v2555_v31 = vmul.f32 %v7577_v36, %v12370_v56  ;;  %v7579_v12 = vpop.eup %7578  ;;  %7592 = vrcp.f32 %v12373_v22  ;;  %v12377_v56 = vld [vmem:[#allocation118_spill] sm:$0xff] }
 0x596   : > { %v7581_v17 = vpop.eup %7580  ;;  %v4185_v54 = vmul.f32 1.442695, %v4123_v33 }
 0x597   : > { %v11057_v23 = vpop.xlane.xlu0 %3179  ;;  %4225 = vadd.xlane.f32.xlu0 %v7573_v4  ;;  %v7583_v15 = vpop.eup %7582 }
 0x598   : > { %4652 = vrot.lane.b32.xlu1 %v2553_v49, %s7855_s16  ;;  %6561 = vmatmul.mubr.f32.gmra.mrb[146].mxu1 %v10926_v14  ;;  %v12372_v14 = vld [vmem:[#allocation116_spill] sm:$0xff]  ;;  %7594 = vpow2.f32 %v4185_v54 }
 0x599   : > { %6563 = vmatprep.mubr.f32.mxu1 %v7575_v52  ;;  %v2557_v63 = vmul.f32 %v7579_v12, %v12372_v14  ;;  %7596 = vrcp.f32 %v12375_v9  ;;  %v12378_v12 = vld [vmem:[#allocation129_spill] sm:$0xff] }
 0x59a   : > { %7598 = vrcp.f32 %v12377_v56 }
 0x59b   : > { %v11064_v1 = vpop.xlane.xlu0 %3183  ;;  %4229 = vadd.xlane.f32.xlu0 %v7575_v52  ;;  %v7585_v4 = vpop.eup %7584  ;;  %v12376_v52 = vld [vmem:[#allocation125_spill] sm:$0xff]  ;;  %7600 = vrcp.f32 %v12379_v41 }
 0x59c   : > { %4656 = vrot.lane.b32.xlu1 %v2555_v31, %s7855_s16  ;;  %6564 = vmatmul.mubr.f32.gmra.mrb[148].mxu1 %v10934_v8  ;;  %v2559_v49 = vmul.f32 %v7585_v4, %v12374_v10  ;;  %v11077_v8 = vpop.xlane.xlu1 %3237  ;;  %v7587_v21 = vpop.eup %7586  ;;  %7602 = vrcp.f32 %v10950_v24 }
 0x59d   : > { %6566 = vmatprep.mubr.f32.mxu1 %v7581_v17  ;;  %v7589_v44 = vpop.eup %7588  ;;  %7604 = vrcp.f32 %v10956_v46 }
 0x59e   : > { %v2561_v36 = vmul.f32 %v7589_v44, %v12376_v52  ;;  %v7591_v31 = vpop.eup %7590  ;;  %7606 = vrcp.f32 %v10966_v2 }
 0x59f   : > { %4233 = vadd.xlane.f32.xlu0 %v7581_v17  ;;  %v11072_v47 = vpop.xlane.xlu0 %3187  ;;  %v7593_v33 = vpop.eup %7592 }
 0x5a0   : > { %4660 = vrot.lane.b32.xlu1 %v2557_v63, %s7855_s16  ;;  %6567 = vmatmul.mubr.f32.gmra.mrb[150].mxu1 %v10942_v40  ;;  %v11086_v35 = vpop.xlane.xlu1 %3241 }
 0x5a1   : > { %6569 = vmatprep.mubr.f32.mxu1 %v7583_v15 }
 0x5a2   : > { %v7595_v17 = vpop.eup %7594 }
 0x5a3   : > { %4237 = vadd.xlane.f32.xlu0 %v7583_v15  ;;  %v11083_v40 = vpop.xlane.xlu0 %3191  ;;  %v7597_v63 = vpop.eup %7596 }
 0x5a4   : > { %4664 = vrot.lane.b32.xlu1 %v2559_v49, %s7855_s16  ;;  %6570 = vmatmul.mubr.f32.gmra.mrb[152].mxu1 %v10947_v58  ;;  %v2563_v58 = vmul.f32 %v7593_v33, %v12378_v12  ;;  %v11098_v54 = vpop.xlane.xlu1 %4191  ;;  %v7599_v22 = vpop.eup %7598  ;;  %v12380_v49 = vld [vmem:[#allocation84_spill] sm:$0xff] }
 0x5a5   : > { %6572 = vmatprep.mubr.f32.mxu1 %v7587_v21  ;;  %v2567_v15 = vmul.f32 %v7599_v22, %v10762_v3  ;;  %v7601_v24 = vpop.eup %7600  ;;  %7608 = vrcp.f32 %v12380_v49 }
 0x5a6   : > { %v7603_v10 = vpop.eup %7602  ;;  %7610 = vrcp.f32 %v10972_v18 }
 0x5a7   : > { %4241 = vadd.xlane.f32.xlu0 %v7587_v21  ;;  %v11092_v14 = vpop.xlane.xlu0 %3195  ;;  %v3549_v3 = vmul.f32 %v7603_v10, %v10787_v51  ;;  %v7605_v46 = vpop.eup %7604  ;;  %v12381_v21 = vld [vmem:[#allocation85_spill] sm:$0xff]  ;;  %v12388_v10 = vld [vmem:[#allocation6_spill] sm:$0xff] }
 0x5a8   : > { %4668 = vrot.lane.b32.xlu1 %v2561_v36, %s7855_s16  ;;  %6573 = vmatmul.mubr.f32.gmra.mrb[154].mxu1 %v10953_v13  ;;  %v2565_v13 = vmul.f32 %v7597_v63, %v10756_v60  ;;  %v2569_v60 = vmul.f32 %v7601_v24, %v10768_v32  ;;  %7612 = vrcp.f32 %v12381_v21  ;;  %v3551_v44 = vmul.f32 %v7605_v46, %v10810_v29  ;;  %v7607_v52 = vpop.eup %7606  ;;  %v12382_v36 = vld [vmem:[#allocation50_spill] sm:$0xff]  ;;  %v12386_v63 = vld [vmem:[#allocation49_spill] sm:$0xff] }
 0x5a9   : > { %6575 = vmatprep.mubr.f32.mxu1 %v7591_v31  ;;  %7614 = vrcp.f32 %v10980_v42  ;;  %v3553_v18 = vmul.f32 %v7607_v52, %v10830_v45  ;;  %v12384_v42 = vld [vmem:[#allocation86_spill] sm:$0xff]  ;;  %v12385_v45 = vld [vmem:[#allocation95_spill] sm:$0xff] }
 0x5aa   : > { %7616 = vrcp.f32 %v12382_v36  ;;  %v12389_v21 = vld [vmem:[#allocation26_spill] sm:$0xff] }
 0x5ab   : > { %4245 = vadd.xlane.f32.xlu0 %v7591_v31  ;;  %v11104_v4 = vpop.xlane.xlu0 %3199  ;;  %7618 = vrcp.f32 %v10988_v6  ;;  %v12383_v31 = vld [vmem:[#allocation22_spill] sm:$0xff] }
 0x5ac   : > { %4672 = vrot.lane.b32.xlu1 %v2563_v58, %s7855_s16  ;;  %6576 = vmatmul.mubr.f32.gmra.mrb[156].mxu1 %v10963_v48  ;;  %v11106_v48 = vpop.xlane.xlu1 %4195  ;;  %7620 = vrcp.f32 %v12384_v42  ;;  %v12391_v36 = vld [vmem:[#allocation110_spill] sm:$0xff] }
 0x5ad   : > { %6578 = vmatprep.mubr.f32.mxu1 %v7595_v17  ;;  %7622 = vrcp.f32 %v10996_v37 }
 0x5ae   : > { %7624 = vrcp.f32 %v12386_v63 }
 0x5af   : > { %4249 = vadd.xlane.f32.xlu0 %v7595_v17  ;;  %v11114_v9 = vpop.xlane.xlu0 %3203  ;;  %v7609_v51 = vpop.eup %7608  ;;  %7626 = vrcp.f32 %v11004_v30 }
 0x5b0   : > { %4676 = vrot.lane.b32.xlu1 %v2565_v13, %s7855_s16  ;;  %6579 = vmatmul.mubr.f32.gmra.mrb[158].mxu1 %v10969_v53  ;;  %v11112_v53 = vpop.xlane.xlu1 %4199  ;;  %v7611_v56 = vpop.eup %7610  ;;  %v2538_v33 = vmul.f32 %v7609_v51, %v12383_v31  ;;  %7628 = vrcp.f32 %v12388_v10 }
 0x5b1   : > { %v3555_v6 = vmul.f32 %v7611_v56, %v10847_v11  ;;  %v12387_v11 = vld [vmem:[#allocation99_spill] sm:$0xff]  ;;  %7630 = vrcp.f32 %v11018_v5 }
 0x5b2   : > { %v7613_v29 = vpop.eup %7612 }
 0x5b3   : > { %v11124_v2 = vpop.xlane.xlu0 %3207  ;;  %v7615_v41 = vpop.eup %7614  ;;  %v2542_v17 = vmul.f32 %v7613_v29, %v12385_v45 }
 0x5b4   : > { %4680 = vrot.lane.b32.xlu1 %v2567_v15, %s7855_s16  ;;  %v11122_v32 = vpop.xlane.xlu1 %4203  ;;  %v7617_v22 = vpop.eup %7616  ;;  %v3557_v15 = vmul.f32 %v7615_v41, %v10855_v59  ;;  %v12390_v59 = vld [vmem:[#allocation92_spill] sm:$0xff] }
 0x5b5   : > { %v7619_v24 = vpop.eup %7618  ;;  %7632 = vrcp.f32 %v12390_v59 }
 0x5b6   : > { %v7621_v49 = vpop.eup %7620  ;;  %7634 = vrcp.f32 %v11026_v57  ;;  %v12393_v57 = vld [vmem:[#allocation115_spill] sm:$0xff] }
 0x5b7   : > { %v11135_v58 = vpop.xlane.xlu0 %3211  ;;  %v7623_v46 = vpop.eup %7622  ;;  %7636 = vrcp.f32 %v12391_v36 }
 0x5b8   : > { %4684 = vrot.lane.b32.xlu1 %v2569_v60, %s7855_s16  ;;  %v11133_v12 = vpop.xlane.xlu1 %4207  ;;  %v2544_v60 = vmul.f32 %v7617_v22, %v12387_v11  ;;  %v7625_v5 = vpop.eup %7624  ;;  %v3561_v51 = vmul.f32 %v7623_v46, %v10885_v39  ;;  %7638 = vrcp.f32 %v11037_v61  ;;  %v12394_v39 = vld [vmem:[#allocation109_spill] sm:$0xff] }
 0x5b9   : > { %7640 = vrcp.f32 %v12393_v57 }
 0x5ba   : > { %7642 = vrcp.f32 %v11043_v50  ;;  %v12397_v50 = vld [vmem:[#allocation124_spill] sm:$0xff] }
 0x5bb   : > { %v11148_v37 = vpop.xlane.xlu0 %3215 }
 0x5bc   : > { %4752 = vrot.lane.b32.xlu1 %v3549_v3, %s7856_s24  ;;  %v3559_v3 = vmul.f32 %v7619_v24, %v10871_v55  ;;  %v12392_v55 = vld [vmem:[#allocation106_spill] sm:$0xff] }
 0x5bd   : > { %v2548_v56 = vmul.f32 %v7625_v5, %v12392_v55 }
 0x5bf   : > { %v11161_v52 = vpop.xlane.xlu0 %3219 }
 0x5c0   : > { %4756 = vrot.lane.b32.xlu1 %v3551_v44, %s7856_s24  ;;  %v11143_v13 = vpop.xlane.xlu1 %4211  ;;  %v2546_v44 = vmul.f32 %v7621_v49, %v12389_v21 }
 0x5c3   : > { %v11175_v42 = vpop.xlane.xlu0 %3223 }
 0x5c4   : > { %4760 = vrot.lane.b32.xlu1 %v3553_v18, %s7856_s24  ;;  %v11156_v30 = vpop.xlane.xlu1 %4215  ;;  %v7627_v18 = vpop.eup %7626 }
 0x5c5   : > { %4622 = vrot.lane.b32.xlu0 %v2538_v33, %s7855_s16  ;;  %v7629_v33 = vpop.eup %7628  ;;  %v3563_v29 = vmul.f32 %v7627_v18, %v10900_v16 }
 0x5c6   : > { %v2550_v41 = vmul.f32 %v7629_v33, %v12394_v39  ;;  %v12402_v33 = vld [vmem:[#allocation122_spill] sm:$0xff] }
 0x5c7   : > { %v11187_v11 = vpop.xlane.xlu0 %3227 }
 0x5c8   : > { %4764 = vrot.lane.b32.xlu1 %v3555_v6, %s7856_s24  ;;  %v11169_v31 = vpop.xlane.xlu1 %4219  ;;  %v7631_v6 = vpop.eup %7630 }
 0x5c9   : > { %4630 = vrot.lane.b32.xlu0 %v2542_v17, %s7855_s16  ;;  %v7633_v61 = vpop.eup %7632  ;;  %v12395_v17 = vld [vmem:[#allocation119_spill] sm:$0xff]  ;;  %v3565_v63 = vmul.f32 %v7631_v6, %v10922_v27 }
 0x5ca   : > { %7644 = vrcp.f32 %v12395_v17  ;;  %v7635_v22 = vpop.eup %7634  ;;  %v12398_v27 = vld [vmem:[#allocation55_spill] sm:$0xff]  ;;  %v12404_v17 = vld [vmem:[#allocation130_spill] sm:$0xff] }
 0x5cb   : > { %v7637_v16 = vpop.eup %7636  ;;  %7646 = vrcp.f32 %v11053_v7  ;;  %v3567_v10 = vmul.f32 %v7635_v22, %v10938_v25  ;;  %v11203_v7 = vpop.xlane.xlu0 %3231  ;;  %v12400_v25 = vld [vmem:[#allocation117_spill] sm:$0xff] }
 0x5cc   : > { %4768 = vrot.lane.b32.xlu1 %v3557_v15, %s7856_s24  ;;  %v12396_v15 = vld [vmem:[#allocation111_spill] sm:$0xff]  ;;  %7648 = vrcp.f32 %v12397_v50  ;;  %v7639_v49 = vpop.eup %7638 }
 0x5cd   : > { %4634 = vrot.lane.b32.xlu0 %v2544_v60, %s7855_s16  ;;  %v2552_v24 = vmul.f32 %v7633_v61, %v12396_v15  ;;  %v7641_v46 = vpop.eup %7640  ;;  %7650 = vrcp.f32 %v11066_v62  ;;  %v3569_v59 = vmul.f32 %v7639_v49, %v10959_v43  ;;  %v12401_v62 = vld [vmem:[#allocation128_spill] sm:$0xff] }
 0x5ce   : > { %v7643_v5 = vpop.eup %7642  ;;  %v2556_v36 = vmul.f32 %v7641_v46, %v12400_v25 }
 0x5cf   : > { %v3571_v55 = vmul.f32 %v7643_v5, %v10975_v19 }
 0x5d0   : > { %4772 = vrot.lane.b32.xlu1 %v3559_v3, %s7856_s24  ;;  %v11179_v45 = vpop.xlane.xlu1 %4223  ;;  %v2554_v3 = vmul.f32 %v7637_v16, %v12398_v27 }
 0x5d1   : > { %4638 = vrot.lane.b32.xlu0 %v2546_v44, %s7855_s16  ;;  %v12399_v44 = vld [vmem:[#allocation127_spill] sm:$0xff] }
 0x5d2   : > { %7652 = vrcp.f32 %v12399_v44 }
 0x5d3   : > { %7654 = vrcp.f32 %v11077_v8 }
 0x5d4   : > { %4776 = vrot.lane.b32.xlu1 %v3561_v51, %s7856_s24  ;;  %v7645_v51 = vpop.eup %7644  ;;  %7656 = vrcp.f32 %v12401_v62 }
 0x5d5   : > { %4642 = vrot.lane.b32.xlu0 %v2548_v56, %s7855_s16  ;;  %v7647_v56 = vpop.eup %7646  ;;  %v2558_v57 = vmul.f32 %v7645_v51, %v12402_v33  ;;  %7658 = vrcp.f32 %v11086_v35 }
 0x5d6   : > { %v7649_v43 = vpop.eup %7648  ;;  %v3573_v8 = vmul.f32 %v7647_v56, %v10983_v26  ;;  %7660 = vrcp.f32 %v12404_v17  ;;  %v12406_v26 = vld [vmem:[#allocation25_spill] sm:$0xff] }
 0x5d7   : > { %v7651_v39 = vpop.eup %7650  ;;  %v12413_v17 = vld [vmem:[#allocation29_spill] sm:$0xff] }
 0x5d8   : > { %4780 = vrot.lane.b32.xlu1 %v3563_v29, %s7856_s24  ;;  %v11189_v60 = vpop.xlane.xlu1 %4227  ;;  %v11215_v29 = vpop.xlane.xlu0 %3235  ;;  %v3575_v35 = vmul.f32 %v7651_v39, %v10991_v20 }
 0x5d9   : > { %4646 = vrot.lane.b32.xlu0 %v2550_v41, %s7855_s16  ;;  %v12403_v41 = vld [vmem:[#allocation126_spill] sm:$0xff] }
 0x5da   : > { %v2560_v61 = vmul.f32 %v7649_v43, %v12403_v41  ;;  %v12411_v43 = vld [vmem:[#allocation52_spill] sm:$0xff] }
 0x5dc   : > { %4784 = vrot.lane.b32.xlu1 %v3565_v63, %s7856_s24  ;;  %v7653_v19 = vpop.eup %7652  ;;  %v11229_v22 = vpop.xlane.xlu0 %3239 }
 0x5dd   : > { %4650 = vrot.lane.b32.xlu0 %v2552_v24, %s7855_s16  ;;  %v7655_v15 = vpop.eup %7654  ;;  %v12405_v24 = vld [vmem:[#allocation59_spill] sm:$0xff]  ;;  %v2562_v16 = vmul.f32 %v7653_v19, %v12406_v26 }
 0x5de   : > { %7662 = vrcp.f32 %v12405_v24  ;;  %v7657_v50 = vpop.eup %7656  ;;  %v3577_v49 = vmul.f32 %v7655_v15, %v10998_v38  ;;  %v12414_v26 = vld [vmem:[#allocation71_spill] sm:$0xff] }
 0x5df   : > { %7664 = vrcp.f32 %v10753_v34  ;;  %v7659_v27 = vpop.eup %7658  ;;  %v2564_v20 = vmul.f32 %v7657_v50, %v10758_v28  ;;  %v12408_v28 = vld [vmem:[#allocation48_spill] sm:$0xff]  ;;  %v12415_v50 = vld [vmem:[#allocation31_spill] sm:$0xff] }
 0x5e0   : > { %4788 = vrot.lane.b32.xlu1 %v3567_v10, %s7856_s24  ;;  %v11198_v21 = vpop.xlane.xlu1 %4231  ;;  %7666 = vrcp.f32 %v11057_v23  ;;  %v7661_v34 = vpop.eup %7660  ;;  %v3579_v44 = vmul.f32 %v7659_v27, %v11006_v0  ;;  %v12410_v0 = vld [vmem:[#allocation132_spill] sm:$0xff] }
 0x5e1   : > { %4654 = vrot.lane.b32.xlu0 %v2554_v3, %s7855_s16  ;;  %v11242_v3 = vpop.xlane.xlu0 %4189  ;;  %7668 = vrcp.f32 %v11064_v1  ;;  %v12409_v1 = vld [vmem:[#allocation73_spill] sm:$0xff] }
 0x5e2   : > { %7670 = vrcp.f32 %v11072_v47 }
 0x5e3   : > { %7672 = vrcp.f32 %v11083_v40 }
 0x5e4   : > { %4792 = vrot.lane.b32.xlu1 %v3569_v59, %s7856_s24  ;;  %v11208_v18 = vpop.xlane.xlu1 %4235  ;;  %v12407_v59 = vld [vmem:[#allocation131_spill] sm:$0xff]  ;;  %7674 = vrcp.f32 %v11092_v14 }
 0x5e5   : > { %4658 = vrot.lane.b32.xlu0 %v2556_v36, %s7855_s16  ;;  %v2566_v23 = vmul.f32 %v7661_v34, %v12407_v59  ;;  %v11258_v51 = vpop.xlane.xlu0 %4193  ;;  %7676 = vrcp.f32 %v11104_v4  ;;  %v12417_v34 = vld [vmem:[#allocation76_spill] sm:$0xff]  ;;  %v12418_v59 = vld [vmem:[#allocation61_spill] sm:$0xff] }
 0x5e6   : > { %v12419_v4 = vld [vmem:[#allocation64_spill] sm:$0xff] }
 0x5e8   : > { %4796 = vrot.lane.b32.xlu1 %v3571_v55, %s7856_s24  ;;  %v11218_v6 = vpop.xlane.xlu1 %4239  ;;  %v7663_v5 = vpop.eup %7662 }
 0x5e9   : > { %4662 = vrot.lane.b32.xlu0 %v2558_v57, %s7855_s16  ;;  %v7665_v36 = vpop.eup %7664  ;;  %v1514_v62 = vmul.f32 %v7663_v5, %v12409_v1  ;;  %v11268_v41 = vpop.xlane.xlu0 %4197 }
 0x5ea   : > { %v2568_v55 = vmul.f32 %v7665_v36, %v12410_v0  ;;  %v7667_v56 = vpop.eup %7666  ;;  %v12420_v36 = vld [vmem:[#allocation79_spill] sm:$0xff] }
 0x5eb   : > { %v7669_v39 = vpop.eup %7668 }
 0x5ec   : > { %4800 = vrot.lane.b32.xlu1 %v3573_v8, %s7856_s24  ;;  %v11226_v63 = vpop.xlane.xlu1 %4243  ;;  %v3548_v8 = vmul.f32 %v7667_v56, %v12411_v43  ;;  %v7671_v15 = vpop.eup %7670 }
 0x5ed   : > { %4666 = vrot.lane.b32.xlu0 %v2560_v61, %s7855_s16  ;;  %v12412_v61 = vld [vmem:[#allocation74_spill] sm:$0xff]  ;;  %v7673_v27 = vpop.eup %7672 }
 0x5f0   : > { %4804 = vrot.lane.b32.xlu1 %v3575_v35, %s7856_s24  ;;  %v11236_v10 = vpop.xlane.xlu1 %4247  ;;  %v3550_v35 = vmul.f32 %v7669_v39, %v12413_v17 }
 0x5f1   : > { %4670 = vrot.lane.b32.xlu0 %v2562_v16, %s7855_s16  ;;  %v11283_v16 = vpop.xlane.xlu0 %4201 }
 0x5f4   : > { %4808 = vrot.lane.b32.xlu1 %v3577_v49, %s7856_s24  ;;  %v11245_v46 = vpop.xlane.xlu1 %4251  ;;  %v3552_v49 = vmul.f32 %v7671_v15, %v12415_v50  ;;  %v12426_v15 = vld [vmem:[#allocation78_spill] sm:$0xff] }
 0x5f5   : > { %4674 = vrot.lane.b32.xlu0 %v2564_v20, %s7855_s16  ;;  %v12416_v20 = vld [vmem:[#allocation63_spill] sm:$0xff]  ;;  %v11295_v5 = vpop.xlane.xlu0 %4205 }
 0x5f6   : > { %7678 = vrcp.f32 %v12416_v20 }
 0x5f7   : > { %7680 = vrcp.f32 %v11114_v9  ;;  %v12422_v9 = vld [vmem:[#allocation69_spill] sm:$0xff] }
 0x5f8   : > { %4812 = vrot.lane.b32.xlu1 %v3579_v44, %s7856_s24  ;;  %v4625_v38 = vpop.permute.xlu1 %4624  ;;  %7682 = vrcp.f32 %v12419_v4 }
 0x5f9   : > { %v11254_v25 = vsel %vm661_vm0, %v12408_v28, %v4625_v38  ;;  %4678 = vrot.lane.b32.xlu0 %v2566_v23, %s7855_s16  ;;  %v3554_v23 = vmul.f32 %v7673_v27, %v12418_v59  ;;  %v7675_v38 = vpop.eup %7674  ;;  %7684 = vrcp.f32 %v11124_v2  ;;  %v11311_v39 = vpop.xlane.xlu0 %4209  ;;  %v12425_v2 = vld [vmem:[#allocation57_spill] sm:$0xff]  ;;  %v12428_v27 = vld [vmem:[#allocation36_spill] sm:$0xff] }
 0x5fa   : > { %7686 = vrcp.f32 %v12422_v9 }
 0x5fb   : > { %7688 = vrcp.f32 %v11135_v58 }
 0x5fc   : > { %v4627_v33 = vpop.permute.xlu1 %4626  ;;  %7690 = vrcp.f32 %v12426_v15 }
 0x5fd   : > { %v11263_v57 = vsel %vm661_vm0, %v1514_v62, %v4627_v33  ;;  %4682 = vrot.lane.b32.xlu0 %v2568_v55, %s7855_s16  ;;  %v12421_v62 = vld [vmem:[#allocation32_spill] sm:$0xff]  ;;  %v7677_v55 = vpop.eup %7676  ;;  %7692 = vrcp.f32 %v11148_v37  ;;  %v11324_v59 = vpop.xlane.xlu0 %4213  ;;  %v12431_v37 = vld [vmem:[#allocation3_spill] sm:$0xff] }
 0x5fe   : > { %v3556_v0 = vmul.f32 %v7675_v38, %v12421_v62  ;;  %v12423_v33 = vld [vmem:[#allocation80_spill] sm:$0xff]  ;;  %v3558_v17 = vmul.f32 %v7677_v55, %v12425_v2  ;;  %v12430_v38 = vld [vmem:[#allocation11_spill] sm:$0xff]  ;;  %v12432_v62 = vld [vmem:[#allocation54_spill] sm:$0xff] }
 0x5ff   : > { %v12435_v2 = vld [vmem:[#allocation133_spill] sm:$0xff] }
 0x600   : > { %v4629_v47 = vpop.permute.xlu1 %4628 }
 0x601   : > { %v11272_v19 = vsel %vm661_vm0, %v12412_v61, %v4629_v47  ;;  %4750 = vrot.lane.b32.xlu0 %v3548_v8, %s7856_s24  ;;  %v7679_v8 = vpop.eup %7678  ;;  %v12424_v47 = vld [vmem:[#allocation2_spill] sm:$0xff] }
 0x602   : > { %v1525_v61 = vmul.f32 %v7679_v8, %v12424_v47 }
 0x604   : > { %v4633_v24 = vpop.permute.xlu1 %4632 }
 0x605   : > { %v11279_v40 = vsel %vm661_vm0, %v12414_v26, %v4633_v24  ;;  %4754 = vrot.lane.b32.xlu0 %v3550_v35, %s7856_s24  ;;  %v7681_v35 = vpop.eup %7680 }
 0x606   : > { %v7683_v50 = vpop.eup %7682  ;;  %v3560_v20 = vmul.f32 %v7681_v35, %v12428_v27  ;;  %v12437_v27 = vld [vmem:[#allocation17_spill] sm:$0xff] }
 0x608   : > { %v4637_v14 = vpop.permute.xlu1 %4636 }
 0x609   : > { %v11289_v44 = vsel %vm661_vm0, %v12417_v34, %v4637_v14  ;;  %4758 = vrot.lane.b32.xlu0 %v3552_v49, %s7856_s24  ;;  %v12427_v49 = vld [vmem:[#allocation8_spill] sm:$0xff]  ;;  %v7685_v14 = vpop.eup %7684  ;;  %v12429_v34 = vld [vmem:[#allocation23_spill] sm:$0xff] }
 0x60a   : > { %v1527_v58 = vmul.f32 %v7683_v50, %v12427_v49  ;;  %7694 = vrcp.f32 %v12429_v34  ;;  %v12436_v50 = vld [vmem:[#allocation18_spill] sm:$0xff] }
 0x60b   : > { %7696 = vrcp.f32 %v12430_v38 }
 0x60c   : > { %v4641_v28 = vpop.permute.xlu1 %4640  ;;  %7698 = vrcp.f32 %v11161_v52 }
 0x60d   : > { %v11299_v1 = vsel %vm661_vm0, %v12420_v36, %v4641_v28  ;;  %4762 = vrot.lane.b32.xlu0 %v3554_v23, %s7856_s24  ;;  %v7687_v28 = vpop.eup %7686 }
 0x60e   : > { %v1529_v36 = vmul.f32 %v7687_v28, %v12431_v37  ;;  %v7689_v55 = vpop.eup %7688  ;;  %v12439_v28 = vld [vmem:[#allocation83_spill] sm:$0xff] }
 0x60f   : > { %v7691_v47 = vpop.eup %7690 }
 0x610   : > { %v4645_v56 = vpop.permute.xlu1 %4644  ;;  %v7693_v35 = vpop.eup %7692 }
 0x611   : > { %v11307_v43 = vsel %vm661_vm0, %v12423_v33, %v4645_v56  ;;  %4766 = vrot.lane.b32.xlu0 %v3556_v0, %s7856_s24  ;;  %v3562_v0 = vmul.f32 %v7685_v14, %v12432_v62  ;;  %v12433_v33 = vld [vmem:[#allocation41_spill] sm:$0xff]  ;;  %v12438_v14 = vld [vmem:[#allocation56_spill] sm:$0xff] }
 0x612   : > { %7700 = vrcp.f32 %v12433_v33  ;;  %v3566_v34 = vmul.f32 %v7693_v35, %v12438_v14 }
 0x613   : > { %7702 = vrcp.f32 %v11175_v42 }
 0x614   : > { %v4649_v24 = vpop.permute.xlu1 %4648  ;;  %7704 = vrcp.f32 %v11098_v54 }
 0x615   : > { %v11317_v26 = vsel %vm661_vm0, %v1525_v61, %v4649_v24  ;;  %4770 = vrot.lane.b32.xlu0 %v3558_v17, %s7856_s24  ;;  %v12434_v61 = vld [vmem:[#allocation37_spill] sm:$0xff]  ;;  %v3564_v17 = vmul.f32 %v7689_v55, %v12435_v2  ;;  %7706 = vrcp.f32 %v12436_v50 }
 0x616   : > { %v1531_v52 = vmul.f32 %v7691_v47, %v12434_v61  ;;  %7708 = vrcp.f32 %v11187_v11  ;;  %v12442_v47 = vld [vmem:[#allocation21_spill] sm:$0xff] }
 0x617   : > { %7710 = vrcp.f32 %v11106_v48 }
 0x618   : > { %v4653_v23 = vpop.permute.xlu1 %4652  ;;  %7712 = vrcp.f32 %v12439_v28 }
 0x619   : > { %v11328_v4 = vsel %vm661_vm0, %v1527_v58, %v4653_v23  ;;  %4774 = vrot.lane.b32.xlu0 %v3560_v20, %s7856_s24  ;;  %v7695_v58 = vpop.eup %7694  ;;  %7714 = vrcp.f32 %v11203_v7 }
 0x61a   : > { %v7697_v42 = vpop.eup %7696  ;;  %v1533_v20 = vmul.f32 %v7695_v58, %v12437_v27  ;;  %7716 = vrcp.f32 %v11112_v53  ;;  %v12444_v53 = vld [vmem:[#allocation34_spill] sm:$0xff] }
 0x61b   : > { %v7699_v23 = vpop.eup %7698  ;;  %7718 = vrcp.f32 %v12442_v47  ;;  %v12447_v47 = vld [vmem:[#allocation58_spill] sm:$0xff] }
 0x61c   : > { %v11334_v9 = vpop.xlane.xlu0 %4217  ;;  %v4657_v56 = vpop.permute.xlu1 %4656  ;;  %7720 = vrcp.f32 %v11215_v29 }
 0x61d   : > { %v11338_v8 = vsel %vm661_vm0, %v1529_v36, %v4657_v56  ;;  %4778 = vrot.lane.b32.xlu0 %v3562_v0, %s7856_s24  ;;  %v7701_v11 = vpop.eup %7700  ;;  %v12440_v36 = vld [vmem:[#allocation14_spill] sm:$0xff]  ;;  %v12441_v0 = vld [vmem:[#allocation121_spill] sm:$0xff]  ;;  %7722 = vrcp.f32 %v11122_v32  ;;  %v12445_v32 = vld [vmem:[#allocation16_spill] sm:$0xff] }
 0x61e   : > { %v1535_v62 = vmul.f32 %v7697_v42, %v12440_v36  ;;  %v3568_v55 = vmul.f32 %v7699_v23, %v12441_v0  ;;  %v7703_v56 = vpop.eup %7702  ;;  %7724 = vrcp.f32 %v11229_v22  ;;  %v12446_v36 = vld [vmem:[#allocation4_spill] sm:$0xff] }
 0x61f   : > { %v3570_v58 = vmul.f32 %v7703_v56, %v12444_v53  ;;  %7726 = vrcp.f32 %v11133_v12  ;;  %v12448_v12 = vld [vmem:[#allocation47_spill] sm:$0xff] }
 0x620   : > { %v11345_v15 = vpop.xlane.xlu0 %4221  ;;  %v4661_v24 = vpop.permute.xlu1 %4660  ;;  %7728 = vrcp.f32 %v12447_v47 }
 0x621   : > { %v11349_v49 = vsel %vm661_vm0, %v1531_v52, %v4661_v24  ;;  %4782 = vrot.lane.b32.xlu0 %v3564_v17, %s7856_s24  ;;  %v7705_v52 = vpop.eup %7704  ;;  %v12443_v17 = vld [vmem:[#allocation13_spill] sm:$0xff]  ;;  %7730 = vrcp.f32 %v11143_v13 }
 0x622   : > { %v7707_v2 = vpop.eup %7706  ;;  %v1537_v35 = vmul.f32 %v7701_v11, %v12443_v17  ;;  %7732 = vrcp.f32 %v11242_v3  ;;  %v12451_v3 = vld [vmem:[#allocation10_spill] sm:$0xff] }
 0x623   : > { %v7709_v42 = vpop.eup %7708  ;;  %v1539_v11 = vmul.f32 %v7707_v2, %v12445_v32 }
 0x624   : > { %v11356_v54 = vpop.xlane.xlu0 %4225  ;;  %v4665_v38 = vpop.permute.xlu1 %4664 }
 0x625   : > { %v11360_v37 = vsel %vm661_vm0, %v1533_v20, %v4665_v38  ;;  %4786 = vrot.lane.b32.xlu0 %v3566_v34, %s7856_s24  ;;  %v7711_v29 = vpop.eup %7710 }
 0x626   : > { %v7713_v23 = vpop.eup %7712 }
 0x627   : > { %v7715_v0 = vpop.eup %7714 }
 0x628   : > { %v11367_v48 = vpop.xlane.xlu0 %4229  ;;  %v4669_v33 = vpop.permute.xlu1 %4668 }
 0x629   : > { %v11371_v61 = vsel %vm661_vm0, %v1535_v62, %v4669_v33  ;;  %4790 = vrot.lane.b32.xlu0 %v3568_v55, %s7856_s24  ;;  %v3572_v62 = vmul.f32 %v7709_v42, %v12446_v36  ;;  %v7717_v22 = vpop.eup %7716  ;;  %v12452_v36 = vld [vmem:[#allocation5_spill] sm:$0xff] }
 0x62a   : > { %v6535_v7 = vpop.f32.mrb[128].mxu1 }
 0x62b   : > { %v4559_v24 = vmul.f32 %v7705_v52, %v6535_v7  ;;  %v11376_v50 = vpop.f32.mrb[129].mxu1  ;;  %v7719_v7 = vpop.eup %7718 }
 0x62c   : > { %v11380_v27 = vpop.xlane.xlu0 %4233  ;;  %v4673_v20 = vpop.permute.xlu1 %4672 }
 0x62d   : > { %v11383_v14 = vsel %vm661_vm0, %v1537_v35, %v4673_v20  ;;  %4794 = vrot.lane.b32.xlu0 %v3570_v58, %s7856_s24  ;;  %4880 = vrot.lane.b32.xlu1 %v4559_v24, %s7857_s7  ;;  %v1541_v35 = vmul.f32 %v7713_v23, %v12448_v12  ;;  %v12449_v24 = vld [vmem:[#allocation45_spill] sm:$0xff]  ;;  %v7721_v58 = vpop.eup %7720 }
 0x62e   : > { %v6538_v34 = vpop.f32.mrb[130].mxu1  ;;  %v3574_v53 = vmul.f32 %v7715_v0, %v12449_v24  ;;  %v7723_v13 = vpop.eup %7722 }
 0x62f   : > { %v4561_v38 = vmul.f32 %v7711_v29, %v6538_v34  ;;  %v11388_v28 = vpop.f32.mrb[131].mxu1  ;;  %v12450_v34 = vld [vmem:[#allocation38_spill] sm:$0xff]  ;;  %v7725_v0 = vpop.eup %7724 }
 0x630   : > { %v11393_v55 = vpop.xlane.xlu0 %4237  ;;  %v4677_v56 = vpop.permute.xlu1 %4676  ;;  %7734 = vrcp.f32 %v12450_v34 }
 0x631   : > { %v11396_v33 = vsel %vm661_vm0, %v1539_v11, %v4677_v56  ;;  %4798 = vrot.lane.b32.xlu0 %v3572_v62, %s7856_s24  ;;  %4884 = vrot.lane.b32.xlu1 %v4561_v38, %s7857_s7  ;;  %7736 = vrcp.f32 %v11156_v30  ;;  %v1543_v11 = vmul.f32 %v7719_v7, %v12451_v3  ;;  %v3576_v62 = vmul.f32 %v7721_v58, %v12452_v36  ;;  %v7727_v30 = vpop.eup %7726 }
 0x632   : > { %v6541_v52 = vpop.f32.mrb[132].mxu1  ;;  %7738 = vrcp.f32 %v11258_v51 }
 0x633   : > { %v4563_v2 = vmul.f32 %v7717_v22, %v6541_v52  ;;  %v11402_v17 = vpop.f32.mrb[133].mxu1 }
 0x634   : > { %v11407_v42 = vpop.xlane.xlu0 %4241  ;;  %v4681_v20 = vpop.permute.xlu1 %4680 }
 0x635   : > { %v11410_v29 = vsel %vm661_vm0, %v1541_v35, %v4681_v20  ;;  %4802 = vrot.lane.b32.xlu0 %v3574_v53, %s7856_s24  ;;  %4888 = vrot.lane.b32.xlu1 %v4563_v2, %s7857_s7  ;;  %v12453_v2 = vld [vmem:[#allocation60_spill] sm:$0xff]  ;;  %v7729_v53 = vpop.eup %7728 }
 0x636   : > { %v6544_v38 = vpop.f32.mrb[134].mxu1  ;;  %7740 = vrcp.f32 %v12453_v2  ;;  %v12454_v35 = vld [vmem:[#allocation88_spill] sm:$0xff]  ;;  %v7731_v20 = vpop.eup %7730 }
 0x637   : > { %v4565_v23 = vmul.f32 %v7723_v13, %v6544_v38  ;;  %v11416_v32 = vpop.f32.mrb[135].mxu1  ;;  %v3578_v24 = vmul.f32 %v7725_v0, %v12454_v35  ;;  %7742 = vrcp.f32 %v11268_v41  ;;  %v7733_v13 = vpop.eup %7732  ;;  %v12455_v38 = vld [vmem:[#allocation40_spill] sm:$0xff]  ;;  %v12457_v35 = vld [vmem:[#allocation42_spill] sm:$0xff] }
 0x638   : > { %v11421_v56 = vpop.xlane.xlu0 %4245  ;;  %v4685_v22 = vpop.permute.xlu1 %4684  ;;  %7744 = vrcp.f32 %v12455_v38 }
 0x639   : > { %v11424_v47 = vsel %vm661_vm0, %v1543_v11, %v4685_v22  ;;  %4806 = vrot.lane.b32.xlu0 %v3576_v62, %s7856_s24  ;;  %4892 = vrot.lane.b32.xlu1 %v4565_v23, %s7857_s7  ;;  %v12456_v23 = vld [vmem:[#allocation67_spill] sm:$0xff]  ;;  %v4558_v11 = vmul.f32 %v7733_v13, %v11376_v50  ;;  %7746 = vrcp.f32 %v11283_v16  ;;  %v12458_v50 = vld [vmem:[#allocation72_spill] sm:$0xff] }
 0x63a   : > { %v6547_v52 = vpop.f32.mrb[136].mxu1  ;;  %v1512_v3 = vmul.f32 %v7729_v53, %v12456_v23  ;;  %v7735_v41 = vpop.eup %7734  ;;  %7748 = vrcp.f32 %v12457_v35  ;;  %v12461_v35 = vld [vmem:[#allocation44_spill] sm:$0xff] }
 0x63b   : > { %v4567_v7 = vmul.f32 %v7727_v30, %v6547_v52  ;;  %v4407_v12 = vpop.f32.mrb[137].mxu1  ;;  %v7737_v30 = vpop.eup %7736  ;;  %7750 = vrcp.f32 %v11295_v5 }
 0x63c   : > { %v11431_v51 = vpop.xlane.xlu0 %4249  ;;  %v11433_v58 = vpop.permute.xlu1 %4752 }
 0x63d   : > { %4810 = vrot.lane.b32.xlu0 %v3578_v24, %s7856_s24  ;;  %4896 = vrot.lane.b32.xlu1 %v4567_v7, %s7857_s7  ;;  %v7739_v2 = vpop.eup %7738  ;;  %v1516_v24 = vmul.f32 %v7735_v41, %v12458_v50  ;;  %v12462_v50 = vld [vmem:[#allocation7_spill] sm:$0xff] }
 0x63e   : > { %v6550_v34 = vpop.f32.mrb[138].mxu1  ;;  %v4560_v53 = vmul.f32 %v7739_v2, %v11388_v28 }
 0x63f   : > { %v4569_v36 = vmul.f32 %v7731_v20, %v6550_v34  ;;  %v4417_v62 = vpop.f32.mrb[139].mxu1 }
 0x640   : > { %v4623_v0 = vpop.permute.xlu0 %4622  ;;  %v11441_v22 = vpop.permute.xlu1 %4756 }
 0x641   : > { %v11444_v52 = vsel %vm661_vm0, %v1512_v3, %v4623_v0  ;;  %4878 = vrot.lane.b32.xlu0 %v4558_v11, %s7857_s7  ;;  %4900 = vrot.lane.b32.xlu1 %v4569_v36, %s7857_s7  ;;  %v7741_v38 = vpop.eup %7740  ;;  %v12459_v11 = vld [vmem:[#allocation62_spill] sm:$0xff]  ;;  %v12460_v36 = vld [vmem:[#allocation75_spill] sm:$0xff] }
 0x642   : > { %v6553_v7 = vpop.f32.mrb[140].mxu1  ;;  %v7743_v3 = vpop.eup %7742  ;;  %7752 = vrcp.f32 %v12459_v11  ;;  %v1518_v28 = vmul.f32 %v7741_v38, %v12460_v36 }
 0x643   : > { %v4571_v16 = vmul.f32 %v7737_v30, %v6553_v7  ;;  %v4427_v20 = vpop.f32.mrb[141].mxu1  ;;  %v4562_v41 = vmul.f32 %v7743_v3, %v11402_v17  ;;  %7754 = vrcp.f32 %v11311_v39  ;;  %v7745_v30 = vpop.eup %7744  ;;  %v12463_v3 = vld [vmem:[#allocation77_spill] sm:$0xff] }
 0x644   : > { %v4631_v13 = vpop.permute.xlu0 %4630  ;;  %v11452_v34 = vpop.permute.xlu1 %4760  ;;  %7756 = vrcp.f32 %v12461_v35 }
 0x645   : > { %v11455_v23 = vsel %vm661_vm0, %v1516_v24, %v4631_v13  ;;  %4882 = vrot.lane.b32.xlu0 %v4560_v53, %s7857_s7  ;;  %4904 = vrot.lane.b32.xlu1 %v4571_v16, %s7857_s7  ;;  %v7747_v7 = vpop.eup %7746  ;;  %v1520_v24 = vmul.f32 %v7745_v30, %v12462_v50  ;;  %7758 = vrcp.f32 %v11324_v59 }
 0x646   : > { %v4564_v53 = vmul.f32 %v7747_v7, %v11416_v32  ;;  %v7749_v16 = vpop.eup %7748  ;;  %v12465_v7 = vld [vmem:[#allocation28_spill] sm:$0xff] }
 0x647   : > { %v7751_v38 = vpop.eup %7750  ;;  %v1522_v11 = vmul.f32 %v7749_v16, %v12463_v3  ;;  %v12467_v3 = vld [vmem:[#allocation30_spill] sm:$0xff] }
 0x648   : > { %v4635_v5 = vpop.permute.xlu0 %4634  ;;  %v11463_v0 = vpop.permute.xlu1 %4764  ;;  %v4566_v36 = vmul.f32 %v7751_v38, %v4407_v12 }
 0x649   : > { %v11466_v2 = vsel %vm661_vm0, %v1518_v28, %v4635_v5  ;;  %4886 = vrot.lane.b32.xlu0 %v4562_v41, %s7857_s7  ;;  %v12464_v28 = vld [vmem:[#allocation46_spill] sm:$0xff] }
 0x64a   : > { %7760 = vrcp.f32 %v12464_v28 }
 0x64c   : > { %v4639_v17 = vpop.permute.xlu0 %4638  ;;  %v11473_v39 = vpop.permute.xlu1 %4768 }
 0x64d   : > { %v11476_v13 = vsel %vm661_vm0, %v1520_v24, %v4639_v17  ;;  %4890 = vrot.lane.b32.xlu0 %v4564_v53, %s7857_s7  ;;  %v7753_v32 = vpop.eup %7752  ;;  %v12466_v24 = vld [vmem:[#allocation65_spill] sm:$0xff] }
 0x64e   : > { %v7755_v30 = vpop.eup %7754  ;;  %v1524_v35 = vmul.f32 %v7753_v32, %v12465_v7  ;;  %7762 = vrcp.f32 %v12466_v24 }
 0x64f   : > { %v4568_v50 = vmul.f32 %v7755_v30, %v4417_v62  ;;  %v7757_v12 = vpop.eup %7756 }
 0x650   : > { %v4643_v41 = vpop.permute.xlu0 %4642  ;;  %v11481_v5 = vpop.permute.xlu1 %4772 }
 0x651   : > { %v11484_v59 = vsel %vm661_vm0, %v1522_v11, %v4643_v41  ;;  %4894 = vrot.lane.b32.xlu0 %v4566_v36, %s7857_s7  ;;  %v7759_v38 = vpop.eup %7758  ;;  %v1526_v11 = vmul.f32 %v7757_v12, %v12467_v3  ;;  %v12468_v36 = vld [vmem:[#allocation70_spill] sm:$0xff] }
 0x652   : > { %v4570_v28 = vmul.f32 %v7759_v38, %v4427_v20  ;;  %7764 = vrcp.f32 %v12468_v36  ;;  %v12470_v20 = vld [vmem:[#allocation66_spill] sm:$0xff]  ;;  %v12471_v38 = vld [vmem:[#allocation12_spill] sm:$0xff] }
 0x653   : > { %7766 = vrcp.f32 %v11169_v31 }
 0x654   : > { %v4647_v53 = vpop.permute.xlu0 %4646  ;;  %v11489_v17 = vpop.permute.xlu1 %4776  ;;  %7768 = vrcp.f32 %v11334_v9 }
 0x655   : > { %v11492_v16 = vsel %vm661_vm0, %v1524_v35, %v4647_v53  ;;  %4898 = vrot.lane.b32.xlu0 %v4568_v50, %s7857_s7  ;;  %v7761_v7 = vpop.eup %7760  ;;  %v12469_v35 = vld [vmem:[#allocation33_spill] sm:$0xff]  ;;  %7770 = vrcp.f32 %v12470_v20 }
 0x656   : > { %v1528_v50 = vmul.f32 %v7761_v7, %v12469_v35  ;;  %7772 = vrcp.f32 %v11179_v45  ;;  %v12474_v35 = vld [vmem:[#allocation24_spill] sm:$0xff] }
 0x657   : > { %7774 = vrcp.f32 %v11345_v15 }
 0x658   : > { %v4651_v41 = vpop.permute.xlu0 %4650  ;;  %v4781_v62 = vpop.permute.xlu1 %4780 }
 0x659   : > { %v11499_v32 = vsel %vm661_vm0, %v1526_v11, %v4651_v41  ;;  %v11503_v30 = vsel %vm5006_vm3, %v11328_v4, %v4781_v62  ;;  %4902 = vrot.lane.b32.xlu0 %v4570_v28, %s7857_s7  ;;  %v7763_v12 = vpop.eup %7762  ;;  %v12472_v11 = vld [vmem:[#allocation68_spill] sm:$0xff]  ;;  %v12473_v62 = vld [vmem:[#allocation19_spill] sm:$0xff] }
 0x65a   : > { %v1530_v3 = vmul.f32 %v7763_v12, %v12471_v38  ;;  %7776 = vrcp.f32 %v12472_v11  ;;  %v12475_v11 = vld [vmem:[#allocation15_spill] sm:$0xff] }
 0x65b   : > { %7778 = vrcp.f32 %v11189_v60 }
 0x65c   : > { %v4655_v24 = vpop.permute.xlu0 %4654  ;;  %v4785_v53 = vpop.permute.xlu1 %4784  ;;  %7780 = vrcp.f32 %v11356_v54 }
 0x65d   : > { %v11511_v31 = vsel %vm661_vm0, %v1528_v50, %v4655_v24  ;;  %v11515_v4 = vsel %vm5006_vm3, %v11338_v8, %v4785_v53  ;;  %v7765_v8 = vpop.eup %7764  ;;  %7782 = vrcp.f32 %v12474_v35 }
 0x65e   : > { %v7767_v41 = vpop.eup %7766  ;;  %v1532_v7 = vmul.f32 %v7765_v8, %v12473_v62  ;;  %7784 = vrcp.f32 %v11198_v21  ;;  %v12476_v8 = vld [vmem:[#allocation9_spill] sm:$0xff] }
 0x65f   : > { %v7769_v60 = vpop.eup %7768  ;;  %7786 = vrcp.f32 %v11367_v48 }
 0x660   : > { %v4659_v9 = vpop.permute.xlu0 %4658  ;;  %v4789_v28 = vpop.permute.xlu1 %4788  ;;  %7788 = vrcp.f32 %v12476_v8 }
 0x661   : > { %v11522_v45 = vsel %vm661_vm0, %v1530_v3, %v4659_v9  ;;  %v11526_v36 = vsel %vm5006_vm3, %v11349_v49, %v4789_v28  ;;  %v7771_v38 = vpop.eup %7770  ;;  %7790 = vrcp.f32 %v11208_v18 }
 0x662   : > { %v7773_v54 = vpop.eup %7772  ;;  %v1534_v9 = vmul.f32 %v7771_v38, %v12475_v11  ;;  %7792 = vrcp.f32 %v11380_v27  ;;  %v12478_v38 = vld [vmem:[#allocation35_spill] sm:$0xff] }
 0x663   : > { %v6556_v15 = vpop.f32.mrb[142].mxu1  ;;  %7794 = vrcp.f32 %v12478_v38  ;;  %v12480_v38 = vld [vmem:[#allocation81_spill] sm:$0xff] }
 0x664   : > { %v4573_v50 = vmul.f32 %v7767_v41, %v6556_v15  ;;  %v4663_v20 = vpop.permute.xlu0 %4662  ;;  %v4793_v24 = vpop.permute.xlu1 %4792  ;;  %7796 = vrcp.f32 %v11218_v6 }
 0x665   : > { %v11533_v53 = vsel %vm661_vm0, %v1532_v7, %v4663_v20  ;;  %v11537_v49 = vsel %vm5006_vm3, %v11360_v37, %v4793_v24  ;;  %v4437_v12 = vpop.f32.mrb[143].mxu1  ;;  %v7775_v37 = vpop.eup %7774  ;;  %v12477_v24 = vld [vmem:[#allocation39_spill] sm:$0xff]  ;;  %7798 = vrcp.f32 %v11393_v55 }
 0x666   : > { %v4572_v3 = vmul.f32 %v7769_v60, %v4437_v12  ;;  %4908 = vrot.lane.b32.xlu1 %v4573_v50, %s7857_s7  ;;  %v7777_v48 = vpop.eup %7776  ;;  %7800 = vrcp.f32 %v11226_v63 }
 0x667   : > { %v6559_v28 = vpop.f32.mrb[144].mxu1  ;;  %v7779_v20 = vpop.eup %7778  ;;  %v1536_v60 = vmul.f32 %v7777_v48, %v12477_v24  ;;  %7802 = vrcp.f32 %v11407_v42 }
 0x668   : > { %4906 = vrot.lane.b32.xlu0 %v4572_v3, %s7857_s7  ;;  %v4575_v21 = vmul.f32 %v7773_v54, %v6559_v28  ;;  %v4667_v41 = vpop.permute.xlu0 %4666  ;;  %v4797_v62 = vpop.permute.xlu1 %4796  ;;  %7804 = vrcp.f32 %v11236_v10 }
 0x669   : > { %v11546_v7 = vsel %vm661_vm0, %v1534_v9, %v4667_v41  ;;  %v11550_v15 = vsel %vm5006_vm3, %v11371_v61, %v4797_v62  ;;  %v4447_v35 = vpop.f32.mrb[145].mxu1  ;;  %v7781_v61 = vpop.eup %7780  ;;  %v12479_v41 = vld [vmem:[#allocation43_spill] sm:$0xff]  ;;  %7806 = vrcp.f32 %v11421_v56 }
 0x66a   : > { %v4574_v50 = vmul.f32 %v7775_v37, %v4447_v35  ;;  %4912 = vrot.lane.b32.xlu1 %v4575_v21, %s7857_s7  ;;  %v7783_v27 = vpop.eup %7782  ;;  %7808 = vrcp.f32 %v11245_v46 }
 0x66b   : > { %v6562_v12 = vpop.f32.mrb[146].mxu1  ;;  %v7785_v21 = vpop.eup %7784  ;;  %v1538_v62 = vmul.f32 %v7783_v27, %v12479_v41  ;;  %7810 = vrcp.f32 %v11431_v51 }
 0x66c   : > { %4910 = vrot.lane.b32.xlu0 %v4574_v50, %s7857_s7  ;;  %v4577_v18 = vmul.f32 %v7779_v20, %v6562_v12  ;;  %v4671_v3 = vpop.permute.xlu0 %4670  ;;  %v4801_v54 = vpop.permute.xlu1 %4800 }
 0x66d   : > { %v11559_v11 = vsel %vm661_vm0, %v1536_v60, %v4671_v3  ;;  %v11563_v9 = vsel %vm5006_vm3, %v11383_v14, %v4801_v54  ;;  %v4457_v28 = vpop.f32.mrb[147].mxu1  ;;  %v7787_v50 = vpop.eup %7786 }
 0x66e   : > { %v4576_v8 = vmul.f32 %v7781_v61, %v4457_v28  ;;  %4916 = vrot.lane.b32.xlu1 %v4577_v18, %s7857_s7  ;;  %v7789_v60 = vpop.eup %7788 }
 0x66f   : > { %v6565_v37 = vpop.f32.mrb[148].mxu1  ;;  %v7791_v12 = vpop.eup %7790  ;;  %v1540_v18 = vmul.f32 %v7789_v60, %v12480_v38 }
 0x670   : > { %4914 = vrot.lane.b32.xlu0 %v4576_v8, %s7857_s7  ;;  %v4579_v6 = vmul.f32 %v7785_v21, %v6565_v37  ;;  %v4675_v35 = vpop.permute.xlu0 %4674  ;;  %v4805_v48 = vpop.permute.xlu1 %4804 }
 0x671   : > { %v11571_v14 = vsel %vm661_vm0, %v1538_v62, %v4675_v35  ;;  %v11575_v20 = vsel %vm5006_vm3, %v11396_v33, %v4805_v48  ;;  %v4467_v24 = vpop.f32.mrb[149].mxu1  ;;  %v7793_v28 = vpop.eup %7792  ;;  %v12481_v62 = vld [vmem:[#allocation82_spill] sm:$0xff] }
 0x672   : > { %v4578_v55 = vmul.f32 %v7787_v50, %v4467_v24  ;;  %4920 = vrot.lane.b32.xlu1 %v4579_v6, %s7857_s7  ;;  %v7795_v8 = vpop.eup %7794 }
 0x673   : > { %v6568_v3 = vpop.f32.mrb[150].mxu1  ;;  %v7797_v41 = vpop.eup %7796  ;;  %v1542_v37 = vmul.f32 %v7795_v8, %v12481_v62 }
 0x674   : > { %4918 = vrot.lane.b32.xlu0 %v4578_v55, %s7857_s7  ;;  %v4581_v63 = vmul.f32 %v7791_v12, %v6568_v3  ;;  %v4679_v54 = vpop.permute.xlu0 %4678  ;;  %v4809_v61 = vpop.permute.xlu1 %4808 }
 0x675   : > { %v11583_v33 = vsel %vm661_vm0, %v1540_v18, %v4679_v54  ;;  %v11587_v42 = vsel %vm5006_vm3, %v11410_v29, %v4809_v61  ;;  %v4477_v27 = vpop.f32.mrb[151].mxu1  ;;  %v7799_v50 = vpop.eup %7798 }
 0x676   : > { %v4580_v21 = vmul.f32 %v7793_v28, %v4477_v27  ;;  %4924 = vrot.lane.b32.xlu1 %v4581_v63, %s7857_s7  ;;  %v7801_v55 = vpop.eup %7800 }
 0x677   : > { %v6571_v6 = vpop.f32.mrb[152].mxu1  ;;  %v7803_v38 = vpop.eup %7802 }
 0x678   : > { %4922 = vrot.lane.b32.xlu0 %v4580_v21, %s7857_s7  ;;  %v4583_v10 = vmul.f32 %v7797_v41, %v6571_v6  ;;  %v4683_v35 = vpop.permute.xlu0 %4682  ;;  %v4813_v48 = vpop.permute.xlu1 %4812 }
 0x679   : > { %v11595_v29 = vsel %vm661_vm0, %v1542_v37, %v4683_v35  ;;  %v11599_v56 = vsel %vm5006_vm3, %v11424_v47, %v4813_v48  ;;  %v4487_v24 = vpop.f32.mrb[153].mxu1  ;;  %v7805_v47 = vpop.eup %7804 }
 0x67a   : > { %v4582_v60 = vmul.f32 %v7799_v50, %v4487_v24  ;;  %4928 = vrot.lane.b32.xlu1 %v4583_v10, %s7857_s7  ;;  %v7807_v61 = vpop.eup %7806 }
 0x67b   : > { %v6574_v12 = vpop.f32.mrb[154].mxu1  ;;  %v7809_v21 = vpop.eup %7808 }
 0x67c   : > { %4926 = vrot.lane.b32.xlu0 %v4582_v60, %s7857_s7  ;;  %v4585_v18 = vmul.f32 %v7801_v55, %v6574_v12  ;;  %v11604_v46 = vpop.permute.xlu0 %4750  ;;  %v4497_v3 = vpop.f32.mrb[155].mxu1 }
 0x67d   : > { %v4584_v63 = vmul.f32 %v7803_v38, %v4497_v3  ;;  %v7811_v62 = vpop.eup %7810  ;;  %v5008_v3 = vsel %vm5006_vm3, %v11254_v25, %v11433_v58  ;;  %v5010_v25 = vsel %vm5006_vm3, %v11272_v19, %v11441_v22 }
 0x67e   : > { %4932 = vrot.lane.b32.xlu1 %v4585_v18, %s7857_s7 }
 0x67f   : > { %v6577_v54 = vpop.f32.mrb[156].mxu1 }
 0x680   : > { %4930 = vrot.lane.b32.xlu0 %v4584_v63, %s7857_s7  ;;  %v4587_v51 = vmul.f32 %v7805_v47, %v6577_v54  ;;  %v11608_v28 = vpop.permute.xlu0 %4754  ;;  %v4507_v27 = vpop.f32.mrb[157].mxu1 }
 0x681   : > { %v4586_v8 = vmul.f32 %v7807_v61, %v4507_v27 }
 0x682   : > { %4936 = vrot.lane.b32.xlu1 %v4587_v51, %s7857_s7 }
 0x683   : > { %v6580_v41 = vpop.f32.mrb[158].mxu1 }
 0x684   : > { %4934 = vrot.lane.b32.xlu0 %v4586_v8, %s7857_s7  ;;  %v4589_v37 = vmul.f32 %v7809_v21, %v6580_v41  ;;  %v11612_v6 = vpop.permute.xlu0 %4758  ;;  %v4517_v10 = vpop.f32.mrb[159].mxu1 }
 0x685   : > { %v4588_v35 = vmul.f32 %v7811_v62, %v4517_v10 }
 0x686   : > { %4940 = vrot.lane.b32.xlu1 %v4589_v37, %s7857_s7 }
 0x688   : > { %4938 = vrot.lane.b32.xlu0 %v4588_v35, %s7857_s7  ;;  %v11616_v48 = vpop.permute.xlu0 %4762 }
 0x68c   : > { %v11618_v50 = vpop.permute.xlu0 %4766 }
 0x690   : > { %v11620_v24 = vpop.permute.xlu0 %4770 }
 0x694   : > { %v11622_v60 = vpop.permute.xlu0 %4774 }
 0x698   : > { %v4779_v55 = vpop.permute.xlu0 %4778 }
 0x699   : > { %v11626_v12 = vsel %vm5006_vm3, %v11499_v32, %v4779_v55 }
 0x69c   : > { %v4783_v38 = vpop.permute.xlu0 %4782 }
 0x69d   : > { %v11631_v18 = vsel %vm5006_vm3, %v11511_v31, %v4783_v38 }
 0x69f   : > { %v4881_v32 = vpop.permute.xlu1 %4880 }
 0x6a0   : > { %v5041_v63 = vsel %vm5039_vm4, %v5008_v3, %v4881_v32  ;;  %v4787_v47 = vpop.permute.xlu0 %4786 }
 0x6a1   : > { %v5074_v31 = vsel %vm5072_vm5, %v5041_v63, 0.0  ;;  %v11645_v54 = vsel %vm5006_vm3, %v11522_v45, %v4787_v47  ;;  %v5012_v45 = vsel %vm5006_vm3, %v11279_v40, %v11452_v34 }
 0x6a2   : > { %5106 = vst [vmem:[%s11639_s13 + $0x8] sm:$0xff] %v5074_v31 }
 0x6a3   : > { %v4885_v58 = vpop.permute.xlu1 %4884 }
 0x6a4   : > { %v5043_v61 = vsel %vm5039_vm4, %v5010_v25, %v4885_v58  ;;  %v4791_v51 = vpop.permute.xlu0 %4790 }
 0x6a5   : > { %v5076_v27 = vsel %vm5072_vm5, %v5043_v61, 0.0  ;;  %v11655_v8 = vsel %vm5006_vm3, %v11533_v53, %v4791_v51  ;;  %v5014_v53 = vsel %vm5006_vm3, %v11289_v44, %v11463_v0  ;;  %v5009_v51 = vsel %vm5006_vm3, %v11263_v57, %v11608_v28 }
 0x6a6   : > { %5108 = vst [vmem:[%s11639_s13 + $0x18] sm:$0xff] %v5076_v27  ;;  %v5013_v57 = vsel %vm5006_vm3, %v11466_v2, %v11616_v48  ;;  %v5017_v2 = vsel %vm5006_vm3, %v11484_v59, %v11620_v24 }
 0x6a7   : > { %v4889_v21 = vpop.permute.xlu1 %4888 }
 0x6a8   : > { %v5045_v41 = vsel %vm5039_vm4, %v5012_v45, %v4889_v21  ;;  %v4795_v19 = vpop.permute.xlu0 %4794 }
 0x6a9   : > { %v5078_v22 = vsel %vm5072_vm5, %v5045_v41, 0.0  ;;  %v11665_v62 = vsel %vm5006_vm3, %v11546_v7, %v4795_v19  ;;  %v5016_v7 = vsel %vm5006_vm3, %v11299_v1, %v11473_v39 }
 0x6aa   : > { %5110 = vst [vmem:[%s11639_s13 + $0x28] sm:$0xff] %v5078_v22 }
 0x6ab   : > { %v4893_v37 = vpop.permute.xlu1 %4892 }
 0x6ac   : > { %v5047_v10 = vsel %vm5039_vm4, %v5014_v53, %v4893_v37  ;;  %v4799_v40 = vpop.permute.xlu0 %4798 }
 0x6ad   : > { %v5080_v34 = vsel %vm5072_vm5, %v5047_v10, 0.0  ;;  %v11675_v35 = vsel %vm5006_vm3, %v11559_v11, %v4799_v40  ;;  %v5018_v11 = vsel %vm5006_vm3, %v11307_v43, %v11481_v5 }
 0x6ae   : > { %5112 = vst [vmem:[%s11639_s13 + $0x38] sm:$0xff] %v5080_v34 }
 0x6af   : > { %v4897_v55 = vpop.permute.xlu1 %4896 }
 0x6b0   : > { %v5049_v38 = vsel %vm5039_vm4, %v5016_v7, %v4897_v55  ;;  %v4803_v44 = vpop.permute.xlu0 %4802 }
 0x6b1   : > { %v5082_v0 = vsel %vm5072_vm5, %v5049_v38, 0.0  ;;  %v11685_v3 = vsel %vm5006_vm3, %v11571_v14, %v4803_v44  ;;  %v5020_v14 = vsel %vm5006_vm3, %v11317_v26, %v11489_v17 }
 0x6b2   : > { %5114 = vst [vmem:[%s11639_s13 + $0x48] sm:$0xff] %v5082_v0 }
 0x6b3   : > { %v4901_v32 = vpop.permute.xlu1 %4900 }
 0x6b4   : > { %v5051_v63 = vsel %vm5039_vm4, %v5018_v11, %v4901_v32  ;;  %v4807_v1 = vpop.permute.xlu0 %4806 }
 0x6b5   : > { %v5084_v39 = vsel %vm5072_vm5, %v5051_v63, 0.0  ;;  %v11695_v47 = vsel %vm5006_vm3, %v11583_v33, %v4807_v1  ;;  %v5007_v33 = vsel %vm5006_vm3, %v11444_v52, %v11604_v46  ;;  %v5011_v52 = vsel %vm5006_vm3, %v11455_v23, %v11612_v6 }
 0x6b6   : > { %5116 = vst [vmem:[%s11639_s13 + $0x58] sm:$0xff] %v5084_v39  ;;  %v5015_v23 = vsel %vm5006_vm3, %v11476_v13, %v11618_v50  ;;  %v5019_v13 = vsel %vm5006_vm3, %v11492_v16, %v11622_v60 }
 0x6b7   : > { %v4905_v31 = vpop.permute.xlu1 %4904 }
 0x6b8   : > { %v5053_v43 = vsel %vm5039_vm4, %v5020_v14, %v4905_v31  ;;  %v4811_v5 = vpop.permute.xlu0 %4810 }
 0x6b9   : > { %v5086_v25 = vsel %vm5072_vm5, %v5053_v43, 0.0  ;;  %v11705_v58 = vsel %vm5006_vm3, %v11595_v29, %v4811_v5 }
 0x6ba   : > { %5118 = vst [vmem:[%s11639_s13 + $0x68] sm:$0xff] %v5086_v25 }
 0x6bc   : > { %v4879_v61 = vpop.permute.xlu0 %4878 }
 0x6bd   : > { %v5040_v26 = vsel %vm5039_vm4, %v5007_v33, %v4879_v61 }
 0x6be   : > { %v5073_v17 = vsel %vm5072_vm5, %v5040_v26, 0.0 }
 0x6bf   : > { %5105 = vst [vmem:[%s11639_s13] sm:$0xff] %v5073_v17 }
 0x6c0   : > { %v4883_v27 = vpop.permute.xlu0 %4882 }
 0x6c1   : > { %v5042_v29 = vsel %vm5039_vm4, %v5009_v51, %v4883_v27 }
 0x6c2   : > { %v5075_v45 = vsel %vm5072_vm5, %v5042_v29, 0.0 }
 0x6c3   : > { %5107 = vst [vmem:[%s11639_s13 + $0x10] sm:$0xff] %v5075_v45 }
 0x6c4   : > { %v4887_v46 = vpop.permute.xlu0 %4886 }
 0x6c5   : > { %v5044_v21 = vsel %vm5039_vm4, %v5011_v52, %v4887_v46 }
 0x6c6   : > { %v5077_v41 = vsel %vm5072_vm5, %v5044_v21, 0.0 }
 0x6c7   : > { %5109 = vst [vmem:[%s11639_s13 + $0x20] sm:$0xff] %v5077_v41 }
 0x6c8   : > { %v4891_v28 = vpop.permute.xlu0 %4890 }
 0x6c9   : > { %v5046_v19 = vsel %vm5039_vm4, %v5013_v57, %v4891_v28 }
 0x6ca   : > { %v5079_v22 = vsel %vm5072_vm5, %v5046_v19, 0.0 }
 0x6cb   : > { %5111 = vst [vmem:[%s11639_s13 + $0x30] sm:$0xff] %v5079_v22 }
 0x6cc   : > { %v4895_v6 = vpop.permute.xlu0 %4894 }
 0x6cd   : > { %v5048_v53 = vsel %vm5039_vm4, %v5015_v23, %v4895_v6 }
 0x6ce   : > { %v5081_v37 = vsel %vm5072_vm5, %v5048_v53, 0.0 }
 0x6cf   : > { %5113 = vst [vmem:[%s11639_s13 + $0x40] sm:$0xff] %v5081_v37 }
 0x6d0   : > { %v4899_v48 = vpop.permute.xlu0 %4898 }
 0x6d1   : > { %v5050_v10 = vsel %vm5039_vm4, %v5017_v2, %v4899_v48 }
 0x6d2   : > { %v5083_v40 = vsel %vm5072_vm5, %v5050_v10, 0.0 }
 0x6d3   : > { %5115 = vst [vmem:[%s11639_s13 + $0x50] sm:$0xff] %v5083_v40 }
 0x6d4   : > { %v4903_v50 = vpop.permute.xlu0 %4902 }
 0x6d5   : > { %v5052_v34 = vsel %vm5039_vm4, %v5019_v13, %v4903_v50 }
 0x6d6   : > { %v5085_v7 = vsel %vm5072_vm5, %v5052_v34, 0.0 }
 0x6d7   : > { %5117 = vst [vmem:[%s11639_s13 + $0x60] sm:$0xff] %v5085_v7 }
 0x6d8   : > { %v4909_v55 = vpop.permute.xlu1 %4908 }
 0x6d9   : > { %v5055_v59 = vsel %vm5039_vm4, %v11503_v30, %v4909_v55 }
 0x6da   : > { %v5088_v24 = vsel %vm5072_vm5, %v5055_v59, 0.0  ;;  %v4907_v38 = vpop.permute.xlu0 %4906 }
 0x6db   : > { %5120 = vst [vmem:[%s11639_s13 + $0x78] sm:$0xff] %v5088_v24  ;;  %v5054_v16 = vsel %vm5039_vm4, %v11626_v12, %v4907_v38 }
 0x6dc   : > { %v5087_v60 = vsel %vm5072_vm5, %v5054_v16, 0.0  ;;  %v4913_v44 = vpop.permute.xlu1 %4912 }
 0x6dd   : > { %5119 = vst [vmem:[%s11639_s13 + $0x70] sm:$0xff] %v5087_v60  ;;  %v5057_v0 = vsel %vm5039_vm4, %v11515_v4, %v4913_v44 }
 0x6de   : > { %v5090_v11 = vsel %vm5072_vm5, %v5057_v0, 0.0  ;;  %v4911_v32 = vpop.permute.xlu0 %4910 }
 0x6df   : > { %5122 = vst [vmem:[%s11639_s13 + $0x88] sm:$0xff] %v5090_v11  ;;  %v5056_v30 = vsel %vm5039_vm4, %v11631_v18, %v4911_v32 }
 0x6e0   : > { %v5089_v63 = vsel %vm5072_vm5, %v5056_v30, 0.0  ;;  %v4917_v1 = vpop.permute.xlu1 %4916 }
 0x6e1   : > { %5121 = vst [vmem:[%s11639_s13 + $0x80] sm:$0xff] %v5089_v63  ;;  %v5059_v12 = vsel %vm5039_vm4, %v11526_v36, %v4917_v1 }
 0x6e2   : > { %v5092_v39 = vsel %vm5072_vm5, %v5059_v12, 0.0  ;;  %v4915_v14 = vpop.permute.xlu0 %4914 }
 0x6e3   : > { %5124 = vst [vmem:[%s11639_s13 + $0x98] sm:$0xff] %v5092_v39  ;;  %v5058_v4 = vsel %vm5039_vm4, %v11645_v54, %v4915_v14 }
 0x6e4   : > { %v5091_v31 = vsel %vm5072_vm5, %v5058_v4, 0.0  ;;  %v4921_v43 = vpop.permute.xlu1 %4920 }
 0x6e5   : > { %5123 = vst [vmem:[%s11639_s13 + $0x90] sm:$0xff] %v5091_v31  ;;  %v5061_v18 = vsel %vm5039_vm4, %v11537_v49, %v4921_v43 }
 0x6e6   : > { %v5094_v5 = vsel %vm5072_vm5, %v5061_v18, 0.0  ;;  %v4919_v25 = vpop.permute.xlu0 %4918 }
 0x6e7   : > { %5126 = vst [vmem:[%s11639_s13 + $0xa8] sm:$0xff] %v5094_v5  ;;  %v5060_v36 = vsel %vm5039_vm4, %v11655_v8, %v4919_v25 }
 0x6e8   : > { %v5093_v33 = vsel %vm5072_vm5, %v5060_v36, 0.0  ;;  %v4925_v61 = vpop.permute.xlu1 %4924 }
 0x6e9   : > { %5125 = vst [vmem:[%s11639_s13 + $0xa0] sm:$0xff] %v5093_v33  ;;  %v5063_v54 = vsel %vm5039_vm4, %v11550_v15, %v4925_v61 }
 0x6ea   : > { %v5096_v26 = vsel %vm5072_vm5, %v5063_v54, 0.0  ;;  %v4923_v17 = vpop.permute.xlu0 %4922 }
 0x6eb   : > { %5128 = vst [vmem:[%s11639_s13 + $0xb8] sm:$0xff] %v5096_v26  ;;  %v5062_v49 = vsel %vm5039_vm4, %v11665_v62, %v4923_v17 }
 0x6ec   : > { %v5095_v51 = vsel %vm5072_vm5, %v5062_v49, 0.0  ;;  %v4929_v27 = vpop.permute.xlu1 %4928 }
 0x6ed   : > { %5127 = vst [vmem:[%s11639_s13 + $0xb0] sm:$0xff] %v5095_v51  ;;  %v5065_v8 = vsel %vm5039_vm4, %v11563_v9, %v4929_v27 }
 0x6ee   : > { %v5098_v29 = vsel %vm5072_vm5, %v5065_v8, 0.0  ;;  %v4927_v45 = vpop.permute.xlu0 %4926 }
 0x6ef   : > { %5130 = vst [vmem:[%s11639_s13 + $0xc8] sm:$0xff] %v5098_v29  ;;  %v5064_v15 = vsel %vm5039_vm4, %v11675_v35, %v4927_v45 }
 0x6f0   : > { %v5097_v52 = vsel %vm5072_vm5, %v5064_v15, 0.0  ;;  %v4933_v46 = vpop.permute.xlu1 %4932 }
 0x6f1   : > { %5129 = vst [vmem:[%s11639_s13 + $0xc0] sm:$0xff] %v5097_v52  ;;  %v5067_v62 = vsel %vm5039_vm4, %v11575_v20, %v4933_v46 }
 0x6f2   : > { %v5100_v21 = vsel %vm5072_vm5, %v5067_v62, 0.0  ;;  %v4931_v41 = vpop.permute.xlu0 %4930 }
 0x6f3   : > { %5132 = vst [vmem:[%s11639_s13 + $0xd8] sm:$0xff] %v5100_v21  ;;  %v5066_v9 = vsel %vm5039_vm4, %v11685_v3, %v4931_v41 }
 0x6f4   : > { %v5099_v57 = vsel %vm5072_vm5, %v5066_v9, 0.0  ;;  %v4937_v28 = vpop.permute.xlu1 %4936 }
 0x6f5   : > { %5131 = vst [vmem:[%s11639_s13 + $0xd0] sm:$0xff] %v5099_v57  ;;  %v5069_v35 = vsel %vm5039_vm4, %v11587_v42, %v4937_v28 }
 0x6f6   : > { %v5102_v19 = vsel %vm5072_vm5, %v5069_v35, 0.0  ;;  %v4935_v22 = vpop.permute.xlu0 %4934 }
 0x6f7   : > { %5134 = vst [vmem:[%s11639_s13 + $0xe8] sm:$0xff] %v5102_v19  ;;  %v5068_v20 = vsel %vm5039_vm4, %v11695_v47, %v4935_v22 }
 0x6f8   : > { %v5101_v23 = vsel %vm5072_vm5, %v5068_v20, 0.0  ;;  %v4941_v6 = vpop.permute.xlu1 %4940 }
 0x6f9   : > { %5133 = vst [vmem:[%s11639_s13 + $0xe0] sm:$0xff] %v5101_v23  ;;  %v5071_v3 = vsel %vm5039_vm4, %v11599_v56, %v4941_v6 }
 0x6fa   : > { %v5104_v53 = vsel %vm5072_vm5, %v5071_v3, 0.0  ;;  %v4939_v37 = vpop.permute.xlu0 %4938 }
 0x6fb   : > { %5136 = vst [vmem:[%s11639_s13 + $0xf8] sm:$0xff] %v5104_v53  ;;  %v5070_v42 = vsel %vm5039_vm4, %v11705_v58, %v4939_v37 }
 0x6fc   : > { %v5103_v2 = vsel %vm5072_vm5, %v5070_v42, 0.0 }
 0x6fd   : > { %5135 = vst [vmem:[%s11639_s13 + $0xf0] sm:$0xff] %v5103_v2 }
 0x6fe PF: > { %s12_s9 = sadd.s32 1, %s7849_s9  }
 0x6ff   : > { %p9_p4 = scmp.ge.s32.totalorder %s12_s9, 4  }
 0x701   :  { %11 = sbr.rel (!%p9_p4) target bundleno = 1 (0x1), region = 58 }

// kernel: linear_attention_forward.5
= control target key start
LH: loop header
LB: loop body
LE: loop exit
PB: predicated region body
PF: predicated region fallthrough
CT: control target
= control target key end

     0   :  { %s2456_s12 = smov 0   ;;  %s4394_s0 = inlined_call_operand.vmem [shape: f32[2,18,18,128], index: 0, kind: input, shape index: {}]   ;;  %s4395_s1 = inlined_call_operand.vmem [shape: f32[3,3,128], index: 1, kind: input, shape index: {}]   ;;  %s4396_s2 = inlined_call_operand.vmem [shape: f32[128,128], index: 2, kind: input, shape index: {}]   ;;  %s4397_s3 = inlined_call_operand.vmem [shape: f32[2,256,128], index: 3, kind: output, shape index: {}]  }
   0x1 LB: > { %s2226_s13 = sadd.s32 4294967295, %s2434_s12   ;;  %p2230_p0 = scmp.ge.s32.totalorder %s2434_s12, 1  ;;  %s2434_s12 = sphi %s2456_s12, %s13_s12  }
   0x2   : > { %p137_p1 = scmp.lt.s32.totalorder %s2434_s12, 3 }
   0x4   : > { %p138_p2 = pnand %p2230_p0, %p137_p1 }
   0x5   : > { %v1898_v0 = vld [vmem:[%s4396_s2] sm:$0xff] (!%p138_p2)  ;;  %v1899_v1 = vld [vmem:[%s4396_s2 + $0x8] sm:$0xff] (!%p138_p2)  ;;  %v1900_v2 = vld [vmem:[%s4396_s2 + $0x10] sm:$0xff] (!%p138_p2)  ;;  %p161_p3 = scmp.lt.s32.totalorder (!%p138_p2), %s2226_s13, 1  ;;  %v228_v3 = vlaneseq (!%p138_p2)  ;;  %vm396_vm0 = vcmask (!%p138_p2), 1046528   ;;  %vm641_vm1 = vcmask (!%p138_p2), 1045504  }
   0x6   : > { %141 = sbr.rel (%p138_p2) target bundleno = 526 (0x20e), region = 32  ;;  %v2365_v4 = vpack.c.bf16 (!%p138_p2), %v1899_v1, %v1898_v0  ;;  %v1901_v5 = vld [vmem:[%s4396_s2 + $0x18] sm:$0xff] (!%p138_p2)  ;;  %v1902_v6 = vld [vmem:[%s4396_s2 + $0x20] sm:$0xff] (!%p138_p2)  ;;  %v1903_v7 = vld [vmem:[%s4396_s2 + $0x28] sm:$0xff] (!%p138_p2) }
   0x7   : > { %v2369_v8 = vpack.c.bf16 (!%p138_p2), %v1901_v5, %v1900_v2  ;;  %v1904_v9 = vld [vmem:[%s4396_s2 + $0x30] sm:$0xff] (!%p138_p2)  ;;  %v1905_v10 = vld [vmem:[%s4396_s2 + $0x38] sm:$0xff] (!%p138_p2)  ;;  %v1906_v11 = vld [vmem:[%s4396_s2 + $0x40] sm:$0xff] (!%p138_p2)  ;;  %v229_v12 = vshrl.u32 (!%p138_p2), %v228_v3, 7  ;;  %v2373_v16 = vpack.c.bf16 (!%p138_p2), %v1903_v7, %v1902_v6 }
   0x8   : > { %2366 = vmatprep.subr.bf16.mxu0 (!%p138_p2), %v2365_v4  ;;  %2397 = vmatprep.subr.bf16.mxu1 (!%p138_p2), %v2365_v4  ;;  %v1907_v13 = vld [vmem:[%s4396_s2 + $0x48] sm:$0xff] (!%p138_p2)  ;;  %v1908_v14 = vld [vmem:[%s4396_s2 + $0x50] sm:$0xff] (!%p138_p2)  ;;  %v1909_v15 = vld [vmem:[%s4396_s2 + $0x58] sm:$0xff] (!%p138_p2)  ;;  %v2509_v21 = vpack.c.bf16 (!%p138_p2), %v1905_v10, %v1904_v9 }
   0x9   : > { %2368 = vmatpush3.bf16.msra.mxu0 (!%p138_p2), %v2365_v4  ;;  %2405 = vmatpush3.bf16.msra.mxu1 (!%p138_p2), %v2365_v4  ;;  %v1910_v17 = vld [vmem:[%s4396_s2 + $0x60] sm:$0xff] (!%p138_p2)  ;;  %v1911_v18 = vld [vmem:[%s4396_s2 + $0x68] sm:$0xff] (!%p138_p2)  ;;  %v230_v19 = vsub.s32 (!%p138_p2), 0, %v229_v12  ;;  %v298_v20 = vsub.s32 (!%p138_p2), 1, %v229_v12  ;;  %v2511_v22 = vpack.c.bf16 (!%p138_p2), %v1907_v13, %v1906_v11  ;;  %v2513_v23 = vpack.c.bf16 (!%p138_p2), %v1909_v15, %v1908_v14  ;;  %v1912_v13 = vld [vmem:[%s4396_s2 + $0x70] sm:$0xff] (!%p138_p2) }
   0xa   : > { %2370 = vmatprep.subr.bf16.mxu0 (!%p138_p2), %v2369_v8  ;;  %2398 = vmatprep.subr.bf16.mxu1 (!%p138_p2), %v2369_v8  ;;  %v225_v24 = vld [vmem:[%s4395_s1] sm:$0x7] (!%p138_p2)  ;;  %v226_v25 = vld [vmem:[%s4395_s1 + $0x4] sm:$0x7] (!%p138_p2)  ;;  %v543_v26 = vsub.s32 (!%p138_p2), 2, %v229_v12  ;;  %v2521_v27 = vpack.c.bf16 (!%p138_p2), %v1911_v18, %v1910_v17  ;;  %v1913_v14 = vld [vmem:[%s4396_s2 + $0x78] sm:$0xff] (!%p138_p2) }
   0xb   : > { %v227_v28 = vld [vmem:[%s4395_s1 + $0x8] sm:$0x7] (!%p138_p2)  ;;  %v2531_v29 = vrot.slane (!%p138_p2), %v225_v24, %v230_v19  ;;  %v2533_v30 = vrot.slane (!%p138_p2), %v225_v24, %v298_v20  ;;  %v2535_v31 = vrot.slane (!%p138_p2), %v226_v25, %v230_v19  ;;  %v2543_v35 = vrot.slane (!%p138_p2), %v226_v25, %v298_v20 }
   0xc   : > { %v2541_v34 = vrot.slane (!%p138_p2), %v225_v24, %v543_v26  ;;  %v2545_v36 = vrot.slane (!%p138_p2), %v226_v25, %v543_v26  ;;  %v2547_v37 = vrot.slane (!%p138_p2), %v227_v28, %v230_v19  ;;  %v2604_v2 = vrot.slane (!%p138_p2), %v227_v28, %v298_v20 }
   0xd   : > { %s4437_s13 = smov (!%p161_p3, %s2226_s13), 1  ;;  %2372 = vmatpush3.bf16.msra.mxu0 %v2369_v8  ;;  %2406 = vmatpush3.bf16.msra.mxu1 %v2369_v8  ;;  %v2606_v3 = vrot.slane %v227_v28, %v543_v26 }
   0xe   : > { %s2413_s17 = smul.u32 432, %s4437_s13  ;;  %2374 = vmatprep.subr.bf16.mxu0 %v2373_v16  ;;  %2399 = vmatprep.subr.bf16.mxu1 %v2373_v16  ;;  %s2236_s4 = sshll.u32 %s4437_s13, 8 }
   0xf   : > { %s4187_s6 = scalar_lea.vmem %s4397_s3, %s2236_s4 }
  0x10   : > { %s2526_s24 = scalar_lea.vmem %s4394_s0, %s2413_s17 }
  0x11   : > { %v171_v32 = vld [vmem:[%s2526_s24] sm:$0xff]  ;;  %v2539_v33 = vld [vmem:[%s2526_s24 + $0x8] sm:$0xff]  ;;  %v2550_v38 = vld [vmem:[%s2526_s24 + $0x18] sm:$0xff]  ;;  %2376 = vmatpush3.bf16.msra.mxu0 %v2373_v16  ;;  %2407 = vmatpush3.bf16.msra.mxu1 %v2373_v16 }
  0x12   : > { %v232_v39 = vmul.f32 %v2531_v29, %v171_v32  ;;  %v300_v40 = vmul.f32 %v2533_v30, %v171_v32  ;;  %v2556_v41 = vmul.f32 %v2533_v30, %v2539_v33  ;;  %v2559_v42 = vld [vmem:[%s2526_s24 + $0x20] sm:$0xff]  ;;  %v545_v43 = vmul.f32 %v2541_v34, %v171_v32  ;;  %v2576_v50 = vld [vmem:[%s2526_s24 + $0x30] sm:$0xff]  ;;  %v2593_v60 = vld [vmem:[%s2526_s24 + $0xc8] sm:$0xff]  ;;  %2378 = vmatprep.subr.bf16.mxu0 %v2509_v21 }
  0x13   : > { %v2564_v44 = vmul.f32 %v2541_v34, %v2539_v33  ;;  %v790_v45 = vmul.f32 %v2535_v31, %v2550_v38  ;;  %v858_v48 = vmul.f32 %v2543_v35, %v2550_v38  ;;  %v2573_v49 = vmul.f32 %v2543_v35, %v2559_v42  ;;  %v195_v59 = vld [vmem:[%s2526_s24 + $0xc0] sm:$0xff]  ;;  %2400 = vmatprep.subr.bf16.mxu1 %v2509_v21  ;;  %v2610_v5 = vld [vmem:[%s2526_s24 + $0x38] sm:$0xff] }
  0x14   : > { %v397_v46 = vrot.slane %v300_v40, 1  ;;  %v398_v47 = vrot.slane %v2556_v41, 1  ;;  %v642_v51 = vrot.slane %v545_v43, 2  ;;  %v1102_v53 = vmul.f32 %v2545_v36, %v2550_v38  ;;  %v2661_v43 = vld [vmem:[%s2526_s24 + $0xd8] sm:$0xff] }
  0x15   : > { %v643_v52 = vrot.slane %v2564_v44, 2  ;;  %v2583_v54 = vmul.f32 %v2545_v36, %v2559_v42  ;;  %v954_v56 = vrot.slane %v858_v48, 1  ;;  %v955_v57 = vrot.slane %v2573_v49, 1  ;;  %2380 = vmatpush3.bf16.msra.mxu0 %v2509_v21  ;;  %2408 = vmatpush3.bf16.msra.mxu1 %v2509_v21 }
  0x16   : > { %v399_v55 = vsel %vm396_vm0, %v397_v46, %v398_v47  ;;  %v1346_v58 = vmul.f32 %v2547_v37, %v2576_v50  ;;  %v1198_v63 = vrot.slane %v1102_v53, 2  ;;  %v248_v4 = vmul.f32 %v2531_v29, %v195_v59  ;;  %2382 = vmatprep.subr.bf16.mxu0 %v2511_v22  ;;  %2401 = vmatprep.subr.bf16.mxu1 %v2511_v22 }
  0x17   : > { %v509_v61 = vadd.f32 %v399_v55, %v232_v39  ;;  %v644_v62 = vsel %vm641_vm1, %v642_v51, %v643_v52  ;;  %v1199_v0 = vrot.slane %v2583_v54, 2  ;;  %v956_v1 = vsel %vm396_vm0, %v954_v56, %v955_v57  ;;  %v2666_v51 = vld [vmem:[%s2526_s24 + $0xe0] sm:$0xff] }
  0x18   : > { %v324_v8 = vmul.f32 %v2533_v30, %v195_v59  ;;  %v2618_v9 = vmul.f32 %v2533_v30, %v2593_v60  ;;  %v1414_v10 = vmul.f32 %v2604_v2, %v2576_v50  ;;  %v2626_v11 = vmul.f32 %v2604_v2, %v2610_v5 }
  0x19   : > { %v754_v6 = vadd.f32 %v644_v62, %v509_v61  ;;  %v1200_v7 = vsel %vm641_vm1, %v1198_v63, %v1199_v0  ;;  %v1658_v12 = vmul.f32 %v2606_v3, %v2576_v50  ;;  %v2640_v16 = vmul.f32 %v2606_v3, %v2610_v5  ;;  %2384 = vmatpush3.bf16.msra.mxu0 %v2511_v22 }
  0x1a   : > { %v437_v17 = vrot.slane %v324_v8, 1  ;;  %v438_v18 = vrot.slane %v2618_v9, 1  ;;  %v1510_v19 = vrot.slane %v1414_v10, 1  ;;  %v1511_v20 = vrot.slane %v2626_v11, 1  ;;  %2409 = vmatpush3.bf16.msra.mxu1 %v2511_v22  ;;  %2386 = vmatprep.subr.bf16.mxu0 %v2513_v23  ;;  %v2697_v8 = vld [vmem:[%s2526_s24 + $0xf8] sm:$0xff] }
  0x1b   : > { %v822_v15 = vadd.f32 %v790_v45, %v754_v6  ;;  %v1754_v21 = vrot.slane %v1658_v12, 2  ;;  %v569_v24 = vmul.f32 %v2541_v34, %v195_v59  ;;  %v1755_v26 = vrot.slane %v2640_v16, 2  ;;  %2402 = vmatprep.subr.bf16.mxu1 %v2513_v23  ;;  %v2677_v59 = vld [vmem:[%s2526_s24 + $0xf0] sm:$0xff] }
  0x1c   : > { %v439_v28 = vsel %vm396_vm0, %v437_v17, %v438_v18  ;;  %v2651_v32 = vmul.f32 %v2541_v34, %v2593_v60  ;;  %v2655_v39 = vpack.c.bf16 %v1913_v14, %v1912_v13  ;;  %v1512_v40 = vsel %vm396_vm0, %v1510_v19, %v1511_v20  ;;  %v173_v19 = vld [vmem:[%s2526_s24 + $0x10] sm:$0x3] }
  0x1d   : > { %v1066_v25 = vadd.f32 %v956_v1, %v822_v15  ;;  %v525_v45 = vadd.f32 %v439_v28, %v248_v4  ;;  %v682_v46 = vrot.slane %v569_v24, 2  ;;  %v806_v53 = vmul.f32 %v2535_v31, %v2661_v43  ;;  %2388 = vmatpush3.bf16.msra.mxu0 %v2513_v23 }
  0x1e   : > { %v683_v22 = vrot.slane %v2651_v32, 2  ;;  %v882_v55 = vmul.f32 %v2543_v35, %v2661_v43  ;;  %v1756_v56 = vsel %vm641_vm1, %v1754_v21, %v1755_v26  ;;  %v2681_v61 = vmul.f32 %v2543_v35, %v2666_v51  ;;  %2410 = vmatpush3.bf16.msra.mxu1 %v2513_v23  ;;  %2390 = vmatprep.subr.bf16.mxu0 %v2521_v27 }
  0x1f   : > { %v1310_v48 = vadd.f32 %v1200_v7, %v1066_v25  ;;  %v1126_v62 = vmul.f32 %v2545_v36, %v2661_v43  ;;  %v2687_v63 = vmul.f32 %v2545_v36, %v2666_v51  ;;  %v1438_v7 = vmul.f32 %v2604_v2, %v2677_v59  ;;  %2403 = vmatprep.subr.bf16.mxu1 %v2521_v27 }
  0x20   : > { %v684_v4 = vsel %vm641_vm1, %v682_v46, %v683_v22  ;;  %v994_v6 = vrot.slane %v882_v55, 1  ;;  %v995_v12 = vrot.slane %v2681_v61, 1  ;;  %v2705_v15 = vmul.f32 %v2604_v2, %v2697_v8 }
  0x21   : > { %v1378_v1 = vadd.f32 %v1346_v58, %v1310_v48  ;;  %v770_v10 = vadd.f32 %v684_v4, %v525_v45  ;;  %v1238_v13 = vrot.slane %v1126_v62, 2  ;;  %v1239_v58 = vrot.slane %v2687_v63, 2  ;;  %2392 = vmatpush3.bf16.msra.mxu0 %v2521_v27  ;;  %v2727_v62 = vld [vmem:[%s2526_s24 + $0x28] sm:$0x3] }
  0x22   : > { %v1550_v17 = vrot.slane %v1438_v7, 1  ;;  %v1682_v23 = vmul.f32 %v2606_v3, %v2677_v59  ;;  %v996_v24 = vsel %vm396_vm0, %v994_v6, %v995_v12  ;;  %v1362_v25 = vmul.f32 %v2547_v37, %v2677_v59  ;;  %2411 = vmatpush3.bf16.msra.mxu1 %v2521_v27  ;;  %2394 = vmatprep.subr.bf16.mxu0 %v2655_v39 }
  0x23   : > { %v1622_v14 = vadd.f32 %v1512_v40, %v1378_v1  ;;  %v838_v21 = vadd.f32 %v806_v53, %v770_v10  ;;  %v2717_v28 = vmul.f32 %v2606_v3, %v2697_v8  ;;  %v1240_v45 = vsel %vm641_vm1, %v1238_v13, %v1239_v58  ;;  %2404 = vmatprep.subr.bf16.mxu1 %v2655_v39  ;;  %v2741_v10 = vld [vmem:[%s2526_s24 + $0x40] sm:$0x3] }
  0x24   : > { %v1551_v46 = vrot.slane %v2705_v15, 1  ;;  %v1794_v48 = vrot.slane %v1682_v23, 2  ;;  %v302_v1 = vmul.f32 %v2533_v30, %v173_v19  ;;  %v233_v27 = vmul.f32 %v2531_v29, %v2539_v33 }
  0x25   : > { %v1866_v40 = vadd.f32 %v1756_v56, %v1622_v14  ;;  %v1082_v53 = vadd.f32 %v996_v24, %v838_v21  ;;  %v4398_v55 = vrot.slane %v2717_v28, 2  ;;  %v547_v56 = vmul.f32 %v2541_v34, %v173_v19  ;;  %v197_v24 = vld [vmem:[%s2526_s24 + $0xd0] sm:$0x3]  ;;  %2396 = vmatpush3.bf16.msra.mxu0 %v2655_v39 }
  0x26   : > { %v1552_v4 = vsel %vm396_vm0, %v1550_v17, %v1551_v46  ;;  %v860_v6 = vmul.f32 %v2543_v35, %v2727_v62  ;;  %v400_v13 = vrot.slane %v302_v1, 1  ;;  %v791_v23 = vmul.f32 %v2535_v31, %v2559_v42  ;;  %2412 = vmatpush3.bf16.msra.mxu1 %v2655_v39 }
  0x27   : > { %2317 = vmatprep.mubr.f32.mxu0 %v1866_v40  ;;  %v1326_v7 = vadd.f32 %v1240_v45, %v1082_v53  ;;  %v645_v14 = vrot.slane %v547_v56, 2  ;;  %v1796_v19 = vsel %vm641_vm1, %v1794_v48, %v4398_v55  ;;  %v1104_v33 = vmul.f32 %v2545_v36, %v2727_v62 }
  0x28   : > { %v957_v17 = vrot.slane %v860_v6, 1  ;;  %v1416_v21 = vmul.f32 %v2604_v2, %v2741_v10  ;;  %v401_v45 = vsel %vm396_vm0, %v398_v47, %v400_v13  ;;  %v1347_v56 = vmul.f32 %v2547_v37, %v2610_v5 }
  0x29   : > { %v1394_v40 = vadd.f32 %v1362_v25, %v1326_v7  ;;  %v646_v48 = vsel %vm641_vm1, %v643_v52, %v645_v14  ;;  %v510_v53 = vadd.f32 %v401_v45, %v233_v27  ;;  %v1201_v1 = vrot.slane %v1104_v33, 2  ;;  %v2779_v7 = vld [vmem:[%s2526_s24 + $0xe8] sm:$0x3] }
  0x2a   : > { %v1513_v6 = vrot.slane %v1416_v21, 1  ;;  %v958_v39 = vsel %vm396_vm0, %v955_v57, %v957_v17  ;;  %v1660_v41 = vmul.f32 %v2606_v3, %v2741_v10  ;;  %v326_v44 = vmul.f32 %v2533_v30, %v197_v24  ;;  %v2782_v17 = vld [vmem:[%s2526_s24 + $0x100] sm:$0x3] }
  0x2b   : > { %v1638_v55 = vadd.f32 %v1552_v4, %v1394_v40  ;;  %v755_v47 = vadd.f32 %v646_v48, %v510_v53  ;;  %v1202_v52 = vsel %vm641_vm1, %v1199_v0, %v1201_v1  ;;  %v249_v25 = vmul.f32 %v2531_v29, %v2593_v60 }
  0x2c   : > { %v571_v27 = vmul.f32 %v2541_v34, %v197_v24  ;;  %v1514_v49 = vsel %vm396_vm0, %v1511_v20, %v1513_v6  ;;  %v1757_v57 = vrot.slane %v1660_v41, 2  ;;  %v440_v13 = vrot.slane %v326_v44, 1 }
  0x2d   : > { %v1882_v4 = vadd.f32 %v1796_v19, %v1638_v55  ;;  %v823_v14 = vadd.f32 %v791_v23, %v755_v47  ;;  %v884_v0 = vmul.f32 %v2543_v35, %v2779_v7  ;;  %v1128_v60 = vmul.f32 %v2545_v36, %v2779_v7 }
  0x2e   : > { %v685_v54 = vrot.slane %v571_v27, 2  ;;  %v1758_v11 = vsel %vm641_vm1, %v1755_v26, %v1757_v57  ;;  %v441_v20 = vsel %vm396_vm0, %v438_v18, %v440_v13  ;;  %v807_v55 = vmul.f32 %v2535_v31, %v2666_v51 }
  0x2f   : > { %2341 = vmatprep.mubr.f32.mxu1 %v1882_v4  ;;  %v1440_v23 = vmul.f32 %v2604_v2, %v2782_v17  ;;  %v1067_v19 = vadd.f32 %v958_v39, %v823_v14  ;;  %v526_v33 = vadd.f32 %v441_v20, %v249_v25  ;;  %v997_v24 = vrot.slane %v884_v0, 1 }
  0x30   : > { %v686_v21 = vsel %vm641_vm1, %v683_v22, %v685_v54  ;;  %v1241_v16 = vrot.slane %v1128_v60, 2  ;;  %v1363_v26 = vmul.f32 %v2547_v37, %v2697_v8  ;;  %v1684_v18 = vmul.f32 %v2606_v3, %v2782_v17  ;;  %v2844_v54 = vld [vmem:[%s2526_s24 + $0x48] sm:$0xff] }
  0x31   : > { %v1553_v9 = vrot.slane %v1440_v23, 1  ;;  %v1311_v40 = vadd.f32 %v1202_v52, %v1067_v19  ;;  %v771_v45 = vadd.f32 %v686_v21, %v526_v33  ;;  %v234_v48 = vmul.f32 %v2531_v29, %v2550_v38  ;;  %v2858_v33 = vld [vmem:[%s2526_s24 + $0x50] sm:$0xff] }
  0x32   : > { %v303_v53 = vmul.f32 %v2533_v30, %v2550_v38  ;;  %v998_v32 = vsel %vm396_vm0, %v995_v12, %v997_v24  ;;  %v1242_v22 = vsel %vm641_vm1, %v1239_v58, %v1241_v16  ;;  %v2820_v6 = vmul.f32 %v2533_v30, %v2559_v42 }
  0x33   : > { %v1554_v1 = vsel %vm396_vm0, %v1551_v46, %v1553_v9  ;;  %v1379_v39 = vadd.f32 %v1347_v56, %v1311_v40  ;;  %v839_v41 = vadd.f32 %v807_v55, %v771_v45  ;;  %v548_v61 = vmul.f32 %v2541_v34, %v2550_v38 }
  0x34   : > { %v402_v44 = vrot.slane %v303_v53, 1  ;;  %v1797_v47 = vrot.slane %v1684_v18, 2  ;;  %v403_v63 = vrot.slane %v2820_v6, 1  ;;  %v2827_v12 = vmul.f32 %v2541_v34, %v2559_v42 }
  0x35   : > { %v792_v58 = vmul.f32 %v2535_v31, %v2576_v50  ;;  %v1623_v15 = vadd.f32 %v1514_v49, %v1379_v39  ;;  %v1083_v46 = vadd.f32 %v998_v32, %v839_v41  ;;  %v647_v52 = vrot.slane %v548_v61, 2 }
  0x36   : > { %v861_v56 = vmul.f32 %v2543_v35, %v2576_v50  ;;  %v404_v38 = vsel %vm396_vm0, %v402_v44, %v403_v63  ;;  %v648_v25 = vrot.slane %v2827_v12, 2  ;;  %v2839_v27 = vmul.f32 %v2543_v35, %v2610_v5 }
  0x37   : > { %v1105_v4 = vmul.f32 %v2545_v36, %v2576_v50  ;;  %v1867_v49 = vadd.f32 %v1758_v11, %v1623_v15  ;;  %v1327_v57 = vadd.f32 %v1242_v22, %v1083_v46  ;;  %v511_v13 = vadd.f32 %v404_v38, %v234_v48 }
  0x38   : > { %v959_v14 = vrot.slane %v861_v56, 1  ;;  %v649_v0 = vsel %vm641_vm1, %v647_v52, %v648_v25  ;;  %v960_v60 = vrot.slane %v2839_v27, 1  ;;  %v2852_v20 = vmul.f32 %v2545_v36, %v2610_v5 }
  0x39   : > { %v1203_v55 = vrot.slane %v1105_v4, 2  ;;  %2318 = vmatmul.mubr.f32.vlgmr.msra.gmra.mrb[0].mxu0 %v1867_v49  ;;  %v1395_v23 = vadd.f32 %v1363_v26, %v1327_v57  ;;  %v4417_v11 = vrot.slane %v2717_v28, 2  ;;  %v756_v21 = vadd.f32 %v649_v0, %v511_v13 }
  0x3a   : > { %v1417_v24 = vmul.f32 %v2604_v2, %v2844_v54  ;;  %v961_v16 = vsel %vm396_vm0, %v959_v14, %v960_v60  ;;  %v1204_v9 = vrot.slane %v2852_v20, 2  ;;  %v2868_v18 = vmul.f32 %v2604_v2, %v2858_v33 }
  0x3b   : > { %v1798_v19 = vsel %vm641_vm1, %v4417_v11, %v1797_v47  ;;  %v1661_v28 = vmul.f32 %v2606_v3, %v2844_v54  ;;  %v1639_v26 = vadd.f32 %v1554_v1, %v1395_v23  ;;  %v824_v40 = vadd.f32 %v792_v58, %v756_v21 }
  0x3c   : > { %v1515_v45 = vrot.slane %v1417_v24, 1  ;;  %v2874_v48 = vmul.f32 %v2606_v3, %v2858_v33  ;;  %v1205_v53 = vsel %vm641_vm1, %v1203_v55, %v1204_v9  ;;  %v1348_v32 = vmul.f32 %v2547_v37, %v2844_v54 }
  0x3d   : > { %v1516_v22 = vrot.slane %v2868_v18, 1  ;;  %v1759_v39 = vrot.slane %v1661_v28, 2  ;;  %v1883_v41 = vadd.f32 %v1798_v19, %v1639_v26  ;;  %v1068_v44 = vadd.f32 %v961_v16, %v824_v40  ;;  %v2926_v28 = vld [vmem:[%s2526_s24 + $0x108] sm:$0xff]  ;;  %v2929_v26 = vld [vmem:[%s2526_s24 + $0x110] sm:$0xff] }
  0x3e   : > { %v1760_v1 = vrot.slane %v2874_v48, 2  ;;  %v327_v61 = vmul.f32 %v2533_v30, %v2661_v43  ;;  %v250_v47 = vmul.f32 %v2531_v29, %v2661_v43  ;;  %v2889_v58 = vmul.f32 %v2533_v30, %v2666_v51 }
  0x3f   : > { %v572_v15 = vmul.f32 %v2541_v34, %v2661_v43  ;;  %v2895_v46 = vmul.f32 %v2541_v34, %v2666_v51  ;;  %2342 = vmatmul.mubr.f32.vlgmr.msra.gmra.mrb[0].mxu1 %v1883_v41  ;;  %v1312_v52 = vadd.f32 %v1205_v53, %v1068_v44  ;;  %v1517_v56 = vsel %vm396_vm0, %v1515_v45, %v1516_v22 }
  0x40   : > { %v1761_v38 = vsel %vm641_vm1, %v1759_v39, %v1760_v1  ;;  %v442_v4 = vrot.slane %v327_v61, 1  ;;  %v443_v49 = vrot.slane %v2889_v58, 1  ;;  %v885_v13 = vmul.f32 %v2543_v35, %v2677_v59 }
  0x41   : > { %v687_v43 = vrot.slane %v572_v15, 2  ;;  %v688_v57 = vrot.slane %v2895_v46, 2  ;;  %v1380_v14 = vadd.f32 %v1348_v32, %v1312_v52  ;;  %v2909_v0 = vmul.f32 %v2543_v35, %v2697_v8 }
  0x42   : > { %v1129_v55 = vmul.f32 %v2545_v36, %v2677_v59  ;;  %v2915_v23 = vmul.f32 %v2545_v36, %v2697_v8  ;;  %v444_v11 = vsel %vm396_vm0, %v442_v4, %v443_v49  ;;  %v808_v21 = vmul.f32 %v2535_v31, %v2677_v59 }
  0x43   : > { %v689_v19 = vsel %vm641_vm1, %v687_v43, %v688_v57  ;;  %v999_v24 = vrot.slane %v885_v13, 1  ;;  %v1624_v16 = vadd.f32 %v1517_v56, %v1380_v14  ;;  %v527_v40 = vadd.f32 %v444_v11, %v250_v47 }
  0x44   : > { %v4401_v45 = vrot.slane %v2909_v0, 1  ;;  %v1243_v53 = vrot.slane %v1129_v55, 2  ;;  %v4400_v32 = vrot.slane %v2915_v23, 2  ;;  %v1441_v39 = vmul.f32 %v2604_v2, %v2926_v28 }
  0x45   : > { %v2937_v41 = vmul.f32 %v2604_v2, %v2929_v26  ;;  %v1685_v44 = vmul.f32 %v2606_v3, %v2926_v28  ;;  %v1868_v61 = vadd.f32 %v1761_v38, %v1624_v16  ;;  %v772_v15 = vadd.f32 %v689_v19, %v527_v40 }
  0x46   : > { %v1364_v47 = vmul.f32 %v2547_v37, %v2926_v28  ;;  %v2945_v52 = vmul.f32 %v2606_v3, %v2929_v26  ;;  %v1001_v56 = vsel %vm396_vm0, %v999_v24, %v4401_v45  ;;  %v1555_v4 = vrot.slane %v1441_v39, 1 }
  0x47   : > { %v4399_v43 = vrot.slane %v2937_v41, 1  ;;  %v1799_v13 = vrot.slane %v1685_v44, 2  ;;  %2320 = vmatprep.mubr.f32.mxu0 %v1868_v61  ;;  %v840_v14 = vadd.f32 %v808_v21, %v772_v15  ;;  %v1245_v38 = vsel %vm641_vm1, %v1243_v53, %v4400_v32  ;;  %v2967_v53 = vld [vmem:[%s2526_s24 + $0x58] sm:$0x3] }
  0x48   : > { %v1800_v55 = vrot.slane %v2945_v52, 2  ;;  %v305_v11 = vmul.f32 %v2533_v30, %v2727_v62  ;;  %v235_v24 = vmul.f32 %v2531_v29, %v2559_v42  ;;  %v550_v16 = vmul.f32 %v2541_v34, %v2727_v62 }
  0x49   : > { %v1557_v19 = vsel %vm396_vm0, %v1555_v4, %v4399_v43  ;;  %v863_v21 = vmul.f32 %v2543_v35, %v2741_v10  ;;  %v1084_v40 = vadd.f32 %v1001_v56, %v840_v14  ;;  %v793_v44 = vmul.f32 %v2535_v31, %v2610_v5 }
  0x4a   : > { %v405_v39 = vrot.slane %v305_v11, 1  ;;  %v1107_v61 = vmul.f32 %v2545_v36, %v2741_v10  ;;  %v1801_v42 = vsel %vm641_vm1, %v1799_v13, %v1800_v55  ;;  %v650_v15 = vrot.slane %v550_v16, 2 }
  0x4b   : > { %v962_v4 = vrot.slane %v863_v21, 1  ;;  %v1419_v62 = vmul.f32 %v2604_v2, %v2967_v53  ;;  %v1328_v43 = vadd.f32 %v1245_v38, %v1084_v40  ;;  %v1663_v11 = vmul.f32 %v2606_v3, %v2967_v53 }
  0x4c   : > { %v406_v56 = vsel %vm396_vm0, %v403_v63, %v405_v39  ;;  %v1206_v14 = vrot.slane %v1107_v61, 2  ;;  %v651_v45 = vsel %vm641_vm1, %v648_v25, %v650_v15  ;;  %v1349_v13 = vmul.f32 %v2547_v37, %v2858_v33 }
  0x4d   : > { %v512_v32 = vadd.f32 %v406_v56, %v235_v24  ;;  %v1518_v16 = vrot.slane %v1419_v62, 1  ;;  %v1396_v21 = vadd.f32 %v1364_v47, %v1328_v43  ;;  %v963_v6 = vsel %vm396_vm0, %v960_v60, %v962_v4 }
  0x4e   : > { %v1207_v63 = vsel %vm641_vm1, %v1204_v9, %v1206_v14  ;;  %v1762_v38 = vrot.slane %v1663_v11, 2  ;;  %v251_v12 = vmul.f32 %v2531_v29, %v2666_v51  ;;  %v329_v25 = vmul.f32 %v2533_v30, %v2779_v7  ;;  %v3009_v51 = vld [vmem:[%s2526_s24 + $0x118] sm:$0x3] }
  0x4f   : > { %v757_v24 = vadd.f32 %v651_v45, %v512_v32  ;;  %v574_v40 = vmul.f32 %v2541_v34, %v2779_v7  ;;  %v1640_v47 = vadd.f32 %v1557_v19, %v1396_v21  ;;  %v1519_v27 = vsel %vm396_vm0, %v1516_v22, %v1518_v16 }
  0x50   : > { %v1763_v60 = vsel %vm641_vm1, %v1760_v1, %v1762_v38  ;;  %v887_v20 = vmul.f32 %v2543_v35, %v2782_v17  ;;  %v445_v45 = vrot.slane %v329_v25, 1  ;;  %v1131_v7 = vmul.f32 %v2545_v36, %v2782_v17 }
  0x51   : > { %v825_v9 = vadd.f32 %v793_v44, %v757_v24  ;;  %v690_v32 = vrot.slane %v574_v40, 2  ;;  %v1884_v43 = vadd.f32 %v1801_v42, %v1640_v47  ;;  %v809_v18 = vmul.f32 %v2535_v31, %v2697_v8 }
  0x52   : > { %v1002_v22 = vrot.slane %v887_v20, 1  ;;  %v1443_v48 = vmul.f32 %v2604_v2, %v3009_v51  ;;  %v446_v19 = vsel %vm396_vm0, %v443_v49, %v445_v45  ;;  %v1246_v44 = vrot.slane %v1131_v7, 2 }
  0x53   : > { %v1069_v1 = vadd.f32 %v963_v6, %v825_v9  ;;  %v691_v39 = vsel %vm641_vm1, %v688_v57, %v690_v32  ;;  %2344 = vmatprep.mubr.f32.mxu1 %v1884_v43  ;;  %v528_v61 = vadd.f32 %v446_v19, %v251_v12  ;;  %v1365_v42 = vmul.f32 %v2547_v37, %v2929_v26 }
  0x54   : > { %v1558_v15 = vrot.slane %v1443_v48, 1  ;;  %v1687_v4 = vmul.f32 %v2606_v3, %v3009_v51  ;;  %v4418_v56 = vrot.slane %v2909_v0, 1  ;;  %v4419_v49 = vrot.slane %v2915_v23, 2  ;;  %v3069_v48 = vld [vmem:[%s2526_s24 + $0x60] sm:$0xff] }
  0x55   : > { %v1313_v62 = vadd.f32 %v1207_v63, %v1069_v1  ;;  %v306_v57 = vmul.f32 %v2533_v30, %v2576_v50  ;;  %v773_v14 = vadd.f32 %v691_v39, %v528_v61  ;;  %v4420_v11 = vrot.slane %v2937_v41, 1  ;;  %v3072_v1 = vld [vmem:[%s2526_s24 + $0x68] sm:$0xff] }
  0x56   : > { %v1003_v58 = vsel %vm396_vm0, %v4418_v56, %v1002_v22  ;;  %v1247_v46 = vsel %vm641_vm1, %v4419_v49, %v1246_v44  ;;  %v236_v21 = vmul.f32 %v2531_v29, %v2576_v50  ;;  %v3042_v0 = vmul.f32 %v2533_v30, %v2610_v5 }
  0x57   : > { %v1559_v16 = vsel %vm396_vm0, %v4420_v11, %v1558_v15  ;;  %v1381_v6 = vadd.f32 %v1349_v13, %v1313_v62  ;;  %v407_v63 = vrot.slane %v306_v57, 1  ;;  %v551_v23 = vmul.f32 %v2541_v34, %v2576_v50 }
  0x58   : > { %v3048_v38 = vmul.f32 %v2541_v34, %v2610_v5  ;;  %v841_v24 = vadd.f32 %v809_v18, %v773_v14  ;;  %v1802_v41 = vrot.slane %v1687_v4, 2  ;;  %v408_v12 = vrot.slane %v3042_v0, 1 }
  0x59   : > { %v794_v25 = vmul.f32 %v2535_v31, %v2844_v54  ;;  %v1625_v40 = vadd.f32 %v1519_v27, %v1381_v6  ;;  %v652_v47 = vrot.slane %v551_v23, 2  ;;  %v864_v50 = vmul.f32 %v2543_v35, %v2844_v54 }
  0x5a   : > { %v653_v13 = vrot.slane %v3048_v38, 2  ;;  %v1085_v20 = vadd.f32 %v1003_v58, %v841_v24  ;;  %v409_v9 = vsel %vm396_vm0, %v407_v63, %v408_v12  ;;  %v3061_v45 = vmul.f32 %v2543_v35, %v2858_v33 }
  0x5b   : > { %v1108_v32 = vmul.f32 %v2545_v36, %v2844_v54  ;;  %v1869_v7 = vadd.f32 %v1763_v60, %v1625_v40  ;;  %v513_v27 = vadd.f32 %v409_v9, %v236_v21  ;;  %v964_v18 = vrot.slane %v864_v50, 1 }
  0x5c   : > { %v654_v43 = vsel %vm641_vm1, %v652_v47, %v653_v13  ;;  %v1329_v22 = vadd.f32 %v1247_v46, %v1085_v20  ;;  %v965_v19 = vrot.slane %v3061_v45, 1  ;;  %v3077_v39 = vmul.f32 %v2545_v36, %v2858_v33 }
  0x5d   : > { %v1208_v44 = vrot.slane %v1108_v32, 2  ;;  %2321 = vmatmul.mubr.f32.gmra.mrb[2].mxu0 %v1869_v7  ;;  %v1803_v60 = vsel %vm641_vm1, %v1800_v55, %v1802_v41  ;;  %v758_v61 = vadd.f32 %v654_v43, %v513_v27  ;;  %v1420_v15 = vmul.f32 %v2604_v2, %v3069_v48 }
  0x5e   : > { %v3086_v4 = vmul.f32 %v2604_v2, %v3072_v1  ;;  %v1397_v62 = vadd.f32 %v1365_v42, %v1329_v22  ;;  %v966_v56 = vsel %vm396_vm0, %v964_v18, %v965_v19  ;;  %v1209_v58 = vrot.slane %v3077_v39, 2 }
  0x5f   : > { %v1664_v52 = vmul.f32 %v2606_v3, %v3069_v48  ;;  %v826_v49 = vadd.f32 %v794_v25, %v758_v61  ;;  %v1520_v55 = vrot.slane %v1420_v15, 1  ;;  %v3097_v57 = vmul.f32 %v2606_v3, %v3072_v1 }
  0x60   : > { %v1521_v46 = vrot.slane %v3086_v4, 1  ;;  %v1641_v14 = vadd.f32 %v1559_v16, %v1397_v62  ;;  %v1210_v42 = vsel %vm641_vm1, %v1208_v44, %v1209_v58  ;;  %v1350_v11 = vmul.f32 %v2547_v37, %v3069_v48 }
  0x61   : > { %v1764_v21 = vrot.slane %v1664_v52, 2  ;;  %v1070_v6 = vadd.f32 %v966_v56, %v826_v49  ;;  %v1765_v63 = vrot.slane %v3097_v57, 2  ;;  %v252_v23 = vmul.f32 %v2531_v29, %v2677_v59  ;;  %v3148_v52 = vld [vmem:[%s2526_s24 + $0x120] sm:$0xff]  ;;  %v3151_v49 = vld [vmem:[%s2526_s24 + $0x128] sm:$0xff] }
  0x62   : > { %v330_v24 = vmul.f32 %v2533_v30, %v2677_v59  ;;  %v1885_v41 = vadd.f32 %v1803_v60, %v1641_v14  ;;  %v3111_v16 = vmul.f32 %v2533_v30, %v2697_v8  ;;  %v575_v25 = vmul.f32 %v2541_v34, %v2677_v59 }
  0x63   : > { %v3117_v40 = vmul.f32 %v2541_v34, %v2697_v8  ;;  %v1314_v47 = vadd.f32 %v1210_v42, %v1070_v6  ;;  %v1522_v50 = vsel %vm396_vm0, %v1520_v55, %v1521_v46  ;;  %v1766_v20 = vsel %vm641_vm1, %v1764_v21, %v1765_v63 }
  0x64   : > { %v447_v9 = vrot.slane %v330_v24, 1  ;;  %2345 = vmatmul.mubr.f32.gmra.mrb[2].mxu1 %v1885_v41  ;;  %v448_v32 = vrot.slane %v3111_v16, 1  ;;  %v692_v59 = vrot.slane %v575_v25, 2  ;;  %v888_v27 = vmul.f32 %v2543_v35, %v2926_v28 }
  0x65   : > { %v693_v7 = vrot.slane %v3117_v40, 2  ;;  %v1382_v43 = vadd.f32 %v1350_v11, %v1314_v47  ;;  %v3131_v18 = vmul.f32 %v2543_v35, %v2929_v26  ;;  %v1132_v22 = vmul.f32 %v2545_v36, %v2926_v28 }
  0x66   : > { %v3137_v44 = vmul.f32 %v2545_v36, %v2929_v26  ;;  %v449_v60 = vsel %vm396_vm0, %v447_v9, %v448_v32  ;;  %v810_v15 = vmul.f32 %v2535_v31, %v2926_v28  ;;  %v1004_v62 = vrot.slane %v888_v27, 1 }
  0x67   : > { %v694_v61 = vsel %vm641_vm1, %v692_v59, %v693_v7  ;;  %v1626_v56 = vadd.f32 %v1522_v50, %v1382_v43  ;;  %v529_v55 = vadd.f32 %v449_v60, %v252_v23  ;;  %v4404_v14 = vrot.slane %v3131_v18, 1 }
  0x68   : > { %v1248_v42 = vrot.slane %v1132_v22, 2  ;;  %v4403_v11 = vrot.slane %v3137_v44, 2  ;;  %v1444_v21 = vmul.f32 %v2604_v2, %v3148_v52  ;;  %v3159_v6 = vmul.f32 %v2604_v2, %v3151_v49 }
  0x69   : > { %v1688_v24 = vmul.f32 %v2606_v3, %v3148_v52  ;;  %v1870_v41 = vadd.f32 %v1766_v20, %v1626_v56  ;;  %v774_v25 = vadd.f32 %v694_v61, %v529_v55  ;;  %v1366_v23 = vmul.f32 %v2547_v37, %v3148_v52 }
  0x6a   : > { %v3167_v47 = vmul.f32 %v2606_v3, %v3151_v49  ;;  %v1006_v50 = vsel %vm396_vm0, %v1004_v62, %v4404_v14  ;;  %v1560_v9 = vrot.slane %v1444_v21, 1  ;;  %v4402_v59 = vrot.slane %v3159_v6, 1 }
  0x6b   : > { %v1804_v27 = vrot.slane %v1688_v24, 2  ;;  %2323 = vmatprep.mubr.f32.mxu0 %v1870_v41  ;;  %v842_v43 = vadd.f32 %v810_v15, %v774_v25  ;;  %v1250_v20 = vsel %vm641_vm1, %v1248_v42, %v4403_v11  ;;  %v308_v60 = vmul.f32 %v2533_v30, %v2741_v10  ;;  %v3189_v42 = vld [vmem:[%s2526_s24 + $0x70] sm:$0x3] }
  0x6c   : > { %v1805_v22 = vrot.slane %v3167_v47, 2  ;;  %v1562_v61 = vsel %vm396_vm0, %v1560_v9, %v4402_v59  ;;  %v237_v62 = vmul.f32 %v2531_v29, %v2610_v5  ;;  %v553_v56 = vmul.f32 %v2541_v34, %v2741_v10 }
  0x6d   : > { %v866_v15 = vmul.f32 %v2543_v35, %v2967_v53  ;;  %v1086_v55 = vadd.f32 %v1006_v50, %v842_v43  ;;  %v410_v21 = vrot.slane %v308_v60, 1  ;;  %v795_v24 = vmul.f32 %v2535_v31, %v2858_v33 }
  0x6e   : > { %v1110_v41 = vmul.f32 %v2545_v36, %v2967_v53  ;;  %v1806_v5 = vsel %vm641_vm1, %v1804_v27, %v1805_v22  ;;  %v655_v25 = vrot.slane %v553_v56, 2  ;;  %v1422_v10 = vmul.f32 %v2604_v2, %v3189_v42 }
  0x6f   : > { %v967_v9 = vrot.slane %v866_v15, 1  ;;  %v1330_v59 = vadd.f32 %v1250_v20, %v1086_v55  ;;  %v411_v50 = vsel %vm396_vm0, %v408_v12, %v410_v21  ;;  %v1666_v60 = vmul.f32 %v2606_v3, %v3189_v42 }
  0x70   : > { %v1211_v43 = vrot.slane %v1110_v41, 2  ;;  %v514_v11 = vadd.f32 %v411_v50, %v237_v62  ;;  %v656_v14 = vsel %vm641_vm1, %v653_v13, %v655_v25  ;;  %v1351_v27 = vmul.f32 %v2547_v37, %v3072_v1 }
  0x71   : > { %v1523_v56 = vrot.slane %v1422_v10, 1  ;;  %v1398_v15 = vadd.f32 %v1366_v23, %v1330_v59  ;;  %v968_v0 = vsel %vm396_vm0, %v965_v19, %v967_v9  ;;  %v1767_v20 = vrot.slane %v1666_v60, 2 }
  0x72   : > { %v1212_v12 = vsel %vm641_vm1, %v1209_v58, %v1211_v43  ;;  %v759_v62 = vadd.f32 %v656_v14, %v514_v11  ;;  %v253_v38 = vmul.f32 %v2531_v29, %v2697_v8  ;;  %v332_v13 = vmul.f32 %v2533_v30, %v2782_v17  ;;  %v3231_v8 = vld [vmem:[%s2526_s24 + $0x130] sm:$0x3] }
  0x73   : > { %v577_v55 = vmul.f32 %v2541_v34, %v2782_v17  ;;  %v1642_v23 = vadd.f32 %v1562_v61, %v1398_v15  ;;  %v1524_v45 = vsel %vm396_vm0, %v1521_v46, %v1523_v56  ;;  %v1768_v19 = vsel %vm641_vm1, %v1765_v63, %v1767_v20 }
  0x74   : > { %v890_v39 = vmul.f32 %v2543_v35, %v3009_v51  ;;  %v827_v58 = vadd.f32 %v795_v24, %v759_v62  ;;  %v450_v14 = vrot.slane %v332_v13, 1  ;;  %v1134_v17 = vmul.f32 %v2545_v36, %v3009_v51 }
  0x75   : > { %v695_v11 = vrot.slane %v577_v55, 2  ;;  %v1886_v59 = vadd.f32 %v1806_v5, %v1642_v23  ;;  %v811_v4 = vmul.f32 %v2535_v31, %v2929_v26  ;;  %v1446_v57 = vmul.f32 %v2604_v2, %v3231_v8 }
  0x76   : > { %v1007_v46 = vrot.slane %v890_v39, 1  ;;  %v1071_v63 = vadd.f32 %v968_v0, %v827_v58  ;;  %v451_v61 = vsel %vm396_vm0, %v448_v32, %v450_v14  ;;  %v1251_v24 = vrot.slane %v1134_v17, 2 }
  0x77   : > { %v696_v21 = vsel %vm641_vm1, %v693_v7, %v695_v11  ;;  %2347 = vmatprep.mubr.f32.mxu1 %v1886_v59  ;;  %v530_v41 = vadd.f32 %v451_v61, %v253_v38  ;;  %v1367_v5 = vmul.f32 %v2547_v37, %v3151_v49  ;;  %v1563_v25 = vrot.slane %v1446_v57, 1  ;;  %v3291_v57 = vld [vmem:[%s2526_s24 + $0x78] sm:$0xff] }
  0x78   : > { %v1690_v9 = vmul.f32 %v2606_v3, %v3231_v8  ;;  %v1315_v10 = vadd.f32 %v1212_v12, %v1071_v63  ;;  %v4421_v50 = vrot.slane %v3131_v18, 1  ;;  %v4422_v32 = vrot.slane %v3137_v44, 2  ;;  %v3294_v63 = vld [vmem:[%s2526_s24 + $0x80] sm:$0xff] }
  0x79   : > { %v309_v7 = vmul.f32 %v2533_v30, %v2844_v54  ;;  %v775_v43 = vadd.f32 %v696_v21, %v530_v41  ;;  %v4423_v60 = vrot.slane %v3159_v6, 1  ;;  %v238_v15 = vmul.f32 %v2531_v29, %v2844_v54 }
  0x7a   : > { %v1008_v16 = vsel %vm396_vm0, %v4421_v50, %v1007_v46  ;;  %v1252_v40 = vsel %vm641_vm1, %v4422_v32, %v1251_v24  ;;  %v3264_v18 = vmul.f32 %v2533_v30, %v2858_v33  ;;  %v1383_v0 = vadd.f32 %v1351_v27, %v1315_v10 }
  0x7b   : > { %v1564_v56 = vsel %vm396_vm0, %v4423_v60, %v1563_v25  ;;  %v412_v12 = vrot.slane %v309_v7, 1  ;;  %v554_v44 = vmul.f32 %v2541_v34, %v2844_v54  ;;  %v3270_v20 = vmul.f32 %v2541_v34, %v2858_v33 }
  0x7c   : > { %v843_v62 = vadd.f32 %v811_v4, %v775_v43  ;;  %v1807_v6 = vrot.slane %v1690_v9, 2  ;;  %v413_v38 = vrot.slane %v3264_v18, 1  ;;  %v796_v13 = vmul.f32 %v2535_v31, %v3069_v48 }
  0x7d   : > { %v1627_v55 = vadd.f32 %v1524_v45, %v1383_v0  ;;  %v657_v23 = vrot.slane %v554_v44, 2  ;;  %v658_v27 = vrot.slane %v3270_v20, 2  ;;  %v867_v54 = vmul.f32 %v2543_v35, %v3069_v48 }
  0x7e   : > { %v1087_v39 = vadd.f32 %v1008_v16, %v843_v62  ;;  %v414_v58 = vsel %vm396_vm0, %v412_v12, %v413_v38  ;;  %v3283_v14 = vmul.f32 %v2543_v35, %v3072_v1  ;;  %v1111_v11 = vmul.f32 %v2545_v36, %v3069_v48 }
  0x7f   : > { %v1871_v17 = vadd.f32 %v1768_v19, %v1627_v55  ;;  %v515_v45 = vadd.f32 %v414_v58, %v238_v15  ;;  %v659_v59 = vsel %vm641_vm1, %v657_v23, %v658_v27  ;;  %v969_v4 = vrot.slane %v867_v54, 1 }
  0x80   : > { %v1331_v46 = vadd.f32 %v1252_v40, %v1087_v39  ;;  %v970_v61 = vrot.slane %v3283_v14, 1  ;;  %v3299_v21 = vmul.f32 %v2545_v36, %v3072_v1  ;;  %v1213_v24 = vrot.slane %v1111_v11, 2 }
  0x81   : > { %2324 = vmatmul.mubr.f32.gmra.mrb[4].mxu0 %v1871_v17  ;;  %v1808_v19 = vsel %vm641_vm1, %v1805_v22, %v1807_v6  ;;  %v760_v41 = vadd.f32 %v659_v59, %v515_v45  ;;  %v1423_v25 = vmul.f32 %v2604_v2, %v3291_v57  ;;  %v3308_v9 = vmul.f32 %v2604_v2, %v3294_v63 }
  0x82   : > { %v1399_v10 = vadd.f32 %v1367_v5, %v1331_v46  ;;  %v971_v50 = vsel %vm396_vm0, %v969_v4, %v970_v61  ;;  %v1214_v16 = vrot.slane %v3299_v21, 2  ;;  %v1667_v47 = vmul.f32 %v2606_v3, %v3291_v57 }
  0x83   : > { %v828_v32 = vadd.f32 %v796_v13, %v760_v41  ;;  %v1525_v22 = vrot.slane %v1423_v25, 1  ;;  %v1526_v40 = vrot.slane %v3308_v9, 1  ;;  %v3319_v7 = vmul.f32 %v2606_v3, %v3294_v63 }
  0x84   : > { %v1643_v43 = vadd.f32 %v1564_v56, %v1399_v10  ;;  %v1215_v5 = vsel %vm641_vm1, %v1213_v24, %v1214_v16  ;;  %v1352_v60 = vmul.f32 %v2547_v37, %v3291_v57  ;;  %v1769_v15 = vrot.slane %v1667_v47, 2  ;;  %v3370_v47 = vld [vmem:[%s2526_s24 + $0x138] sm:$0xff] }
  0x85   : > { %v1072_v0 = vadd.f32 %v971_v50, %v828_v32  ;;  %v1770_v12 = vrot.slane %v3319_v7, 2  ;;  %v254_v44 = vmul.f32 %v2531_v29, %v2926_v28  ;;  %v333_v62 = vmul.f32 %v2533_v30, %v2926_v28  ;;  %v3373_v32 = vld [vmem:[%s2526_s24 + $0x140] sm:$0xff] }
  0x86   : > { %v1887_v6 = vadd.f32 %v1808_v19, %v1643_v43  ;;  %v3333_v56 = vmul.f32 %v2533_v30, %v2929_v26  ;;  %v578_v13 = vmul.f32 %v2541_v34, %v2926_v28  ;;  %v3339_v55 = vmul.f32 %v2541_v34, %v2929_v26 }
  0x87   : > { %v1316_v23 = vadd.f32 %v1215_v5, %v1072_v0  ;;  %v1527_v54 = vsel %vm396_vm0, %v1525_v22, %v1526_v40  ;;  %v1771_v39 = vsel %vm641_vm1, %v1769_v15, %v1770_v12  ;;  %v452_v58 = vrot.slane %v333_v62, 1 }
  0x88   : > { %2348 = vmatmul.mubr.f32.gmra.mrb[4].mxu1 %v1887_v6  ;;  %v453_v11 = vrot.slane %v3333_v56, 1  ;;  %v697_v28 = vrot.slane %v578_v13, 2  ;;  %v698_v17 = vrot.slane %v3339_v55, 2  ;;  %v891_v45 = vmul.f32 %v2543_v35, %v3148_v52 }
  0x89   : > { %v1384_v59 = vadd.f32 %v1352_v60, %v1316_v23  ;;  %v3353_v4 = vmul.f32 %v2543_v35, %v3151_v49  ;;  %v1135_v46 = vmul.f32 %v2545_v36, %v3148_v52  ;;  %v3359_v24 = vmul.f32 %v2545_v36, %v3151_v49 }
  0x8a   : > { %v454_v19 = vsel %vm396_vm0, %v452_v58, %v453_v11  ;;  %v699_v41 = vsel %vm641_vm1, %v697_v28, %v698_v17  ;;  %v812_v25 = vmul.f32 %v2535_v31, %v3148_v52  ;;  %v1009_v10 = vrot.slane %v891_v45, 1 }
  0x8b   : > { %v1628_v50 = vadd.f32 %v1527_v54, %v1384_v59  ;;  %v531_v22 = vadd.f32 %v454_v19, %v254_v44  ;;  %v4407_v43 = vrot.slane %v3353_v4, 1  ;;  %v1253_v5 = vrot.slane %v1135_v46, 2 }
  0x8c   : > { %v4406_v60 = vrot.slane %v3359_v24, 2  ;;  %v1447_v15 = vmul.f32 %v2604_v2, %v3370_v47  ;;  %v3381_v0 = vmul.f32 %v2604_v2, %v3373_v32  ;;  %v1691_v62 = vmul.f32 %v2606_v3, %v3370_v47 }
  0x8d   : > { %v1872_v6 = vadd.f32 %v1771_v39, %v1628_v50  ;;  %v776_v13 = vadd.f32 %v699_v41, %v531_v22  ;;  %v1368_v44 = vmul.f32 %v2547_v37, %v3370_v47  ;;  %v3389_v23 = vmul.f32 %v2606_v3, %v3373_v32 }
  0x8e   : > { %v1011_v54 = vsel %vm396_vm0, %v1009_v10, %v4407_v43  ;;  %v1565_v58 = vrot.slane %v1447_v15, 1  ;;  %v4405_v28 = vrot.slane %v3381_v0, 1  ;;  %v1809_v45 = vrot.slane %v1691_v62, 2 }
  0x8f   : > { %2326 = vmatprep.mubr.f32.mxu0 %v1872_v6  ;;  %v844_v59 = vadd.f32 %v812_v25, %v776_v13  ;;  %v1255_v39 = vsel %vm641_vm1, %v1253_v5, %v4406_v60  ;;  %v1810_v46 = vrot.slane %v3389_v23, 2  ;;  %v311_v19 = vmul.f32 %v2533_v30, %v2967_v53  ;;  %v3411_v5 = vld [vmem:[%s2526_s24 + $0x88] sm:$0x3] }
  0x90   : > { %v1567_v41 = vsel %vm396_vm0, %v1565_v58, %v4405_v28  ;;  %v239_v10 = vmul.f32 %v2531_v29, %v2858_v33  ;;  %v556_v50 = vmul.f32 %v2541_v34, %v2967_v53  ;;  %v869_v25 = vmul.f32 %v2543_v35, %v3189_v42 }
  0x91   : > { %v1088_v22 = vadd.f32 %v1011_v54, %v844_v59  ;;  %v415_v15 = vrot.slane %v311_v19, 1  ;;  %v797_v62 = vmul.f32 %v2535_v31, %v3072_v1  ;;  %v1113_v6 = vmul.f32 %v2545_v36, %v3189_v42 }
  0x92   : > { %v1811_v33 = vsel %vm641_vm1, %v1809_v45, %v1810_v46  ;;  %v660_v13 = vrot.slane %v556_v50, 2  ;;  %v972_v58 = vrot.slane %v869_v25, 1  ;;  %v1425_v53 = vmul.f32 %v2604_v2, %v3411_v5 }
  0x93   : > { %v1332_v28 = vadd.f32 %v1255_v39, %v1088_v22  ;;  %v416_v54 = vsel %vm396_vm0, %v413_v38, %v415_v15  ;;  %v1216_v59 = vrot.slane %v1113_v6, 2  ;;  %v1669_v19 = vmul.f32 %v2606_v3, %v3411_v5 }
  0x94   : > { %v516_v60 = vadd.f32 %v416_v54, %v239_v10  ;;  %v661_v43 = vsel %vm641_vm1, %v658_v27, %v660_v13  ;;  %v1353_v45 = vmul.f32 %v2547_v37, %v3294_v63  ;;  %v1528_v50 = vrot.slane %v1425_v53, 1 }
  0x95   : > { %v1400_v25 = vadd.f32 %v1368_v44, %v1332_v28  ;;  %v973_v18 = vsel %vm396_vm0, %v970_v61, %v972_v58  ;;  %v1217_v38 = vsel %vm641_vm1, %v1214_v16, %v1216_v59  ;;  %v1772_v39 = vrot.slane %v1669_v19, 2 }
  0x96   : > { %v761_v10 = vadd.f32 %v661_v43, %v516_v60  ;;  %v255_v20 = vmul.f32 %v2531_v29, %v2929_v26  ;;  %v335_v27 = vmul.f32 %v2533_v30, %v3009_v51  ;;  %v580_v22 = vmul.f32 %v2541_v34, %v3009_v51  ;;  %v3453_v26 = vld [vmem:[%s2526_s24 + $0x148] sm:$0x3] }
  0x97   : > { %v1644_v44 = vadd.f32 %v1567_v41, %v1400_v25  ;;  %v1529_v14 = vsel %vm396_vm0, %v1526_v40, %v1528_v50  ;;  %v1773_v61 = vsel %vm641_vm1, %v1770_v12, %v1772_v39  ;;  %v893_v21 = vmul.f32 %v2543_v35, %v3231_v8 }
  0x98   : > { %v829_v16 = vadd.f32 %v797_v62, %v761_v10  ;;  %v455_v43 = vrot.slane %v335_v27, 1  ;;  %v700_v60 = vrot.slane %v580_v22, 2  ;;  %v1137_v51 = vmul.f32 %v2545_v36, %v3231_v8 }
  0x99   : > { %v1888_v28 = vadd.f32 %v1811_v33, %v1644_v44  ;;  %v813_v9 = vmul.f32 %v2535_v31, %v3151_v49  ;;  %v1012_v40 = vrot.slane %v893_v21, 1  ;;  %v1449_v7 = vmul.f32 %v2604_v2, %v3453_v26 }
  0x9a   : > { %v1073_v12 = vadd.f32 %v973_v18, %v829_v16  ;;  %v456_v41 = vsel %vm396_vm0, %v453_v11, %v455_v43  ;;  %v701_v15 = vsel %vm641_vm1, %v698_v17, %v700_v60  ;;  %v1256_v62 = vrot.slane %v1137_v51, 2 }
  0x9b   : > { %2350 = vmatprep.mubr.f32.mxu1 %v1888_v28  ;;  %v532_v6 = vadd.f32 %v456_v41, %v255_v20  ;;  %v1369_v33 = vmul.f32 %v2547_v37, %v3373_v32  ;;  %v1568_v13 = vrot.slane %v1449_v7, 1  ;;  %v1693_v58 = vmul.f32 %v2606_v3, %v3453_v26  ;;  %v3513_v7 = vld [vmem:[%s2526_s24 + $0x90] sm:$0xff] }
  0x9c   : > { %v1317_v53 = vadd.f32 %v1217_v38, %v1073_v12  ;;  %v4424_v54 = vrot.slane %v3353_v4, 1  ;;  %v4425_v11 = vrot.slane %v3359_v24, 2  ;;  %v312_v17 = vmul.f32 %v2533_v30, %v3069_v48  ;;  %v3516_v12 = vld [vmem:[%s2526_s24 + $0x98] sm:$0xff] }
  0x9d   : > { %v777_v59 = vadd.f32 %v701_v15, %v532_v6  ;;  %v4426_v19 = vrot.slane %v3381_v0, 1  ;;  %v240_v25 = vmul.f32 %v2531_v29, %v3069_v48  ;;  %v3486_v4 = vmul.f32 %v2533_v30, %v3072_v1 }
  0x9e   : > { %v1013_v56 = vsel %vm396_vm0, %v4424_v54, %v1012_v40  ;;  %v1257_v55 = vsel %vm641_vm1, %v4425_v11, %v1256_v62  ;;  %v1385_v18 = vadd.f32 %v1353_v45, %v1317_v53  ;;  %v417_v38 = vrot.slane %v312_v17, 1 }
  0x9f   : > { %v1569_v50 = vsel %vm396_vm0, %v4426_v19, %v1568_v13  ;;  %v557_v24 = vmul.f32 %v2541_v34, %v3069_v48  ;;  %v3492_v39 = vmul.f32 %v2541_v34, %v3072_v1  ;;  %v845_v10 = vadd.f32 %v813_v9, %v777_v59 }
  0xa0   : > { %v1812_v0 = vrot.slane %v1693_v58, 2  ;;  %v418_v20 = vrot.slane %v3486_v4, 1  ;;  %v798_v27 = vmul.f32 %v2535_v31, %v3291_v57  ;;  %v1629_v22 = vadd.f32 %v1529_v14, %v1385_v18 }
  0xa1   : > { %v662_v44 = vrot.slane %v557_v24, 2  ;;  %v663_v45 = vrot.slane %v3492_v39, 2  ;;  %v870_v48 = vmul.f32 %v2543_v35, %v3291_v57  ;;  %v1089_v21 = vadd.f32 %v1013_v56, %v845_v10 }
  0xa2   : > { %v419_v16 = vsel %vm396_vm0, %v417_v38, %v418_v20  ;;  %v3505_v43 = vmul.f32 %v2543_v35, %v3294_v63  ;;  %v1114_v60 = vmul.f32 %v2545_v36, %v3291_v57  ;;  %v1873_v51 = vadd.f32 %v1773_v61, %v1629_v22 }
  0xa3   : > { %v517_v14 = vadd.f32 %v419_v16, %v240_v25  ;;  %v664_v28 = vsel %vm641_vm1, %v662_v44, %v663_v45  ;;  %v974_v9 = vrot.slane %v870_v48, 1  ;;  %v1333_v40 = vadd.f32 %v1257_v55, %v1089_v21 }
  0xa4   : > { %v975_v41 = vrot.slane %v3505_v43, 1  ;;  %v3521_v15 = vmul.f32 %v2545_v36, %v3294_v63  ;;  %v1218_v62 = vrot.slane %v1114_v60, 2  ;;  %2327 = vmatmul.mubr.f32.gmra.mrb[6].mxu0 %v1873_v51  ;;  %v1813_v61 = vsel %vm641_vm1, %v1810_v46, %v1812_v0 }
  0xa5   : > { %v762_v6 = vadd.f32 %v664_v28, %v517_v14  ;;  %v1426_v13 = vmul.f32 %v2604_v2, %v3513_v7  ;;  %v3530_v58 = vmul.f32 %v2604_v2, %v3516_v12  ;;  %v1401_v53 = vadd.f32 %v1369_v33, %v1333_v40 }
  0xa6   : > { %v976_v54 = vsel %vm396_vm0, %v974_v9, %v975_v41  ;;  %v1219_v56 = vrot.slane %v3521_v15, 2  ;;  %v1670_v23 = vmul.f32 %v2606_v3, %v3513_v7  ;;  %v3541_v17 = vmul.f32 %v2606_v3, %v3516_v12 }
  0xa7   : > { %v830_v11 = vadd.f32 %v798_v27, %v762_v6  ;;  %v1530_v46 = vrot.slane %v1426_v13, 1  ;;  %v1531_v55 = vrot.slane %v3530_v58, 1  ;;  %v1645_v59 = vadd.f32 %v1569_v50, %v1401_v53 }
  0xa8   : > { %v1220_v33 = vsel %vm641_vm1, %v1218_v62, %v1219_v56  ;;  %v1354_v19 = vmul.f32 %v2547_v37, %v3513_v7  ;;  %v1774_v25 = vrot.slane %v1670_v23, 2  ;;  %v1775_v38 = vrot.slane %v3541_v17, 2  ;;  %v3592_v23 = vld [vmem:[%s2526_s24 + $0x150] sm:$0xff] }
  0xa9   : > { %v1074_v18 = vadd.f32 %v976_v54, %v830_v11  ;;  %v256_v24 = vmul.f32 %v2531_v29, %v3148_v52  ;;  %v336_v10 = vmul.f32 %v2533_v30, %v3148_v52  ;;  %v1889_v0 = vadd.f32 %v1813_v61, %v1645_v59  ;;  %v3595_v11 = vld [vmem:[%s2526_s24 + $0x158] sm:$0xff] }
  0xaa   : > { %v3555_v50 = vmul.f32 %v2533_v30, %v3151_v49  ;;  %v581_v27 = vmul.f32 %v2541_v34, %v3148_v52  ;;  %v3561_v22 = vmul.f32 %v2541_v34, %v3151_v49  ;;  %v1532_v48 = vsel %vm396_vm0, %v1530_v46, %v1531_v55 }
  0xab   : > { %v1318_v44 = vadd.f32 %v1220_v33, %v1074_v18  ;;  %v1776_v21 = vsel %vm641_vm1, %v1774_v25, %v1775_v38  ;;  %v457_v16 = vrot.slane %v336_v10, 1  ;;  %2351 = vmatmul.mubr.f32.gmra.mrb[6].mxu1 %v1889_v0  ;;  %v894_v14 = vmul.f32 %v2543_v35, %v3370_v47 }
  0xac   : > { %v458_v60 = vrot.slane %v3555_v50, 1  ;;  %v702_v52 = vrot.slane %v581_v27, 2  ;;  %v703_v51 = vrot.slane %v3561_v22, 2  ;;  %v3575_v9 = vmul.f32 %v2543_v35, %v3373_v32 }
  0xad   : > { %v1386_v28 = vadd.f32 %v1354_v19, %v1318_v44  ;;  %v1138_v40 = vmul.f32 %v2545_v36, %v3370_v47  ;;  %v3581_v62 = vmul.f32 %v2545_v36, %v3373_v32  ;;  %v814_v13 = vmul.f32 %v2535_v31, %v3370_v47 }
  0xae   : > { %v459_v61 = vsel %vm396_vm0, %v457_v16, %v458_v60  ;;  %v704_v6 = vsel %vm641_vm1, %v702_v52, %v703_v51  ;;  %v1014_v53 = vrot.slane %v894_v14, 1  ;;  %v4410_v59 = vrot.slane %v3575_v9, 1 }
  0xaf   : > { %v1630_v54 = vadd.f32 %v1532_v48, %v1386_v28  ;;  %v533_v46 = vadd.f32 %v459_v61, %v256_v24  ;;  %v1258_v33 = vrot.slane %v1138_v40, 2  ;;  %v4409_v19 = vrot.slane %v3581_v62, 2 }
  0xb0   : > { %v1450_v25 = vmul.f32 %v2604_v2, %v3592_v23  ;;  %v3603_v18 = vmul.f32 %v2604_v2, %v3595_v11  ;;  %v1694_v10 = vmul.f32 %v2606_v3, %v3592_v23  ;;  %v1370_v24 = vmul.f32 %v2547_v37, %v3592_v23 }
  0xb1   : > { %v1874_v0 = vadd.f32 %v1776_v21, %v1630_v54  ;;  %v778_v27 = vadd.f32 %v704_v6, %v533_v46  ;;  %v3611_v44 = vmul.f32 %v2606_v3, %v3595_v11  ;;  %v1016_v48 = vsel %vm396_vm0, %v1014_v53, %v4410_v59 }
  0xb2   : > { %v1570_v16 = vrot.slane %v1450_v25, 1  ;;  %v4408_v52 = vrot.slane %v3603_v18, 1  ;;  %v1814_v14 = vrot.slane %v1694_v10, 2  ;;  %v1260_v21 = vsel %vm641_vm1, %v1258_v33, %v4409_v19  ;;  %v3633_v33 = vld [vmem:[%s2526_s24 + $0xa0] sm:$0x3] }
  0xb3   : > { %2329 = vmatprep.mubr.f32.mxu0 %v1874_v0  ;;  %v846_v28 = vadd.f32 %v814_v13, %v778_v27  ;;  %v1815_v40 = vrot.slane %v3611_v44, 2  ;;  %v314_v61 = vmul.f32 %v2533_v30, %v3189_v42  ;;  %v241_v53 = vmul.f32 %v2531_v29, %v3072_v1 }
  0xb4   : > { %v1572_v6 = vsel %vm396_vm0, %v1570_v16, %v4408_v52  ;;  %v559_v54 = vmul.f32 %v2541_v34, %v3189_v42  ;;  %v872_v13 = vmul.f32 %v2543_v35, %v3411_v5  ;;  %v799_v10 = vmul.f32 %v2535_v31, %v3294_v63 }
  0xb5   : > { %v1090_v46 = vadd.f32 %v1016_v48, %v846_v28  ;;  %v420_v25 = vrot.slane %v314_v61, 1  ;;  %v1116_v0 = vmul.f32 %v2545_v36, %v3411_v5  ;;  %v1816_v1 = vsel %vm641_vm1, %v1814_v14, %v1815_v40 }
  0xb6   : > { %v665_v27 = vrot.slane %v559_v54, 2  ;;  %v977_v16 = vrot.slane %v872_v13, 1  ;;  %v1428_v42 = vmul.f32 %v2604_v2, %v3633_v33  ;;  %v1672_v61 = vmul.f32 %v2606_v3, %v3633_v33 }
  0xb7   : > { %v1334_v52 = vadd.f32 %v1260_v21, %v1090_v46  ;;  %v421_v48 = vsel %vm396_vm0, %v418_v20, %v420_v25  ;;  %v1221_v28 = vrot.slane %v1116_v0, 2  ;;  %v1355_v14 = vmul.f32 %v2547_v37, %v3516_v12 }
  0xb8   : > { %v518_v19 = vadd.f32 %v421_v48, %v241_v53  ;;  %v666_v59 = vsel %vm641_vm1, %v663_v45, %v665_v27  ;;  %v1533_v54 = vrot.slane %v1428_v42, 1  ;;  %v978_v4 = vsel %vm396_vm0, %v975_v41, %v977_v16 }
  0xb9   : > { %v1402_v13 = vadd.f32 %v1370_v24, %v1334_v52  ;;  %v1222_v20 = vsel %vm641_vm1, %v1219_v56, %v1221_v28  ;;  %v1777_v21 = vrot.slane %v1672_v61, 2  ;;  %v257_v39 = vmul.f32 %v2531_v29, %v3151_v49  ;;  %v3675_v49 = vld [vmem:[%s2526_s24 + $0x160] sm:$0x3] }
  0xba   : > { %v763_v53 = vadd.f32 %v666_v59, %v518_v19  ;;  %v338_v45 = vmul.f32 %v2533_v30, %v3231_v8  ;;  %v583_v46 = vmul.f32 %v2541_v34, %v3231_v8  ;;  %v1534_v43 = vsel %vm396_vm0, %v1531_v55, %v1533_v54 }
  0xbb   : > { %v1646_v24 = vadd.f32 %v1572_v6, %v1402_v13  ;;  %v1778_v41 = vsel %vm641_vm1, %v1775_v38, %v1777_v21  ;;  %v896_v15 = vmul.f32 %v2543_v35, %v3453_v26  ;;  %v1140_v8 = vmul.f32 %v2545_v36, %v3453_v26 }
  0xbc   : > { %v831_v56 = vadd.f32 %v799_v10, %v763_v53  ;;  %v460_v59 = vrot.slane %v338_v45, 1  ;;  %v705_v19 = vrot.slane %v583_v46, 2  ;;  %v815_v58 = vmul.f32 %v2535_v31, %v3373_v32 }
  0xbd   : > { %v1890_v52 = vadd.f32 %v1816_v1, %v1646_v24  ;;  %v1017_v55 = vrot.slane %v896_v15, 1  ;;  %v1452_v17 = vmul.f32 %v2604_v2, %v3675_v49  ;;  %v1261_v10 = vrot.slane %v1140_v8, 2 }
  0xbe   : > { %v1075_v38 = vadd.f32 %v978_v4, %v831_v56  ;;  %v461_v6 = vsel %vm396_vm0, %v458_v60, %v460_v59  ;;  %v706_v25 = vsel %vm641_vm1, %v703_v51, %v705_v19  ;;  %v1371_v1 = vmul.f32 %v2547_v37, %v3595_v11 }
  0xbf   : > { %2353 = vmatprep.mubr.f32.mxu1 %v1890_v52  ;;  %v534_v0 = vadd.f32 %v461_v6, %v257_v39  ;;  %v1573_v27 = vrot.slane %v1452_v17, 1  ;;  %v1696_v16 = vmul.f32 %v2606_v3, %v3675_v49  ;;  %v4427_v48 = vrot.slane %v3575_v9, 1  ;;  %v3735_v17 = vld [vmem:[%s2526_s24 + $0xa8] sm:$0xff] }
  0xc0   : > { %v1319_v42 = vadd.f32 %v1222_v20, %v1075_v38  ;;  %v4428_v60 = vrot.slane %v3581_v62, 2  ;;  %v315_v51 = vmul.f32 %v2533_v30, %v3291_v57  ;;  %v4429_v61 = vrot.slane %v3603_v18, 1  ;;  %v3738_v38 = vld [vmem:[%s2526_s24 + $0xb0] sm:$0xff] }
  0xc1   : > { %v1018_v50 = vsel %vm396_vm0, %v4427_v48, %v1017_v55  ;;  %v779_v28 = vadd.f32 %v706_v25, %v534_v0  ;;  %v242_v13 = vmul.f32 %v2531_v29, %v3291_v57  ;;  %v3708_v9 = vmul.f32 %v2533_v30, %v3294_v63 }
  0xc2   : > { %v1262_v22 = vsel %vm641_vm1, %v4428_v60, %v1261_v10  ;;  %v1574_v54 = vsel %vm396_vm0, %v4429_v61, %v1573_v27  ;;  %v1387_v4 = vadd.f32 %v1355_v14, %v1319_v42  ;;  %v422_v20 = vrot.slane %v315_v51, 1 }
  0xc3   : > { %v560_v62 = vmul.f32 %v2541_v34, %v3291_v57  ;;  %v3714_v21 = vmul.f32 %v2541_v34, %v3294_v63  ;;  %v847_v53 = vadd.f32 %v815_v58, %v779_v28  ;;  %v1817_v18 = vrot.slane %v1696_v16, 2 }
  0xc4   : > { %v423_v39 = vrot.slane %v3708_v9, 1  ;;  %v800_v45 = vmul.f32 %v2535_v31, %v3513_v7  ;;  %v1631_v46 = vadd.f32 %v1534_v43, %v1387_v4  ;;  %v873_v57 = vmul.f32 %v2543_v35, %v3513_v7 }
  0xc5   : > { %v667_v24 = vrot.slane %v560_v62, 2  ;;  %v668_v14 = vrot.slane %v3714_v21, 2  ;;  %v1091_v15 = vadd.f32 %v1018_v50, %v847_v53  ;;  %v3727_v59 = vmul.f32 %v2543_v35, %v3516_v12 }
  0xc6   : > { %v424_v56 = vsel %vm396_vm0, %v422_v20, %v423_v39  ;;  %v1117_v19 = vmul.f32 %v2545_v36, %v3513_v7  ;;  %v1875_v8 = vadd.f32 %v1778_v41, %v1631_v46  ;;  %v979_v58 = vrot.slane %v873_v57, 1 }
  0xc7   : > { %v519_v43 = vadd.f32 %v424_v56, %v242_v13  ;;  %v669_v52 = vsel %vm641_vm1, %v667_v24, %v668_v14  ;;  %v1335_v55 = vadd.f32 %v1262_v22, %v1091_v15  ;;  %v980_v6 = vrot.slane %v3727_v59, 1 }
  0xc8   : > { %v3743_v25 = vmul.f32 %v2545_v36, %v3516_v12  ;;  %v1223_v10 = vrot.slane %v1117_v19, 2  ;;  %2330 = vmatmul.mubr.f32.gmra.mrb[8].mxu0 %v1875_v8  ;;  %v1818_v41 = vsel %vm641_vm1, %v1815_v40, %v1817_v18  ;;  %v1429_v27 = vmul.f32 %v2604_v2, %v3735_v17 }
  0xc9   : > { %v764_v0 = vadd.f32 %v669_v52, %v519_v43  ;;  %v3752_v16 = vmul.f32 %v2604_v2, %v3738_v38  ;;  %v1403_v42 = vadd.f32 %v1371_v1, %v1335_v55  ;;  %v981_v48 = vsel %vm396_vm0, %v979_v58, %v980_v6 }
  0xca   : > { %v1224_v50 = vrot.slane %v3743_v25, 2  ;;  %v1673_v44 = vmul.f32 %v2606_v3, %v3735_v17  ;;  %v1535_v40 = vrot.slane %v1429_v27, 1  ;;  %v3763_v51 = vmul.f32 %v2606_v3, %v3738_v38 }
  0xcb   : > { %v832_v60 = vadd.f32 %v800_v45, %v764_v0  ;;  %v1536_v22 = vrot.slane %v3752_v16, 1  ;;  %v1647_v28 = vadd.f32 %v1574_v54, %v1403_v42  ;;  %v1356_v61 = vmul.f32 %v2547_v37, %v3735_v17 }
  0xcc   : > { %v1225_v1 = vsel %vm641_vm1, %v1223_v10, %v1224_v50  ;;  %v1779_v13 = vrot.slane %v1673_v44, 2  ;;  %v1780_v20 = vrot.slane %v3763_v51, 2  ;;  %v258_v62 = vmul.f32 %v2531_v29, %v3370_v47  ;;  %v3814_v44 = vld [vmem:[%s2526_s24 + $0x168] sm:$0xff] }
  0xcd   : > { %v1076_v4 = vadd.f32 %v981_v48, %v832_v60  ;;  %v339_v53 = vmul.f32 %v2533_v30, %v3370_v47  ;;  %v1891_v18 = vadd.f32 %v1818_v41, %v1647_v28  ;;  %v3777_v54 = vmul.f32 %v2533_v30, %v3373_v32  ;;  %v3817_v60 = vld [vmem:[%s2526_s24 + $0x170] sm:$0xff] }
  0xce   : > { %v584_v45 = vmul.f32 %v2541_v34, %v3370_v47  ;;  %v3783_v46 = vmul.f32 %v2541_v34, %v3373_v32  ;;  %v1537_v57 = vsel %vm396_vm0, %v1535_v40, %v1536_v22  ;;  %v1781_v15 = vsel %vm641_vm1, %v1779_v13, %v1780_v20 }
  0xcf   : > { %v1320_v24 = vadd.f32 %v1225_v1, %v1076_v4  ;;  %v462_v56 = vrot.slane %v339_v53, 1  ;;  %2354 = vmatmul.mubr.f32.gmra.mrb[8].mxu1 %v1891_v18  ;;  %v463_v19 = vrot.slane %v3777_v54, 1  ;;  %v897_v43 = vmul.f32 %v2543_v35, %v3592_v23 }
  0xd0   : > { %v707_v47 = vrot.slane %v584_v45, 2  ;;  %v708_v8 = vrot.slane %v3783_v46, 2  ;;  %v3797_v58 = vmul.f32 %v2543_v35, %v3595_v11  ;;  %v1141_v55 = vmul.f32 %v2545_v36, %v3592_v23 }
  0xd1   : > { %v1388_v52 = vadd.f32 %v1356_v61, %v1320_v24  ;;  %v3803_v10 = vmul.f32 %v2545_v36, %v3595_v11  ;;  %v464_v41 = vsel %vm396_vm0, %v462_v56, %v463_v19  ;;  %v816_v27 = vmul.f32 %v2535_v31, %v3592_v23 }
  0xd2   : > { %v709_v0 = vsel %vm641_vm1, %v707_v47, %v708_v8  ;;  %v1019_v42 = vrot.slane %v897_v43, 1  ;;  %v535_v40 = vadd.f32 %v464_v41, %v258_v62  ;;  %v4413_v28 = vrot.slane %v3797_v58, 1 }
  0xd3   : > { %v1632_v48 = vadd.f32 %v1537_v57, %v1388_v52  ;;  %v1263_v1 = vrot.slane %v1141_v55, 2  ;;  %v4412_v61 = vrot.slane %v3803_v10, 2  ;;  %v1453_v13 = vmul.f32 %v2604_v2, %v3814_v44 }
  0xd4   : > { %v3825_v4 = vmul.f32 %v2604_v2, %v3817_v60  ;;  %v1697_v53 = vmul.f32 %v2606_v3, %v3814_v44  ;;  %v780_v45 = vadd.f32 %v709_v0, %v535_v40  ;;  %v1372_v62 = vmul.f32 %v2547_v37, %v3814_v44 }
  0xd5   : > { %v1876_v18 = vadd.f32 %v1781_v15, %v1632_v48  ;;  %v3833_v24 = vmul.f32 %v2606_v3, %v3817_v60  ;;  %v1021_v57 = vsel %vm396_vm0, %v1019_v42, %v4413_v28  ;;  %v1575_v56 = vrot.slane %v1453_v13, 1 }
  0xd6   : > { %v4411_v47 = vrot.slane %v3825_v4, 1  ;;  %v1819_v43 = vrot.slane %v1697_v53, 2  ;;  %v848_v52 = vadd.f32 %v816_v27, %v780_v45  ;;  %v1265_v15 = vsel %vm641_vm1, %v1263_v1, %v4412_v61  ;;  %v3855_v1 = vld [vmem:[%s2526_s24 + $0xb8] sm:$0x3] }
  0xd7   : > { %2332 = vmatprep.mubr.f32.mxu0 %v1876_v18  ;;  %v1820_v55 = vrot.slane %v3833_v24, 2  ;;  %v317_v41 = vmul.f32 %v2533_v30, %v3411_v5  ;;  %v243_v42 = vmul.f32 %v2531_v29, %v3294_v63  ;;  %v562_v48 = vmul.f32 %v2541_v34, %v3411_v5 }
  0xd8   : > { %v1577_v0 = vsel %vm396_vm0, %v1575_v56, %v4411_v47  ;;  %v875_v27 = vmul.f32 %v2543_v35, %v3633_v33  ;;  %v1092_v40 = vadd.f32 %v1021_v57, %v848_v52  ;;  %v801_v53 = vmul.f32 %v2535_v31, %v3516_v12 }
  0xd9   : > { %v425_v13 = vrot.slane %v317_v41, 1  ;;  %v1119_v18 = vmul.f32 %v2545_v36, %v3633_v33  ;;  %v1821_v63 = vsel %vm641_vm1, %v1819_v43, %v1820_v55  ;;  %v670_v45 = vrot.slane %v562_v48, 2 }
  0xda   : > { %v982_v56 = vrot.slane %v875_v27, 1  ;;  %v1431_v5 = vmul.f32 %v2604_v2, %v3855_v1  ;;  %v1336_v47 = vadd.f32 %v1265_v15, %v1092_v40  ;;  %v1675_v41 = vmul.f32 %v2606_v3, %v3855_v1 }
  0xdb   : > { %v426_v57 = vsel %vm396_vm0, %v423_v39, %v425_v13  ;;  %v1226_v52 = vrot.slane %v1119_v18, 2  ;;  %v671_v28 = vsel %vm641_vm1, %v668_v14, %v670_v45  ;;  %v1357_v43 = vmul.f32 %v2547_v37, %v3738_v38 }
  0xdc   : > { %v520_v61 = vadd.f32 %v426_v57, %v243_v42  ;;  %v1538_v48 = vrot.slane %v1431_v5, 1  ;;  %v1404_v27 = vadd.f32 %v1372_v62, %v1336_v47  ;;  %v983_v9 = vsel %vm396_vm0, %v980_v6, %v982_v56 }
  0xdd   : > { %v1227_v39 = vsel %vm641_vm1, %v1224_v50, %v1226_v52  ;;  %v1782_v15 = vrot.slane %v1675_v41, 2  ;;  %v259_v21 = vmul.f32 %v2531_v29, %v3373_v32  ;;  %v341_v14 = vmul.f32 %v2533_v30, %v3453_v26  ;;  %v3897_v32 = vld [vmem:[%s2526_s24 + $0x178] sm:$0x3] }
  0xde   : > { %v765_v42 = vadd.f32 %v671_v28, %v520_v61  ;;  %v586_v40 = vmul.f32 %v2541_v34, %v3453_v26  ;;  %v1648_v62 = vadd.f32 %v1577_v0, %v1404_v27  ;;  %v1539_v59 = vsel %vm396_vm0, %v1536_v22, %v1538_v48 }
  0xdf   : > { %v1783_v6 = vsel %vm641_vm1, %v1780_v20, %v1782_v15  ;;  %v899_v25 = vmul.f32 %v2543_v35, %v3675_v49  ;;  %v465_v28 = vrot.slane %v341_v14, 1  ;;  %v1143_v26 = vmul.f32 %v2545_v36, %v3675_v49 }
  0xe0   : > { %v833_v50 = vadd.f32 %v801_v53, %v765_v42  ;;  %v710_v61 = vrot.slane %v586_v40, 2  ;;  %v1892_v47 = vadd.f32 %v1821_v63, %v1648_v62  ;;  %v817_v16 = vmul.f32 %v2535_v31, %v3595_v11 }
  0xe1   : > { %v1022_v22 = vrot.slane %v899_v25, 1  ;;  %v1455_v51 = vmul.f32 %v2604_v2, %v3897_v32  ;;  %v466_v0 = vsel %vm396_vm0, %v463_v19, %v465_v28  ;;  %v1266_v53 = vrot.slane %v1143_v26, 2 }
  0xe2   : > { %v1077_v20 = vadd.f32 %v983_v9, %v833_v50  ;;  %v711_v13 = vsel %vm641_vm1, %v708_v8, %v710_v61  ;;  %2356 = vmatprep.mubr.f32.mxu1 %v1892_v47  ;;  %v536_v18 = vadd.f32 %v466_v0, %v259_v21  ;;  %v1373_v63 = vmul.f32 %v2547_v37, %v3817_v60 }
  0xe3   : > { %v1578_v45 = vrot.slane %v1455_v51, 1  ;;  %v1699_v56 = vmul.f32 %v2606_v3, %v3897_v32  ;;  %v4430_v57 = vrot.slane %v3797_v58, 1  ;;  %v4431_v19 = vrot.slane %v3803_v10, 2 }
  0xe4   : > { %v1321_v5 = vadd.f32 %v1227_v39, %v1077_v20  ;;  %v318_v8 = vmul.f32 %v2533_v30, %v3513_v7  ;;  %v781_v52 = vadd.f32 %v711_v13, %v536_v18  ;;  %v4432_v41 = vrot.slane %v3825_v4, 1 }
  0xe5   : > { %v1023_v54 = vsel %vm396_vm0, %v4430_v57, %v1022_v22  ;;  %v1267_v46 = vsel %vm641_vm1, %v4431_v19, %v1266_v53  ;;  %v244_v27 = vmul.f32 %v2531_v29, %v3513_v7  ;;  %v3930_v58 = vmul.f32 %v2533_v30, %v3516_v12  ;;  %v3965_v53 = vld [vmem:[%s2526_s24 + $0xc0] sm:$0xff] }
  0xe6   : > { %v1579_v48 = vsel %vm396_vm0, %v4432_v41, %v1578_v45  ;;  %v1389_v9 = vadd.f32 %v1357_v43, %v1321_v5  ;;  %v427_v39 = vrot.slane %v318_v8, 1  ;;  %v563_v10 = vmul.f32 %v2541_v34, %v3513_v7  ;;  %v3970_v45 = vld [vmem:[%s2526_s24 + $0xc8] sm:$0xff] }
  0xe7   : > { %v3936_v15 = vmul.f32 %v2541_v34, %v3516_v12  ;;  %v849_v42 = vadd.f32 %v817_v16, %v781_v52  ;;  %v1822_v4 = vrot.slane %v1699_v56, 2  ;;  %v428_v21 = vrot.slane %v3930_v58, 1 }
  0xe8   : > { %v802_v14 = vmul.f32 %v2535_v31, %v3735_v17  ;;  %v1633_v40 = vadd.f32 %v1539_v59, %v1389_v9  ;;  %v672_v62 = vrot.slane %v563_v10, 2  ;;  %v876_v43 = vmul.f32 %v2543_v35, %v3735_v17 }
  0xe9   : > { %v673_v25 = vrot.slane %v3936_v15, 2  ;;  %v1093_v7 = vadd.f32 %v1023_v54, %v849_v42  ;;  %v429_v50 = vsel %vm396_vm0, %v427_v39, %v428_v21  ;;  %v3949_v28 = vmul.f32 %v2543_v35, %v3738_v38 }
  0xea   : > { %v1120_v59 = vmul.f32 %v2545_v36, %v3735_v17  ;;  %v1877_v61 = vadd.f32 %v1783_v6, %v1633_v40  ;;  %v521_v26 = vadd.f32 %v429_v50, %v244_v27  ;;  %v984_v16 = vrot.slane %v876_v43, 1 }
  0xeb   : > { %v674_v47 = vsel %vm641_vm1, %v672_v62, %v673_v25  ;;  %v1337_v22 = vadd.f32 %v1267_v46, %v1093_v7  ;;  %v985_v51 = vrot.slane %v3949_v28, 1  ;;  %v3959_v20 = vmul.f32 %v2545_v36, %v3738_v38 }
  0xec   : > { %v1228_v0 = vrot.slane %v1120_v59, 2  ;;  %2333 = vmatmul.mubr.f32.gmra.mrb[10].mxu0 %v1877_v61  ;;  %v1823_v13 = vsel %vm641_vm1, %v1820_v55, %v1822_v4  ;;  %v766_v6 = vadd.f32 %v674_v47, %v521_v26  ;;  %v1432_v18 = vmul.f32 %v3965_v53, %v2604_v2 }
  0xed   : > { %v3974_v56 = vmul.f32 %v3970_v45, %v2604_v2  ;;  %v1405_v5 = vadd.f32 %v1373_v63, %v1337_v22  ;;  %v986_v57 = vsel %vm396_vm0, %v984_v16, %v985_v51  ;;  %v1229_v24 = vrot.slane %v3959_v20, 2 }
  0xee   : > { %v1676_v55 = vmul.f32 %v3965_v53, %v2606_v3  ;;  %v834_v54 = vadd.f32 %v802_v14, %v766_v6  ;;  %v1540_v19 = vrot.slane %v1432_v18, 1  ;;  %v3985_v8 = vmul.f32 %v3970_v45, %v2606_v3 }
  0xef   : > { %v1541_v46 = vrot.slane %v3974_v56, 1  ;;  %v1649_v52 = vadd.f32 %v1579_v48, %v1405_v5  ;;  %v1230_v63 = vsel %vm641_vm1, %v1228_v0, %v1229_v24  ;;  %v1358_v41 = vmul.f32 %v3965_v53, %v2547_v37 }
  0xf0   : > { %v1784_v27 = vrot.slane %v1676_v55, 2  ;;  %v1078_v9 = vadd.f32 %v986_v57, %v834_v54  ;;  %v1785_v39 = vrot.slane %v3985_v8, 2  ;;  %v260_v10 = vmul.f32 %v2531_v29, %v3592_v23  ;;  %v4036_v55 = vld [vmem:[%s2526_s24 + $0x180] sm:$0xff]  ;;  %v4039_v54 = vld [vmem:[%s2526_s24 + $0x188] sm:$0xff] }
  0xf1   : > { %v342_v42 = vmul.f32 %v2533_v30, %v3592_v23  ;;  %v1893_v4 = vadd.f32 %v1823_v13, %v1649_v52  ;;  %v3999_v48 = vmul.f32 %v2533_v30, %v3595_v11  ;;  %v587_v14 = vmul.f32 %v2541_v34, %v3592_v23 }
  0xf2   : > { %v4005_v40 = vmul.f32 %v2541_v34, %v3595_v11  ;;  %v1322_v62 = vadd.f32 %v1230_v63, %v1078_v9  ;;  %v1542_v43 = vsel %vm396_vm0, %v1540_v19, %v1541_v46  ;;  %v1786_v7 = vsel %vm641_vm1, %v1784_v27, %v1785_v39 }
  0xf3   : > { %v467_v50 = vrot.slane %v342_v42, 1  ;;  %2357 = vmatmul.mubr.f32.gmra.mrb[10].mxu1 %v1893_v4  ;;  %v468_v59 = vrot.slane %v3999_v48, 1  ;;  %v712_v23 = vrot.slane %v587_v14, 2  ;;  %v900_v26 = vmul.f32 %v2543_v35, %v3814_v44 }
  0xf4   : > { %v713_v61 = vrot.slane %v4005_v40, 2  ;;  %v1390_v47 = vadd.f32 %v1358_v41, %v1322_v62  ;;  %v4019_v16 = vmul.f32 %v2543_v35, %v3817_v60  ;;  %v1144_v22 = vmul.f32 %v2545_v36, %v3814_v44 }
  0xf5   : > { %v4025_v0 = vmul.f32 %v2545_v36, %v3817_v60  ;;  %v469_v13 = vsel %vm396_vm0, %v467_v50, %v468_v59  ;;  %v818_v18 = vmul.f32 %v2535_v31, %v3814_v44  ;;  %v1024_v5 = vrot.slane %v900_v26, 1 }
  0xf6   : > { %v714_v6 = vsel %vm641_vm1, %v712_v23, %v713_v61  ;;  %v1634_v57 = vadd.f32 %v1542_v43, %v1390_v47  ;;  %v537_v19 = vadd.f32 %v469_v13, %v260_v10  ;;  %v1025_v52 = vrot.slane %v4019_v16, 1 }
  0xf7   : > { %v1268_v63 = vrot.slane %v1144_v22, 2  ;;  %v4415_v41 = vrot.slane %v4025_v0, 2  ;;  %v1456_v27 = vmul.f32 %v2604_v2, %v4036_v55  ;;  %v4047_v9 = vmul.f32 %v2604_v2, %v4039_v54 }
  0xf8   : > { %v1700_v42 = vmul.f32 %v2606_v3, %v4036_v55  ;;  %v1878_v4 = vadd.f32 %v1786_v7, %v1634_v57  ;;  %v782_v14 = vadd.f32 %v714_v6, %v537_v19  ;;  %v1374_v10 = vmul.f32 %v2547_v37, %v4036_v55 }
  0xf9   : > { %v4055_v62 = vmul.f32 %v2606_v3, %v4039_v54  ;;  %v1026_v43 = vsel %vm396_vm0, %v1024_v5, %v1025_v52  ;;  %v1580_v50 = vrot.slane %v1456_v27, 1  ;;  %v4414_v23 = vrot.slane %v4047_v9, 1 }
  0xfa   : > { %v1824_v26 = vrot.slane %v1700_v42, 2  ;;  %2335 = vmatprep.mubr.f32.mxu0 %v1878_v4  ;;  %v850_v47 = vadd.f32 %v818_v18, %v782_v14  ;;  %v1270_v7 = vsel %vm641_vm1, %v1268_v63, %v4415_v41  ;;  %v320_v13 = vmul.f32 %v2533_v30, %v3633_v33 }
  0xfb   : > { %v4416_v22 = vrot.slane %v4055_v62, 2  ;;  %v1582_v6 = vsel %vm396_vm0, %v1580_v50, %v4414_v23  ;;  %v245_v5 = vmul.f32 %v2531_v29, %v3516_v12  ;;  %v565_v57 = vmul.f32 %v2541_v34, %v3633_v33  ;;  %v4084_v50 = vld [vmem:[%s2526_s24 + $0xd0] sm:$0x3] }
  0xfc   : > { %v878_v18 = vmul.f32 %v2543_v35, %v3855_v1  ;;  %v1094_v19 = vadd.f32 %v1026_v43, %v850_v47  ;;  %v430_v63 = vrot.slane %v320_v13, 1  ;;  %v803_v27 = vmul.f32 %v2535_v31, %v3738_v38 }
  0xfd   : > { %v1122_v42 = vmul.f32 %v2545_v36, %v3855_v1  ;;  %v1826_v4 = vsel %vm641_vm1, %v1824_v26, %v4416_v22  ;;  %v675_v14 = vrot.slane %v565_v57, 2  ;;  %v1434_v33 = vmul.f32 %v4084_v50, %v2604_v2 }
  0xfe   : > { %v987_v12 = vrot.slane %v878_v18, 1  ;;  %v1338_v23 = vadd.f32 %v1270_v7, %v1094_v19  ;;  %v431_v43 = vsel %vm396_vm0, %v428_v21, %v430_v63  ;;  %v1678_v13 = vmul.f32 %v4084_v50, %v2606_v3 }
  0xff   : > { %v1231_v47 = vrot.slane %v1122_v42, 2  ;;  %v522_v41 = vadd.f32 %v431_v43, %v245_v5  ;;  %v676_v26 = vsel %vm641_vm1, %v673_v25, %v675_v14  ;;  %v1359_v57 = vmul.f32 %v3970_v45, %v2547_v37 }
 0x100   : > { %v1543_v18 = vrot.slane %v1434_v33, 1  ;;  %v1406_v22 = vadd.f32 %v1374_v10, %v1338_v23  ;;  %v988_v58 = vsel %vm396_vm0, %v985_v51, %v987_v12  ;;  %v1787_v7 = vrot.slane %v1678_v13, 2 }
 0x101   : > { %v1232_v21 = vsel %vm641_vm1, %v1229_v24, %v1231_v47  ;;  %v767_v5 = vadd.f32 %v676_v26, %v522_v41  ;;  %v261_v15 = vmul.f32 %v2531_v29, %v3595_v11  ;;  %v344_v25 = vmul.f32 %v2533_v30, %v3675_v49  ;;  %v4119_v11 = vld [vmem:[%s2526_s24 + $0x190] sm:$0x3] }
 0x102   : > { %v589_v19 = vmul.f32 %v2541_v34, %v3675_v49  ;;  %v1650_v10 = vadd.f32 %v1582_v6, %v1406_v22  ;;  %v1544_v28 = vsel %vm396_vm0, %v1541_v46, %v1543_v18  ;;  %v1788_v51 = vsel %vm641_vm1, %v1785_v39, %v1787_v7 }
 0x103   : > { %v902_v20 = vmul.f32 %v2543_v35, %v3897_v32  ;;  %v835_v24 = vadd.f32 %v803_v27, %v767_v5  ;;  %v470_v41 = vrot.slane %v344_v25, 1  ;;  %v1146_v49 = vmul.f32 %v2545_v36, %v3897_v32 }
 0x104   : > { %v715_v23 = vrot.slane %v589_v19, 2  ;;  %v1894_v22 = vadd.f32 %v1826_v4, %v1650_v10  ;;  %v819_v56 = vmul.f32 %v2535_v31, %v3817_v60  ;;  %v1458_v8 = vmul.f32 %v2604_v2, %v4119_v11 }
 0x105   : > { %v1027_v46 = vrot.slane %v902_v20, 1  ;;  %v1079_v39 = vadd.f32 %v988_v58, %v835_v24  ;;  %v471_v6 = vsel %vm396_vm0, %v468_v59, %v470_v41  ;;  %v1271_v27 = vrot.slane %v1146_v49, 2 }
 0x106   : > { %v716_v63 = vsel %vm641_vm1, %v713_v61, %v715_v23  ;;  %2359 = vmatprep.mubr.f32.mxu1 %v1894_v22  ;;  %v538_v42 = vadd.f32 %v471_v6, %v261_v15  ;;  %v1375_v4 = vmul.f32 %v2547_v37, %v4039_v54  ;;  %v1583_v14 = vrot.slane %v1458_v8, 1  ;;  %v2425_v6 = vld [vmem:[%s2526_s24 + $0xd8] sm:$0xff] }
 0x107   : > { %v1702_v12 = vmul.f32 %v2606_v3, %v4119_v11  ;;  %v1323_v33 = vadd.f32 %v1232_v21, %v1079_v39  ;;  %v1028_v48 = vsel %vm396_vm0, %v1025_v52, %v1027_v46  ;;  %v4433_v59 = vrot.slane %v4025_v0, 2 }
 0x108   : > { %v321_v61 = vmul.f32 %v2533_v30, %v3735_v17  ;;  %v783_v43 = vadd.f32 %v716_v63, %v538_v42  ;;  %v4434_v47 = vrot.slane %v4047_v9, 1  ;;  %v246_v26 = vmul.f32 %v2531_v29, %v3735_v17 }
 0x109   : > { %v1272_v40 = vsel %vm641_vm1, %v4433_v59, %v1271_v27  ;;  %v4152_v16 = vmul.f32 %v2533_v30, %v3738_v38  ;;  %v1391_v52 = vadd.f32 %v1359_v57, %v1323_v33  ;;  %v566_v18 = vmul.f32 %v2541_v34, %v3735_v17  ;;  %v4195_v27 = vld [vmem:[%s2526_s24 + $0xe0] sm:$0xff] }
 0x10a   : > { %v1584_v13 = vsel %vm396_vm0, %v4434_v47, %v1583_v14  ;;  %v432_v0 = vrot.slane %v321_v61, 1  ;;  %v4158_v58 = vmul.f32 %v2541_v34, %v3738_v38  ;;  %v851_v9 = vadd.f32 %v819_v56, %v783_v43 }
 0x10b   : > { %v1827_v21 = vrot.slane %v1702_v12, 2  ;;  %v433_v7 = vrot.slane %v4152_v16, 1  ;;  %v804_v5 = vmul.f32 %v3965_v53, %v2535_v31  ;;  %v1635_v15 = vadd.f32 %v1544_v28, %v1391_v52 }
 0x10c   : > { %v677_v25 = vrot.slane %v566_v18, 2  ;;  %v678_v19 = vrot.slane %v4158_v58, 2  ;;  %v879_v57 = vmul.f32 %v3965_v53, %v2543_v35  ;;  %v1095_v17 = vadd.f32 %v1028_v48, %v851_v9  ;;  %v2319_v48 = vpop.f32.mrb[0].mxu0 }
 0x10d   : > { %v434_v10 = vsel %vm396_vm0, %v432_v0, %v433_v7  ;;  %v4172_v20 = vmul.f32 %v3970_v45, %v2543_v35  ;;  %v1123_v28 = vmul.f32 %v3965_v53, %v2545_v36  ;;  %v1879_v24 = vadd.f32 %v1788_v51, %v1635_v15  ;;  %2140 = vst [vmem:[%s4187_s6 + $0x8] sm:$0xff] %v2319_v48  ;;  %v1980_v47 = vpop.f32.mrb[1].mxu0 }
 0x10e   : > { %v523_v41 = vadd.f32 %v434_v10, %v246_v26  ;;  %v679_v23 = vsel %vm641_vm1, %v677_v25, %v678_v19  ;;  %v989_v49 = vrot.slane %v879_v57, 1  ;;  %v1339_v22 = vadd.f32 %v1272_v40, %v1095_v17  ;;  %2139 = vst [vmem:[%s4187_s6] sm:$0xff] %v1980_v47 }
 0x10f   : > { %v990_v56 = vrot.slane %v4172_v20, 1  ;;  %v4182_v46 = vmul.f32 %v3970_v45, %v2545_v36  ;;  %v1233_v8 = vrot.slane %v1123_v28, 2  ;;  %2336 = vmatmul.mubr.f32.gmra.mrb[12].mxu0 %v1879_v24  ;;  %v4435_v53 = vrot.slane %v4055_v62, 2 }
 0x110   : > { %v768_v39 = vadd.f32 %v679_v23, %v523_v41  ;;  %v1435_v63 = vmul.f32 %v2425_v6, %v2604_v2  ;;  %v4199_v42 = vmul.f32 %v4195_v27, %v2604_v2  ;;  %v1407_v14 = vadd.f32 %v1375_v4, %v1339_v22 }
 0x111   : > { %v1828_v51 = vsel %vm641_vm1, %v4435_v53, %v1827_v21  ;;  %v991_v12 = vsel %vm396_vm0, %v989_v49, %v990_v56  ;;  %v1234_v62 = vrot.slane %v4182_v46, 2  ;;  %v1679_v33 = vmul.f32 %v2425_v6, %v2606_v3  ;;  %v222_v53 = vld [vmem:[%s2526_s24 + $0x198] sm:$0xff] }
 0x112   : > { %v836_v59 = vadd.f32 %v804_v5, %v768_v39  ;;  %v1545_v40 = vrot.slane %v1435_v63, 1  ;;  %v1546_v61 = vrot.slane %v4199_v42, 1  ;;  %v4209_v43 = vmul.f32 %v4195_v27, %v2606_v3  ;;  %v2343_v22 = vpop.f32.mrb[0].mxu1 }
 0x113   : > { %v1651_v4 = vadd.f32 %v1584_v13, %v1407_v14  ;;  %v1235_v26 = vsel %vm641_vm1, %v1233_v8, %v1234_v62  ;;  %v1360_v52 = vmul.f32 %v2425_v6, %v2547_v37  ;;  %v1789_v0 = vrot.slane %v1679_v33, 2  ;;  %2156 = vst [vmem:[%s4187_s6 + $0x88] sm:$0xff] %v2343_v22  ;;  %v2060_v14 = vpop.f32.mrb[1].mxu1 }
 0x114   : > { %v1080_v18 = vadd.f32 %v991_v12, %v836_v59  ;;  %v1790_v9 = vrot.slane %v4209_v43, 2  ;;  %v262_v21 = vmul.f32 %v2531_v29, %v3814_v44  ;;  %v345_v5 = vmul.f32 %v2533_v30, %v3814_v44  ;;  %2155 = vst [vmem:[%s4187_s6 + $0x80] sm:$0xff] %v2060_v14 }
 0x115   : > { %v1895_v15 = vadd.f32 %v1828_v51, %v1651_v4  ;;  %v4224_v13 = vmul.f32 %v2533_v30, %v3817_v60  ;;  %v590_v25 = vmul.f32 %v2541_v34, %v3814_v44  ;;  %v4230_v57 = vmul.f32 %v2541_v34, %v3817_v60  ;;  %v4244_v51 = vld [vmem:[%s2526_s24 + $0x1a0] sm:$0xff] }
 0x116   : > { %v1324_v17 = vadd.f32 %v1235_v26, %v1080_v18  ;;  %v1547_v10 = vsel %vm396_vm0, %v1545_v40, %v1546_v61  ;;  %v1791_v28 = vsel %vm641_vm1, %v1789_v0, %v1790_v9  ;;  %v472_v24 = vrot.slane %v345_v5, 1 }
 0x117   : > { %2360 = vmatmul.mubr.f32.gmra.mrb[12].mxu1 %v1895_v15  ;;  %v473_v41 = vrot.slane %v4224_v13, 1  ;;  %v717_v23 = vrot.slane %v590_v25, 2  ;;  %v718_v44 = vrot.slane %v4230_v57, 2  ;;  %v903_v49 = vmul.f32 %v2543_v35, %v4036_v55 }
 0x118   : > { %v1392_v8 = vadd.f32 %v1360_v52, %v1324_v17  ;;  %v4248_v39 = vmul.f32 %v2543_v35, %v4039_v54  ;;  %v1147_v6 = vmul.f32 %v2545_v36, %v4036_v55  ;;  %v4254_v63 = vmul.f32 %v2545_v36, %v4039_v54 }
 0x119   : > { %v474_v12 = vsel %vm396_vm0, %v472_v24, %v473_v41  ;;  %v719_v33 = vsel %vm641_vm1, %v717_v23, %v718_v44  ;;  %v820_v48 = vmul.f32 %v2535_v31, %v4036_v55  ;;  %v1029_v59 = vrot.slane %v903_v49, 1 }
 0x11a   : > { %v1636_v40 = vadd.f32 %v1547_v10, %v1392_v8  ;;  %v539_v47 = vadd.f32 %v474_v12, %v262_v21  ;;  %v1030_v4 = vrot.slane %v4248_v39, 1  ;;  %v1273_v26 = vrot.slane %v1147_v6, 2 }
 0x11b   : > { %v1274_v52 = vrot.slane %v4254_v63, 2  ;;  %v1459_v0 = vmul.f32 %v2604_v2, %v222_v53  ;;  %v4271_v18 = vmul.f32 %v2604_v2, %v4244_v51  ;;  %v1703_v5 = vmul.f32 %v2606_v3, %v222_v53 }
 0x11c   : > { %v1880_v15 = vadd.f32 %v1791_v28, %v1636_v40  ;;  %v784_v25 = vadd.f32 %v719_v33, %v539_v47  ;;  %v4276_v55 = vmul.f32 %v2606_v3, %v4244_v51  ;;  %v1031_v21 = vsel %vm396_vm0, %v1029_v59, %v1030_v4 }
 0x11d   : > { %v1275_v17 = vsel %vm641_vm1, %v1273_v26, %v1274_v52  ;;  %v1376_v10 = vmul.f32 %v2547_v37, %v222_v53  ;;  %v1585_v23 = vrot.slane %v1459_v0, 1  ;;  %v1586_v28 = vrot.slane %v4271_v18, 1 }
 0x11e   : > { %2338 = vmatprep.mubr.f32.mxu0 %v1880_v15  ;;  %v852_v24 = vadd.f32 %v820_v48, %v784_v25  ;;  %v323_v49 = vmul.f32 %v2533_v30, %v3855_v1  ;;  %v1829_v22 = vrot.slane %v1703_v5, 2  ;;  %v247_v8 = vmul.f32 %v2531_v29, %v3738_v38 }
 0x11f   : > { %v568_v6 = vmul.f32 %v2541_v34, %v3855_v1  ;;  %v881_v14 = vmul.f32 %v4084_v50, %v2543_v35  ;;  %v1830_v12 = vrot.slane %v4276_v55, 2  ;;  %v1125_v48 = vmul.f32 %v4084_v50, %v2545_v36 }
 0x120   : > { %v1096_v53 = vadd.f32 %v1031_v21, %v852_v24  ;;  %v435_v33 = vrot.slane %v323_v49, 1  ;;  %v1587_v1 = vsel %vm396_vm0, %v1585_v23, %v1586_v28  ;;  %v805_v5 = vmul.f32 %v3970_v45, %v2535_v31 }
 0x121   : > { %v680_v59 = vrot.slane %v568_v6, 2  ;;  %v992_v47 = vrot.slane %v881_v14, 1  ;;  %v1831_v16 = vsel %vm641_vm1, %v1829_v22, %v1830_v12  ;;  %v1236_v15 = vrot.slane %v1125_v48, 2 }
 0x122   : > { %v1340_v40 = vadd.f32 %v1275_v17, %v1096_v53  ;;  %v436_v38 = vsel %vm396_vm0, %v433_v7, %v435_v33  ;;  %v2427_v7 = vld [vmem:[%s2526_s24 + $0xe8] sm:$0x3]  ;;  %v347_v58 = vmul.f32 %v2533_v30, %v3897_v32  ;;  %v263_v24 = vmul.f32 %v2531_v29, %v3817_v60 }
 0x123   : > { %v524_v26 = vadd.f32 %v436_v38, %v247_v8  ;;  %v681_v0 = vsel %vm641_vm1, %v678_v19, %v680_v59  ;;  %v1437_v25 = vmul.f32 %v2427_v7, %v2604_v2  ;;  %v1681_v17 = vmul.f32 %v2427_v7, %v2606_v3 }
 0x124   : > { %v1408_v50 = vadd.f32 %v1376_v10, %v1340_v40  ;;  %v592_v19 = vmul.f32 %v2541_v34, %v3897_v32  ;;  %v993_v10 = vsel %vm396_vm0, %v990_v56, %v992_v47  ;;  %v905_v23 = vmul.f32 %v2543_v35, %v4119_v11  ;;  %v224_v56 = vld [vmem:[%s2526_s24 + $0x1a8] sm:$0x3] }
 0x125   : > { %v769_v21 = vadd.f32 %v681_v0, %v524_v26  ;;  %v475_v22 = vrot.slane %v347_v58, 1  ;;  %v1149_v30 = vmul.f32 %v2545_v36, %v4119_v11  ;;  %v1237_v34 = vsel %vm641_vm1, %v1234_v62, %v1236_v15 }
 0x126   : > { %v1652_v45 = vadd.f32 %v1587_v1, %v1408_v50  ;;  %v720_v8 = vrot.slane %v592_v19, 2  ;;  %v1361_v32 = vmul.f32 %v4195_v27, %v2547_v37  ;;  %v1548_v20 = vrot.slane %v1437_v25, 1 }
 0x127   : > { %v837_v49 = vadd.f32 %v805_v5, %v769_v21  ;;  %v476_v35 = vsel %vm396_vm0, %v473_v41, %v475_v22  ;;  %v1032_v36 = vrot.slane %v905_v23, 1  ;;  %v1792_v11 = vrot.slane %v1681_v17, 2 }
 0x128   : > { %v1896_v6 = vadd.f32 %v1831_v16, %v1652_v45  ;;  %v721_v60 = vsel %vm641_vm1, %v718_v44, %v720_v8  ;;  %v540_v46 = vadd.f32 %v476_v35, %v263_v24  ;;  %v821_v62 = vmul.f32 %v2535_v31, %v4039_v54 }
 0x129   : > { %v1081_v29 = vadd.f32 %v993_v10, %v837_v49  ;;  %v1276_v27 = vrot.slane %v1149_v30, 2  ;;  %v1461_v53 = vmul.f32 %v2604_v2, %v224_v56  ;;  %v1549_v13 = vsel %vm396_vm0, %v1546_v61, %v1548_v20 }
 0x12a   : > { %2362 = vmatprep.mubr.f32.mxu1 %v1896_v6  ;;  %v785_v41 = vadd.f32 %v721_v60, %v540_v46  ;;  %v1033_v57 = vsel %vm396_vm0, %v1030_v4, %v1032_v36  ;;  %v1705_v44 = vmul.f32 %v2606_v3, %v224_v56  ;;  %v1793_v31 = vsel %vm641_vm1, %v1790_v9, %v1792_v11 }
 0x12b   : > { %v1325_v14 = vadd.f32 %v1237_v34, %v1081_v29  ;;  %v1277_v2 = vsel %vm641_vm1, %v1274_v52, %v1276_v27  ;;  %v1588_v42 = vrot.slane %v1461_v53, 1  ;;  %v1377_v39 = vmul.f32 %v2547_v37, %v4244_v51 }
 0x12c   : > { %v853_v54 = vadd.f32 %v821_v62, %v785_v41  ;;  %v1832_v3 = vrot.slane %v1705_v44, 2 }
 0x12d   : > { %v1393_v33 = vadd.f32 %v1361_v32, %v1325_v14  ;;  %v1589_v9 = vsel %vm396_vm0, %v1586_v28, %v1588_v42 }
 0x12e   : > { %v1097_v61 = vadd.f32 %v1033_v57, %v853_v54  ;;  %v1833_v52 = vsel %vm641_vm1, %v1830_v12, %v1832_v3 }
 0x12f   : > { %v1637_v48 = vadd.f32 %v1549_v13, %v1393_v33 }
 0x130   : > { %v1341_v43 = vadd.f32 %v1277_v2, %v1097_v61  ;;  %v2322_v59 = vpop.f32.mrb[2].mxu0 }
 0x131   : > { %v1881_v4 = vadd.f32 %v1793_v31, %v1637_v48  ;;  %2142 = vst [vmem:[%s4187_s6 + $0x18] sm:$0xff] %v2322_v59  ;;  %v1990_v37 = vpop.f32.mrb[3].mxu0 }
 0x132   : > { %v1409_v63 = vadd.f32 %v1377_v39, %v1341_v43  ;;  %2141 = vst [vmem:[%s4187_s6 + $0x10] sm:$0xff] %v1990_v37 }
 0x133   : > { %2339 = vmatmul.mubr.f32.gmra.mrb[14].mxu0 %v1881_v4 }
 0x134   : > { %v1653_v51 = vadd.f32 %v1589_v9, %v1409_v63 }
 0x136   : > { %v1897_v40 = vadd.f32 %v1833_v52, %v1653_v51 }
 0x137   : > { %v2346_v18 = vpop.f32.mrb[2].mxu1 }
 0x138   : > { %2363 = vmatmul.mubr.f32.gmra.mrb[14].mxu1 %v1897_v40  ;;  %2158 = vst [vmem:[%s4187_s6 + $0x98] sm:$0xff] %v2346_v18  ;;  %v2070_v28 = vpop.f32.mrb[3].mxu1 }
 0x139   : > { %2157 = vst [vmem:[%s4187_s6 + $0x90] sm:$0xff] %v2070_v28 }
 0x154   : > { %v2325_v38 = vpop.f32.mrb[4].mxu0 }
 0x155   : > { %2144 = vst [vmem:[%s4187_s6 + $0x28] sm:$0xff] %v2325_v38  ;;  %v2000_v55 = vpop.f32.mrb[5].mxu0 }
 0x156   : > { %2143 = vst [vmem:[%s4187_s6 + $0x20] sm:$0xff] %v2000_v55 }
 0x15b   : > { %v2349_v12 = vpop.f32.mrb[4].mxu1 }
 0x15c   : > { %2160 = vst [vmem:[%s4187_s6 + $0xa8] sm:$0xff] %v2349_v12  ;;  %v2080_v47 = vpop.f32.mrb[5].mxu1 }
 0x15d   : > { %2159 = vst [vmem:[%s4187_s6 + $0xa0] sm:$0xff] %v2080_v47 }
 0x177   : > { %v2328_v1 = vpop.f32.mrb[6].mxu0 }
 0x178   : > { %2146 = vst [vmem:[%s4187_s6 + $0x38] sm:$0xff] %v2328_v1  ;;  %v2010_v26 = vpop.f32.mrb[7].mxu0 }
 0x179   : > { %2145 = vst [vmem:[%s4187_s6 + $0x30] sm:$0xff] %v2010_v26 }
 0x17e   : > { %v2352_v0 = vpop.f32.mrb[6].mxu1 }
 0x17f   : > { %2162 = vst [vmem:[%s4187_s6 + $0xb8] sm:$0xff] %v2352_v0  ;;  %v2090_v5 = vpop.f32.mrb[7].mxu1 }
 0x180   : > { %2161 = vst [vmem:[%s4187_s6 + $0xb0] sm:$0xff] %v2090_v5 }
 0x19b   : > { %v2331_v50 = vpop.f32.mrb[8].mxu0 }
 0x19c   : > { %2148 = vst [vmem:[%s4187_s6 + $0x48] sm:$0xff] %v2331_v50  ;;  %v2020_v16 = vpop.f32.mrb[9].mxu0 }
 0x19d   : > { %2147 = vst [vmem:[%s4187_s6 + $0x40] sm:$0xff] %v2020_v16 }
 0x1a2   : > { %v2355_v15 = vpop.f32.mrb[8].mxu1 }
 0x1a3   : > { %2164 = vst [vmem:[%s4187_s6 + $0xc8] sm:$0xff] %v2355_v15  ;;  %v2100_v7 = vpop.f32.mrb[9].mxu1 }
 0x1a4   : > { %2163 = vst [vmem:[%s4187_s6 + $0xc0] sm:$0xff] %v2100_v7 }
 0x1bf   : > { %v2334_v25 = vpop.f32.mrb[10].mxu0 }
 0x1c0   : > { %2150 = vst [vmem:[%s4187_s6 + $0x58] sm:$0xff] %v2334_v25  ;;  %v2030_v21 = vpop.f32.mrb[11].mxu0 }
 0x1c1   : > { %2149 = vst [vmem:[%s4187_s6 + $0x50] sm:$0xff] %v2030_v21 }
 0x1c6   : > { %v2358_v17 = vpop.f32.mrb[10].mxu1 }
 0x1c7   : > { %2166 = vst [vmem:[%s4187_s6 + $0xd8] sm:$0xff] %v2358_v17  ;;  %v2110_v58 = vpop.f32.mrb[11].mxu1 }
 0x1c8   : > { %2165 = vst [vmem:[%s4187_s6 + $0xd0] sm:$0xff] %v2110_v58 }
 0x1e2   : > { %v2337_v19 = vpop.f32.mrb[12].mxu0 }
 0x1e3   : > { %2152 = vst [vmem:[%s4187_s6 + $0x68] sm:$0xff] %v2337_v19  ;;  %v2040_v45 = vpop.f32.mrb[13].mxu0 }
 0x1e4   : > { %2151 = vst [vmem:[%s4187_s6 + $0x60] sm:$0xff] %v2040_v45 }
 0x1ea   : > { %v2361_v10 = vpop.f32.mrb[12].mxu1 }
 0x1eb   : > { %2168 = vst [vmem:[%s4187_s6 + $0xe8] sm:$0xff] %v2361_v10  ;;  %v2120_v24 = vpop.f32.mrb[13].mxu1 }
 0x1ec   : > { %2167 = vst [vmem:[%s4187_s6 + $0xe0] sm:$0xff] %v2120_v24 }
 0x206   : > { %v2340_v23 = vpop.f32.mrb[14].mxu0 }
 0x207   : > { %2154 = vst [vmem:[%s4187_s6 + $0x78] sm:$0xff] %v2340_v23  ;;  %v2050_v49 = vpop.f32.mrb[15].mxu0 }
 0x208   : > { %2153 = vst [vmem:[%s4187_s6 + $0x70] sm:$0xff] %v2050_v49 }
 0x20b   : > { %v2364_v22 = vpop.f32.mrb[14].mxu1 }
 0x20c   : > { %2170 = vst [vmem:[%s4187_s6 + $0xf8] sm:$0xff] %v2364_v22  ;;  %v2130_v8 = vpop.f32.mrb[15].mxu1 }
 0x20d   : > { %2169 = vst [vmem:[%s4187_s6 + $0xf0] sm:$0xff] %v2130_v8 }
 0x20e PF: > { %s13_s12 = sadd.s32 1, %s2434_s12  }
 0x20f   : > { %p10_p4 = scmp.ge.s32.totalorder %s13_s12, 4  }
 0x211   :  { %12 = sbr.rel (!%p10_p4) target bundleno = 1 (0x1), region = 62 }

</bundles_post_ra>
